<compile_context>
chip_gen: v6e
topology: v6e:2x2x1
jax: 0.10.0
libtpu: 0.0.40
codegen_flags: <defaults>
</compile_context>

<pallas_src>
import functools

import jax
import jax.numpy as jnp
from jax.experimental import pallas as pl
from jax.experimental.pallas import tpu as pltpu


def _temporal_attn_kernel(q_ref, k_ref, v_ref,
                          wq_ref, wk_ref, wv_ref, wo_ref, bo_ref,
                          o_ref,
                          qs_ref, ks_ref, vs_ref,
                          *, n_heads: int, head_dim: int,
                          blk: int, seq_len: int, d_model: int):
    """One grid step: all T timesteps for `blk` spatial positions of batch b.

    Block layouts:
      q_ref/k_ref/v_ref/o_ref : (1, T, blk, D)  -- native HBM layout
      qs_ref/ks_ref/vs_ref    : (blk, T, D) f32 -- VMEM scratch holding the
                                                   transposed projections
    """
    cdt = wq_ref.dtype            # matmul operand dtype (bf16 by default)
    hd = head_dim
    rows = blk * seq_len

    # ---- Q/K/V projections as one big (rows, D) x (D, D) MXU matmul each,
    # ---- then a VMEM-local (T, blk, D) -> (blk, T, D) relayout via per-t
    # ---- slab stores (Mosaic does not lower non-minormost transposes).
    def project_and_transpose(x_ref, w_ref, s_ref):
        if blk % 8 == 0:
            # (T, blk, D) -> (T*blk, D) is layout-free when blk % 8 == 0.
            x2 = x_ref[0].reshape(seq_len * blk, d_model).astype(cdt)
            y = jnp.dot(x2, w_ref[...], preferred_element_type=jnp.float32)
            y = y.reshape(seq_len, blk, d_model)
            for t in range(seq_len):          # static loop: T slab copies
                s_ref[:, t, :] = y[t]
        else:
            # Fallback when blk is not sublane-aligned (the reshape above
            # would otherwise materialize a copy): project per timestep.
            for t in range(seq_len):
                xt = x_ref[0, t].astype(cdt)                       # (blk, D)
                s_ref[:, t, :] = jnp.dot(xt, w_ref[...],
                                         preferred_element_type=jnp.float32)

    project_and_transpose(q_ref, wq_ref, qs_ref)
    project_and_transpose(k_ref, wk_ref, ks_ref)
    project_and_transpose(v_ref, wv_ref, vs_ref)

    q3 = qs_ref[...].astype(cdt)          # (blk, T, D)
    k3 = ks_ref[...].astype(cdt)
    v3 = vs_ref[...].astype(cdt)

    # ---- attention for ALL heads in one batched einsum chain ----------------
    # (blk, T, D) -> (n_heads*blk, T, hd): per-head lane slices stacked along
    # the leading (untiled) axis; single batch dim keeps dot_general in the
    # known-good Mosaic form.
    def split_heads(x):
        return jnp.concatenate(
            [x[:, :, h * hd:(h + 1) * hd] for h in range(n_heads)], axis=0)

    qh = split_heads(q3)
    kh = split_heads(k3)
    vh = split_heads(v3)

    # Softmax scale (head_dim**-0.5) is folded into Wq on the host.
    s = jnp.einsum("bqd,bkd->bqk", qh, kh,
                   preferred_element_type=jnp.float32)       # (nh*blk, T, T)
    s = s - jnp.max(s, axis=-1, keepdims=True)
    p = jnp.exp(s)
    p = p * pl.reciprocal(jnp.sum(p, axis=-1, keepdims=True), approx=False)
    o = jnp.einsum("bqk,bkd->bqd", p.astype(cdt), vh,
                   preferred_element_type=jnp.float32)       # (nh*blk, T, hd)

    # Heads back onto the lane axis: (n_heads*blk, T, hd) -> (blk, T, D).
    o = jnp.concatenate([o[h * blk:(h + 1) * blk] for h in range(n_heads)],
                        axis=-1)

    # ---- single K=D output projection + bias, stored in native layout -------
    bias = bo_ref[...]                                       # (1, D) f32
    if seq_len % 8 == 0:
        # (blk, T, D) -> (rows, D) is layout-free when T % 8 == 0.
        y = jnp.dot(o.reshape(rows, d_model).astype(cdt), wo_ref[...],
                    preferred_element_type=jnp.float32)
        y = (y + bias).reshape(blk, seq_len, d_model).astype(o_ref.dtype)
        for t in range(seq_len):          # native (1, T, blk, D) store order
            o_ref[0, t] = y[:, t, :]
    else:
        # Fallback: per-timestep output projection (keeps reshapes aligned).
        for t in range(seq_len):
            yt = jnp.dot(o[:, t, :].astype(cdt), wo_ref[...],
                         preferred_element_type=jnp.float32)
            o_ref[0, t] = (yt + bias).astype(o_ref.dtype)


def temporal_attention_layer(queries, keys, values, params, *, n_heads: int,
                             freqs_cis=None, attn_mask=None,
                             matmul_dtype=jnp.bfloat16):
    """queries/keys/values: (B, T, H, W, D) float32.

    Default-config forward of TemporalAttentionLayer (qkv_bias=False,
    qk_norm=False, proj_bias=True, dropout=0, is_rotary=False, non-causal).
    """
    if freqs_cis is not None:
        raise NotImplementedError("rotary embedding (is_rotary=True) is not supported")
    if attn_mask is not None:
        raise NotImplementedError("attn_mask / causal attention is not supported")

    B, T, H, W, D = queries.shape
    assert D % n_heads == 0, "d_model must be divisible by n_heads"
    head_dim = D // n_heads
    HW = H * W

    # (B, T, H, W, D) -> (B, T, HW, D): a free view, NOT an HBM transpose.
    q = queries.reshape(B, T, HW, D)
    k = keys.reshape(B, T, HW, D)
    v = values.reshape(B, T, HW, D)

    # ---- per-chip VMEM budgeting & block sizing ------------------------------
    try:
        vmem_cap = int(pltpu.get_tpu_info().vmem_capacity_bytes)
    except Exception:                      # be conservative if the query fails
        vmem_cap = 64 << 20                # v7x per-core VMEM
    vmem_limit = min((vmem_cap * 3) // 4, 100 << 20)

    wbytes = jnp.dtype(matmul_dtype).itemsize
    # Resident weights (double-buffered by the pipeline) + bias: a fixed cost
    # charged to the budget before sizing the data blocks.
    fixed = 2 * (4 * D * D * wbytes + D * 4)
    data_budget = max(int(0.6 * (vmem_limit - fixed)), 1 << 20)

    def est_vmem(b):
        tile = b * T * D * 4
        return (4 * 2 * tile                       # q/k/v/out pipeline buffers
                + 3 * tile                         # f32 transpose scratch
                + 8 * tile                         # in-kernel temporaries
                + 3 * n_heads * b * T * T * 4)     # score / prob tiles

    # blk must divide HW, and be a multiple of 8 (or equal HW) to satisfy the
    # (8, 128) block constraint.  Pick the largest candidate under the budget
    # so blk*T rows fill the MXU and the grid has as few steps as possible.
    cands = sorted({d for d in range(8, HW + 1, 8) if HW % d == 0} | {HW},
                   reverse=True)
    blk = cands[-1]
    for c in cands:
        if est_vmem(c) <= data_budget:
            blk = c
            break
    # v7x has 2 TensorCores sharing the chip: keep at least 2 grid steps.
    if B == 1 and HW // blk < 2:
        for c in cands:
            if c < blk:
                blk = c
                break

    grid = (B, HW // blk)

    # PyTorch Linear computes y = x @ W.T (+ b); pass W.T in the matmul dtype.
    # The softmax scale is folded into Wq at trace time (free host transform).
    scale = head_dim ** (-0.5)
    wq_t = (params["wq"].T * scale).astype(matmul_dtype)
    wk_t = params["wk"].T.astype(matmul_dtype)
    wv_t = params["wv"].T.astype(matmul_dtype)
    wo_t = params["wo"].T.astype(matmul_dtype)
    bo = params["bo"].reshape(1, D).astype(jnp.float32)

    kernel = functools.partial(_temporal_attn_kernel,
                               n_heads=n_heads, head_dim=head_dim,
                               blk=blk, seq_len=T, d_model=D)

    seq_spec = pl.BlockSpec((1, T, blk, D), lambda b, j: (b, 0, j, 0))
    # Constant index_map => weights are fetched once and stay resident; they
    # are passed in bf16 (halved footprint) and their double-buffered cost is
    # already charged as `fixed` in the blk budget above.
    w_spec = pl.BlockSpec((D, D), lambda b, j: (0, 0))
    b_spec = pl.BlockSpec((1, D), lambda b, j: (0, 0))

    out = pl.pallas_call(
        kernel,
        out_shape=jax.ShapeDtypeStruct((B, T, HW, D), queries.dtype),
        grid_spec=pltpu.PrefetchScalarGridSpec(
            num_scalar_prefetch=0,
            grid=grid,
            in_specs=[seq_spec, seq_spec, seq_spec,
                      w_spec, w_spec, w_spec, w_spec, b_spec],
            out_specs=seq_spec,
            scratch_shapes=[pltpu.VMEM((blk, T, D), jnp.float32)] * 3,
        ),
        compiler_params=pltpu.CompilerParams(
            dimension_semantics=("parallel", "parallel"),
            vmem_limit_bytes=int(vmem_limit)),
    )(q, k, v, wq_t, wk_t, wv_t, wo_t, bo)

    # (B, T, HW, D) -> (B, T, H, W, D): free view.
    return out.reshape(B, T, H, W, D)


def _reference(queries, keys, values, params, *, n_heads: int):
    """Pure-JAX f32 reference matching the PyTorch forward (default flags)."""
    B, T, H, W, D = queries.shape
    hd = D // n_heads
    BN = B * H * W

    def to_bn_t_d(x):
        return jnp.transpose(x, (0, 2, 3, 1, 4)).reshape(BN, T, D)

    q = to_bn_t_d(queries) @ params["wq"].T
    k = to_bn_t_d(keys) @ params["wk"].T
    v = to_bn_t_d(values) @ params["wv"].T

    def split_heads(x):  # (BN, T, D) -> (BN, n, T, hd)
        return jnp.transpose(x.reshape(BN, T, n_heads, hd), (0, 2, 1, 3))

    qh, kh, vh = split_heads(q), split_heads(k), split_heads(v)
    scale = hd ** (-0.5)
    attn = jnp.einsum("bntd,bnsd->bnts", qh * scale, kh)
    attn = jax.nn.softmax(attn, axis=-1)
    o = jnp.einsum("bnts,bnsd->bntd", attn, vh)            # (BN, n, T, hd)
    o = jnp.transpose(o, (0, 2, 1, 3)).reshape(BN, T, D)
    o = o @ params["wo"].T + params["bo"]
    o = o.reshape(B, H, W, T, D)
    return jnp.transpose(o, (0, 3, 1, 2, 4))


if __name__ == "__main__":
    B, T, H, W, D = 2, 8, 4, 4, 32
    n_heads = 4

    key = jax.random.PRNGKey(0)
    ks = jax.random.split(key, 8)

    queries = jax.random.normal(ks[0], (B, T, H, W, D), dtype=jnp.float32)
    keys_in = jax.random.normal(ks[1], (B, T, H, W, D), dtype=jnp.float32)
    values = jax.random.normal(ks[2], (B, T, H, W, D), dtype=jnp.float32)

    # Deterministic parameter init (PyTorch Linear weight shape: (out, in)).
    bound = 1.0 / (D ** 0.5)
    params = {
        "wq": jax.random.uniform(ks[3], (D, D), jnp.float32, -bound, bound),
        "wk": jax.random.uniform(ks[4], (D, D), jnp.float32, -bound, bound),
        "wv": jax.random.uniform(ks[5], (D, D), jnp.float32, -bound, bound),
        "wo": jax.random.uniform(ks[6], (D, D), jnp.float32, -bound, bound),
        "bo": jax.random.uniform(ks[7], (D,), jnp.float32, -bound, bound),
    }

    out = temporal_attention_layer(queries, keys_in, values, params,
                                   n_heads=n_heads)
    out = jax.block_until_ready(out)

    ref = _reference(queries, keys_in, values, params, n_heads=n_heads)
    assert out.shape == (B, T, H, W, D)
    # Tolerance accounts for bf16 MXU operands (requested perf change): the
    # reference runs entirely in f32, the kernel accumulates in f32 but rounds
    # matmul inputs/weights to bf16 (~1e-2-level relative differences).
    assert jnp.allclose(out, ref, atol=3e-2, rtol=3e-2), "mismatch vs reference"

    print("KERNEL_OK")
</pallas_src>

<mosaic_0001>
module attributes {stable_mosaic.version = 11 : i64} {
  func.func @_temporal_attn_kernel(%arg0: i32, %arg1: i32, %arg2: memref<1x8x16x32xf32, #tpu.memory_space<vmem>>, %arg3: memref<1x8x16x32xf32, #tpu.memory_space<vmem>>, %arg4: memref<1x8x16x32xf32, #tpu.memory_space<vmem>>, %arg5: memref<32x32xbf16, #tpu.memory_space<vmem>>, %arg6: memref<32x32xbf16, #tpu.memory_space<vmem>>, %arg7: memref<32x32xbf16, #tpu.memory_space<vmem>>, %arg8: memref<32x32xbf16, #tpu.memory_space<vmem>>, %arg9: memref<1x32xf32, #tpu.memory_space<vmem>>, %arg10: memref<1x8x16x32xf32, #tpu.memory_space<vmem>>, %arg11: memref<16x8x32xf32, #tpu.memory_space<vmem>>, %arg12: memref<16x8x32xf32, #tpu.memory_space<vmem>>, %arg13: memref<16x8x32xf32, #tpu.memory_space<vmem>>) attributes {dimension_semantics = [#tpu.dimension_semantics<parallel>, #tpu.dimension_semantics<parallel>], iteration_bounds = array<i64: 2, 1>, scalar_prefetch = 0 : i64, scratch_operands = 3 : i64, tpu.core_type = #tpu.core_type<tc>, window_params = [{transform_indices = @transform_0, window_bounds = array<i64: 1, 8, 16, 32>}, {transform_indices = @transform_1, window_bounds = array<i64: 1, 8, 16, 32>}, {transform_indices = @transform_2, window_bounds = array<i64: 1, 8, 16, 32>}, {pipeline_mode = #tpu.pipeline_mode<synchronous>, transform_indices = @transform_3, window_bounds = array<i64: 32, 32>}, {pipeline_mode = #tpu.pipeline_mode<synchronous>, transform_indices = @transform_4, window_bounds = array<i64: 32, 32>}, {pipeline_mode = #tpu.pipeline_mode<synchronous>, transform_indices = @transform_5, window_bounds = array<i64: 32, 32>}, {pipeline_mode = #tpu.pipeline_mode<synchronous>, transform_indices = @transform_6, window_bounds = array<i64: 32, 32>}, {pipeline_mode = #tpu.pipeline_mode<synchronous>, transform_indices = @transform_7, window_bounds = array<i64: 1, 32>}, {transform_indices = @transform_8, window_bounds = array<i64: 1, 8, 16, 32>}]} {
    %c0 = arith.constant 0 : index
    %c0_0 = arith.constant 0 : index
    %c0_1 = arith.constant 0 : index
    %c0_2 = arith.constant 0 : index
    %0 = vector.load %arg2[%c0, %c0_0, %c0_1, %c0_2] : memref<1x8x16x32xf32, #tpu.memory_space<vmem>>, vector<1x8x16x32xf32>
    %1 = vector.shape_cast %0 : vector<1x8x16x32xf32> to vector<8x16x32xf32>
    %2 = vector.shape_cast %1 : vector<8x16x32xf32> to vector<128x32xf32>
    %3 = arith.truncf %2 : vector<128x32xf32> to vector<128x32xbf16>
    %c0_3 = arith.constant 0 : index
    %c0_4 = arith.constant 0 : index
    %4 = vector.load %arg5[%c0_3, %c0_4] : memref<32x32xbf16, #tpu.memory_space<vmem>>, vector<32x32xbf16>
    %cst = arith.constant dense<0.000000e+00> : vector<128x32xf32>
    %5 = tpu.matmul %3, %4, %cst {dimension_numbers = #tpu.dot_dimension_numbers<[1], [0], [0], [1], [0, 0, 1, 1], [], []>} : vector<128x32xbf16>, vector<32x32xbf16>, vector<128x32xf32> -> vector<128x32xf32>
    %6 = vector.shape_cast %5 : vector<128x32xf32> to vector<8x16x32xf32>
    %7 = vector.extract_strided_slice %6 {offsets = [0, 0, 0], sizes = [1, 16, 32], strides = [1, 1, 1]} : vector<8x16x32xf32> to vector<1x16x32xf32>
    %8 = vector.shape_cast %7 : vector<1x16x32xf32> to vector<16x32xf32>
    %c0_5 = arith.constant 0 : index
    %c0_6 = arith.constant 0 : index
    %c0_7 = arith.constant 0 : index
    %9 = vector.load %arg11[%c0_5, %c0_6, %c0_7] : memref<16x8x32xf32, #tpu.memory_space<vmem>>, vector<16x1x32xf32>
    %10 = vector.shape_cast %9 : vector<16x1x32xf32> to vector<16x32xf32>
    %11 = vector.shape_cast %8 : vector<16x32xf32> to vector<16x1x32xf32>
    tpu.vector_store %arg11[%c0_5, %c0_6, %c0_7], %11 {strides = array<i32>} : memref<16x8x32xf32, #tpu.memory_space<vmem>>, vector<16x1x32xf32>,
    %12 = vector.extract_strided_slice %6 {offsets = [1, 0, 0], sizes = [1, 16, 32], strides = [1, 1, 1]} : vector<8x16x32xf32> to vector<1x16x32xf32>
    %13 = vector.shape_cast %12 : vector<1x16x32xf32> to vector<16x32xf32>
    %c0_8 = arith.constant 0 : index
    %c1 = arith.constant 1 : index
    %c0_9 = arith.constant 0 : index
    %14 = vector.load %arg11[%c0_8, %c1, %c0_9] : memref<16x8x32xf32, #tpu.memory_space<vmem>>, vector<16x1x32xf32>
    %15 = vector.shape_cast %14 : vector<16x1x32xf32> to vector<16x32xf32>
    %16 = vector.shape_cast %13 : vector<16x32xf32> to vector<16x1x32xf32>
    tpu.vector_store %arg11[%c0_8, %c1, %c0_9], %16 {strides = array<i32>} : memref<16x8x32xf32, #tpu.memory_space<vmem>>, vector<16x1x32xf32>,
    %17 = vector.extract_strided_slice %6 {offsets = [2, 0, 0], sizes = [1, 16, 32], strides = [1, 1, 1]} : vector<8x16x32xf32> to vector<1x16x32xf32>
    %18 = vector.shape_cast %17 : vector<1x16x32xf32> to vector<16x32xf32>
    %c0_10 = arith.constant 0 : index
    %c2 = arith.constant 2 : index
    %c0_11 = arith.constant 0 : index
    %19 = vector.load %arg11[%c0_10, %c2, %c0_11] : memref<16x8x32xf32, #tpu.memory_space<vmem>>, vector<16x1x32xf32>
    %20 = vector.shape_cast %19 : vector<16x1x32xf32> to vector<16x32xf32>
    %21 = vector.shape_cast %18 : vector<16x32xf32> to vector<16x1x32xf32>
    tpu.vector_store %arg11[%c0_10, %c2, %c0_11], %21 {strides = array<i32>} : memref<16x8x32xf32, #tpu.memory_space<vmem>>, vector<16x1x32xf32>,
    %22 = vector.extract_strided_slice %6 {offsets = [3, 0, 0], sizes = [1, 16, 32], strides = [1, 1, 1]} : vector<8x16x32xf32> to vector<1x16x32xf32>
    %23 = vector.shape_cast %22 : vector<1x16x32xf32> to vector<16x32xf32>
    %c0_12 = arith.constant 0 : index
    %c3 = arith.constant 3 : index
    %c0_13 = arith.constant 0 : index
    %24 = vector.load %arg11[%c0_12, %c3, %c0_13] : memref<16x8x32xf32, #tpu.memory_space<vmem>>, vector<16x1x32xf32>
    %25 = vector.shape_cast %24 : vector<16x1x32xf32> to vector<16x32xf32>
    %26 = vector.shape_cast %23 : vector<16x32xf32> to vector<16x1x32xf32>
    tpu.vector_store %arg11[%c0_12, %c3, %c0_13], %26 {strides = array<i32>} : memref<16x8x32xf32, #tpu.memory_space<vmem>>, vector<16x1x32xf32>,
    %27 = vector.extract_strided_slice %6 {offsets = [4, 0, 0], sizes = [1, 16, 32], strides = [1, 1, 1]} : vector<8x16x32xf32> to vector<1x16x32xf32>
    %28 = vector.shape_cast %27 : vector<1x16x32xf32> to vector<16x32xf32>
    %c0_14 = arith.constant 0 : index
    %c4 = arith.constant 4 : index
    %c0_15 = arith.constant 0 : index
    %29 = vector.load %arg11[%c0_14, %c4, %c0_15] : memref<16x8x32xf32, #tpu.memory_space<vmem>>, vector<16x1x32xf32>
    %30 = vector.shape_cast %29 : vector<16x1x32xf32> to vector<16x32xf32>
    %31 = vector.shape_cast %28 : vector<16x32xf32> to vector<16x1x32xf32>
    tpu.vector_store %arg11[%c0_14, %c4, %c0_15], %31 {strides = array<i32>} : memref<16x8x32xf32, #tpu.memory_space<vmem>>, vector<16x1x32xf32>,
    %32 = vector.extract_strided_slice %6 {offsets = [5, 0, 0], sizes = [1, 16, 32], strides = [1, 1, 1]} : vector<8x16x32xf32> to vector<1x16x32xf32>
    %33 = vector.shape_cast %32 : vector<1x16x32xf32> to vector<16x32xf32>
    %c0_16 = arith.constant 0 : index
    %c5 = arith.constant 5 : index
    %c0_17 = arith.constant 0 : index
    %34 = vector.load %arg11[%c0_16, %c5, %c0_17] : memref<16x8x32xf32, #tpu.memory_space<vmem>>, vector<16x1x32xf32>
    %35 = vector.shape_cast %34 : vector<16x1x32xf32> to vector<16x32xf32>
    %36 = vector.shape_cast %33 : vector<16x32xf32> to vector<16x1x32xf32>
    tpu.vector_store %arg11[%c0_16, %c5, %c0_17], %36 {strides = array<i32>} : memref<16x8x32xf32, #tpu.memory_space<vmem>>, vector<16x1x32xf32>,
    %37 = vector.extract_strided_slice %6 {offsets = [6, 0, 0], sizes = [1, 16, 32], strides = [1, 1, 1]} : vector<8x16x32xf32> to vector<1x16x32xf32>
    %38 = vector.shape_cast %37 : vector<1x16x32xf32> to vector<16x32xf32>
    %c0_18 = arith.constant 0 : index
    %c6 = arith.constant 6 : index
    %c0_19 = arith.constant 0 : index
    %39 = vector.load %arg11[%c0_18, %c6, %c0_19] : memref<16x8x32xf32, #tpu.memory_space<vmem>>, vector<16x1x32xf32>
    %40 = vector.shape_cast %39 : vector<16x1x32xf32> to vector<16x32xf32>
    %41 = vector.shape_cast %38 : vector<16x32xf32> to vector<16x1x32xf32>
    tpu.vector_store %arg11[%c0_18, %c6, %c0_19], %41 {strides = array<i32>} : memref<16x8x32xf32, #tpu.memory_space<vmem>>, vector<16x1x32xf32>,
    %42 = vector.extract_strided_slice %6 {offsets = [7, 0, 0], sizes = [1, 16, 32], strides = [1, 1, 1]} : vector<8x16x32xf32> to vector<1x16x32xf32>
    %43 = vector.shape_cast %42 : vector<1x16x32xf32> to vector<16x32xf32>
    %c0_20 = arith.constant 0 : index
    %c7 = arith.constant 7 : index
    %c0_21 = arith.constant 0 : index
    %44 = vector.load %arg11[%c0_20, %c7, %c0_21] : memref<16x8x32xf32, #tpu.memory_space<vmem>>, vector<16x1x32xf32>
    %45 = vector.shape_cast %44 : vector<16x1x32xf32> to vector<16x32xf32>
    %46 = vector.shape_cast %43 : vector<16x32xf32> to vector<16x1x32xf32>
    tpu.vector_store %arg11[%c0_20, %c7, %c0_21], %46 {strides = array<i32>} : memref<16x8x32xf32, #tpu.memory_space<vmem>>, vector<16x1x32xf32>,
    %c0_22 = arith.constant 0 : index
    %c0_23 = arith.constant 0 : index
    %c0_24 = arith.constant 0 : index
    %c0_25 = arith.constant 0 : index
    %47 = vector.load %arg3[%c0_22, %c0_23, %c0_24, %c0_25] : memref<1x8x16x32xf32, #tpu.memory_space<vmem>>, vector<1x8x16x32xf32>
    %48 = vector.shape_cast %47 : vector<1x8x16x32xf32> to vector<8x16x32xf32>
    %49 = vector.shape_cast %48 : vector<8x16x32xf32> to vector<128x32xf32>
    %50 = arith.truncf %49 : vector<128x32xf32> to vector<128x32xbf16>
    %c0_26 = arith.constant 0 : index
    %c0_27 = arith.constant 0 : index
    %51 = vector.load %arg6[%c0_26, %c0_27] : memref<32x32xbf16, #tpu.memory_space<vmem>>, vector<32x32xbf16>
    %cst_28 = arith.constant dense<0.000000e+00> : vector<128x32xf32>
    %52 = tpu.matmul %50, %51, %cst_28 {dimension_numbers = #tpu.dot_dimension_numbers<[1], [0], [0], [1], [0, 0, 1, 1], [], []>} : vector<128x32xbf16>, vector<32x32xbf16>, vector<128x32xf32> -> vector<128x32xf32>
    %53 = vector.shape_cast %52 : vector<128x32xf32> to vector<8x16x32xf32>
    %54 = vector.extract_strided_slice %53 {offsets = [0, 0, 0], sizes = [1, 16, 32], strides = [1, 1, 1]} : vector<8x16x32xf32> to vector<1x16x32xf32>
    %55 = vector.shape_cast %54 : vector<1x16x32xf32> to vector<16x32xf32>
    %c0_29 = arith.constant 0 : index
    %c0_30 = arith.constant 0 : index
    %c0_31 = arith.constant 0 : index
    %56 = vector.load %arg12[%c0_29, %c0_30, %c0_31] : memref<16x8x32xf32, #tpu.memory_space<vmem>>, vector<16x1x32xf32>
    %57 = vector.shape_cast %56 : vector<16x1x32xf32> to vector<16x32xf32>
    %58 = vector.shape_cast %55 : vector<16x32xf32> to vector<16x1x32xf32>
    tpu.vector_store %arg12[%c0_29, %c0_30, %c0_31], %58 {strides = array<i32>} : memref<16x8x32xf32, #tpu.memory_space<vmem>>, vector<16x1x32xf32>,
    %59 = vector.extract_strided_slice %53 {offsets = [1, 0, 0], sizes = [1, 16, 32], strides = [1, 1, 1]} : vector<8x16x32xf32> to vector<1x16x32xf32>
    %60 = vector.shape_cast %59 : vector<1x16x32xf32> to vector<16x32xf32>
    %c0_32 = arith.constant 0 : index
    %c1_33 = arith.constant 1 : index
    %c0_34 = arith.constant 0 : index
    %61 = vector.load %arg12[%c0_32, %c1_33, %c0_34] : memref<16x8x32xf32, #tpu.memory_space<vmem>>, vector<16x1x32xf32>
    %62 = vector.shape_cast %61 : vector<16x1x32xf32> to vector<16x32xf32>
    %63 = vector.shape_cast %60 : vector<16x32xf32> to vector<16x1x32xf32>
    tpu.vector_store %arg12[%c0_32, %c1_33, %c0_34], %63 {strides = array<i32>} : memref<16x8x32xf32, #tpu.memory_space<vmem>>, vector<16x1x32xf32>,
    %64 = vector.extract_strided_slice %53 {offsets = [2, 0, 0], sizes = [1, 16, 32], strides = [1, 1, 1]} : vector<8x16x32xf32> to vector<1x16x32xf32>
    %65 = vector.shape_cast %64 : vector<1x16x32xf32> to vector<16x32xf32>
    %c0_35 = arith.constant 0 : index
    %c2_36 = arith.constant 2 : index
    %c0_37 = arith.constant 0 : index
    %66 = vector.load %arg12[%c0_35, %c2_36, %c0_37] : memref<16x8x32xf32, #tpu.memory_space<vmem>>, vector<16x1x32xf32>
    %67 = vector.shape_cast %66 : vector<16x1x32xf32> to vector<16x32xf32>
    %68 = vector.shape_cast %65 : vector<16x32xf32> to vector<16x1x32xf32>
    tpu.vector_store %arg12[%c0_35, %c2_36, %c0_37], %68 {strides = array<i32>} : memref<16x8x32xf32, #tpu.memory_space<vmem>>, vector<16x1x32xf32>,
    %69 = vector.extract_strided_slice %53 {offsets = [3, 0, 0], sizes = [1, 16, 32], strides = [1, 1, 1]} : vector<8x16x32xf32> to vector<1x16x32xf32>
    %70 = vector.shape_cast %69 : vector<1x16x32xf32> to vector<16x32xf32>
    %c0_38 = arith.constant 0 : index
    %c3_39 = arith.constant 3 : index
    %c0_40 = arith.constant 0 : index
    %71 = vector.load %arg12[%c0_38, %c3_39, %c0_40] : memref<16x8x32xf32, #tpu.memory_space<vmem>>, vector<16x1x32xf32>
    %72 = vector.shape_cast %71 : vector<16x1x32xf32> to vector<16x32xf32>
    %73 = vector.shape_cast %70 : vector<16x32xf32> to vector<16x1x32xf32>
    tpu.vector_store %arg12[%c0_38, %c3_39, %c0_40], %73 {strides = array<i32>} : memref<16x8x32xf32, #tpu.memory_space<vmem>>, vector<16x1x32xf32>,
    %74 = vector.extract_strided_slice %53 {offsets = [4, 0, 0], sizes = [1, 16, 32], strides = [1, 1, 1]} : vector<8x16x32xf32> to vector<1x16x32xf32>
    %75 = vector.shape_cast %74 : vector<1x16x32xf32> to vector<16x32xf32>
    %c0_41 = arith.constant 0 : index
    %c4_42 = arith.constant 4 : index
    %c0_43 = arith.constant 0 : index
    %76 = vector.load %arg12[%c0_41, %c4_42, %c0_43] : memref<16x8x32xf32, #tpu.memory_space<vmem>>, vector<16x1x32xf32>
    %77 = vector.shape_cast %76 : vector<16x1x32xf32> to vector<16x32xf32>
    %78 = vector.shape_cast %75 : vector<16x32xf32> to vector<16x1x32xf32>
    tpu.vector_store %arg12[%c0_41, %c4_42, %c0_43], %78 {strides = array<i32>} : memref<16x8x32xf32, #tpu.memory_space<vmem>>, vector<16x1x32xf32>,
    %79 = vector.extract_strided_slice %53 {offsets = [5, 0, 0], sizes = [1, 16, 32], strides = [1, 1, 1]} : vector<8x16x32xf32> to vector<1x16x32xf32>
    %80 = vector.shape_cast %79 : vector<1x16x32xf32> to vector<16x32xf32>
    %c0_44 = arith.constant 0 : index
    %c5_45 = arith.constant 5 : index
    %c0_46 = arith.constant 0 : index
    %81 = vector.load %arg12[%c0_44, %c5_45, %c0_46] : memref<16x8x32xf32, #tpu.memory_space<vmem>>, vector<16x1x32xf32>
    %82 = vector.shape_cast %81 : vector<16x1x32xf32> to vector<16x32xf32>
    %83 = vector.shape_cast %80 : vector<16x32xf32> to vector<16x1x32xf32>
    tpu.vector_store %arg12[%c0_44, %c5_45, %c0_46], %83 {strides = array<i32>} : memref<16x8x32xf32, #tpu.memory_space<vmem>>, vector<16x1x32xf32>,
    %84 = vector.extract_strided_slice %53 {offsets = [6, 0, 0], sizes = [1, 16, 32], strides = [1, 1, 1]} : vector<8x16x32xf32> to vector<1x16x32xf32>
    %85 = vector.shape_cast %84 : vector<1x16x32xf32> to vector<16x32xf32>
    %c0_47 = arith.constant 0 : index
    %c6_48 = arith.constant 6 : index
    %c0_49 = arith.constant 0 : index
    %86 = vector.load %arg12[%c0_47, %c6_48, %c0_49] : memref<16x8x32xf32, #tpu.memory_space<vmem>>, vector<16x1x32xf32>
    %87 = vector.shape_cast %86 : vector<16x1x32xf32> to vector<16x32xf32>
    %88 = vector.shape_cast %85 : vector<16x32xf32> to vector<16x1x32xf32>
    tpu.vector_store %arg12[%c0_47, %c6_48, %c0_49], %88 {strides = array<i32>} : memref<16x8x32xf32, #tpu.memory_space<vmem>>, vector<16x1x32xf32>,
    %89 = vector.extract_strided_slice %53 {offsets = [7, 0, 0], sizes = [1, 16, 32], strides = [1, 1, 1]} : vector<8x16x32xf32> to vector<1x16x32xf32>
    %90 = vector.shape_cast %89 : vector<1x16x32xf32> to vector<16x32xf32>
    %c0_50 = arith.constant 0 : index
    %c7_51 = arith.constant 7 : index
    %c0_52 = arith.constant 0 : index
    %91 = vector.load %arg12[%c0_50, %c7_51, %c0_52] : memref<16x8x32xf32, #tpu.memory_space<vmem>>, vector<16x1x32xf32>
    %92 = vector.shape_cast %91 : vector<16x1x32xf32> to vector<16x32xf32>
    %93 = vector.shape_cast %90 : vector<16x32xf32> to vector<16x1x32xf32>
    tpu.vector_store %arg12[%c0_50, %c7_51, %c0_52], %93 {strides = array<i32>} : memref<16x8x32xf32, #tpu.memory_space<vmem>>, vector<16x1x32xf32>,
    %c0_53 = arith.constant 0 : index
    %c0_54 = arith.constant 0 : index
    %c0_55 = arith.constant 0 : index
    %c0_56 = arith.constant 0 : index
    %94 = vector.load %arg4[%c0_53, %c0_54, %c0_55, %c0_56] : memref<1x8x16x32xf32, #tpu.memory_space<vmem>>, vector<1x8x16x32xf32>
    %95 = vector.shape_cast %94 : vector<1x8x16x32xf32> to vector<8x16x32xf32>
    %96 = vector.shape_cast %95 : vector<8x16x32xf32> to vector<128x32xf32>
    %97 = arith.truncf %96 : vector<128x32xf32> to vector<128x32xbf16>
    %c0_57 = arith.constant 0 : index
    %c0_58 = arith.constant 0 : index
    %98 = vector.load %arg7[%c0_57, %c0_58] : memref<32x32xbf16, #tpu.memory_space<vmem>>, vector<32x32xbf16>
    %cst_59 = arith.constant dense<0.000000e+00> : vector<128x32xf32>
    %99 = tpu.matmul %97, %98, %cst_59 {dimension_numbers = #tpu.dot_dimension_numbers<[1], [0], [0], [1], [0, 0, 1, 1], [], []>} : vector<128x32xbf16>, vector<32x32xbf16>, vector<128x32xf32> -> vector<128x32xf32>
    %100 = vector.shape_cast %99 : vector<128x32xf32> to vector<8x16x32xf32>
    %101 = vector.extract_strided_slice %100 {offsets = [0, 0, 0], sizes = [1, 16, 32], strides = [1, 1, 1]} : vector<8x16x32xf32> to vector<1x16x32xf32>
    %102 = vector.shape_cast %101 : vector<1x16x32xf32> to vector<16x32xf32>
    %c0_60 = arith.constant 0 : index
    %c0_61 = arith.constant 0 : index
    %c0_62 = arith.constant 0 : index
    %103 = vector.load %arg13[%c0_60, %c0_61, %c0_62] : memref<16x8x32xf32, #tpu.memory_space<vmem>>, vector<16x1x32xf32>
    %104 = vector.shape_cast %103 : vector<16x1x32xf32> to vector<16x32xf32>
    %105 = vector.shape_cast %102 : vector<16x32xf32> to vector<16x1x32xf32>
    tpu.vector_store %arg13[%c0_60, %c0_61, %c0_62], %105 {strides = array<i32>} : memref<16x8x32xf32, #tpu.memory_space<vmem>>, vector<16x1x32xf32>,
    %106 = vector.extract_strided_slice %100 {offsets = [1, 0, 0], sizes = [1, 16, 32], strides = [1, 1, 1]} : vector<8x16x32xf32> to vector<1x16x32xf32>
    %107 = vector.shape_cast %106 : vector<1x16x32xf32> to vector<16x32xf32>
    %c0_63 = arith.constant 0 : index
    %c1_64 = arith.constant 1 : index
    %c0_65 = arith.constant 0 : index
    %108 = vector.load %arg13[%c0_63, %c1_64, %c0_65] : memref<16x8x32xf32, #tpu.memory_space<vmem>>, vector<16x1x32xf32>
    %109 = vector.shape_cast %108 : vector<16x1x32xf32> to vector<16x32xf32>
    %110 = vector.shape_cast %107 : vector<16x32xf32> to vector<16x1x32xf32>
    tpu.vector_store %arg13[%c0_63, %c1_64, %c0_65], %110 {strides = array<i32>} : memref<16x8x32xf32, #tpu.memory_space<vmem>>, vector<16x1x32xf32>,
    %111 = vector.extract_strided_slice %100 {offsets = [2, 0, 0], sizes = [1, 16, 32], strides = [1, 1, 1]} : vector<8x16x32xf32> to vector<1x16x32xf32>
    %112 = vector.shape_cast %111 : vector<1x16x32xf32> to vector<16x32xf32>
    %c0_66 = arith.constant 0 : index
    %c2_67 = arith.constant 2 : index
    %c0_68 = arith.constant 0 : index
    %113 = vector.load %arg13[%c0_66, %c2_67, %c0_68] : memref<16x8x32xf32, #tpu.memory_space<vmem>>, vector<16x1x32xf32>
    %114 = vector.shape_cast %113 : vector<16x1x32xf32> to vector<16x32xf32>
    %115 = vector.shape_cast %112 : vector<16x32xf32> to vector<16x1x32xf32>
    tpu.vector_store %arg13[%c0_66, %c2_67, %c0_68], %115 {strides = array<i32>} : memref<16x8x32xf32, #tpu.memory_space<vmem>>, vector<16x1x32xf32>,
    %116 = vector.extract_strided_slice %100 {offsets = [3, 0, 0], sizes = [1, 16, 32], strides = [1, 1, 1]} : vector<8x16x32xf32> to vector<1x16x32xf32>
    %117 = vector.shape_cast %116 : vector<1x16x32xf32> to vector<16x32xf32>
    %c0_69 = arith.constant 0 : index
    %c3_70 = arith.constant 3 : index
    %c0_71 = arith.constant 0 : index
    %118 = vector.load %arg13[%c0_69, %c3_70, %c0_71] : memref<16x8x32xf32, #tpu.memory_space<vmem>>, vector<16x1x32xf32>
    %119 = vector.shape_cast %118 : vector<16x1x32xf32> to vector<16x32xf32>
    %120 = vector.shape_cast %117 : vector<16x32xf32> to vector<16x1x32xf32>
    tpu.vector_store %arg13[%c0_69, %c3_70, %c0_71], %120 {strides = array<i32>} : memref<16x8x32xf32, #tpu.memory_space<vmem>>, vector<16x1x32xf32>,
    %121 = vector.extract_strided_slice %100 {offsets = [4, 0, 0], sizes = [1, 16, 32], strides = [1, 1, 1]} : vector<8x16x32xf32> to vector<1x16x32xf32>
    %122 = vector.shape_cast %121 : vector<1x16x32xf32> to vector<16x32xf32>
    %c0_72 = arith.constant 0 : index
    %c4_73 = arith.constant 4 : index
    %c0_74 = arith.constant 0 : index
    %123 = vector.load %arg13[%c0_72, %c4_73, %c0_74] : memref<16x8x32xf32, #tpu.memory_space<vmem>>, vector<16x1x32xf32>
    %124 = vector.shape_cast %123 : vector<16x1x32xf32> to vector<16x32xf32>
    %125 = vector.shape_cast %122 : vector<16x32xf32> to vector<16x1x32xf32>
    tpu.vector_store %arg13[%c0_72, %c4_73, %c0_74], %125 {strides = array<i32>} : memref<16x8x32xf32, #tpu.memory_space<vmem>>, vector<16x1x32xf32>,
    %126 = vector.extract_strided_slice %100 {offsets = [5, 0, 0], sizes = [1, 16, 32], strides = [1, 1, 1]} : vector<8x16x32xf32> to vector<1x16x32xf32>
    %127 = vector.shape_cast %126 : vector<1x16x32xf32> to vector<16x32xf32>
    %c0_75 = arith.constant 0 : index
    %c5_76 = arith.constant 5 : index
    %c0_77 = arith.constant 0 : index
    %128 = vector.load %arg13[%c0_75, %c5_76, %c0_77] : memref<16x8x32xf32, #tpu.memory_space<vmem>>, vector<16x1x32xf32>
    %129 = vector.shape_cast %128 : vector<16x1x32xf32> to vector<16x32xf32>
    %130 = vector.shape_cast %127 : vector<16x32xf32> to vector<16x1x32xf32>
    tpu.vector_store %arg13[%c0_75, %c5_76, %c0_77], %130 {strides = array<i32>} : memref<16x8x32xf32, #tpu.memory_space<vmem>>, vector<16x1x32xf32>,
    %131 = vector.extract_strided_slice %100 {offsets = [6, 0, 0], sizes = [1, 16, 32], strides = [1, 1, 1]} : vector<8x16x32xf32> to vector<1x16x32xf32>
    %132 = vector.shape_cast %131 : vector<1x16x32xf32> to vector<16x32xf32>
    %c0_78 = arith.constant 0 : index
    %c6_79 = arith.constant 6 : index
    %c0_80 = arith.constant 0 : index
    %133 = vector.load %arg13[%c0_78, %c6_79, %c0_80] : memref<16x8x32xf32, #tpu.memory_space<vmem>>, vector<16x1x32xf32>
    %134 = vector.shape_cast %133 : vector<16x1x32xf32> to vector<16x32xf32>
    %135 = vector.shape_cast %132 : vector<16x32xf32> to vector<16x1x32xf32>
    tpu.vector_store %arg13[%c0_78, %c6_79, %c0_80], %135 {strides = array<i32>} : memref<16x8x32xf32, #tpu.memory_space<vmem>>, vector<16x1x32xf32>,
    %136 = vector.extract_strided_slice %100 {offsets = [7, 0, 0], sizes = [1, 16, 32], strides = [1, 1, 1]} : vector<8x16x32xf32> to vector<1x16x32xf32>
    %137 = vector.shape_cast %136 : vector<1x16x32xf32> to vector<16x32xf32>
    %c0_81 = arith.constant 0 : index
    %c7_82 = arith.constant 7 : index
    %c0_83 = arith.constant 0 : index
    %138 = vector.load %arg13[%c0_81, %c7_82, %c0_83] : memref<16x8x32xf32, #tpu.memory_space<vmem>>, vector<16x1x32xf32>
    %139 = vector.shape_cast %138 : vector<16x1x32xf32> to vector<16x32xf32>
    %140 = vector.shape_cast %137 : vector<16x32xf32> to vector<16x1x32xf32>
    tpu.vector_store %arg13[%c0_81, %c7_82, %c0_83], %140 {strides = array<i32>} : memref<16x8x32xf32, #tpu.memory_space<vmem>>, vector<16x1x32xf32>,
    %c0_84 = arith.constant 0 : index
    %c0_85 = arith.constant 0 : index
    %c0_86 = arith.constant 0 : index
    %141 = vector.load %arg11[%c0_84, %c0_85, %c0_86] : memref<16x8x32xf32, #tpu.memory_space<vmem>>, vector<16x8x32xf32>
    %142 = arith.truncf %141 : vector<16x8x32xf32> to vector<16x8x32xbf16>
    %c0_87 = arith.constant 0 : index
    %c0_88 = arith.constant 0 : index
    %c0_89 = arith.constant 0 : index
    %143 = vector.load %arg12[%c0_87, %c0_88, %c0_89] : memref<16x8x32xf32, #tpu.memory_space<vmem>>, vector<16x8x32xf32>
    %144 = arith.truncf %143 : vector<16x8x32xf32> to vector<16x8x32xbf16>
    %c0_90 = arith.constant 0 : index
    %c0_91 = arith.constant 0 : index
    %c0_92 = arith.constant 0 : index
    %145 = vector.load %arg13[%c0_90, %c0_91, %c0_92] : memref<16x8x32xf32, #tpu.memory_space<vmem>>, vector<16x8x32xf32>
    %146 = arith.truncf %145 : vector<16x8x32xf32> to vector<16x8x32xbf16>
    %147 = vector.extract_strided_slice %142 {offsets = [0, 0, 0], sizes = [16, 8, 8], strides = [1, 1, 1]} : vector<16x8x32xbf16> to vector<16x8x8xbf16>
    %148 = vector.extract_strided_slice %142 {offsets = [0, 0, 8], sizes = [16, 8, 8], strides = [1, 1, 1]} : vector<16x8x32xbf16> to vector<16x8x8xbf16>
    %149 = vector.extract_strided_slice %142 {offsets = [0, 0, 16], sizes = [16, 8, 8], strides = [1, 1, 1]} : vector<16x8x32xbf16> to vector<16x8x8xbf16>
    %150 = vector.extract_strided_slice %142 {offsets = [0, 0, 24], sizes = [16, 8, 8], strides = [1, 1, 1]} : vector<16x8x32xbf16> to vector<16x8x8xbf16>
    %151 = tpu.concatenate %147, %148, %149, %150 in 0 : vector<16x8x8xbf16>, vector<16x8x8xbf16>, vector<16x8x8xbf16>, vector<16x8x8xbf16> -> vector<64x8x8xbf16>
    %152 = vector.extract_strided_slice %144 {offsets = [0, 0, 0], sizes = [16, 8, 8], strides = [1, 1, 1]} : vector<16x8x32xbf16> to vector<16x8x8xbf16>
    %153 = vector.extract_strided_slice %144 {offsets = [0, 0, 8], sizes = [16, 8, 8], strides = [1, 1, 1]} : vector<16x8x32xbf16> to vector<16x8x8xbf16>
    %154 = vector.extract_strided_slice %144 {offsets = [0, 0, 16], sizes = [16, 8, 8], strides = [1, 1, 1]} : vector<16x8x32xbf16> to vector<16x8x8xbf16>
    %155 = vector.extract_strided_slice %144 {offsets = [0, 0, 24], sizes = [16, 8, 8], strides = [1, 1, 1]} : vector<16x8x32xbf16> to vector<16x8x8xbf16>
    %156 = tpu.concatenate %152, %153, %154, %155 in 0 : vector<16x8x8xbf16>, vector<16x8x8xbf16>, vector<16x8x8xbf16>, vector<16x8x8xbf16> -> vector<64x8x8xbf16>
    %157 = vector.extract_strided_slice %146 {offsets = [0, 0, 0], sizes = [16, 8, 8], strides = [1, 1, 1]} : vector<16x8x32xbf16> to vector<16x8x8xbf16>
    %158 = vector.extract_strided_slice %146 {offsets = [0, 0, 8], sizes = [16, 8, 8], strides = [1, 1, 1]} : vector<16x8x32xbf16> to vector<16x8x8xbf16>
    %159 = vector.extract_strided_slice %146 {offsets = [0, 0, 16], sizes = [16, 8, 8], strides = [1, 1, 1]} : vector<16x8x32xbf16> to vector<16x8x8xbf16>
    %160 = vector.extract_strided_slice %146 {offsets = [0, 0, 24], sizes = [16, 8, 8], strides = [1, 1, 1]} : vector<16x8x32xbf16> to vector<16x8x8xbf16>
    %161 = tpu.concatenate %157, %158, %159, %160 in 0 : vector<16x8x8xbf16>, vector<16x8x8xbf16>, vector<16x8x8xbf16>, vector<16x8x8xbf16> -> vector<64x8x8xbf16>
    "tpu.trace_start"() <{level = 10 : i32, message = "bqd,bkd->bqk"}> : () -> ()
    %cst_93 = arith.constant dense<0.000000e+00> : vector<64x8x8xf32>
    %162 = tpu.matmul %151, %156, %cst_93 {dimension_numbers = #tpu.dot_dimension_numbers<[2], [2], [1], [1], [0, 0, 0, 1, 1, 1], [0], [0]>} : vector<64x8x8xbf16>, vector<64x8x8xbf16>, vector<64x8x8xf32> -> vector<64x8x8xf32>
    "tpu.trace_stop"() : () -> ()
    %cst_94 = arith.constant dense<0xFF800000> : vector<64x8xf32>
    %163 = vector.multi_reduction <maximumf>, %162, %cst_94 [2] : vector<64x8x8xf32> to vector<64x8xf32>
    %164 = vector.shape_cast %163 : vector<64x8xf32> to vector<64x8x1xf32>
    %165 = vector.broadcast %164 : vector<64x8x1xf32> to vector<64x8x8xf32>
    %166 = arith.subf %162, %165 : vector<64x8x8xf32>
    %167 = math.exp %166 : vector<64x8x8xf32>
    %cst_95 = arith.constant dense<0.000000e+00> : vector<64x8xf32>
    %168 = vector.multi_reduction <add>, %167, %cst_95 [2] : vector<64x8x8xf32> to vector<64x8xf32>
    %169 = vector.shape_cast %168 : vector<64x8xf32> to vector<64x8x1xf32>
    %170 = tpu.reciprocal %169 : vector<64x8x1xf32> -> vector<64x8x1xf32>
    %171 = vector.broadcast %170 : vector<64x8x1xf32> to vector<64x8x8xf32>
    %172 = arith.mulf %167, %171 : vector<64x8x8xf32>
    %173 = arith.truncf %172 : vector<64x8x8xf32> to vector<64x8x8xbf16>
    "tpu.trace_start"() <{level = 10 : i32, message = "bqk,bkd->bqd"}> : () -> ()
    %cst_96 = arith.constant dense<0.000000e+00> : vector<64x8x8xf32>
    %174 = tpu.matmul %173, %161, %cst_96 {dimension_numbers = #tpu.dot_dimension_numbers<[2], [1], [1], [2], [0, 0, 0, 1, 1, 2], [0], [0]>} : vector<64x8x8xbf16>, vector<64x8x8xbf16>, vector<64x8x8xf32> -> vector<64x8x8xf32>
    "tpu.trace_stop"() : () -> ()
    %175 = vector.extract_strided_slice %174 {offsets = [0, 0, 0], sizes = [16, 8, 8], strides = [1, 1, 1]} : vector<64x8x8xf32> to vector<16x8x8xf32>
    %176 = vector.extract_strided_slice %174 {offsets = [16, 0, 0], sizes = [16, 8, 8], strides = [1, 1, 1]} : vector<64x8x8xf32> to vector<16x8x8xf32>
    %177 = vector.extract_strided_slice %174 {offsets = [32, 0, 0], sizes = [16, 8, 8], strides = [1, 1, 1]} : vector<64x8x8xf32> to vector<16x8x8xf32>
    %178 = vector.extract_strided_slice %174 {offsets = [48, 0, 0], sizes = [16, 8, 8], strides = [1, 1, 1]} : vector<64x8x8xf32> to vector<16x8x8xf32>
    %179 = tpu.concatenate %175, %176, %177, %178 in 2 : vector<16x8x8xf32>, vector<16x8x8xf32>, vector<16x8x8xf32>, vector<16x8x8xf32> -> vector<16x8x32xf32>
    %c0_97 = arith.constant 0 : index
    %c0_98 = arith.constant 0 : index
    %180 = vector.load %arg9[%c0_97, %c0_98] : memref<1x32xf32, #tpu.memory_space<vmem>>, vector<1x32xf32>
    %181 = vector.shape_cast %179 : vector<16x8x32xf32> to vector<128x32xf32>
    %182 = arith.truncf %181 : vector<128x32xf32> to vector<128x32xbf16>
    %c0_99 = arith.constant 0 : index
    %c0_100 = arith.constant 0 : index
    %183 = vector.load %arg8[%c0_99, %c0_100] : memref<32x32xbf16, #tpu.memory_space<vmem>>, vector<32x32xbf16>
    %cst_101 = arith.constant dense<0.000000e+00> : vector<128x32xf32>
    %184 = tpu.matmul %182, %183, %cst_101 {dimension_numbers = #tpu.dot_dimension_numbers<[1], [0], [0], [1], [0, 0, 1, 1], [], []>} : vector<128x32xbf16>, vector<32x32xbf16>, vector<128x32xf32> -> vector<128x32xf32>
    %185 = vector.broadcast %180 : vector<1x32xf32> to vector<128x32xf32>
    %186 = arith.addf %184, %185 : vector<128x32xf32>
    %187 = vector.shape_cast %186 : vector<128x32xf32> to vector<16x8x32xf32>
    %188 = vector.extract_strided_slice %187 {offsets = [0, 0, 0], sizes = [16, 1, 32], strides = [1, 1, 1]} : vector<16x8x32xf32> to vector<16x1x32xf32>
    %189 = vector.shape_cast %188 : vector<16x1x32xf32> to vector<16x32xf32>
    %c0_102 = arith.constant 0 : index
    %c0_103 = arith.constant 0 : index
    %c0_104 = arith.constant 0 : index
    %c0_105 = arith.constant 0 : index
    %190 = vector.load %arg10[%c0_102, %c0_103, %c0_104, %c0_105] : memref<1x8x16x32xf32, #tpu.memory_space<vmem>>, vector<1x1x16x32xf32>
    %191 = vector.shape_cast %190 : vector<1x1x16x32xf32> to vector<16x32xf32>
    %192 = vector.shape_cast %189 : vector<16x32xf32> to vector<1x1x16x32xf32>
    tpu.vector_store %arg10[%c0_102, %c0_103, %c0_104, %c0_105], %192 {strides = array<i32>} : memref<1x8x16x32xf32, #tpu.memory_space<vmem>>, vector<1x1x16x32xf32>,
    %193 = vector.extract_strided_slice %187 {offsets = [0, 1, 0], sizes = [16, 1, 32], strides = [1, 1, 1]} : vector<16x8x32xf32> to vector<16x1x32xf32>
    %194 = vector.shape_cast %193 : vector<16x1x32xf32> to vector<16x32xf32>
    %c0_106 = arith.constant 0 : index
    %c1_107 = arith.constant 1 : index
    %c0_108 = arith.constant 0 : index
    %c0_109 = arith.constant 0 : index
    %195 = vector.load %arg10[%c0_106, %c1_107, %c0_108, %c0_109] : memref<1x8x16x32xf32, #tpu.memory_space<vmem>>, vector<1x1x16x32xf32>
    %196 = vector.shape_cast %195 : vector<1x1x16x32xf32> to vector<16x32xf32>
    %197 = vector.shape_cast %194 : vector<16x32xf32> to vector<1x1x16x32xf32>
    tpu.vector_store %arg10[%c0_106, %c1_107, %c0_108, %c0_109], %197 {strides = array<i32>} : memref<1x8x16x32xf32, #tpu.memory_space<vmem>>, vector<1x1x16x32xf32>,
    %198 = vector.extract_strided_slice %187 {offsets = [0, 2, 0], sizes = [16, 1, 32], strides = [1, 1, 1]} : vector<16x8x32xf32> to vector<16x1x32xf32>
    %199 = vector.shape_cast %198 : vector<16x1x32xf32> to vector<16x32xf32>
    %c0_110 = arith.constant 0 : index
    %c2_111 = arith.constant 2 : index
    %c0_112 = arith.constant 0 : index
    %c0_113 = arith.constant 0 : index
    %200 = vector.load %arg10[%c0_110, %c2_111, %c0_112, %c0_113] : memref<1x8x16x32xf32, #tpu.memory_space<vmem>>, vector<1x1x16x32xf32>
    %201 = vector.shape_cast %200 : vector<1x1x16x32xf32> to vector<16x32xf32>
    %202 = vector.shape_cast %199 : vector<16x32xf32> to vector<1x1x16x32xf32>
    tpu.vector_store %arg10[%c0_110, %c2_111, %c0_112, %c0_113], %202 {strides = array<i32>} : memref<1x8x16x32xf32, #tpu.memory_space<vmem>>, vector<1x1x16x32xf32>,
    %203 = vector.extract_strided_slice %187 {offsets = [0, 3, 0], sizes = [16, 1, 32], strides = [1, 1, 1]} : vector<16x8x32xf32> to vector<16x1x32xf32>
    %204 = vector.shape_cast %203 : vector<16x1x32xf32> to vector<16x32xf32>
    %c0_114 = arith.constant 0 : index
    %c3_115 = arith.constant 3 : index
    %c0_116 = arith.constant 0 : index
    %c0_117 = arith.constant 0 : index
    %205 = vector.load %arg10[%c0_114, %c3_115, %c0_116, %c0_117] : memref<1x8x16x32xf32, #tpu.memory_space<vmem>>, vector<1x1x16x32xf32>
    %206 = vector.shape_cast %205 : vector<1x1x16x32xf32> to vector<16x32xf32>
    %207 = vector.shape_cast %204 : vector<16x32xf32> to vector<1x1x16x32xf32>
    tpu.vector_store %arg10[%c0_114, %c3_115, %c0_116, %c0_117], %207 {strides = array<i32>} : memref<1x8x16x32xf32, #tpu.memory_space<vmem>>, vector<1x1x16x32xf32>,
    %208 = vector.extract_strided_slice %187 {offsets = [0, 4, 0], sizes = [16, 1, 32], strides = [1, 1, 1]} : vector<16x8x32xf32> to vector<16x1x32xf32>
    %209 = vector.shape_cast %208 : vector<16x1x32xf32> to vector<16x32xf32>
    %c0_118 = arith.constant 0 : index
    %c4_119 = arith.constant 4 : index
    %c0_120 = arith.constant 0 : index
    %c0_121 = arith.constant 0 : index
    %210 = vector.load %arg10[%c0_118, %c4_119, %c0_120, %c0_121] : memref<1x8x16x32xf32, #tpu.memory_space<vmem>>, vector<1x1x16x32xf32>
    %211 = vector.shape_cast %210 : vector<1x1x16x32xf32> to vector<16x32xf32>
    %212 = vector.shape_cast %209 : vector<16x32xf32> to vector<1x1x16x32xf32>
    tpu.vector_store %arg10[%c0_118, %c4_119, %c0_120, %c0_121], %212 {strides = array<i32>} : memref<1x8x16x32xf32, #tpu.memory_space<vmem>>, vector<1x1x16x32xf32>,
    %213 = vector.extract_strided_slice %187 {offsets = [0, 5, 0], sizes = [16, 1, 32], strides = [1, 1, 1]} : vector<16x8x32xf32> to vector<16x1x32xf32>
    %214 = vector.shape_cast %213 : vector<16x1x32xf32> to vector<16x32xf32>
    %c0_122 = arith.constant 0 : index
    %c5_123 = arith.constant 5 : index
    %c0_124 = arith.constant 0 : index
    %c0_125 = arith.constant 0 : index
    %215 = vector.load %arg10[%c0_122, %c5_123, %c0_124, %c0_125] : memref<1x8x16x32xf32, #tpu.memory_space<vmem>>, vector<1x1x16x32xf32>
    %216 = vector.shape_cast %215 : vector<1x1x16x32xf32> to vector<16x32xf32>
    %217 = vector.shape_cast %214 : vector<16x32xf32> to vector<1x1x16x32xf32>
    tpu.vector_store %arg10[%c0_122, %c5_123, %c0_124, %c0_125], %217 {strides = array<i32>} : memref<1x8x16x32xf32, #tpu.memory_space<vmem>>, vector<1x1x16x32xf32>,
    %218 = vector.extract_strided_slice %187 {offsets = [0, 6, 0], sizes = [16, 1, 32], strides = [1, 1, 1]} : vector<16x8x32xf32> to vector<16x1x32xf32>
    %219 = vector.shape_cast %218 : vector<16x1x32xf32> to vector<16x32xf32>
    %c0_126 = arith.constant 0 : index
    %c6_127 = arith.constant 6 : index
    %c0_128 = arith.constant 0 : index
    %c0_129 = arith.constant 0 : index
    %220 = vector.load %arg10[%c0_126, %c6_127, %c0_128, %c0_129] : memref<1x8x16x32xf32, #tpu.memory_space<vmem>>, vector<1x1x16x32xf32>
    %221 = vector.shape_cast %220 : vector<1x1x16x32xf32> to vector<16x32xf32>
    %222 = vector.shape_cast %219 : vector<16x32xf32> to vector<1x1x16x32xf32>
    tpu.vector_store %arg10[%c0_126, %c6_127, %c0_128, %c0_129], %222 {strides = array<i32>} : memref<1x8x16x32xf32, #tpu.memory_space<vmem>>, vector<1x1x16x32xf32>,
    %223 = vector.extract_strided_slice %187 {offsets = [0, 7, 0], sizes = [16, 1, 32], strides = [1, 1, 1]} : vector<16x8x32xf32> to vector<16x1x32xf32>
    %224 = vector.shape_cast %223 : vector<16x1x32xf32> to vector<16x32xf32>
    %c0_130 = arith.constant 0 : index
    %c7_131 = arith.constant 7 : index
    %c0_132 = arith.constant 0 : index
    %c0_133 = arith.constant 0 : index
    %225 = vector.load %arg10[%c0_130, %c7_131, %c0_132, %c0_133] : memref<1x8x16x32xf32, #tpu.memory_space<vmem>>, vector<1x1x16x32xf32>
    %226 = vector.shape_cast %225 : vector<1x1x16x32xf32> to vector<16x32xf32>
    %227 = vector.shape_cast %224 : vector<16x32xf32> to vector<1x1x16x32xf32>
    tpu.vector_store %arg10[%c0_130, %c7_131, %c0_132, %c0_133], %227 {strides = array<i32>} : memref<1x8x16x32xf32, #tpu.memory_space<vmem>>, vector<1x1x16x32xf32>,
    return
  }
  func.func @transform_0(%arg0: i32, %arg1: i32) -> (i32, i32, i32, i32) {
    %c0_i32 = arith.constant 0 : i32
    %c0_i32_0 = arith.constant 0 : i32
    %c0_i32_1 = arith.constant 0 : i32
    return %arg0, %c0_i32, %arg1, %c0_i32_0 : i32, i32, i32, i32
  }
  func.func @transform_1(%arg0: i32, %arg1: i32) -> (i32, i32, i32, i32) {
    %c0_i32 = arith.constant 0 : i32
    %c0_i32_0 = arith.constant 0 : i32
    %c0_i32_1 = arith.constant 0 : i32
    return %arg0, %c0_i32, %arg1, %c0_i32_0 : i32, i32, i32, i32
  }
  func.func @transform_2(%arg0: i32, %arg1: i32) -> (i32, i32, i32, i32) {
    %c0_i32 = arith.constant 0 : i32
    %c0_i32_0 = arith.constant 0 : i32
    %c0_i32_1 = arith.constant 0 : i32
    return %arg0, %c0_i32, %arg1, %c0_i32_0 : i32, i32, i32, i32
  }
  func.func @transform_3(%arg0: i32, %arg1: i32) -> (i32, i32) {
    %c0_i32 = arith.constant 0 : i32
    %c0_i32_0 = arith.constant 0 : i32
    %c0_i32_1 = arith.constant 0 : i32
    return %c0_i32, %c0_i32_0 : i32, i32
  }
  func.func @transform_4(%arg0: i32, %arg1: i32) -> (i32, i32) {
    %c0_i32 = arith.constant 0 : i32
    %c0_i32_0 = arith.constant 0 : i32
    %c0_i32_1 = arith.constant 0 : i32
    return %c0_i32, %c0_i32_0 : i32, i32
  }
  func.func @transform_5(%arg0: i32, %arg1: i32) -> (i32, i32) {
    %c0_i32 = arith.constant 0 : i32
    %c0_i32_0 = arith.constant 0 : i32
    %c0_i32_1 = arith.constant 0 : i32
    return %c0_i32, %c0_i32_0 : i32, i32
  }
  func.func @transform_6(%arg0: i32, %arg1: i32) -> (i32, i32) {
    %c0_i32 = arith.constant 0 : i32
    %c0_i32_0 = arith.constant 0 : i32
    %c0_i32_1 = arith.constant 0 : i32
    return %c0_i32, %c0_i32_0 : i32, i32
  }
  func.func @transform_7(%arg0: i32, %arg1: i32) -> (i32, i32) {
    %c0_i32 = arith.constant 0 : i32
    %c0_i32_0 = arith.constant 0 : i32
    %c0_i32_1 = arith.constant 0 : i32
    return %c0_i32, %c0_i32_0 : i32, i32
  }
  func.func @transform_8(%arg0: i32, %arg1: i32) -> (i32, i32, i32, i32) {
    %c0_i32 = arith.constant 0 : i32
    %c0_i32_0 = arith.constant 0 : i32
    %c0_i32_1 = arith.constant 0 : i32
    return %arg0, %c0_i32, %arg1, %c0_i32_0 : i32, i32, i32, i32
  }
}

</mosaic_0001>

<bundles_post_ra>
// kernel: tpu_custom_call.1
= control target key start
LH: loop header
LB: loop body
LE: loop exit
PB: predicated region body
PF: predicated region fallthrough
CT: control target
= control target key end

     0   :  { %s17974_s0 = inlined_call_operand.hbm [shape: f32[2,8,16,32], index: 0, kind: input, shape index: {}]   ;;  %s17975_s1 = inlined_call_operand.hbm [shape: f32[2,8,16,32], index: 1, kind: input, shape index: {}]   ;;  %s17976_s2 = inlined_call_operand.hbm [shape: f32[2,8,16,32], index: 2, kind: input, shape index: {}]   ;;  %s17977_s3 = inlined_call_operand.hbm [shape: bf16[32,32], index: 3, kind: input, shape index: {}]   ;;  %s17978_s4 = inlined_call_operand.hbm [shape: bf16[32,32], index: 4, kind: input, shape index: {}]   ;;  %s17979_s5 = inlined_call_operand.hbm [shape: bf16[32,32], index: 5, kind: input, shape index: {}]   ;;  %s17980_s6 = inlined_call_operand.hbm [shape: bf16[32,32], index: 6, kind: input, shape index: {}]   ;;  %s17981_s7 = inlined_call_operand.vmem [shape: f32[1,32], index: 7, kind: input, shape index: {}]   ;;  %s17982_s8 = inlined_call_operand.hbm [shape: f32[2,8,16,32], index: 8, kind: output, shape index: {}]  }
   0x1   :  { %18087 = sst [smem:[#allocation81_spill]] %s17975_s1 }
   0x2   :  { %18088 = sst [smem:[#allocation82_spill]] %s17977_s3 }
   0x3   :  { %18089 = sst [smem:[#allocation83_spill]] %s17978_s4 }
   0x4   :  { %18090 = sst [smem:[#allocation84_spill]] %s17979_s5 }
   0x5   :  { %13 = vsyncpa [#allocation6], 0 }
   0x6   :  { %15 = vsyncpa [#allocation6 + $0x1], 0 }
   0x7   :  { %16 = vsyncpa [#allocation9], 0 }
   0x8   :  { %18 = vsyncpa [#allocation9 + $0x1], 0 }
   0x9   :  { %19 = vsyncpa [#allocation12], 0 }
   0xa   :  { %20 = vsyncpa [#allocation15], 0 }
   0xb   :  { %21 = vsyncpa [#allocation7], 0 }
   0xc   :  { %23 = vsyncpa [#allocation7 + $0x1], 0  ;;  %s14258_s27 = smov 0   ;;  %s14260_s28 = smov 0  }
   0xd   :  { %s14262_s29 = smov 0   ;;  %s14264_s30 = smov 0  }
   0xe   :  { %s14266_s9 = smov 0   ;;  %s14268_s10 = smov 0  }
   0xf LB: > { %18091 = sst [smem:[#allocation23_spill]] %s14169_s27  ;;  %s14289_s11 = sadd.s32 4294967295, %s14189_s10   ;;  %s14189_s10 = sphi %s14268_s10, %s29_s10   ;;  %s14185_s9 = sphi %s14266_s9, %s18363_s9   ;;  %s14181_s30 = sphi %s14264_s30, %s18362_s30   ;;  %s14177_s29 = sphi %s14262_s29, %s18366_s29   ;;  %s14173_s28 = sphi %s14260_s28, %s18365_s28   ;;  %s14169_s27 = sphi %s14258_s27, %s18364_s27  }
  0x10   : > { %18092 = sst [smem:[#allocation24_spill]] %s14185_s9  ;;  %s12026_s12 = sadd.s32 4294967294, %s14189_s10  }
  0x11   : > { %18093 = sst [smem:[#allocation25_spill]] %s14189_s10  ;;  %p63_p0 = scmp.ne.s32.totalorder %s14173_s28, %s14169_s27 }
  0x12   : > { %p17983_p1 = scmp.eq.s32.totalorder %s14289_s11, 0  ;;  %p250_p2 = scmp.eq.s32.totalorder %s14289_s11, 1 }
  0x13   : > { %p256_p3 = scmp.eq.s32.totalorder %s12026_s12, 1  ;;  %p12027_p5 = scmp.ge.s32.totalorder %s14189_s10, 1 }
  0x14   : > { %p14298_p4 = por %p17983_p1, %p63_p0  ;;  %p263_p7 = scmp.lt.s32.totalorder %s14189_s10, 3 }
  0x15   : > { %p14303_p6 = por %p256_p3, %p63_p0  ;;  %s14191_s16 = smov [#allocation11]  }
  0x16   : > { %p14308_p8 = pnand %p12027_p5, %p263_p7  ;;  %s275_s17 = sshll.u32 %s14191_s16, 4  ;;  %s276_s17 = int_to_ptr.vmem [resolvable:$true] %s275_s17 }
  0x17   : > { %s18095_s14 = scalar_select %p14303_p6, 1, 0 }
  0x18   : > { %p13422_p9 = pneg %p14308_p8  ;;  %s14192_s19 = smov [#allocation14]  }
  0x19   : > { %18096 = sst [smem:[#allocation26_spill]] %s18095_s14  ;;  %s301_s20 = sshll.u32 %s14192_s19, 4  ;;  %s302_s20 = int_to_ptr.vmem [resolvable:$true] %s301_s20 }
  0x1a   : > { %p14317_p11 = pnand %p13422_p9, %p17983_p1  ;;  %s13920_s21 = scalar_lea.vmem %s276_s17, 256 }
  0x1b   : > { %p13921_p13 = scmp.ne.s32.totalorder %s276_s17, %s13920_s21  ;;  %p13928_p5 = scmp.lt.s32.totalorder %s276_s17, %s276_s17 }
  0x1c   : > { %p17993_p12 = pneg %p14317_p11  ;;  %p13929_p7 = scmp.lt.s32.totalorder %s13920_s21, %s13920_s21 }
  0x1e   : > { %p13923_p0 = pnand %p13921_p13, %p17993_p12  ;;  %p13930_p10 = por %p13929_p7, %p13928_p5 }
  0x20   : > { %p13924_p3 = pneg %p13923_p0 }
  0x22   : > { %p13931_p9 = pnand %p13930_p10, %p13924_p3 }
  0x24   : > { %13934 = shalt.err (!%p13931_p9)
}
  0x25   : > { %s17984_s22 = smov 64   ;;  %s17986_s23 = smov 4  }
  0x26   : > { %s18099_s3 = sld [smem:[#allocation82_spill]]  ;;  %s13946_s26 = scalar_lea.vmem %s302_s20, 256 }
  0x27   : > { %p13947_p13 = scmp.ne.s32.totalorder %s302_s20, %s13946_s26  ;;  %p13954_p10 = scmp.lt.s32.totalorder %s302_s20, %s302_s20 }
  0x28   : > { %p13955_p3 = scmp.lt.s32.totalorder %s13946_s26, %s13946_s26 }
  0x29   : > { %p13949_p0 = pnand %p13947_p13, %p17993_p12 }
  0x2a   : > { %p13956_p7 = por %p13955_p3, %p13954_p10 }
  0x2b   : > { %p13950_p5 = pneg %p13949_p0 }
  0x2c   : > { %13425 = dma.hbm_to_vmem [thread:$0]  (!%p14317_p11), %s18099_s3, 256, %s276_s17, [#allocation12], %s17984_s22, %s17984_s22, %s17986_s23  }
  0x2d   : > { %p13957_p9 = pnand %p13956_p7, %p13950_p5 }
  0x2f   : > { %13960 = shalt.err (!%p13957_p9)
}
  0x30   : > { %s18100_s5 = sld [smem:[#allocation84_spill]]  ;;  %s41_s17 = sadd.s32 1, %s14185_s9 }
  0x31   : > { %s50_s19 = sadd.s32 1, %s14177_s29  ;;  %p43_p13 = scmp.ge.s32.totalorder %s41_s17, 2 }
  0x32   : > { %p57_p0 = scmp.ne.s32.totalorder %s14177_s29, %s14173_s28  ;;  %p58_p5 = scmp.eq.s32.totalorder %s14189_s10, 0 }
  0x33   : > { %p13453_p10 = scmp.lt.s32.totalorder %s14189_s10, 2  ;;  %s18368_s17 = smov (%p43_p13, %s41_s17), 0 }
  0x34   : > { %18101 = sst [smem:[#allocation27_spill]] %s18368_s17  ;;  %p59_p3 = por %p58_p5, %p57_p0 }
  0x35   : > { %p14355_p7 = por %p250_p2, %p57_p0  ;;  %s45_s24 = ssub.s32 %s14185_s9, %s18368_s17 }
  0x36   : > { %13431 = dma.hbm_to_vmem [thread:$0]  (!%p14317_p11), %s18100_s5, 256, %s302_s20, [#allocation15], %s17984_s22, %s17984_s22, %s17986_s23  }
  0x37   : > { %s17988_s25 = sand.u32 1, %s14177_s29   ;;  %p48_p9 = scmp.eq.s32.totalorder %s45_s24, 0 }
  0x38   : > { %s14364_s20 = sshll.u32 %s17988_s25, 7  ;;  %s14367_s26 = sshll.u32 %s14185_s9, 11 }
  0x39   : > { %p14369_p1 = pnand %p13453_p10, %p59_p3  ;;  %s354_s22 = sand.u32 1, %s14189_s10  }
  0x3a   : > { %s14374_s16 = scalar_select %p48_p9, %s14177_s29, %s50_s19  }
  0x3b   : > { %s18105_s1 = sld [smem:[#allocation81_spill]]  ;;  %s358_s5 = scalar_lea.vmem [#allocation8], %s14364_s20 }
  0x3c   : > { %18104 = sst [smem:[#allocation28_spill]] %s14374_s16  ;;  %s367_s25 = sshll.u32 %s358_s5, 4  ;;  %s368_s25 = int_to_ptr.vmem [resolvable:$true] %s367_s25 }
  0x3d   : > { %s14382_s17 = scalar_lea.sflag [#allocation9], %s354_s22  ;;  %p17994_p2 = pneg %p14369_p1 }
  0x3e   : > { %s13974_s9 = scalar_lea.vmem %s368_s25, 2048  ;;  %s14195_s19 = smov [#allocation8]  }
  0x3f   : > { %p13975_p13 = scmp.ne.s32.totalorder %s368_s25, %s13974_s9  ;;  %s13979_s16 = sshll.u32 %s14195_s19, 4  ;;  %s13980_s16 = int_to_ptr.vmem [resolvable:$false] %s13979_s16 }
  0x40   : > { %s13981_s10 = scalar_lea.vmem %s13980_s16, 4096  ;;  %p13982_p10 = scmp.lt.s32.totalorder %s368_s25, %s13980_s16 }
  0x41   : > { %s366_s24 = scalar_lea.hbm %s18105_s1, %s14367_s26  ;;  %p13977_p0 = pnand %p13975_p13, %p17994_p2 }
  0x42   : > { %p13983_p3 = scmp.lt.s32.totalorder %s13981_s10, %s13974_s9 }
  0x43   : > { %p13978_p5 = pneg %p13977_p0 }
  0x44   : > { %p13984_p9 = por %p13983_p3, %p13982_p10 }
  0x46   : > { %p13985_p12 = pnand %p13984_p9, %p13978_p5 }
  0x48   : > { %13988 = shalt.err (!%p13985_p12)
}
  0x49   : > { %s17995_s3 = smov 128   ;;  %s17997_s5 = smov 8  }
  0x4a   : > { %13441 = dma.hbm_to_vmem [thread:$0]  (!%p14369_p1), %s366_s24, 2048, %s368_s25, %s14382_s17, %s17995_s3, %s17995_s3, %s17997_s5  }
  0x4b   : > { %s14198_s22 = smov [#allocation13]   ;;  %s14199_s19 = smov [#allocation16]  }
  0x4c   : > { %s288_s23 = sshll.u32 %s14198_s22, 4  ;;  %s314_s1 = sshll.u32 %s14199_s19, 4  ;;  %s289_s23 = int_to_ptr.vmem [resolvable:$true] %s288_s23  ;;  %s315_s1 = int_to_ptr.vmem [resolvable:$true] %s314_s1 }
  0x4d   : > { %s14000_s16 = scalar_lea.vmem %s289_s23, 256  ;;  %p18106_p0 = pneg %p14317_p11 }
  0x4e   : > { %p14001_p13 = scmp.ne.s32.totalorder %s289_s23, %s14000_s16  ;;  %p14008_p10 = scmp.lt.s32.totalorder %s289_s23, %s289_s23 }
  0x4f   : > { %p14009_p3 = scmp.lt.s32.totalorder %s14000_s16, %s14000_s16 }
  0x50   : > { %p14003_p12 = pnand %p14001_p13, %p18106_p0 }
  0x51   : > { %p14010_p9 = por %p14009_p3, %p14008_p10 }
  0x52   : > { %p14004_p5 = pneg %p14003_p12 }
  0x54   : > { %p14011_p2 = pnand %p14010_p9, %p14004_p5 }
  0x56   : > { %14014 = shalt.err (!%p14011_p2)
}
  0x57   : > { %s18107_s9 = smov 4   ;;  %s18108_s10 = smov 64  }
  0x58   : > { %s18109_s4 = sld [smem:[#allocation83_spill]]  ;;  %s14026_s22 = scalar_lea.vmem %s315_s1, 256 }
  0x59   : > { %p14027_p6 = scmp.ne.s32.totalorder %s315_s1, %s14026_s22  ;;  %p18110_p13 = pmov %p18106_p0 }
  0x5a   : > { %p14034_p10 = scmp.lt.s32.totalorder %s315_s1, %s315_s1  ;;  %p14035_p5 = scmp.lt.s32.totalorder %s14026_s22, %s14026_s22 }
  0x5b   : > { %p14029_p0 = pnand %p14027_p6, %p18110_p13 }
  0x5c   : > { %p14036_p2 = por %p14035_p5, %p14034_p10 }
  0x5d   : > { %p14030_p12 = pneg %p14029_p0 }
  0x5e   : > { %13428 = dma.hbm_to_vmem [thread:$0]  (!%p14317_p11), %s18109_s4, 256, %s289_s23, [#allocation12], %s18108_s10, %s18108_s10, %s18107_s9  }
  0x5f   : > { %p14037_p3 = pnand %p14036_p2, %p14030_p12 }
  0x61   : > { %14040 = shalt.err (!%p14037_p3)
}
  0x62   : > { %13434 = dma.hbm_to_vmem [thread:$0]  (!%p14317_p11), %s17980_s6, 256, %s315_s1, [#allocation15], %s18108_s10, %s18108_s10, %s18107_s9  }
  0x63   : > { %s343_s24 = scalar_lea.hbm %s17974_s0, %s14367_s26  ;;  %s335_s22 = scalar_lea.vmem [#allocation5], %s14364_s20 }
  0x64   : > { %s344_s3 = sshll.u32 %s335_s22, 4  ;;  %s389_s4 = scalar_lea.hbm %s17976_s2, %s14367_s26  ;;  %s345_s3 = int_to_ptr.vmem [resolvable:$true] %s344_s3 }
  0x65   : > { %s18111_s14 = sand.u32 1, %s14177_s29   ;;  %s14054_s19 = scalar_lea.vmem %s345_s3, 2048 }
  0x66   : > { %s332_s27 = scalar_lea.sflag [#allocation6], %s18111_s14  ;;  %p14055_p6 = scmp.ne.s32.totalorder %s345_s3, %s14054_s19 }
  0x67   : > { %p18112_p9 = pneg %p14369_p1  ;;  %s14200_s1 = smov [#allocation5]  }
  0x68   : > { %s14059_s9 = sshll.u32 %s14200_s1, 4  ;;  %s14060_s9 = int_to_ptr.vmem [resolvable:$false] %s14059_s9 }
  0x69   : > { %p14057_p13 = pnand %p14055_p6, %p18112_p9  ;;  %s14061_s10 = scalar_lea.vmem %s14060_s9, 4096 }
  0x6a   : > { %p14062_p11 = scmp.lt.s32.totalorder %s345_s3, %s14060_s9  ;;  %p14063_p12 = scmp.lt.s32.totalorder %s14061_s10, %s14054_s19 }
  0x6b   : > { %p14058_p0 = pneg %p14057_p13 }
  0x6c   : > { %p14064_p10 = por %p14063_p12, %p14062_p11 }
  0x6e   : > { %p14065_p5 = pnand %p14064_p10, %p14058_p0 }
  0x70   : > { %14068 = shalt.err (!%p14065_p5)
}
  0x71   : > { %s18113_s5 = smov 8   ;;  %s18114_s16 = smov 128  }
  0x72   : > { %13438 = dma.hbm_to_vmem [thread:$0]  (!%p14369_p1), %s343_s24, 2048, %s345_s3, %s332_s27, %s18114_s16, %s18114_s16, %s18113_s5  }
  0x73   : > { %s381_s14 = scalar_lea.vmem [#allocation10], %s14364_s20  ;;  %p18115_p3 = pmov %p18112_p9 }
  0x74   : > { %s390_s23 = sshll.u32 %s381_s14, 4  ;;  %s14201_s22 = smov [#allocation10]   ;;  %s391_s23 = int_to_ptr.vmem [resolvable:$true] %s390_s23 }
  0x75   : > { %s14082_s25 = scalar_lea.vmem %s391_s23, 2048  ;;  %s14087_s18 = sshll.u32 %s14201_s22, 4  ;;  %s14088_s18 = int_to_ptr.vmem [resolvable:$false] %s14087_s18 }
  0x76   : > { %p14083_p2 = scmp.ne.s32.totalorder %s391_s23, %s14082_s25  ;;  %s14089_s19 = scalar_lea.vmem %s14088_s18, 4096 }
  0x77   : > { %p14090_p13 = scmp.lt.s32.totalorder %s391_s23, %s14088_s18  ;;  %p14091_p0 = scmp.lt.s32.totalorder %s14089_s19, %s14082_s25 }
  0x78   : > { %p14085_p6 = pnand %p14083_p2, %p18115_p3 }
  0x79   : > { %p14092_p11 = por %p14091_p0, %p14090_p13 }
  0x7a   : > { %p14086_p9 = pneg %p14085_p6 }
  0x7c   : > { %p14093_p12 = pnand %p14092_p11, %p14086_p9 }
  0x7e   : > { %14096 = shalt.err (!%p14093_p12)
}
  0x7f   : > { %13444 = dma.hbm_to_vmem [thread:$0]  (!%p14369_p1), %s389_s4, 2048, %s391_s23, %s14382_s17, %s18114_s16, %s18114_s16, %s18113_s5  }
  0x80   : > { %402 = sbr.rel (%p14308_p8) target bundleno = 2545 (0x9f1), region = 52 }
  0x85   : > { %s14454_s3 = sand.u32 1, %s14173_s28  }
  0x86   : > { %s14457_s12 = sshll.u32 %s14454_s3, 7  ;;  %s405_s24 = scalar_lea.sflag [#allocation6], %s14454_s3 }
  0x87   : > { %s14461_s1 = scalar_lea.vmem [#allocation5], %s14457_s12 }
  0x88   : > { %14148 = dma.done.wait (%p14298_p4), %s405_s24, 2048  }
  0x89   : > { %14150 = vsyncadd (%p14298_p4), %s405_s24, 4294965248  ;;  %s413_s4 = sand.u32 1, %s14289_s11   ;;  %s14469_s17 = scalar_lea.vmem [#allocation8], %s14457_s12 }
  0x8a   : > { %s414_s15 = scalar_lea.sflag [#allocation9], %s413_s4 }
  0x8b   : > { %14152 = dma.done.wait (%p14298_p4), %s414_s15, 4096  }
  0x8c   : > { %14154 = vsyncadd (%p14298_p4), %s414_s15, 4294963200  ;;  %s14476_s26 = scalar_lea.vmem [#allocation10], %s14457_s12  ;;  %p18116_p1 = scmp.eq.s32.totalorder %s14289_s11, 0 }
  0x8e   : > { %14156 = dma.done.wait (%p18116_p1), [#allocation12], 512   ;;  %p18117_p8 = pmov %p18116_p1 }
  0x8f   : > { %p18118_p10 = pmov %p18116_p1 }
  0x90   : > { %14158 = vsyncadd (%p18117_p8), [#allocation12], 4294966784 }
  0x91   : > { %14160 = dma.done.wait (%p18118_p10), [#allocation15], 512   ;;  %p18119_p5 = pmov %p18116_p1 }
  0x92   : > { %v13645_v0 = vld [vmem:[#allocation11 + $0x8] sm:$0xff]   ;;  %v13646_v1 = vld [vmem:[#allocation11] sm:$0xff]   ;;  %vm530_vm0 = vcmask 261120   ;;  %v492_v7 = vld [vmem:[%s14461_s1 + $0x10] sm:$0xff]  ;;  %vm768_vm1 = vcmask 253952   ;;  %s14204_s11 = smov 112  }
  0x93   : > { %14162 = vsyncadd (%p18119_p5), [#allocation15], 4294966784  ;;  %12546 = vmatprep.subr.bf16.mxu0 %v13645_v0  ;;  %13394 = vmatprep.subr.bf16.mxu1 %v13645_v0  ;;  %v490_v2 = vld [vmem:[%s14461_s1] sm:$0xff]  ;;  %v491_v3 = vld [vmem:[%s14461_s1 + $0x8] sm:$0xff]  ;;  %s14205_s13 = smov 120   ;;  %vm14206_vm2 = vmmov 0  }
  0x94   : > { %v498_v4 = vld [vmem:[%s14461_s1 + $0x40] sm:$0xff]  ;;  %12547 = vmatpush3.bf16.msra.mxu0 %v13645_v0  ;;  %13396 = vmatpush3.bf16.msra.mxu1 %v13645_v0  ;;  %v506_v5 = vpack.c.bf16 %v491_v3, %v490_v2  ;;  %v499_v6 = vld [vmem:[%s14461_s1 + $0x48] sm:$0xff]  ;;  %v493_v8 = vld [vmem:[%s14461_s1 + $0x18] sm:$0xff]  ;;  %s14207_s9 = smov 104   ;;  %vm4575_vm3 = vcmask 64512   ;;  %vm8291_vm4 = vcmask 1043456  }
  0x95   : > { %12548 = vmatprep.subr.bf16.mxu0 %v13646_v1  ;;  %13395 = vmatprep.subr.bf16.mxu1 %v13646_v1  ;;  %v510_v9 = vpack.c.bf16 %v499_v6, %v498_v4  ;;  %v500_v10 = vld [vmem:[%s14461_s1 + $0x50] sm:$0xff]  ;;  %v501_v11 = vld [vmem:[%s14461_s1 + $0x58] sm:$0xff]  ;;  %v494_v12 = vld [vmem:[%s14461_s1 + $0x20] sm:$0xff]  ;;  %v507_v16 = vpack.c.bf16 %v493_v8, %v492_v7  ;;  %s14208_s10 = smov 8   ;;  %s14209_s5 = smov 16   ;;  %vm11441_vm5 = vcmask 130048  }
  0x96   : > { %12550 = vmatprep.mubr.msk.bf16.mxu0 %vm530_vm0, %v506_v5  ;;  %v495_v13 = vld [vmem:[%s14461_s1 + $0x28] sm:$0xff]  ;;  %v502_v14 = vld [vmem:[%s14461_s1 + $0x60] sm:$0xff]  ;;  %v511_v17 = vpack.c.bf16 %v501_v11, %v500_v10  ;;  %v13647_v20 = vld [vmem:[#allocation13 + $0x8] sm:$0xff]   ;;  %s14210_s16 = smov 24   ;;  %vm11458_vm6 = vcmask 195584   ;;  %vm11830_vm7 = vcmask 261127  }
  0x97   : > { %v503_v15 = vld [vmem:[%s14461_s1 + $0x68] sm:$0xff]  ;;  %12558 = vmatprep.mubr.msk.bf16.mxu1 %vm530_vm0, %v510_v9  ;;  %v508_v18 = vpack.c.bf16 %v495_v13, %v494_v12  ;;  %v496_v21 = vld [vmem:[%s14461_s1 + $0x30] sm:$0xff]  ;;  %v497_v23 = vld [vmem:[%s14461_s1 + $0x38] sm:$0xff]  ;;  %s17722_s25 = scalar_lea.vmem [#allocation17], %s14457_s12  ;;  %vm11644_vm8 = vcmask 1041409   ;;  %vm11647_vm9 = vcmask 1042434  }
  0x98   : > { %12549 = vmatpush3.bf16.msra.mxu0 %v13646_v1  ;;  %13397 = vmatpush3.bf16.msra.mxu1 %v13646_v1  ;;  %v512_v19 = vpack.c.bf16 %v503_v15, %v502_v14  ;;  %v13648_v22 = vld [vmem:[#allocation13] sm:$0xff]   ;;  %v505_v25 = vld [vmem:[%s14461_s1 + $0x78] sm:$0xff]  ;;  %v1709_v26 = vld [vmem:[%s14469_s17] sm:$0xff]  ;;  %v509_v28 = vpack.c.bf16 %v497_v23, %v496_v21  ;;  %v18001_v14 = vmov 0.0   ;;  %v14203_v15 = vmov 1966171168  }
  0x99   : > { %v504_v24 = vld [vmem:[%s14461_s1 + $0x70] sm:$0xff]  ;;  %12566 = vmatprep.subr.bf16.mxu1 %v13647_v20  ;;  %v1710_v27 = vld [vmem:[%s14469_s17 + $0x8] sm:$0xff]  ;;  %v13650_v32 = vld [vmem:[#allocation14] sm:$0xff]   ;;  %vm11650_vm10 = vcmask 1043459   ;;  %vm11653_vm11 = vcmask 1044484   ;;  %vm11656_vm12 = vcmask 1045509  }
  0x9a   : > { %v513_v29 = vpack.c.bf16 %v505_v25, %v504_v24  ;;  %v1725_v30 = vpack.c.bf16 %v1710_v27, %v1709_v26  ;;  %v13649_v31 = vld [vmem:[#allocation14 + $0x8] sm:$0xff]   ;;  %v2926_v33 = vld [vmem:[%s14476_s26] sm:$0xff]  ;;  %v1711_v35 = vld [vmem:[%s14469_s17 + $0x10] sm:$0xff]  ;;  %vm11659_vm13 = vcmask 1046534   ;;  %vm11662_vm14 = vcmask 1047559   ;;  %s12249_s22 = sshll.u32 %s14181_s30, 11 }
  0x9b   : > { %12551 = vmatmul.mubr.msk.bf16.vlgmr.msra.gmra.mxu0 %vm530_vm0, %v507_v16  ;;  %12559 = vmatmul.mubr.msk.bf16.vlgmr.msra.gmra.mxu1 %vm530_vm0, %v511_v17  ;;  %v2927_v34 = vld [vmem:[%s14476_s26 + $0x8] sm:$0xff]  ;;  %v1712_v36 = vld [vmem:[%s14469_s17 + $0x18] sm:$0xff]  ;;  %v1713_v38 = vld [vmem:[%s14469_s17 + $0x20] sm:$0xff]  ;;  %v656_v16 = vunpack.c.l.s4 %v14203_v15  ;;  %v658_v17 = vlaneseq  ;;  %vm11764_vm15 = vcmask 261124   ;;  %s11851_s18 = sshll.u32 %s17722_s25, 4  ;;  %s17911_s27 = scalar_lea.hbm %s17982_s8, %s12249_s22  ;;  %s17918_s18 = int_to_ptr.vmem [resolvable:$true] %s11851_s18 }
  0x9c   : > { %12554 = vmatprep.mubr.msk.bf16.mxu0 %vm530_vm0, %v508_v18  ;;  %12562 = vmatprep.mubr.msk.bf16.mxu1 %vm530_vm0, %v512_v19  ;;  %v2942_v37 = vpack.c.bf16 %v2927_v34, %v2926_v33  ;;  %v2928_v39 = vld [vmem:[%s14476_s26 + $0x10] sm:$0xff]  ;;  %v2929_v40 = vld [vmem:[%s14476_s26 + $0x18] sm:$0xff]  ;;  %v1714_v41 = vld [vmem:[%s14469_s17 + $0x28] sm:$0xff]  ;;  %v1726_v44 = vpack.c.bf16 %v1712_v36, %v1711_v35  ;;  %s11836_s20 = scalar_lea.sflag [#allocation7], %s14454_s3  ;;  %s14097_s12 = scalar_lea.vmem %s17918_s18, 2048 }
  0x9d   : > { %12567 = vmatpush3.bf16.msra.mxu1 %v13647_v20  ;;  %12586 = vmatprep.subr.bf16.mxu0 %v13649_v31  ;;  %v2930_v42 = vld [vmem:[%s14476_s26 + $0x20] sm:$0xff]  ;;  %v2931_v43 = vld [vmem:[%s14476_s26 + $0x28] sm:$0xff]  ;;  %v2943_v45 = vpack.c.bf16 %v2929_v40, %v2928_v39  ;;  %v1727_v46 = vpack.c.bf16 %v1714_v41, %v1713_v38  ;;  %v1715_v48 = vld [vmem:[%s14469_s17 + $0x30] sm:$0xff]  ;;  %v657_v18 = vunpack.c.0.s8 %v656_v16  ;;  %v659_v19 = vshrl.u32 %v658_v17, 7  ;;  %p14098_p4 = scmp.ne.s32.totalorder %s17918_s18, %s14097_s12  ;;  %s14211_s24 = smov [#allocation17]  }
  0x9e   : > { %12568 = vmatprep.subr.bf16.mxu1 %v13648_v22  ;;  %12587 = vmatpush3.bf16.msra.mxu0 %v13649_v31  ;;  %v2944_v47 = vpack.c.bf16 %v2931_v43, %v2930_v42  ;;  %v1716_v49 = vld [vmem:[%s14469_s17 + $0x38] sm:$0xff]  ;;  %v1717_v50 = vld [vmem:[%s14469_s17 + $0x40] sm:$0xff]  ;;  %v2932_v51 = vld [vmem:[%s14476_s26 + $0x30] sm:$0xff]  ;;  %s14101_s1 = sshll.u32 %s14211_s24, 4  ;;  %s14102_s1 = int_to_ptr.vmem [resolvable:$false] %s14101_s1 }
  0x9f   : > { %12588 = vmatprep.subr.bf16.mxu0 %v13650_v32  ;;  %v2933_v52 = vld [vmem:[%s14476_s26 + $0x38] sm:$0xff]  ;;  %v1718_v53 = vld [vmem:[%s14469_s17 + $0x48] sm:$0xff]  ;;  %v2934_v54 = vld [vmem:[%s14476_s26 + $0x40] sm:$0xff]  ;;  %v1728_v56 = vpack.c.bf16 %v1716_v49, %v1715_v48  ;;  %v14560_v20 = vsub.s32 %v657_v18, %v659_v19  ;;  %p14099_p2 = pnand %p14098_p4, %p14355_p7  ;;  %s14103_s4 = scalar_lea.vmem %s14102_s1, 4096 }
  0xa0   : > { %v2935_v55 = vld [vmem:[%s14476_s26 + $0x48] sm:$0xff]  ;;  %v2945_v57 = vpack.c.bf16 %v2933_v52, %v2932_v51  ;;  %v1729_v58 = vpack.c.bf16 %v1718_v53, %v1717_v50  ;;  %v1719_v60 = vld [vmem:[%s14469_s17 + $0x50] sm:$0xff]  ;;  %v1720_v61 = vld [vmem:[%s14469_s17 + $0x58] sm:$0xff]  ;;  %p14104_p6 = scmp.lt.s32.totalorder %s17918_s18, %s14102_s1  ;;  %p14105_p9 = scmp.lt.s32.totalorder %s14103_s4, %s14097_s12 }
  0xa1   : > { %12569 = vmatpush3.bf16.msra.mxu1 %v13648_v22  ;;  %v2946_v59 = vpack.c.bf16 %v2935_v55, %v2934_v54  ;;  %v1721_v62 = vld [vmem:[%s14469_s17 + $0x60] sm:$0xff]  ;;  %v2936_v63 = vld [vmem:[%s14476_s26 + $0x50] sm:$0xff]  ;;  %v2937_v0 = vld [vmem:[%s14476_s26 + $0x58] sm:$0xff]  ;;  %v1730_v4 = vpack.c.bf16 %v1720_v61, %v1719_v60  ;;  %p14100_p3 = pneg %p14099_p2 }
  0xa2   : > { %12589 = vmatpush3.bf16.msra.mxu0 %v13650_v32  ;;  %v1722_v1 = vld [vmem:[%s14469_s17 + $0x68] sm:$0xff]  ;;  %v2938_v2 = vld [vmem:[%s14476_s26 + $0x60] sm:$0xff]  ;;  %v2947_v5 = vpack.c.bf16 %v2937_v0, %v2936_v63  ;;  %v1723_v8 = vld [vmem:[%s14469_s17 + $0x70] sm:$0xff]  ;;  %12606 = vmatprep.subr.bf16.mxu1 %v18001_v14  ;;  %p14106_p13 = por %p14105_p9, %p14104_p6 }
  0xa3   : > { %12555 = vmatmul.mubr.msk.bf16.gmra.mxu0 %vm530_vm0, %v509_v28  ;;  %12563 = vmatmul.mubr.msk.bf16.gmra.mxu1 %vm530_vm0, %v513_v29  ;;  %v2939_v3 = vld [vmem:[%s14476_s26 + $0x68] sm:$0xff]  ;;  %v1731_v6 = vpack.c.bf16 %v1722_v1, %v1721_v62  ;;  %v1724_v9 = vld [vmem:[%s14469_s17 + $0x78] sm:$0xff]  ;;  %v2940_v10 = vld [vmem:[%s14476_s26 + $0x70] sm:$0xff] }
  0xa4   : > { %12570 = vmatprep.mubr.msk.bf16.mxu1 %vm530_vm0, %v1725_v30  ;;  %12590 = vmatprep.mubr.msk.bf16.mxu0 %vm530_vm0, %v2942_v37  ;;  %v2948_v7 = vpack.c.bf16 %v2939_v3, %v2938_v2  ;;  %v2941_v11 = vld [vmem:[%s14476_s26 + $0x78] sm:$0xff]  ;;  %v1732_v12 = vpack.c.bf16 %v1724_v9, %v1723_v8  ;;  %p14107_p0 = pnand %p14106_p13, %p14100_p3 }
  0xa5   : > { %v2949_v13 = vpack.c.bf16 %v2941_v11, %v2940_v10  ;;  %12630 = vmatprep.subr.bf16.mxu0 %v18001_v14 }
  0xab   : > { %12571 = vmatmul.mubr.msk.bf16.vlgmr.msra.gmra.mxu1 %vm530_vm0, %v1726_v44  ;;  %12591 = vmatmul.mubr.msk.bf16.vlgmr.msra.gmra.mxu0 %vm530_vm0, %v2943_v45 }
  0xac   : > { %12574 = vmatprep.mubr.msk.bf16.mxu1 %vm530_vm0, %v1727_v46  ;;  %12594 = vmatprep.mubr.msk.bf16.mxu0 %vm530_vm0, %v2944_v47 }
  0xb3   : > { %12575 = vmatmul.mubr.msk.bf16.gmra.mxu1 %vm530_vm0, %v1728_v56  ;;  %12595 = vmatmul.mubr.msk.bf16.gmra.mxu0 %vm530_vm0, %v2945_v57 }
  0xb4   : > { %12578 = vmatprep.mubr.msk.bf16.mxu1 %vm530_vm0, %v1729_v58  ;;  %12598 = vmatprep.mubr.msk.bf16.mxu0 %vm530_vm0, %v2946_v59 }
  0xbb   : > { %12579 = vmatmul.mubr.msk.bf16.gmra.mxu1 %vm530_vm0, %v1730_v4  ;;  %12599 = vmatmul.mubr.msk.bf16.gmra.mxu0 %vm530_vm0, %v2947_v5 }
  0xbc   : > { %12582 = vmatprep.mubr.msk.bf16.mxu1 %vm530_vm0, %v1731_v6  ;;  %12602 = vmatprep.mubr.msk.bf16.mxu0 %vm530_vm0, %v2948_v7 }
  0xc3   : > { %12583 = vmatmul.mubr.msk.bf16.gmra.mxu1 %vm530_vm0, %v1732_v12  ;;  %12603 = vmatmul.mubr.msk.bf16.gmra.mxu0 %vm530_vm0, %v2949_v13 }
  0xc4   : > { %12608 = vmatprep.mubr.msk.bf16.mxu1 %vm14206_vm2, %v18001_v14  ;;  %12632 = vmatprep.mubr.msk.bf16.mxu0 %vm14206_vm2, %v18001_v14 }
 0x15b   : > { %v12552_v21 = vpop.f32.mrf.mxu0  ;;  %v12560_v22 = vpop.f32.mrf.mxu1 }
 0x15c   : > { %v787_v23 = vcombine.high %v12552_v21, %v12552_v21  ;;  %v794_v24 = vrot.slane %v12552_v21, %v14560_v20  ;;  %v1315_v25 = vcombine.high %v12560_v22, %v12560_v22  ;;  %v1322_v26 = vrot.slane %v12560_v22, %v14560_v20 }
 0x15d   : > { %v589_v27 = vpop.f32.mrf.mxu0  ;;  %v621_v44 = vpop.f32.mrf.mxu1 }
 0x15e   : > { %v801_v28 = vrot.slane %v787_v23, %v14560_v20  ;;  %v802_v29 = vcombine.high %v794_v24, %v794_v24  ;;  %v810_v30 = vrot.slane %v794_v24, %v14560_v20  ;;  %v1329_v31 = vrot.slane %v1315_v25, %v14560_v20 }
 0x15f   : > { %v1330_v32 = vcombine.high %v1322_v26, %v1322_v26  ;;  %v1338_v33 = vrot.slane %v1322_v26, %v14560_v20  ;;  %v654_v34 = vcombine.high %v589_v27, %v589_v27  ;;  %v661_v35 = vrot.slane %v589_v27, %v14560_v20  ;;  %v12553_v53 = vpop.f32.mrf.mxu0  ;;  %v12561_v62 = vpop.f32.mrf.mxu1 }
 0x160   : > { %v803_v36 = vcombine.high %v801_v28, %v801_v28  ;;  %v817_v37 = vrot.slane %v801_v28, %v14560_v20  ;;  %v824_v38 = vrot.slane %v802_v29, %v14560_v20  ;;  %v832_v39 = vcombine.high %v810_v30, %v810_v30  ;;  %901 = vst.msk [vmem:[#allocation2 + $0x1] sm:$0x1] %vm768_vm1, %v810_v30 }
 0x161   : > { %v1331_v40 = vcombine.high %v1329_v31, %v1329_v31  ;;  %v1345_v41 = vrot.slane %v1329_v31, %v14560_v20  ;;  %v1352_v42 = vrot.slane %v1330_v32, %v14560_v20  ;;  %v1360_v43 = vcombine.high %v1338_v33, %v1338_v33  ;;  %1429 = vst.msk [vmem:[#allocation2 + $0x5] sm:$0x1] %vm768_vm1, %v1338_v33  ;;  %v592_v25 = vpop.f32.mrf.mxu0  ;;  %v624_v30 = vpop.f32.mrf.mxu1 }
 0x162   : > { %v831_v45 = vrot.slane %v803_v36, %v14560_v20  ;;  %v833_v46 = vcombine.high %v817_v37, %v817_v37  ;;  %v834_v47 = vcombine.high %v824_v38, %v824_v38  ;;  %902 = vst.msk [vmem:[#allocation2 + $0x9] sm:$0x1] %vm768_vm1, %v824_v38  ;;  %903 = vst.msk [vmem:[#allocation2 + $0x11] sm:$0x1] %vm768_vm1, %v832_v39 }
 0x163   : > { %905 = vst.msk [vmem:[#allocation2 + $0x21] sm:$0x1] %vm768_vm1, %v817_v37  ;;  %v668_v48 = vrot.slane %v654_v34, %v14560_v20  ;;  %v1359_v49 = vrot.slane %v1331_v40, %v14560_v20  ;;  %v1361_v50 = vcombine.high %v1345_v41, %v1345_v41  ;;  %v1362_v51 = vcombine.high %v1352_v42, %v1352_v42 }
 0x164   : > { %1430 = vst.msk [vmem:[#allocation2 + $0xd] sm:$0x1] %vm768_vm1, %v1352_v42  ;;  %1431 = vst.msk [vmem:[#allocation2 + $0x15] sm:$0x1] %vm768_vm1, %v1360_v43  ;;  %v669_v52 = vcombine.high %v661_v35, %v661_v35  ;;  %v835_v54 = vcombine.high %v831_v45, %v831_v45  ;;  %v677_v56 = vrot.slane %v661_v35, %v14560_v20 }
 0x165   : > { %1433 = vst.msk [vmem:[#allocation2 + $0x25] sm:$0x1] %vm768_vm1, %v1345_v41  ;;  %904 = vst.msk [vmem:[#allocation2 + $0x19] sm:$0x1] %vm768_vm1, %v834_v47  ;;  %v670_v55 = vcombine.high %v668_v48, %v668_v48  ;;  %v684_v57 = vrot.slane %v668_v48, %v14560_v20  ;;  %v1363_v58 = vcombine.high %v1359_v49, %v1359_v49  ;;  %v12564_v47 = vpop.f32.mrf.mxu1 }
 0x166   : > { %906 = vst.msk [vmem:[#allocation2 + $0x29] sm:$0x1] %vm768_vm1, %v831_v45  ;;  %907 = vst.msk [vmem:[#allocation2 + $0x31] sm:$0x1] %vm768_vm1, %v833_v46  ;;  %v691_v59 = vrot.slane %v669_v52, %v14560_v20  ;;  %v1183_v60 = vcombine.high %v621_v44, %v621_v44  ;;  %v1190_v61 = vrot.slane %v621_v44, %v14560_v20  ;;  %v12556_v52 = vpop.f32.mrf.mxu0 }
 0x167   : > { %1432 = vst.msk [vmem:[#allocation2 + $0x1d] sm:$0x1] %vm768_vm1, %v1362_v51  ;;  %1434 = vst.msk [vmem:[#allocation2 + $0x2d] sm:$0x1] %vm768_vm1, %v1359_v49  ;;  %v698_v63 = vrot.slane %v670_v55, %v14560_v20  ;;  %v699_v0 = vcombine.high %v677_v56, %v677_v56  ;;  %v700_v1 = vcombine.high %v684_v57, %v684_v57 }
 0x168   : > { %1435 = vst.msk [vmem:[#allocation2 + $0x35] sm:$0x1] %vm768_vm1, %v1361_v50  ;;  %908 = vst.msk [vmem:[#allocation2 + $0x39] sm:$0x1] %vm768_vm1, %v835_v54  ;;  %v836_v2 = vcombine.high %v12553_v53, %v12553_v53  ;;  %v701_v3 = vcombine.high %v691_v59, %v691_v59  ;;  %v1197_v4 = vrot.slane %v1183_v60, %v14560_v20 }
 0x169   : > { %769 = vst.msk [vmem:[#allocation2] sm:$0x1] %vm768_vm1, %v677_v56  ;;  %773 = vst.msk [vmem:[#allocation2 + $0x20] sm:$0x1] %vm768_vm1, %v684_v57  ;;  %v1198_v5 = vcombine.high %v1190_v61, %v1190_v61  ;;  %v1206_v6 = vrot.slane %v1190_v61, %v14560_v20  ;;  %v702_v7 = vcombine.high %v698_v63, %v698_v63 }
 0x16a   : > { %1436 = vst.msk [vmem:[#allocation2 + $0x3d] sm:$0x1] %vm768_vm1, %v1363_v58  ;;  %770 = vst.msk [vmem:[#allocation2 + $0x8] sm:$0x1] %vm768_vm1, %v691_v59  ;;  %v843_v8 = vrot.slane %v12553_v53, %v14560_v20  ;;  %v850_v9 = vrot.slane %v836_v2, %v14560_v20  ;;  %v1364_v10 = vcombine.high %v12561_v62, %v12561_v62 }
 0x16b   : > { %771 = vst.msk [vmem:[#allocation2 + $0x10] sm:$0x1] %vm768_vm1, %v699_v0  ;;  %774 = vst.msk [vmem:[#allocation2 + $0x28] sm:$0x1] %vm768_vm1, %v698_v63  ;;  %v1199_v11 = vcombine.high %v1197_v4, %v1197_v4  ;;  %v1213_v12 = vrot.slane %v1197_v4, %v14560_v20  ;;  %v1220_v13 = vrot.slane %v1198_v5, %v14560_v20 }
 0x16c   : > { %775 = vst.msk [vmem:[#allocation2 + $0x30] sm:$0x1] %vm768_vm1, %v700_v1  ;;  %772 = vst.msk [vmem:[#allocation2 + $0x18] sm:$0x1] %vm768_vm1, %v701_v3  ;;  %v1228_v15 = vcombine.high %v1206_v6, %v1206_v6  ;;  %v851_v16 = vcombine.high %v843_v8, %v843_v8  ;;  %v852_v17 = vcombine.high %v850_v9, %v850_v9  ;;  %v14658_v1 = vpop.f32.mrf.mxu1 }
 0x16d   : > { %1297 = vst.msk [vmem:[#allocation2 + $0x4] sm:$0x1] %vm768_vm1, %v1206_v6  ;;  %776 = vst.msk [vmem:[#allocation2 + $0x38] sm:$0x1] %vm768_vm1, %v702_v7  ;;  %v859_v18 = vrot.slane %v843_v8, %v14560_v20  ;;  %v866_v19 = vrot.slane %v850_v9, %v14560_v20  ;;  %v1227_v21 = vrot.slane %v1199_v11, %v14560_v20 }
 0x16e   : > { %v1229_v22 = vcombine.high %v1213_v12, %v1213_v12  ;;  %v1230_v23 = vcombine.high %v1220_v13, %v1220_v13  ;;  %1298 = vst.msk [vmem:[#allocation2 + $0xc] sm:$0x1] %vm768_vm1, %v1220_v13  ;;  %1299 = vst.msk [vmem:[#allocation2 + $0x14] sm:$0x1] %vm768_vm1, %v1228_v15  ;;  %v1371_v24 = vrot.slane %v12561_v62, %v14560_v20 }
 0x16f   : > { %1301 = vst.msk [vmem:[#allocation2 + $0x24] sm:$0x1] %vm768_vm1, %v1213_v12  ;;  %v873_v26 = vrot.slane %v851_v16, %v14560_v20  ;;  %v880_v27 = vrot.slane %v852_v17, %v14560_v20  ;;  %v881_v28 = vcombine.high %v859_v18, %v859_v18  ;;  %v882_v29 = vcombine.high %v866_v19, %v866_v19 }
 0x170   : > { %909 = vst.msk [vmem:[#allocation2 + $0x41] sm:$0x1] %vm768_vm1, %v859_v18  ;;  %913 = vst.msk [vmem:[#allocation2 + $0x61] sm:$0x1] %vm768_vm1, %v866_v19  ;;  %v1231_v31 = vcombine.high %v1227_v21, %v1227_v21  ;;  %v1378_v32 = vrot.slane %v1364_v10, %v14560_v20  ;;  %v1379_v33 = vcombine.high %v1371_v24, %v1371_v24  ;;  %v605_v19 = vpop.f32.mrf.mxu0 }
 0x171   : > { %1300 = vst.msk [vmem:[#allocation2 + $0x1c] sm:$0x1] %vm768_vm1, %v1230_v23  ;;  %1302 = vst.msk [vmem:[#allocation2 + $0x2c] sm:$0x1] %vm768_vm1, %v1227_v21  ;;  %v1387_v34 = vrot.slane %v1371_v24, %v14560_v20  ;;  %v883_v35 = vcombine.high %v873_v26, %v873_v26  ;;  %v884_v36 = vcombine.high %v880_v27, %v880_v27  ;;  %v14677_v21 = vpop.f32.mrf.mxu1 }
 0x172   : > { %1303 = vst.msk [vmem:[#allocation2 + $0x34] sm:$0x1] %vm768_vm1, %v1229_v22  ;;  %910 = vst.msk [vmem:[#allocation2 + $0x49] sm:$0x1] %vm768_vm1, %v873_v26  ;;  %v703_v37 = vcombine.high %v592_v25, %v592_v25  ;;  %v710_v38 = vrot.slane %v592_v25, %v14560_v20  ;;  %v1380_v39 = vcombine.high %v1378_v32, %v1378_v32 }
 0x173   : > { %911 = vst.msk [vmem:[#allocation2 + $0x51] sm:$0x1] %vm768_vm1, %v881_v28  ;;  %914 = vst.msk [vmem:[#allocation2 + $0x69] sm:$0x1] %vm768_vm1, %v880_v27  ;;  %v1394_v40 = vrot.slane %v1378_v32, %v14560_v20  ;;  %v1401_v41 = vrot.slane %v1379_v33, %v14560_v20  ;;  %v1409_v42 = vcombine.high %v1387_v34, %v1387_v34 }
 0x174   : > { %915 = vst.msk [vmem:[#allocation2 + $0x71] sm:$0x1] %vm768_vm1, %v882_v29  ;;  %1304 = vst.msk [vmem:[#allocation2 + $0x3c] sm:$0x1] %vm768_vm1, %v1231_v31  ;;  %v717_v43 = vrot.slane %v703_v37, %v14560_v20  ;;  %v718_v44 = vcombine.high %v710_v38, %v710_v38  ;;  %v726_v45 = vrot.slane %v710_v38, %v14560_v20  ;;  %v12557_v38 = vpop.f32.mrf.mxu0 }
 0x175   : > { %1437 = vst.msk [vmem:[#allocation2 + $0x45] sm:$0x1] %vm768_vm1, %v1387_v34  ;;  %912 = vst.msk [vmem:[#allocation2 + $0x59] sm:$0x1] %vm768_vm1, %v883_v35  ;;  %v1232_v46 = vcombine.high %v624_v30, %v624_v30  ;;  %v1408_v48 = vrot.slane %v1380_v39, %v14560_v20  ;;  %v1410_v49 = vcombine.high %v1394_v40, %v1394_v40  ;;  %v14697_v39 = vpop.f32.mrf.mxu1 }
 0x176   : > { %916 = vst.msk [vmem:[#allocation2 + $0x79] sm:$0x1] %vm768_vm1, %v884_v36  ;;  %v1411_v50 = vcombine.high %v1401_v41, %v1401_v41  ;;  %1438 = vst.msk [vmem:[#allocation2 + $0x4d] sm:$0x1] %vm768_vm1, %v1401_v41  ;;  %v1239_v51 = vrot.slane %v624_v30, %v14560_v20  ;;  %v719_v53 = vcombine.high %v717_v43, %v717_v43 }
 0x177   : > { %1439 = vst.msk [vmem:[#allocation2 + $0x55] sm:$0x1] %vm768_vm1, %v1409_v42  ;;  %1441 = vst.msk [vmem:[#allocation2 + $0x65] sm:$0x1] %vm768_vm1, %v1394_v40  ;;  %v733_v54 = vrot.slane %v717_v43, %v14560_v20  ;;  %v740_v55 = vrot.slane %v718_v44, %v14560_v20  ;;  %v748_v56 = vcombine.high %v726_v45, %v726_v45 }
 0x178   : > { %777 = vst.msk [vmem:[#allocation2 + $0x40] sm:$0x1] %vm768_vm1, %v726_v45  ;;  %v1412_v57 = vcombine.high %v1408_v48, %v1408_v48  ;;  %1440 = vst.msk [vmem:[#allocation2 + $0x5d] sm:$0x1] %vm768_vm1, %v1411_v50  ;;  %v1246_v58 = vrot.slane %v1232_v46, %v14560_v20  ;;  %v1247_v59 = vcombine.high %v1239_v51, %v1239_v51 }
 0x179   : > { %1442 = vst.msk [vmem:[#allocation2 + $0x6d] sm:$0x1] %vm768_vm1, %v1408_v48  ;;  %1443 = vst.msk [vmem:[#allocation2 + $0x75] sm:$0x1] %vm768_vm1, %v1410_v49  ;;  %v1255_v60 = vrot.slane %v1239_v51, %v14560_v20  ;;  %v747_v61 = vrot.slane %v719_v53, %v14560_v20  ;;  %v749_v62 = vcombine.high %v733_v54, %v733_v54 }
 0x17a   : > { %v750_v63 = vcombine.high %v740_v55, %v740_v55  ;;  %778 = vst.msk [vmem:[#allocation2 + $0x48] sm:$0x1] %vm768_vm1, %v740_v55  ;;  %779 = vst.msk [vmem:[#allocation2 + $0x50] sm:$0x1] %vm768_vm1, %v748_v56  ;;  %v1051_v0 = vcombine.high %v12556_v52, %v12556_v52  ;;  %v1248_v2 = vcombine.high %v1246_v58, %v1246_v58  ;;  %v14719_v56 = vpop.f32.mrf.mxu1 }
 0x17b   : > { %781 = vst.msk [vmem:[#allocation2 + $0x60] sm:$0x1] %vm768_vm1, %v733_v54  ;;  %1444 = vst.msk [vmem:[#allocation2 + $0x7d] sm:$0x1] %vm768_vm1, %v1412_v57  ;;  %v1262_v3 = vrot.slane %v1246_v58, %v14560_v20  ;;  %v1269_v4 = vrot.slane %v1247_v59, %v14560_v20  ;;  %v1277_v5 = vcombine.high %v1255_v60, %v1255_v60 }
 0x17c   : > { %1305 = vst.msk [vmem:[#allocation2 + $0x44] sm:$0x1] %vm768_vm1, %v1255_v60  ;;  %v751_v6 = vcombine.high %v747_v61, %v747_v61  ;;  %780 = vst.msk [vmem:[#allocation2 + $0x58] sm:$0x1] %vm768_vm1, %v750_v63  ;;  %v1058_v7 = vrot.slane %v12556_v52, %v14560_v20  ;;  %v1065_v8 = vrot.slane %v1051_v0, %v14560_v20 }
 0x17d   : > { %782 = vst.msk [vmem:[#allocation2 + $0x68] sm:$0x1] %vm768_vm1, %v747_v61  ;;  %783 = vst.msk [vmem:[#allocation2 + $0x70] sm:$0x1] %vm768_vm1, %v749_v62  ;;  %v1579_v9 = vcombine.high %v12564_v47, %v12564_v47  ;;  %v1276_v10 = vrot.slane %v1248_v2, %v14560_v20  ;;  %v1278_v11 = vcombine.high %v1262_v3, %v1262_v3 }
 0x17e   : > { %v1279_v12 = vcombine.high %v1269_v4, %v1269_v4  ;;  %1306 = vst.msk [vmem:[#allocation2 + $0x4c] sm:$0x1] %vm768_vm1, %v1269_v4  ;;  %1307 = vst.msk [vmem:[#allocation2 + $0x54] sm:$0x1] %vm768_vm1, %v1277_v5  ;;  %v1586_v13 = vrot.slane %v12564_v47, %v14560_v20  ;;  %v1066_v15 = vcombine.high %v1058_v7, %v1058_v7 }
 0x17f   : > { %1309 = vst.msk [vmem:[#allocation2 + $0x64] sm:$0x1] %vm768_vm1, %v1262_v3  ;;  %784 = vst.msk [vmem:[#allocation2 + $0x78] sm:$0x1] %vm768_vm1, %v751_v6  ;;  %v1067_v16 = vcombine.high %v1065_v8, %v1065_v8  ;;  %v1074_v17 = vrot.slane %v1058_v7, %v14560_v20  ;;  %v1081_v18 = vrot.slane %v1065_v8, %v14560_v20 }
 0x180   : > { %v1280_v22 = vcombine.high %v1276_v10, %v1276_v10  ;;  %1308 = vst.msk [vmem:[#allocation2 + $0x5c] sm:$0x1] %vm768_vm1, %v1279_v12  ;;  %1310 = vst.msk [vmem:[#allocation2 + $0x6c] sm:$0x1] %vm768_vm1, %v1276_v10  ;;  %v1593_v23 = vrot.slane %v1579_v9, %v14560_v20  ;;  %v1594_v24 = vcombine.high %v1586_v13, %v1586_v13  ;;  %v608_v9 = vpop.f32.mrf.mxu0  ;;  %v14737_v10 = vpop.f32.mrf.mxu1 }
 0x181   : > { %1311 = vst.msk [vmem:[#allocation2 + $0x74] sm:$0x1] %vm768_vm1, %v1278_v11  ;;  %v1602_v25 = vrot.slane %v1586_v13, %v14560_v20  ;;  %v1088_v26 = vrot.slane %v1066_v15, %v14560_v20  ;;  %v1095_v27 = vrot.slane %v1067_v16, %v14560_v20  ;;  %v1096_v28 = vcombine.high %v1074_v17, %v1074_v17 }
 0x182   : > { %v1097_v29 = vcombine.high %v1081_v18, %v1081_v18  ;;  %1165 = vst.msk [vmem:[#allocation2 + $0x3] sm:$0x1] %vm768_vm1, %v1074_v17  ;;  %1169 = vst.msk [vmem:[#allocation2 + $0x23] sm:$0x1] %vm768_vm1, %v1081_v18  ;;  %v1595_v30 = vcombine.high %v1593_v23, %v1593_v23  ;;  %v1609_v31 = vrot.slane %v1593_v23, %v14560_v20 }
 0x183   : > { %1312 = vst.msk [vmem:[#allocation2 + $0x7c] sm:$0x1] %vm768_vm1, %v1280_v22  ;;  %v1616_v32 = vrot.slane %v1594_v24, %v14560_v20  ;;  %v1624_v33 = vcombine.high %v1602_v25, %v1602_v25  ;;  %1693 = vst.msk [vmem:[#allocation2 + $0x7] sm:$0x1] %vm768_vm1, %v1602_v25  ;;  %v1098_v34 = vcombine.high %v1088_v26, %v1088_v26 }
 0x184   : > { %v1099_v35 = vcombine.high %v1095_v27, %v1095_v27  ;;  %1166 = vst.msk [vmem:[#allocation2 + $0xb] sm:$0x1] %vm768_vm1, %v1088_v26  ;;  %1167 = vst.msk [vmem:[#allocation2 + $0x13] sm:$0x1] %vm768_vm1, %v1096_v28  ;;  %v919_v36 = vcombine.high %v605_v19, %v605_v19  ;;  %v926_v37 = vrot.slane %v605_v19, %v14560_v20 }
 0x185   : > { %1170 = vst.msk [vmem:[#allocation2 + $0x2b] sm:$0x1] %vm768_vm1, %v1095_v27  ;;  %1171 = vst.msk [vmem:[#allocation2 + $0x33] sm:$0x1] %vm768_vm1, %v1097_v29  ;;  %v1623_v40 = vrot.slane %v1595_v30, %v14560_v20  ;;  %v1625_v41 = vcombine.high %v1609_v31, %v1609_v31  ;;  %v1626_v42 = vcombine.high %v1616_v32, %v1616_v32  ;;  %v14761_v29 = vpop.f32.mrf.mxu1 }
 0x186   : > { %1694 = vst.msk [vmem:[#allocation2 + $0xf] sm:$0x1] %vm768_vm1, %v1616_v32  ;;  %1695 = vst.msk [vmem:[#allocation2 + $0x17] sm:$0x1] %vm768_vm1, %v1624_v33  ;;  %v1447_v43 = vcombine.high %v14658_v1, %v14658_v1  ;;  %v933_v44 = vrot.slane %v919_v36, %v14560_v20  ;;  %v934_v45 = vcombine.high %v926_v37, %v926_v37 }
 0x187   : > { %1697 = vst.msk [vmem:[#allocation2 + $0x27] sm:$0x1] %vm768_vm1, %v1609_v31  ;;  %1168 = vst.msk [vmem:[#allocation2 + $0x1b] sm:$0x1] %vm768_vm1, %v1098_v34  ;;  %v942_v46 = vrot.slane %v926_v37, %v14560_v20  ;;  %v1454_v47 = vrot.slane %v14658_v1, %v14560_v20  ;;  %v1627_v48 = vcombine.high %v1623_v40, %v1623_v40 }
 0x188   : > { %1172 = vst.msk [vmem:[#allocation2 + $0x3b] sm:$0x1] %vm768_vm1, %v1099_v35  ;;  %1696 = vst.msk [vmem:[#allocation2 + $0x1f] sm:$0x1] %vm768_vm1, %v1626_v42  ;;  %v1461_v49 = vrot.slane %v1447_v43, %v14560_v20  ;;  %v1100_v50 = vcombine.high %v12557_v38, %v12557_v38  ;;  %v1107_v51 = vrot.slane %v12557_v38, %v14560_v20 }
 0x189   : > { %1698 = vst.msk [vmem:[#allocation2 + $0x2f] sm:$0x1] %vm768_vm1, %v1623_v40  ;;  %1699 = vst.msk [vmem:[#allocation2 + $0x37] sm:$0x1] %vm768_vm1, %v1625_v41  ;;  %v935_v52 = vcombine.high %v933_v44, %v933_v44  ;;  %v949_v53 = vrot.slane %v933_v44, %v14560_v20  ;;  %v956_v54 = vrot.slane %v934_v45, %v14560_v20 }
 0x18a   : > { %v964_v55 = vcombine.high %v942_v46, %v942_v46  ;;  %1033 = vst.msk [vmem:[#allocation2 + $0x2] sm:$0x1] %vm768_vm1, %v942_v46  ;;  %1700 = vst.msk [vmem:[#allocation2 + $0x3f] sm:$0x1] %vm768_vm1, %v1627_v48  ;;  %v1462_v57 = vcombine.high %v1454_v47, %v1454_v47  ;;  %v1463_v58 = vcombine.high %v1461_v49, %v1461_v49 }
 0x18b   : > { %v1470_v59 = vrot.slane %v1454_v47, %v14560_v20  ;;  %v1477_v60 = vrot.slane %v1461_v49, %v14560_v20  ;;  %v963_v61 = vrot.slane %v935_v52, %v14560_v20  ;;  %v965_v62 = vcombine.high %v949_v53, %v949_v53  ;;  %1034 = vst.msk [vmem:[#allocation2 + $0xa] sm:$0x1] %vm768_vm1, %v956_v54  ;;  %v14782_v47 = vpop.f32.mrf.mxu1 }
 0x18c   : > { %v966_v63 = vcombine.high %v956_v54, %v956_v54  ;;  %1035 = vst.msk [vmem:[#allocation2 + $0x12] sm:$0x1] %vm768_vm1, %v964_v55  ;;  %1037 = vst.msk [vmem:[#allocation2 + $0x22] sm:$0x1] %vm768_vm1, %v949_v53  ;;  %v1114_v0 = vrot.slane %v1100_v50, %v14560_v20  ;;  %v1484_v1 = vrot.slane %v1462_v57, %v14560_v20 }
 0x18d   : > { %v1491_v2 = vrot.slane %v1463_v58, %v14560_v20  ;;  %v1492_v3 = vcombine.high %v1470_v59, %v1470_v59  ;;  %v1493_v4 = vcombine.high %v1477_v60, %v1477_v60  ;;  %1561 = vst.msk [vmem:[#allocation2 + $0x6] sm:$0x1] %vm768_vm1, %v1470_v59  ;;  %1565 = vst.msk [vmem:[#allocation2 + $0x26] sm:$0x1] %vm768_vm1, %v1477_v60 }
 0x18e   : > { %v967_v5 = vcombine.high %v963_v61, %v963_v61  ;;  %1036 = vst.msk [vmem:[#allocation2 + $0x1a] sm:$0x1] %vm768_vm1, %v966_v63  ;;  %1038 = vst.msk [vmem:[#allocation2 + $0x2a] sm:$0x1] %vm768_vm1, %v963_v61  ;;  %v1115_v6 = vcombine.high %v1107_v51, %v1107_v51  ;;  %v1116_v7 = vcombine.high %v1114_v0, %v1114_v0 }
 0x18f   : > { %1039 = vst.msk [vmem:[#allocation2 + $0x32] sm:$0x1] %vm768_vm1, %v965_v62  ;;  %v1123_v8 = vrot.slane %v1107_v51, %v14560_v20  ;;  %v1494_v11 = vcombine.high %v1484_v1, %v1484_v1  ;;  %v1495_v12 = vcombine.high %v1491_v2, %v1491_v2  ;;  %1562 = vst.msk [vmem:[#allocation2 + $0xe] sm:$0x1] %vm768_vm1, %v1484_v1 }
 0x190   : > { %1563 = vst.msk [vmem:[#allocation2 + $0x16] sm:$0x1] %vm768_vm1, %v1492_v3  ;;  %1566 = vst.msk [vmem:[#allocation2 + $0x2e] sm:$0x1] %vm768_vm1, %v1491_v2  ;;  %v1130_v13 = vrot.slane %v1114_v0, %v14560_v20  ;;  %v1628_v15 = vcombine.high %v14677_v21, %v14677_v21  ;;  %v1137_v16 = vrot.slane %v1115_v6, %v14560_v20  ;;  %v14807_v0 = vpop.f32.mrf.mxu1 }
 0x191   : > { %1567 = vst.msk [vmem:[#allocation2 + $0x36] sm:$0x1] %vm768_vm1, %v1493_v4  ;;  %1040 = vst.msk [vmem:[#allocation2 + $0x3a] sm:$0x1] %vm768_vm1, %v967_v5  ;;  %v1144_v17 = vrot.slane %v1116_v7, %v14560_v20  ;;  %v1145_v18 = vcombine.high %v1123_v8, %v1123_v8  ;;  %v1635_v19 = vrot.slane %v14677_v21, %v14560_v20 }
 0x192   : > { %1173 = vst.msk [vmem:[#allocation2 + $0x43] sm:$0x1] %vm768_vm1, %v1123_v8  ;;  %1564 = vst.msk [vmem:[#allocation2 + $0x1e] sm:$0x1] %vm768_vm1, %v1494_v11  ;;  %v1146_v22 = vcombine.high %v1130_v13, %v1130_v13  ;;  %v1642_v23 = vrot.slane %v1628_v15, %v14560_v20  ;;  %v968_v24 = vcombine.high %v608_v9, %v608_v9 }
 0x193   : > { %1568 = vst.msk [vmem:[#allocation2 + $0x3e] sm:$0x1] %vm768_vm1, %v1495_v12  ;;  %1177 = vst.msk [vmem:[#allocation2 + $0x63] sm:$0x1] %vm768_vm1, %v1130_v13  ;;  %v975_v25 = vrot.slane %v608_v9, %v14560_v20  ;;  %v1147_v26 = vcombine.high %v1137_v16, %v1137_v16  ;;  %v1148_v27 = vcombine.high %v1144_v17, %v1144_v17 }
 0x194   : > { %1174 = vst.msk [vmem:[#allocation2 + $0x4b] sm:$0x1] %vm768_vm1, %v1137_v16  ;;  %1175 = vst.msk [vmem:[#allocation2 + $0x53] sm:$0x1] %vm768_vm1, %v1145_v18  ;;  %v1643_v21 = vcombine.high %v1635_v19, %v1635_v19  ;;  %v1651_v28 = vrot.slane %v1635_v19, %v14560_v20  ;;  %v1644_v30 = vcombine.high %v1642_v23, %v1642_v23 }
 0x195   : > { %1178 = vst.msk [vmem:[#allocation2 + $0x6b] sm:$0x1] %vm768_vm1, %v1144_v17  ;;  %1179 = vst.msk [vmem:[#allocation2 + $0x73] sm:$0x1] %vm768_vm1, %v1146_v22  ;;  %v1658_v31 = vrot.slane %v1642_v23, %v14560_v20  ;;  %v982_v32 = vrot.slane %v968_v24, %v14560_v20  ;;  %v983_v33 = vcombine.high %v975_v25, %v975_v25  ;;  %v14827_v17 = vpop.f32.mrf.mxu1 }
 0x196   : > { %1176 = vst.msk [vmem:[#allocation2 + $0x5b] sm:$0x1] %vm768_vm1, %v1147_v26  ;;  %1180 = vst.msk [vmem:[#allocation2 + $0x7b] sm:$0x1] %vm768_vm1, %v1148_v27  ;;  %v1665_v34 = vrot.slane %v1643_v21, %v14560_v20  ;;  %v1673_v35 = vcombine.high %v1651_v28, %v1651_v28  ;;  %v991_v36 = vrot.slane %v975_v25, %v14560_v20 }
 0x197   : > { %1701 = vst.msk [vmem:[#allocation2 + $0x47] sm:$0x1] %vm768_vm1, %v1651_v28  ;;  %v1496_v37 = vcombine.high %v14697_v39, %v14697_v39  ;;  %v1672_v38 = vrot.slane %v1644_v30, %v14560_v20  ;;  %v1674_v40 = vcombine.high %v1658_v31, %v1658_v31  ;;  %1705 = vst.msk [vmem:[#allocation2 + $0x67] sm:$0x1] %vm768_vm1, %v1658_v31 }
 0x198   : > { %v984_v41 = vcombine.high %v982_v32, %v982_v32  ;;  %v998_v42 = vrot.slane %v982_v32, %v14560_v20  ;;  %v1675_v43 = vcombine.high %v1665_v34, %v1665_v34  ;;  %1702 = vst.msk [vmem:[#allocation2 + $0x4f] sm:$0x1] %vm768_vm1, %v1665_v34  ;;  %1703 = vst.msk [vmem:[#allocation2 + $0x57] sm:$0x1] %vm768_vm1, %v1673_v35  ;;  %v14853_v35 = vpop.f32.mrf.mxu1 }
 0x199   : > { %v1005_v44 = vrot.slane %v983_v33, %v14560_v20  ;;  %v1013_v45 = vcombine.high %v991_v36, %v991_v36  ;;  %1041 = vst.msk [vmem:[#allocation2 + $0x42] sm:$0x1] %vm768_vm1, %v991_v36  ;;  %v1503_v46 = vrot.slane %v14697_v39, %v14560_v20  ;;  %v1676_v48 = vcombine.high %v1672_v38, %v1672_v38 }
 0x19a   : > { %1706 = vst.msk [vmem:[#allocation2 + $0x6f] sm:$0x1] %vm768_vm1, %v1672_v38  ;;  %1707 = vst.msk [vmem:[#allocation2 + $0x77] sm:$0x1] %vm768_vm1, %v1674_v40  ;;  %v1012_v49 = vrot.slane %v984_v41, %v14560_v20  ;;  %v1014_v50 = vcombine.high %v998_v42, %v998_v42  ;;  %v1510_v51 = vrot.slane %v1496_v37, %v14560_v20 }
 0x19b   : > { %1045 = vst.msk [vmem:[#allocation2 + $0x62] sm:$0x1] %vm768_vm1, %v998_v42  ;;  %1704 = vst.msk [vmem:[#allocation2 + $0x5f] sm:$0x1] %vm768_vm1, %v1675_v43  ;;  %v1015_v52 = vcombine.high %v1005_v44, %v1005_v44  ;;  %v1511_v39 = vcombine.high %v1503_v46, %v1503_v46  ;;  %v1519_v53 = vrot.slane %v1503_v46, %v14560_v20 }
 0x19c   : > { %1042 = vst.msk [vmem:[#allocation2 + $0x4a] sm:$0x1] %vm768_vm1, %v1005_v44  ;;  %1043 = vst.msk [vmem:[#allocation2 + $0x52] sm:$0x1] %vm768_vm1, %v1013_v45  ;;  %v2004_v54 = vcombine.high %v14719_v56, %v14719_v56  ;;  %v1016_v55 = vcombine.high %v1012_v49, %v1012_v49  ;;  %v1512_v57 = vcombine.high %v1510_v51, %v1510_v51 }
 0x19d   : > { %1708 = vst.msk [vmem:[#allocation2 + $0x7f] sm:$0x1] %vm768_vm1, %v1676_v48  ;;  %1046 = vst.msk [vmem:[#allocation2 + $0x6a] sm:$0x1] %vm768_vm1, %v1012_v49  ;;  %v1526_v58 = vrot.slane %v1510_v51, %v14560_v20  ;;  %v2011_v59 = vrot.slane %v14719_v56, %v14560_v20  ;;  %v1533_v60 = vrot.slane %v1511_v39, %v14560_v20  ;;  %v4143_v49 = vld [vmem:[#allocation2] sm:$0xff] }
 0x19e   : > { %1047 = vst.msk [vmem:[#allocation2 + $0x72] sm:$0x1] %vm768_vm1, %v1014_v50  ;;  %1044 = vst.msk [vmem:[#allocation2 + $0x5a] sm:$0x1] %vm768_vm1, %v1015_v52  ;;  %v1541_v61 = vcombine.high %v1519_v53, %v1519_v53  ;;  %v2018_v62 = vrot.slane %v2004_v54, %v14560_v20  ;;  %v1872_v63 = vcombine.high %v14737_v10, %v14737_v10 }
 0x19f   : > { %1569 = vst.msk [vmem:[#allocation2 + $0x46] sm:$0x1] %vm768_vm1, %v1519_v53  ;;  %1048 = vst.msk [vmem:[#allocation2 + $0x7a] sm:$0x1] %vm768_vm1, %v1016_v55  ;;  %v1540_v1 = vrot.slane %v1512_v57, %v14560_v20  ;;  %v1542_v2 = vcombine.high %v1526_v58, %v1526_v58  ;;  %v2019_v56 = vcombine.high %v2011_v59, %v2011_v59  ;;  %v14873_v53 = vpop.f32.mrf.mxu1 }
 0x1a0   : > { %1573 = vst.msk [vmem:[#allocation2 + $0x66] sm:$0x1] %vm768_vm1, %v1526_v58  ;;  %v2027_v3 = vrot.slane %v2011_v59, %v14560_v20  ;;  %v1543_v4 = vcombine.high %v1533_v60, %v1533_v60  ;;  %1570 = vst.msk [vmem:[#allocation2 + $0x4e] sm:$0x1] %vm768_vm1, %v1533_v60  ;;  %v2020_v5 = vcombine.high %v2018_v62, %v2018_v62 }
 0x1a1   : > { %1571 = vst.msk [vmem:[#allocation2 + $0x56] sm:$0x1] %vm768_vm1, %v1541_v61  ;;  %v2034_v6 = vrot.slane %v2018_v62, %v14560_v20  ;;  %v1879_v7 = vrot.slane %v14737_v10, %v14560_v20  ;;  %v1544_v8 = vcombine.high %v1540_v1, %v1540_v1  ;;  %1574 = vst.msk [vmem:[#allocation2 + $0x6e] sm:$0x1] %vm768_vm1, %v1540_v1 }
 0x1a2   : > { %1575 = vst.msk [vmem:[#allocation2 + $0x76] sm:$0x1] %vm768_vm1, %v1542_v2  ;;  %v2041_v9 = vrot.slane %v2019_v56, %v14560_v20  ;;  %v2049_v11 = vcombine.high %v2027_v3, %v2027_v3  ;;  %2118 = vst.msk [vmem:[#allocation3 + $0x1] sm:$0x1] %vm768_vm1, %v2027_v3  ;;  %v1886_v12 = vrot.slane %v1872_v63, %v14560_v20 }
 0x1a3   : > { %1572 = vst.msk [vmem:[#allocation2 + $0x5e] sm:$0x1] %vm768_vm1, %v1543_v4  ;;  %v2048_v13 = vrot.slane %v2020_v5, %v14560_v20  ;;  %v2050_v15 = vcombine.high %v2034_v6, %v2034_v6  ;;  %2122 = vst.msk [vmem:[#allocation3 + $0x21] sm:$0x1] %vm768_vm1, %v2034_v6  ;;  %v1887_v10 = vcombine.high %v1879_v7, %v1879_v7  ;;  %v14902_v5 = vpop.f32.mrf.mxu1 }
 0x1a4   : > { %v1895_v16 = vrot.slane %v1879_v7, %v14560_v20  ;;  %1576 = vst.msk [vmem:[#allocation2 + $0x7e] sm:$0x1] %vm768_vm1, %v1544_v8  ;;  %v2051_v18 = vcombine.high %v2041_v9, %v2041_v9  ;;  %2119 = vst.msk [vmem:[#allocation3 + $0x9] sm:$0x1] %vm768_vm1, %v2041_v9  ;;  %v1888_v19 = vcombine.high %v1886_v12, %v1886_v12 }
 0x1a5   : > { %2120 = vst.msk [vmem:[#allocation3 + $0x11] sm:$0x1] %vm768_vm1, %v2049_v11  ;;  %v1902_v22 = vrot.slane %v1886_v12, %v14560_v20  ;;  %v2053_v23 = vcombine.high %v14761_v29, %v14761_v29  ;;  %v2052_v24 = vcombine.high %v2048_v13, %v2048_v13  ;;  %2123 = vst.msk [vmem:[#allocation3 + $0x29] sm:$0x1] %vm768_vm1, %v2048_v13 }
 0x1a6   : > { %2124 = vst.msk [vmem:[#allocation3 + $0x31] sm:$0x1] %vm768_vm1, %v2050_v15  ;;  %v1909_v25 = vrot.slane %v1887_v10, %v14560_v20  ;;  %v1917_v26 = vcombine.high %v1895_v16, %v1895_v16  ;;  %1986 = vst.msk [vmem:[#allocation3] sm:$0x1] %vm768_vm1, %v1895_v16  ;;  %v2060_v27 = vrot.slane %v14761_v29, %v14560_v20  ;;  %v4144_v10 = vld [vmem:[#allocation2 + $0x8] sm:$0xff] }
 0x1a7   : > { %2121 = vst.msk [vmem:[#allocation3 + $0x19] sm:$0x1] %vm768_vm1, %v2051_v18  ;;  %v1916_v21 = vrot.slane %v1888_v19, %v14560_v20  ;;  %v1918_v28 = vcombine.high %v1902_v22, %v1902_v22  ;;  %1990 = vst.msk [vmem:[#allocation3 + $0x20] sm:$0x1] %vm768_vm1, %v1902_v22  ;;  %v2067_v30 = vrot.slane %v2053_v23, %v14560_v20 }
 0x1a8   : > { %v1921_v31 = vcombine.high %v14782_v47, %v14782_v47  ;;  %2125 = vst.msk [vmem:[#allocation3 + $0x39] sm:$0x1] %vm768_vm1, %v2052_v24  ;;  %v1919_v32 = vcombine.high %v1909_v25, %v1909_v25  ;;  %1987 = vst.msk [vmem:[#allocation3 + $0x8] sm:$0x1] %vm768_vm1, %v1909_v25  ;;  %v2068_v29 = vcombine.high %v2060_v27, %v2060_v27 }
 0x1a9   : > { %1988 = vst.msk [vmem:[#allocation3 + $0x10] sm:$0x1] %vm768_vm1, %v1917_v26  ;;  %v2076_v33 = vrot.slane %v2060_v27, %v14560_v20  ;;  %v1928_v34 = vrot.slane %v14782_v47, %v14560_v20  ;;  %v1920_v36 = vcombine.high %v1916_v21, %v1916_v21  ;;  %1991 = vst.msk [vmem:[#allocation3 + $0x28] sm:$0x1] %vm768_vm1, %v1916_v21  ;;  %v14929_v26 = vpop.f32.mrf.mxu1 }
 0x1aa   : > { %1992 = vst.msk [vmem:[#allocation3 + $0x30] sm:$0x1] %vm768_vm1, %v1918_v28  ;;  %v2069_v37 = vcombine.high %v2067_v30, %v2067_v30  ;;  %v2083_v38 = vrot.slane %v2067_v30, %v14560_v20  ;;  %v1935_v40 = vrot.slane %v1921_v31, %v14560_v20  ;;  %1989 = vst.msk [vmem:[#allocation3 + $0x18] sm:$0x1] %vm768_vm1, %v1919_v32 }
 0x1ab   : > { %v2090_v41 = vrot.slane %v2068_v29, %v14560_v20  ;;  %v2098_v42 = vcombine.high %v2076_v33, %v2076_v33  ;;  %2126 = vst.msk [vmem:[#allocation3 + $0x41] sm:$0x1] %vm768_vm1, %v2076_v33  ;;  %v1936_v43 = vcombine.high %v1928_v34, %v1928_v34  ;;  %v1944_v44 = vrot.slane %v1928_v34, %v14560_v20 }
 0x1ac   : > { %1993 = vst.msk [vmem:[#allocation3 + $0x38] sm:$0x1] %vm768_vm1, %v1920_v36  ;;  %v2097_v45 = vrot.slane %v2069_v37, %v14560_v20  ;;  %v2099_v46 = vcombine.high %v2083_v38, %v2083_v38  ;;  %2130 = vst.msk [vmem:[#allocation3 + $0x61] sm:$0x1] %vm768_vm1, %v2083_v38  ;;  %v1937_v47 = vcombine.high %v1935_v40, %v1935_v40 }
 0x1ad   : > { %v1951_v48 = vrot.slane %v1935_v40, %v14560_v20  ;;  %v2100_v50 = vcombine.high %v2090_v41, %v2090_v41  ;;  %2127 = vst.msk [vmem:[#allocation3 + $0x49] sm:$0x1] %vm768_vm1, %v2090_v41  ;;  %2128 = vst.msk [vmem:[#allocation3 + $0x51] sm:$0x1] %vm768_vm1, %v2098_v42  ;;  %v1958_v51 = vrot.slane %v1936_v43, %v14560_v20  ;;  %v12581_v43 = vpop.f32.mrf.mxu1 }
 0x1ae   : > { %v1966_v52 = vcombine.high %v1944_v44, %v1944_v44  ;;  %1994 = vst.msk [vmem:[#allocation3 + $0x40] sm:$0x1] %vm768_vm1, %v1944_v44  ;;  %v2268_v39 = vcombine.high %v14807_v0, %v14807_v0  ;;  %v2101_v54 = vcombine.high %v2097_v45, %v2097_v45  ;;  %2131 = vst.msk [vmem:[#allocation3 + $0x69] sm:$0x1] %vm768_vm1, %v2097_v45 }
 0x1af   : > { %2132 = vst.msk [vmem:[#allocation3 + $0x71] sm:$0x1] %vm768_vm1, %v2099_v46  ;;  %v1965_v55 = vrot.slane %v1937_v47, %v14560_v20  ;;  %v1967_v57 = vcombine.high %v1951_v48, %v1951_v48  ;;  %1998 = vst.msk [vmem:[#allocation3 + $0x60] sm:$0x1] %vm768_vm1, %v1951_v48  ;;  %v2275_v58 = vrot.slane %v14807_v0, %v14560_v20  ;;  %v4145_v48 = vld [vmem:[#allocation2 + $0x10] sm:$0xff] }
 0x1b0   : > { %2129 = vst.msk [vmem:[#allocation3 + $0x59] sm:$0x1] %vm768_vm1, %v2100_v50  ;;  %v1968_v59 = vcombine.high %v1958_v51, %v1958_v51  ;;  %1995 = vst.msk [vmem:[#allocation3 + $0x48] sm:$0x1] %vm768_vm1, %v1958_v51  ;;  %v2282_v60 = vrot.slane %v2268_v39, %v14560_v20  ;;  %v14885_v61 = vpack.c.bf16 %v4143_v49, %v4143_v49 }
 0x1b1   : > { %1996 = vst.msk [vmem:[#allocation3 + $0x50] sm:$0x1] %vm768_vm1, %v1966_v52  ;;  %v2136_v62 = vcombine.high %v14827_v17, %v14827_v17  ;;  %2133 = vst.msk [vmem:[#allocation3 + $0x79] sm:$0x1] %vm768_vm1, %v2101_v54  ;;  %v1969_v63 = vcombine.high %v1965_v55, %v1965_v55  ;;  %v2283_v0 = vcombine.high %v2275_v58, %v2275_v58 }
 0x1b2   : > { %1999 = vst.msk [vmem:[#allocation3 + $0x68] sm:$0x1] %vm768_vm1, %v1965_v55  ;;  %2000 = vst.msk [vmem:[#allocation3 + $0x70] sm:$0x1] %vm768_vm1, %v1967_v57  ;;  %v2291_v1 = vrot.slane %v2275_v58, %v14560_v20  ;;  %v2143_v2 = vrot.slane %v14827_v17, %v14560_v20  ;;  %v2284_v56 = vcombine.high %v2282_v60, %v2282_v60  ;;  %4287 = vrot.lane.b32.xlu0 %v14885_v61, %s14204_s11 }
 0x1b3   : > { %1997 = vst.msk [vmem:[#allocation3 + $0x58] sm:$0x1] %vm768_vm1, %v1968_v59  ;;  %v2298_v3 = vrot.slane %v2282_v60, %v14560_v20  ;;  %4255 = vrot.lane.b32.xlu1 %v14885_v61, %s14205_s13  ;;  %v2150_v4 = vrot.slane %v2136_v62, %v14560_v20  ;;  %2001 = vst.msk [vmem:[#allocation3 + $0x78] sm:$0x1] %vm768_vm1, %v1969_v63  ;;  %v2305_v6 = vrot.slane %v2283_v0, %v14560_v20  ;;  %v14978_v62 = vpop.f32.mrf.mxu1 }
 0x1b4   : > { %v2313_v7 = vcombine.high %v2291_v1, %v2291_v1  ;;  %2382 = vst.msk [vmem:[#allocation3 + $0x3] sm:$0x1] %vm768_vm1, %v2291_v1  ;;  %v2151_v8 = vcombine.high %v2143_v2, %v2143_v2  ;;  %v2159_v9 = vrot.slane %v2143_v2, %v14560_v20  ;;  %v2312_v11 = vrot.slane %v2284_v56, %v14560_v20 }
 0x1b5   : > { %v2314_v12 = vcombine.high %v2298_v3, %v2298_v3  ;;  %2386 = vst.msk [vmem:[#allocation3 + $0x23] sm:$0x1] %vm768_vm1, %v2298_v3  ;;  %v2152_v13 = vcombine.high %v2150_v4, %v2150_v4  ;;  %v2166_v15 = vrot.slane %v2150_v4, %v14560_v20  ;;  %v2315_v16 = vcombine.high %v2305_v6, %v2305_v6 }
 0x1b6   : > { %2383 = vst.msk [vmem:[#allocation3 + $0xb] sm:$0x1] %vm768_vm1, %v2305_v6  ;;  %2384 = vst.msk [vmem:[#allocation3 + $0x13] sm:$0x1] %vm768_vm1, %v2313_v7  ;;  %v2173_v17 = vrot.slane %v2151_v8, %v14560_v20  ;;  %v2181_v18 = vcombine.high %v2159_v9, %v2159_v9  ;;  %v2317_v19 = vcombine.high %v14853_v35, %v14853_v35  ;;  %4319 = vrot.lane.b32.xlu0 %v14885_v61, %s14207_s9 }
 0x1b7   : > { %2250 = vst.msk [vmem:[#allocation3 + $0x2] sm:$0x1] %vm768_vm1, %v2159_v9  ;;  %v2316_v22 = vcombine.high %v2312_v11, %v2312_v11  ;;  %2387 = vst.msk [vmem:[#allocation3 + $0x2b] sm:$0x1] %vm768_vm1, %v2312_v11  ;;  %v2180_v23 = vrot.slane %v2152_v13, %v14560_v20  ;;  %v2182_v24 = vcombine.high %v2166_v15, %v2166_v15 }
 0x1b8   : > { %2388 = vst.msk [vmem:[#allocation3 + $0x33] sm:$0x1] %vm768_vm1, %v2314_v12  ;;  %2254 = vst.msk [vmem:[#allocation3 + $0x22] sm:$0x1] %vm768_vm1, %v2166_v15  ;;  %v2324_v25 = vrot.slane %v14853_v35, %v14560_v20  ;;  %v2183_v27 = vcombine.high %v2173_v17, %v2173_v17  ;;  %v2331_v21 = vrot.slane %v2317_v19, %v14560_v20 }
 0x1b9   : > { %2385 = vst.msk [vmem:[#allocation3 + $0x1b] sm:$0x1] %vm768_vm1, %v2315_v16  ;;  %2251 = vst.msk [vmem:[#allocation3 + $0xa] sm:$0x1] %vm768_vm1, %v2173_v17  ;;  %v14935_v28 = vpack.c.bf16 %v4144_v10, %v4144_v10  ;;  %v2185_v30 = vcombine.high %v14873_v53, %v14873_v53  ;;  %v2184_v31 = vcombine.high %v2180_v23, %v2180_v23  ;;  %v12584_v10 = vpop.f32.mrf.mxu1 }
 0x1ba   : > { %2252 = vst.msk [vmem:[#allocation3 + $0x12] sm:$0x1] %vm768_vm1, %v2181_v18  ;;  %2389 = vst.msk [vmem:[#allocation3 + $0x3b] sm:$0x1] %vm768_vm1, %v2316_v22  ;;  %v2332_v32 = vcombine.high %v2324_v25, %v2324_v25  ;;  %v2340_v29 = vrot.slane %v2324_v25, %v14560_v20  ;;  %v2192_v33 = vrot.slane %v14873_v53, %v14560_v20  ;;  %v4147_v22 = vld [vmem:[#allocation2 + $0x20] sm:$0xff] }
 0x1bb   : > { %2255 = vst.msk [vmem:[#allocation3 + $0x2a] sm:$0x1] %vm768_vm1, %v2180_v23  ;;  %2256 = vst.msk [vmem:[#allocation3 + $0x32] sm:$0x1] %vm768_vm1, %v2182_v24  ;;  %v2333_v34 = vcombine.high %v2331_v21, %v2331_v21  ;;  %v2347_v35 = vrot.slane %v2331_v21, %v14560_v20  ;;  %4257 = vrot.lane.b32.xlu1 %v14935_v28, %s14205_s13  ;;  %v2199_v36 = vrot.slane %v2185_v30, %v14560_v20 }
 0x1bc   : > { %2253 = vst.msk [vmem:[#allocation3 + $0x1a] sm:$0x1] %vm768_vm1, %v2183_v27  ;;  %v2532_v37 = vcombine.high %v14902_v5, %v14902_v5  ;;  %2257 = vst.msk [vmem:[#allocation3 + $0x3a] sm:$0x1] %vm768_vm1, %v2184_v31  ;;  %v2354_v38 = vrot.slane %v2332_v32, %v14560_v20  ;;  %v2362_v40 = vcombine.high %v2340_v29, %v2340_v29 }
 0x1bd   : > { %2390 = vst.msk [vmem:[#allocation3 + $0x43] sm:$0x1] %vm768_vm1, %v2340_v29  ;;  %v2200_v41 = vcombine.high %v2192_v33, %v2192_v33  ;;  %v2208_v42 = vrot.slane %v2192_v33, %v14560_v20  ;;  %v2361_v44 = vrot.slane %v2333_v34, %v14560_v20  ;;  %v2363_v45 = vcombine.high %v2347_v35, %v2347_v35 }
 0x1be   : > { %2394 = vst.msk [vmem:[#allocation3 + $0x63] sm:$0x1] %vm768_vm1, %v2347_v35  ;;  %v2201_v46 = vcombine.high %v2199_v36, %v2199_v36  ;;  %v2215_v47 = vrot.slane %v2199_v36, %v14560_v20  ;;  %v2364_v49 = vcombine.high %v2354_v38, %v2354_v38  ;;  %2391 = vst.msk [vmem:[#allocation3 + $0x4b] sm:$0x1] %vm768_vm1, %v2354_v38  ;;  %v4146_v35 = vld [vmem:[#allocation2 + $0x18] sm:$0xff]  ;;  %v1855_v36 = vpop.f32.mrf.mxu1 }
 0x1bf   : > { %2392 = vst.msk [vmem:[#allocation3 + $0x53] sm:$0x1] %vm768_vm1, %v2362_v40  ;;  %v2222_v50 = vrot.slane %v2200_v41, %v14560_v20  ;;  %v2230_v51 = vcombine.high %v2208_v42, %v2208_v42  ;;  %2258 = vst.msk [vmem:[#allocation3 + $0x42] sm:$0x1] %vm768_vm1, %v2208_v42  ;;  %v2539_v52 = vrot.slane %v14902_v5, %v14560_v20  ;;  %4289 = vrot.lane.b32.xlu1 %v14935_v28, %s14204_s11 }
 0x1c0   : > { %v2365_v39 = vcombine.high %v2361_v44, %v2361_v44  ;;  %2395 = vst.msk [vmem:[#allocation3 + $0x6b] sm:$0x1] %vm768_vm1, %v2361_v44  ;;  %2396 = vst.msk [vmem:[#allocation3 + $0x73] sm:$0x1] %vm768_vm1, %v2363_v45  ;;  %v2229_v53 = vrot.slane %v2201_v46, %v14560_v20  ;;  %v2231_v54 = vcombine.high %v2215_v47, %v2215_v47 }
 0x1c1   : > { %2262 = vst.msk [vmem:[#allocation3 + $0x62] sm:$0x1] %vm768_vm1, %v2215_v47  ;;  %v2546_v55 = vrot.slane %v2532_v37, %v14560_v20  ;;  %2393 = vst.msk [vmem:[#allocation3 + $0x5b] sm:$0x1] %vm768_vm1, %v2364_v49  ;;  %v2232_v57 = vcombine.high %v2222_v50, %v2222_v50  ;;  %v2547_v58 = vcombine.high %v2539_v52, %v2539_v52 }
 0x1c2   : > { %2259 = vst.msk [vmem:[#allocation3 + $0x4a] sm:$0x1] %vm768_vm1, %v2222_v50  ;;  %2260 = vst.msk [vmem:[#allocation3 + $0x52] sm:$0x1] %vm768_vm1, %v2230_v51  ;;  %v2555_v59 = vrot.slane %v2539_v52, %v14560_v20  ;;  %v14976_v60 = vpack.c.bf16 %v4145_v48, %v4145_v48  ;;  %v2233_v63 = vcombine.high %v2229_v53, %v2229_v53 }
 0x1c3   : > { %2397 = vst.msk [vmem:[#allocation3 + $0x7b] sm:$0x1] %vm768_vm1, %v2365_v39  ;;  %2263 = vst.msk [vmem:[#allocation3 + $0x6a] sm:$0x1] %vm768_vm1, %v2229_v53  ;;  %v2548_v0 = vcombine.high %v2546_v55, %v2546_v55  ;;  %v2562_v1 = vrot.slane %v2546_v55, %v14560_v20  ;;  %v2400_v2 = vcombine.high %v14929_v26, %v14929_v26  ;;  %4321 = vrot.lane.b32.xlu1 %v14935_v28, %s14207_s9 }
 0x1c4   : > { %2264 = vst.msk [vmem:[#allocation3 + $0x72] sm:$0x1] %vm768_vm1, %v2231_v54  ;;  %2261 = vst.msk [vmem:[#allocation3 + $0x5a] sm:$0x1] %vm768_vm1, %v2232_v57  ;;  %v2569_v56 = vrot.slane %v2547_v58, %v14560_v20  ;;  %v2577_v3 = vcombine.high %v2555_v59, %v2555_v59  ;;  %4259 = vrot.lane.b32.xlu0 %v14976_v60, %s14205_s13  ;;  %v2407_v4 = vrot.slane %v14929_v26, %v14560_v20 }
 0x1c5   : > { %2646 = vst.msk [vmem:[#allocation3 + $0x5] sm:$0x1] %vm768_vm1, %v2555_v59  ;;  %v2581_v5 = vcombine.high %v12581_v43, %v12581_v43  ;;  %2265 = vst.msk [vmem:[#allocation3 + $0x7a] sm:$0x1] %vm768_vm1, %v2233_v63  ;;  %v2576_v6 = vrot.slane %v2548_v0, %v14560_v20  ;;  %v2578_v7 = vcombine.high %v2562_v1, %v2562_v1 }
 0x1c6   : > { %2650 = vst.msk [vmem:[#allocation3 + $0x25] sm:$0x1] %vm768_vm1, %v2562_v1  ;;  %v2414_v8 = vrot.slane %v2400_v2, %v14560_v20  ;;  %v2588_v9 = vrot.slane %v12581_v43, %v14560_v20  ;;  %v2579_v11 = vcombine.high %v2569_v56, %v2569_v56  ;;  %2647 = vst.msk [vmem:[#allocation3 + $0xd] sm:$0x1] %vm768_vm1, %v2569_v56 }
 0x1c7   : > { %2648 = vst.msk [vmem:[#allocation3 + $0x15] sm:$0x1] %vm768_vm1, %v2577_v3  ;;  %v2415_v12 = vcombine.high %v2407_v4, %v2407_v4  ;;  %v2423_v13 = vrot.slane %v2407_v4, %v14560_v20  ;;  %v2595_v15 = vrot.slane %v2581_v5, %v14560_v20  ;;  %v2580_v16 = vcombine.high %v2576_v6, %v2576_v6  ;;  %v4148_v3 = vld [vmem:[#allocation2 + $0x28] sm:$0xff]  ;;  %v12592_v4 = vpop.f32.mrf.mxu0 }
 0x1c8   : > { %2651 = vst.msk [vmem:[#allocation3 + $0x2d] sm:$0x1] %vm768_vm1, %v2576_v6  ;;  %2652 = vst.msk [vmem:[#allocation3 + $0x35] sm:$0x1] %vm768_vm1, %v2578_v7  ;;  %v2416_v17 = vcombine.high %v2414_v8, %v2414_v8  ;;  %v2430_v18 = vrot.slane %v2414_v8, %v14560_v20  ;;  %v2596_v19 = vcombine.high %v2588_v9, %v2588_v9 }
 0x1c9   : > { %2649 = vst.msk [vmem:[#allocation3 + $0x1d] sm:$0x1] %vm768_vm1, %v2579_v11  ;;  %v2437_v23 = vrot.slane %v2415_v12, %v14560_v20  ;;  %v2445_v24 = vcombine.high %v2423_v13, %v2423_v13  ;;  %2514 = vst.msk [vmem:[#allocation3 + $0x4] sm:$0x1] %vm768_vm1, %v2423_v13  ;;  %v2597_v25 = vcombine.high %v2595_v15, %v2595_v15 }
 0x1ca   : > { %v2604_v26 = vrot.slane %v2588_v9, %v14560_v20  ;;  %2653 = vst.msk [vmem:[#allocation3 + $0x3d] sm:$0x1] %vm768_vm1, %v2580_v16  ;;  %v2444_v27 = vrot.slane %v2416_v17, %v14560_v20  ;;  %v2446_v21 = vcombine.high %v2430_v18, %v2430_v18  ;;  %2518 = vst.msk [vmem:[#allocation3 + $0x24] sm:$0x1] %vm768_vm1, %v2430_v18 }
 0x1cb   : > { %v2611_v30 = vrot.slane %v2595_v15, %v14560_v20  ;;  %v2618_v31 = vrot.slane %v2596_v19, %v14560_v20  ;;  %v2447_v32 = vcombine.high %v2437_v23, %v2437_v23  ;;  %2515 = vst.msk [vmem:[#allocation3 + $0xc] sm:$0x1] %vm768_vm1, %v2437_v23  ;;  %2516 = vst.msk [vmem:[#allocation3 + $0x14] sm:$0x1] %vm768_vm1, %v2445_v24  ;;  %v3024_v24 = vpop.f32.mrf.mxu0 }
 0x1cc   : > { %v2625_v29 = vrot.slane %v2597_v25, %v14560_v20  ;;  %v2626_v33 = vcombine.high %v2604_v26, %v2604_v26  ;;  %2654 = vst.msk [vmem:[#allocation3 + $0x45] sm:$0x1] %vm768_vm1, %v2604_v26  ;;  %v15020_v34 = vpack.c.bf16 %v4147_v22, %v4147_v22  ;;  %v2448_v37 = vcombine.high %v2444_v27, %v2444_v27  ;;  %v4149_v25 = vld [vmem:[#allocation2 + $0x30] sm:$0xff] }
 0x1cd   : > { %2519 = vst.msk [vmem:[#allocation3 + $0x2c] sm:$0x1] %vm768_vm1, %v2444_v27  ;;  %2520 = vst.msk [vmem:[#allocation3 + $0x34] sm:$0x1] %vm768_vm1, %v2446_v21  ;;  %v2627_v38 = vcombine.high %v2611_v30, %v2611_v30  ;;  %v2628_v40 = vcombine.high %v2618_v31, %v2618_v31  ;;  %v2449_v41 = vcombine.high %v14978_v62, %v14978_v62 }
 0x1ce   : > { %2655 = vst.msk [vmem:[#allocation3 + $0x4d] sm:$0x1] %vm768_vm1, %v2618_v31  ;;  %2658 = vst.msk [vmem:[#allocation3 + $0x65] sm:$0x1] %vm768_vm1, %v2611_v30  ;;  %v2629_v42 = vcombine.high %v2625_v29, %v2625_v29  ;;  %4263 = vrot.lane.b32.xlu0 %v15020_v34, %s14205_s13  ;;  %v2456_v43 = vrot.slane %v14978_v62, %v14560_v20  ;;  %v2796_v44 = vcombine.high %v12584_v10, %v12584_v10 }
 0x1cf   : > { %2517 = vst.msk [vmem:[#allocation3 + $0x1c] sm:$0x1] %vm768_vm1, %v2447_v32  ;;  %2656 = vst.msk [vmem:[#allocation3 + $0x55] sm:$0x1] %vm768_vm1, %v2626_v33  ;;  %v2803_v45 = vrot.slane %v12584_v10, %v14560_v20  ;;  %v2463_v46 = vrot.slane %v2449_v41, %v14560_v20  ;;  %v15040_v47 = vpack.c.bf16 %v4146_v35, %v4146_v35 }
 0x1d0   : > { %2659 = vst.msk [vmem:[#allocation3 + $0x6d] sm:$0x1] %vm768_vm1, %v2625_v29  ;;  %2521 = vst.msk [vmem:[#allocation3 + $0x3c] sm:$0x1] %vm768_vm1, %v2448_v37  ;;  %v2664_v48 = vcombine.high %v1855_v36, %v1855_v36  ;;  %v2671_v49 = vrot.slane %v1855_v36, %v14560_v20  ;;  %v2464_v50 = vcombine.high %v2456_v43, %v2456_v43 }
 0x1d1   : > { %2657 = vst.msk [vmem:[#allocation3 + $0x5d] sm:$0x1] %vm768_vm1, %v2628_v40  ;;  %2660 = vst.msk [vmem:[#allocation3 + $0x75] sm:$0x1] %vm768_vm1, %v2627_v38  ;;  %v2472_v51 = vrot.slane %v2456_v43, %v14560_v20  ;;  %v2810_v52 = vrot.slane %v2796_v44, %v14560_v20  ;;  %v2811_v39 = vcombine.high %v2803_v45, %v2803_v45  ;;  %4261 = vrot.lane.b32.xlu1 %v15040_v47, %s14205_s13  ;;  %v12593_v44 = vpop.f32.mrf.mxu0 }
 0x1d2   : > { %2661 = vst.msk [vmem:[#allocation3 + $0x7d] sm:$0x1] %vm768_vm1, %v2629_v42  ;;  %v2465_v53 = vcombine.high %v2463_v46, %v2463_v46  ;;  %v2479_v54 = vrot.slane %v2463_v46, %v14560_v20  ;;  %v2819_v55 = vrot.slane %v2803_v45, %v14560_v20  ;;  %v2678_v57 = vrot.slane %v2664_v48, %v14560_v20 }
 0x1d3   : > { %v2486_v58 = vrot.slane %v2464_v50, %v14560_v20  ;;  %v2494_v59 = vcombine.high %v2472_v51, %v2472_v51  ;;  %2522 = vst.msk [vmem:[#allocation3 + $0x44] sm:$0x1] %vm768_vm1, %v2472_v51  ;;  %v2812_v62 = vcombine.high %v2810_v52, %v2810_v52  ;;  %v2826_v63 = vrot.slane %v2810_v52, %v14560_v20  ;;  %v12585_v50 = vpop.f32.mrf.mxu1 }
 0x1d4   : > { %4291 = vrot.lane.b32.xlu0 %v14976_v60, %s14204_s11  ;;  %v2493_v0 = vrot.slane %v2465_v53, %v14560_v20  ;;  %v2495_v1 = vcombine.high %v2479_v54, %v2479_v54  ;;  %2526 = vst.msk [vmem:[#allocation3 + $0x64] sm:$0x1] %vm768_vm1, %v2479_v54  ;;  %v2833_v2 = vrot.slane %v2811_v39, %v14560_v20  ;;  %2910 = vst.msk [vmem:[#allocation3 + $0x7] sm:$0x1] %vm768_vm1, %v2819_v55 }
 0x1d5   : > { %v2841_v56 = vcombine.high %v2819_v55, %v2819_v55  ;;  %v2496_v5 = vcombine.high %v2486_v58, %v2486_v58  ;;  %2523 = vst.msk [vmem:[#allocation3 + $0x4c] sm:$0x1] %vm768_vm1, %v2486_v58  ;;  %2524 = vst.msk [vmem:[#allocation3 + $0x54] sm:$0x1] %vm768_vm1, %v2494_v59  ;;  %v2840_v6 = vrot.slane %v2812_v62, %v14560_v20 }
 0x1d6   : > { %v2842_v7 = vcombine.high %v2826_v63, %v2826_v63  ;;  %2914 = vst.msk [vmem:[#allocation3 + $0x27] sm:$0x1] %vm768_vm1, %v2826_v63  ;;  %v2679_v8 = vcombine.high %v2671_v49, %v2671_v49  ;;  %v2497_v9 = vcombine.high %v2493_v0, %v2493_v0  ;;  %2527 = vst.msk [vmem:[#allocation3 + $0x6c] sm:$0x1] %vm768_vm1, %v2493_v0 }
 0x1d7   : > { %2528 = vst.msk [vmem:[#allocation3 + $0x74] sm:$0x1] %vm768_vm1, %v2495_v1  ;;  %v2843_v11 = vcombine.high %v2833_v2, %v2833_v2  ;;  %2911 = vst.msk [vmem:[#allocation3 + $0xf] sm:$0x1] %vm768_vm1, %v2833_v2  ;;  %v2680_v12 = vcombine.high %v2678_v57, %v2678_v57  ;;  %v2687_v13 = vrot.slane %v2671_v49, %v14560_v20  ;;  %v15126_v2 = vpop.f32.mrf.mxu0 }
 0x1d8   : > { %2912 = vst.msk [vmem:[#allocation3 + $0x17] sm:$0x1] %vm768_vm1, %v2841_v56  ;;  %2525 = vst.msk [vmem:[#allocation3 + $0x5c] sm:$0x1] %vm768_vm1, %v2496_v5  ;;  %v2844_v15 = vcombine.high %v2840_v6, %v2840_v6  ;;  %v2694_v10 = vrot.slane %v2678_v57, %v14560_v20  ;;  %v2701_v16 = vrot.slane %v2679_v8, %v14560_v20  ;;  %4295 = vrot.lane.b32.xlu0 %v15020_v34, %s14204_s11 }
 0x1d9   : > { %2915 = vst.msk [vmem:[#allocation3 + $0x2f] sm:$0x1] %vm768_vm1, %v2840_v6  ;;  %2916 = vst.msk [vmem:[#allocation3 + $0x37] sm:$0x1] %vm768_vm1, %v2842_v7  ;;  %v15076_v17 = vpack.c.bf16 %v4148_v3, %v4148_v3  ;;  %v2708_v18 = vrot.slane %v2680_v12, %v14560_v20  ;;  %v2709_v19 = vcombine.high %v2687_v13, %v2687_v13 }
 0x1da   : > { %2529 = vst.msk [vmem:[#allocation3 + $0x7c] sm:$0x1] %vm768_vm1, %v2497_v9  ;;  %2913 = vst.msk [vmem:[#allocation3 + $0x1f] sm:$0x1] %vm768_vm1, %v2843_v11  ;;  %v3221_v22 = vcombine.high %v12592_v4, %v12592_v4  ;;  %v3228_v23 = vrot.slane %v12592_v4, %v14560_v20  ;;  %v2710_v26 = vcombine.high %v2694_v10, %v2694_v10 }
 0x1db   : > { %2778 = vst.msk [vmem:[#allocation3 + $0x6] sm:$0x1] %vm768_vm1, %v2687_v13  ;;  %2917 = vst.msk [vmem:[#allocation3 + $0x3f] sm:$0x1] %vm768_vm1, %v2844_v15  ;;  %v2711_v27 = vcombine.high %v2701_v16, %v2701_v16  ;;  %4265 = vrot.lane.b32.xlu1 %v15076_v17, %s14205_s13  ;;  %v3089_v21 = vcombine.high %v3024_v24, %v3024_v24  ;;  %v3096_v30 = vrot.slane %v3024_v24, %v14560_v20 }
 0x1dc   : > { %2779 = vst.msk [vmem:[#allocation3 + $0xe] sm:$0x1] %vm768_vm1, %v2701_v16  ;;  %2782 = vst.msk [vmem:[#allocation3 + $0x26] sm:$0x1] %vm768_vm1, %v2694_v10  ;;  %v2712_v31 = vcombine.high %v2708_v18, %v2708_v18  ;;  %v3235_v32 = vrot.slane %v3221_v22, %v14560_v20  ;;  %v3236_v29 = vcombine.high %v3228_v23, %v3228_v23  ;;  %4323 = vrot.lane.b32.xlu0 %v14976_v60, %s14207_s9  ;;  %v1858_v10 = vpop.f32.mrf.mxu1 }
 0x1dd   : > { %2780 = vst.msk [vmem:[#allocation3 + $0x16] sm:$0x1] %vm768_vm1, %v2709_v19  ;;  %2783 = vst.msk [vmem:[#allocation3 + $0x2e] sm:$0x1] %vm768_vm1, %v2708_v18  ;;  %v3244_v33 = vrot.slane %v3228_v23, %v14560_v20  ;;  %v3103_v35 = vrot.slane %v3089_v21, %v14560_v20  ;;  %v3104_v36 = vcombine.high %v3096_v30, %v3096_v30  ;;  %v15150_v23 = vpop.f32.mrf.mxu0 }
 0x1de   : > { %2781 = vst.msk [vmem:[#allocation3 + $0x1e] sm:$0x1] %vm768_vm1, %v2711_v27  ;;  %2784 = vst.msk [vmem:[#allocation3 + $0x36] sm:$0x1] %vm768_vm1, %v2710_v26  ;;  %v3112_v37 = vrot.slane %v3096_v30, %v14560_v20  ;;  %v15099_v38 = vpack.c.bf16 %v4149_v25, %v4149_v25  ;;  %v3237_v40 = vcombine.high %v3235_v32, %v3235_v32 }
 0x1df   : > { %2785 = vst.msk [vmem:[#allocation3 + $0x3e] sm:$0x1] %vm768_vm1, %v2712_v31  ;;  %v3251_v41 = vrot.slane %v3235_v32, %v14560_v20  ;;  %v3258_v42 = vrot.slane %v3236_v29, %v14560_v20  ;;  %v3266_v43 = vcombine.high %v3244_v33, %v3244_v33  ;;  %3335 = vst.msk [vmem:[#allocation4 + $0x1] sm:$0x1] %vm768_vm1, %v3244_v33  ;;  %4293 = vrot.lane.b32.xlu1 %v15040_v47, %s14204_s11 }
 0x1e0   : > { %v3105_v45 = vcombine.high %v3103_v35, %v3103_v35  ;;  %v3119_v46 = vrot.slane %v3103_v35, %v14560_v20  ;;  %v3126_v48 = vrot.slane %v3104_v36, %v14560_v20  ;;  %v3134_v49 = vcombine.high %v3112_v37, %v3112_v37  ;;  %3203 = vst.msk [vmem:[#allocation4] sm:$0x1] %vm768_vm1, %v3112_v37 }
 0x1e1   : > { %v3265_v51 = vrot.slane %v3237_v40, %v14560_v20  ;;  %v3267_v52 = vcombine.high %v3251_v41, %v3251_v41  ;;  %v3268_v39 = vcombine.high %v3258_v42, %v3258_v42  ;;  %3336 = vst.msk [vmem:[#allocation4 + $0x9] sm:$0x1] %vm768_vm1, %v3258_v42  ;;  %3337 = vst.msk [vmem:[#allocation4 + $0x11] sm:$0x1] %vm768_vm1, %v3266_v43  ;;  %4327 = vrot.lane.b32.xlu0 %v15020_v34, %s14207_s9 }
 0x1e2   : > { %3339 = vst.msk [vmem:[#allocation4 + $0x21] sm:$0x1] %vm768_vm1, %v3251_v41  ;;  %v2845_v53 = vcombine.high %v12585_v50, %v12585_v50  ;;  %v3133_v54 = vrot.slane %v3105_v45, %v14560_v20  ;;  %v3135_v55 = vcombine.high %v3119_v46, %v3119_v46  ;;  %v3136_v57 = vcombine.high %v3126_v48, %v3126_v48  ;;  %v4175_v59 = vld [vmem:[#allocation3] sm:$0xff] }
 0x1e3   : > { %3204 = vst.msk [vmem:[#allocation4 + $0x8] sm:$0x1] %vm768_vm1, %v3126_v48  ;;  %3205 = vst.msk [vmem:[#allocation4 + $0x10] sm:$0x1] %vm768_vm1, %v3134_v49  ;;  %v2852_v58 = vrot.slane %v12585_v50, %v14560_v20  ;;  %v3269_v62 = vcombine.high %v3265_v51, %v3265_v51  ;;  %v3270_v0 = vcombine.high %v12593_v44, %v12593_v44  ;;  %4297 = vrot.lane.b32.xlu1 %v15076_v17, %s14204_s11  ;;  %v4179_v21 = vld [vmem:[#allocation3 + $0x20] sm:$0xff] }
 0x1e4   : > { %3207 = vst.msk [vmem:[#allocation4 + $0x20] sm:$0x1] %vm768_vm1, %v3119_v46  ;;  %3338 = vst.msk [vmem:[#allocation4 + $0x19] sm:$0x1] %vm768_vm1, %v3268_v39  ;;  %v2859_v63 = vrot.slane %v2845_v53, %v14560_v20  ;;  %v3277_v1 = vrot.slane %v12593_v44, %v14560_v20  ;;  %v3137_v56 = vcombine.high %v3133_v54, %v3133_v54  ;;  %v3040_v44 = vpop.f32.mrf.mxu0  ;;  %v4151_v50 = vld [vmem:[#allocation2 + $0x40] sm:$0xff] }
 0x1e5   : > { %3340 = vst.msk [vmem:[#allocation4 + $0x29] sm:$0x1] %vm768_vm1, %v3265_v51  ;;  %3341 = vst.msk [vmem:[#allocation4 + $0x31] sm:$0x1] %vm768_vm1, %v3267_v52  ;;  %v2860_v3 = vcombine.high %v2852_v58, %v2852_v58  ;;  %v2868_v4 = vrot.slane %v2852_v58, %v14560_v20  ;;  %v15134_v5 = vpack.c.bf16 %v4175_v59, %v4175_v59  ;;  %4267 = vrot.lane.b32.xlu0 %v15099_v38, %s14205_s13 }
 0x1e6   : > { %3206 = vst.msk [vmem:[#allocation4 + $0x18] sm:$0x1] %vm768_vm1, %v3136_v57  ;;  %3208 = vst.msk [vmem:[#allocation4 + $0x28] sm:$0x1] %vm768_vm1, %v3133_v54  ;;  %v2861_v6 = vcombine.high %v2859_v63, %v2859_v63  ;;  %v2875_v7 = vrot.slane %v2859_v63, %v14560_v20  ;;  %v3284_v8 = vrot.slane %v3270_v0, %v14560_v20 }
 0x1e7   : > { %3209 = vst.msk [vmem:[#allocation4 + $0x30] sm:$0x1] %vm768_vm1, %v3135_v55  ;;  %3342 = vst.msk [vmem:[#allocation4 + $0x39] sm:$0x1] %vm768_vm1, %v3269_v62  ;;  %v3285_v9 = vcombine.high %v3277_v1, %v3277_v1  ;;  %v2882_v11 = vrot.slane %v2860_v3, %v14560_v20  ;;  %v2890_v12 = vcombine.high %v2868_v4, %v2868_v4  ;;  %v4580_v15 = vsel %vm4575_vm3, %v15134_v5, 0 }
 0x1e8   : > { %3210 = vst.msk [vmem:[#allocation4 + $0x38] sm:$0x1] %vm768_vm1, %v3137_v56  ;;  %2918 = vst.msk [vmem:[#allocation3 + $0x47] sm:$0x1] %vm768_vm1, %v2868_v4  ;;  %v3293_v13 = vrot.slane %v3277_v1, %v14560_v20  ;;  %v2889_v16 = vrot.slane %v2861_v6, %v14560_v20  ;;  %v2891_v18 = vcombine.high %v2875_v7, %v2875_v7  ;;  %12607 = vmatpush3.bf16.xpose.msra.mxu1 %v4580_v15  ;;  %v4150_v1 = vld [vmem:[#allocation2 + $0x38] sm:$0xff] }
 0x1e9   : > { %2922 = vst.msk [vmem:[#allocation3 + $0x67] sm:$0x1] %vm768_vm1, %v2875_v7  ;;  %v3286_v19 = vcombine.high %v3284_v8, %v3284_v8  ;;  %v3300_v22 = vrot.slane %v3284_v8, %v14560_v20  ;;  %4325 = vrot.lane.b32.xlu1 %v15040_v47, %s14207_s9  ;;  %v2892_v24 = vcombine.high %v2882_v11, %v2882_v11  ;;  %2919 = vst.msk [vmem:[#allocation3 + $0x4f] sm:$0x1] %vm768_vm1, %v2882_v11 }
 0x1ea   : > { %2920 = vst.msk [vmem:[#allocation3 + $0x57] sm:$0x1] %vm768_vm1, %v2890_v12  ;;  %v3307_v25 = vrot.slane %v3285_v9, %v14560_v20  ;;  %v3315_v26 = vcombine.high %v3293_v13, %v3293_v13  ;;  %3343 = vst.msk [vmem:[#allocation4 + $0x41] sm:$0x1] %vm768_vm1, %v3293_v13  ;;  %v2713_v27 = vcombine.high %v1858_v10, %v1858_v10  ;;  %12612 = vmatprep.subr.bf16.mxu1 %v18001_v14 }
 0x1eb   : > { %v2893_v30 = vcombine.high %v2889_v16, %v2889_v16  ;;  %2923 = vst.msk [vmem:[#allocation3 + $0x6f] sm:$0x1] %vm768_vm1, %v2889_v16  ;;  %2924 = vst.msk [vmem:[#allocation3 + $0x77] sm:$0x1] %vm768_vm1, %v2891_v18  ;;  %v3314_v31 = vrot.slane %v3286_v19, %v14560_v20  ;;  %v3316_v32 = vcombine.high %v3300_v22, %v3300_v22 }
 0x1ec   : > { %3347 = vst.msk [vmem:[#allocation4 + $0x61] sm:$0x1] %vm768_vm1, %v3300_v22  ;;  %v2720_v29 = vrot.slane %v1858_v10, %v14560_v20  ;;  %2921 = vst.msk [vmem:[#allocation3 + $0x5f] sm:$0x1] %vm768_vm1, %v2892_v24  ;;  %v3317_v33 = vcombine.high %v3307_v25, %v3307_v25  ;;  %v2727_v35 = vrot.slane %v2713_v27, %v14560_v20 }
 0x1ed   : > { %3344 = vst.msk [vmem:[#allocation4 + $0x49] sm:$0x1] %vm768_vm1, %v3307_v25  ;;  %3345 = vst.msk [vmem:[#allocation4 + $0x51] sm:$0x1] %vm768_vm1, %v3315_v26  ;;  %v3138_v36 = vcombine.high %v15126_v2, %v15126_v2  ;;  %v3145_v37 = vrot.slane %v15126_v2, %v14560_v20  ;;  %v3318_v40 = vcombine.high %v3314_v31, %v3314_v31  ;;  %4329 = vrot.lane.b32.xlu1 %v15076_v17, %s14207_s9  ;;  %v12597_v2 = vpop.f32.mrf.mxu0 }
 0x1ee   : > { %2925 = vst.msk [vmem:[#allocation3 + $0x7f] sm:$0x1] %vm768_vm1, %v2893_v30  ;;  %3348 = vst.msk [vmem:[#allocation4 + $0x69] sm:$0x1] %vm768_vm1, %v3314_v31  ;;  %v2728_v41 = vcombine.high %v2720_v29, %v2720_v29  ;;  %v2736_v42 = vrot.slane %v2720_v29, %v14560_v20  ;;  %v15176_v43 = vpack.c.bf16 %v4179_v21, %v4179_v21 }
 0x1ef   : > { %3349 = vst.msk [vmem:[#allocation4 + $0x71] sm:$0x1] %vm768_vm1, %v3316_v32  ;;  %3346 = vst.msk [vmem:[#allocation4 + $0x59] sm:$0x1] %vm768_vm1, %v3317_v33  ;;  %v2729_v45 = vcombine.high %v2727_v35, %v2727_v35  ;;  %v2743_v46 = vrot.slane %v2727_v35, %v14560_v20  ;;  %v3152_v48 = vrot.slane %v3138_v36, %v14560_v20  ;;  %12609 = vmatmul.mubr.msk.bf16.vlgmr.msra.gmra.mxu1 %vm4575_vm3, %v14885_v61  ;;  %v15226_v22 = vpop.f32.mrf.mxu0  ;;  %v4176_v36 = vld [vmem:[#allocation3 + $0x8] sm:$0xff] }
 0x1f0   : > { %v3153_v49 = vcombine.high %v3145_v37, %v3145_v37  ;;  %3350 = vst.msk [vmem:[#allocation4 + $0x79] sm:$0x1] %vm768_vm1, %v3318_v40  ;;  %v2750_v51 = vrot.slane %v2728_v41, %v14560_v20  ;;  %v2758_v52 = vcombine.high %v2736_v42, %v2736_v42  ;;  %2786 = vst.msk [vmem:[#allocation3 + $0x46] sm:$0x1] %vm768_vm1, %v2736_v42  ;;  %v4764_v53 = vsel %vm4575_vm3, %v15176_v43, 0 }
 0x1f1   : > { %v3161_v39 = vrot.slane %v3145_v37, %v14560_v20  ;;  %v2757_v54 = vrot.slane %v2729_v45, %v14560_v20  ;;  %v2759_v55 = vcombine.high %v2743_v46, %v2743_v46  ;;  %2790 = vst.msk [vmem:[#allocation3 + $0x66] sm:$0x1] %vm768_vm1, %v2743_v46  ;;  %v3154_v57 = vcombine.high %v3152_v48, %v3152_v48 }
 0x1f2   : > { %v3168_v58 = vrot.slane %v3152_v48, %v14560_v20  ;;  %12631 = vmatpush3.bf16.xpose.msra.mxu0 %v4764_v53  ;;  %v2760_v59 = vcombine.high %v2750_v51, %v2750_v51  ;;  %2787 = vst.msk [vmem:[#allocation3 + $0x4e] sm:$0x1] %vm768_vm1, %v2750_v51  ;;  %2788 = vst.msk [vmem:[#allocation3 + $0x56] sm:$0x1] %vm768_vm1, %v2758_v52  ;;  %v3175_v62 = vrot.slane %v3153_v49, %v14560_v20  ;;  %v4181_v49 = vld [vmem:[#allocation3 + $0x30] sm:$0xff] }
 0x1f3   : > { %v3183_v63 = vcombine.high %v3161_v39, %v3161_v39  ;;  %3211 = vst.msk [vmem:[#allocation4 + $0x40] sm:$0x1] %vm768_vm1, %v3161_v39  ;;  %v15196_v0 = vpack.c.bf16 %v4151_v50, %v4151_v50  ;;  %v2761_v56 = vcombine.high %v2757_v54, %v2757_v54  ;;  %2791 = vst.msk [vmem:[#allocation3 + $0x6e] sm:$0x1] %vm768_vm1, %v2757_v54  ;;  %12642 = vmatprep.subr.bf16.mxu0 %v18001_v14 }
 0x1f4   : > { %2792 = vst.msk [vmem:[#allocation3 + $0x76] sm:$0x1] %vm768_vm1, %v2759_v55  ;;  %v3182_v3 = vrot.slane %v3154_v57, %v14560_v20  ;;  %v3184_v4 = vcombine.high %v3168_v58, %v3168_v58  ;;  %3215 = vst.msk [vmem:[#allocation4 + $0x60] sm:$0x1] %vm768_vm1, %v3168_v58  ;;  %v3485_v6 = vcombine.high %v15150_v23, %v15150_v23  ;;  %12614 = vmatprep.mubr.msk.bf16.mxu1 %vm14206_vm2, %v18001_v14  ;;  %v4152_v58 = vld [vmem:[#allocation2 + $0x48] sm:$0xff] }
 0x1f5   : > { %2789 = vst.msk [vmem:[#allocation3 + $0x5e] sm:$0x1] %vm768_vm1, %v2760_v59  ;;  %v3185_v61 = vcombine.high %v3175_v62, %v3175_v62  ;;  %3212 = vst.msk [vmem:[#allocation4 + $0x48] sm:$0x1] %vm768_vm1, %v3175_v62  ;;  %4271 = vrot.lane.b32.xlu0 %v15196_v0, %s14205_s13  ;;  %v3492_v7 = vrot.slane %v15150_v23, %v14560_v20  ;;  %v3353_v8 = vcombine.high %v3040_v44, %v3040_v44 }
 0x1f6   : > { %3213 = vst.msk [vmem:[#allocation4 + $0x50] sm:$0x1] %vm768_vm1, %v3183_v63  ;;  %v3360_v9 = vrot.slane %v3040_v44, %v14560_v20  ;;  %2793 = vst.msk [vmem:[#allocation3 + $0x7e] sm:$0x1] %vm768_vm1, %v2761_v56  ;;  %v3186_v11 = vcombine.high %v3182_v3, %v3182_v3  ;;  %v3499_v12 = vrot.slane %v3485_v6, %v14560_v20  ;;  %v12600_v44 = vpop.f32.mrf.mxu0 }
 0x1f7   : > { %3216 = vst.msk [vmem:[#allocation4 + $0x68] sm:$0x1] %vm768_vm1, %v3182_v3  ;;  %3217 = vst.msk [vmem:[#allocation4 + $0x70] sm:$0x1] %vm768_vm1, %v3184_v4  ;;  %v15219_v13 = vpack.c.bf16 %v4150_v1, %v4150_v1  ;;  %v3534_v15 = vcombine.high %v12597_v2, %v12597_v2  ;;  %v3500_v10 = vcombine.high %v3492_v7, %v3492_v7 }
 0x1f8   : > { %3214 = vst.msk [vmem:[#allocation4 + $0x58] sm:$0x1] %vm768_vm1, %v3185_v61  ;;  %v3508_v16 = vrot.slane %v3492_v7, %v14560_v20  ;;  %v3367_v18 = vrot.slane %v3353_v8, %v14560_v20  ;;  %v3368_v19 = vcombine.high %v3360_v9, %v3360_v9  ;;  %3218 = vst.msk [vmem:[#allocation4 + $0x78] sm:$0x1] %vm768_vm1, %v3186_v11 }
 0x1f9   : > { %v3501_v23 = vcombine.high %v3499_v12, %v3499_v12  ;;  %v3515_v24 = vrot.slane %v3499_v12, %v14560_v20  ;;  %v3376_v25 = vrot.slane %v3360_v9, %v14560_v20  ;;  %4269 = vrot.lane.b32.xlu1 %v15219_v13, %s14205_s13  ;;  %v3541_v26 = vrot.slane %v12597_v2, %v14560_v20  ;;  %v3056_v2 = vpop.f32.mrf.mxu0 }
 0x1fa   : > { %v3522_v27 = vrot.slane %v3500_v10, %v14560_v20  ;;  %v3530_v21 = vcombine.high %v3508_v16, %v3508_v16  ;;  %3599 = vst.msk [vmem:[#allocation4 + $0x3] sm:$0x1] %vm768_vm1, %v3508_v16  ;;  %v3369_v30 = vcombine.high %v3367_v18, %v3367_v18  ;;  %v3383_v31 = vrot.slane %v3367_v18, %v14560_v20 }
 0x1fb   : > { %4299 = vrot.lane.b32.xlu0 %v15099_v38, %s14204_s11  ;;  %v3529_v32 = vrot.slane %v3501_v23, %v14560_v20  ;;  %v3531_v29 = vcombine.high %v3515_v24, %v3515_v24  ;;  %3603 = vst.msk [vmem:[#allocation4 + $0x23] sm:$0x1] %vm768_vm1, %v3515_v24  ;;  %v3390_v33 = vrot.slane %v3368_v19, %v14560_v20  ;;  %3467 = vst.msk [vmem:[#allocation4 + $0x2] sm:$0x1] %vm768_vm1, %v3376_v25  ;;  %v12601_v23 = vpop.f32.mrf.mxu0 }
 0x1fc   : > { %v3398_v35 = vcombine.high %v3376_v25, %v3376_v25  ;;  %12633 = vmatmul.mubr.msk.bf16.vlgmr.msra.gmra.mxu0 %vm4575_vm3, %v15020_v34  ;;  %v3532_v37 = vcombine.high %v3522_v27, %v3522_v27  ;;  %3600 = vst.msk [vmem:[#allocation4 + $0xb] sm:$0x1] %vm768_vm1, %v3522_v27  ;;  %3601 = vst.msk [vmem:[#allocation4 + $0x13] sm:$0x1] %vm768_vm1, %v3530_v21  ;;  %v3397_v40 = vrot.slane %v3369_v30, %v14560_v20 }
 0x1fd   : > { %v3399_v41 = vcombine.high %v3383_v31, %v3383_v31  ;;  %3471 = vst.msk [vmem:[#allocation4 + $0x22] sm:$0x1] %vm768_vm1, %v3383_v31  ;;  %v3548_v42 = vrot.slane %v3534_v15, %v14560_v20  ;;  %12644 = vmatprep.mubr.msk.bf16.mxu0 %vm14206_vm2, %v18001_v14  ;;  %v3533_v45 = vcombine.high %v3529_v32, %v3529_v32  ;;  %3604 = vst.msk [vmem:[#allocation4 + $0x2b] sm:$0x1] %vm768_vm1, %v3529_v32 }
 0x1fe   : > { %3605 = vst.msk [vmem:[#allocation4 + $0x33] sm:$0x1] %vm768_vm1, %v3531_v29  ;;  %v3400_v34 = vcombine.high %v3390_v33, %v3390_v33  ;;  %3468 = vst.msk [vmem:[#allocation4 + $0xa] sm:$0x1] %vm768_vm1, %v3390_v33  ;;  %v3549_v46 = vcombine.high %v3541_v26, %v3541_v26  ;;  %v3557_v48 = vrot.slane %v3541_v26, %v14560_v20 }
 0x1ff   : > { %3469 = vst.msk [vmem:[#allocation4 + $0x12] sm:$0x1] %vm768_vm1, %v3398_v35  ;;  %3602 = vst.msk [vmem:[#allocation4 + $0x1b] sm:$0x1] %vm768_vm1, %v3532_v37  ;;  %v3401_v50 = vcombine.high %v3397_v40, %v3397_v40  ;;  %v3550_v51 = vcombine.high %v3548_v42, %v3548_v42  ;;  %v3564_v52 = vrot.slane %v3548_v42, %v14560_v20  ;;  %4303 = vrot.lane.b32.xlu0 %v15196_v0, %s14204_s11 }
 0x200   : > { %3472 = vst.msk [vmem:[#allocation4 + $0x2a] sm:$0x1] %vm768_vm1, %v3397_v40  ;;  %3473 = vst.msk [vmem:[#allocation4 + $0x32] sm:$0x1] %vm768_vm1, %v3399_v41  ;;  %v15261_v39 = vpack.c.bf16 %v4176_v36, %v4176_v36  ;;  %v3571_v53 = vrot.slane %v3549_v46, %v14560_v20  ;;  %v3579_v54 = vcombine.high %v3557_v48, %v3557_v48 }
 0x201   : > { %3606 = vst.msk [vmem:[#allocation4 + $0x3b] sm:$0x1] %vm768_vm1, %v3533_v45  ;;  %3470 = vst.msk [vmem:[#allocation4 + $0x1a] sm:$0x1] %vm768_vm1, %v3400_v34  ;;  %v3402_v55 = vcombine.high %v15226_v22, %v15226_v22  ;;  %v3409_v57 = vrot.slane %v15226_v22, %v14560_v20  ;;  %v3578_v59 = vrot.slane %v3550_v51, %v14560_v20  ;;  %v3059_v45 = vpop.f32.mrf.mxu0 }
 0x202   : > { %3607 = vst.msk [vmem:[#allocation4 + $0x43] sm:$0x1] %vm768_vm1, %v3557_v48  ;;  %3474 = vst.msk [vmem:[#allocation4 + $0x3a] sm:$0x1] %vm768_vm1, %v3401_v50  ;;  %v3580_v62 = vcombine.high %v3564_v52, %v3564_v52  ;;  %v4626_v63 = vsel %vm4575_vm3, %v15261_v39, 0  ;;  %v15278_v1 = vpack.c.bf16 %v4181_v49, %v4181_v49  ;;  %v3581_v56 = vcombine.high %v3571_v53, %v3571_v53 }
 0x203   : > { %3611 = vst.msk [vmem:[#allocation4 + $0x63] sm:$0x1] %vm768_vm1, %v3564_v52  ;;  %3608 = vst.msk [vmem:[#allocation4 + $0x4b] sm:$0x1] %vm768_vm1, %v3571_v53  ;;  %12613 = vmatpush3.bf16.xpose.msra.mxu1 %v4626_v63  ;;  %v3416_v3 = vrot.slane %v3402_v55, %v14560_v20  ;;  %v3417_v4 = vcombine.high %v3409_v57, %v3409_v57  ;;  %v3425_v6 = vrot.slane %v3409_v57, %v14560_v20  ;;  %v4183_v63 = vld [vmem:[#allocation3 + $0x40] sm:$0xff] }
 0x204   : > { %3609 = vst.msk [vmem:[#allocation4 + $0x53] sm:$0x1] %vm768_vm1, %v3579_v54  ;;  %v3582_v61 = vcombine.high %v3578_v59, %v3578_v59  ;;  %3612 = vst.msk [vmem:[#allocation4 + $0x6b] sm:$0x1] %vm768_vm1, %v3578_v59  ;;  %v4856_v7 = vsel %vm4575_vm3, %v15278_v1, 0  ;;  %v15288_v8 = vpack.c.bf16 %v4152_v58, %v4152_v58  ;;  %v3749_v9 = vcombine.high %v12600_v44, %v12600_v44 }
 0x205   : > { %3613 = vst.msk [vmem:[#allocation4 + $0x73] sm:$0x1] %vm768_vm1, %v3580_v62  ;;  %12618 = vmatprep.subr.bf16.mxu1 %v18001_v14  ;;  %4331 = vrot.lane.b32.xlu0 %v15099_v38, %s14207_s9  ;;  %3610 = vst.msk [vmem:[#allocation4 + $0x5b] sm:$0x1] %vm768_vm1, %v3581_v56  ;;  %v3418_v11 = vcombine.high %v3416_v3, %v3416_v3  ;;  %v3432_v12 = vrot.slane %v3416_v3, %v14560_v20 }
 0x206   : > { %v3439_v15 = vrot.slane %v3417_v4, %v14560_v20  ;;  %v3447_v10 = vcombine.high %v3425_v6, %v3425_v6  ;;  %3475 = vst.msk [vmem:[#allocation4 + $0x42] sm:$0x1] %vm768_vm1, %v3425_v6  ;;  %12643 = vmatpush3.bf16.xpose.msra.mxu0 %v4856_v7  ;;  %3614 = vst.msk [vmem:[#allocation4 + $0x7b] sm:$0x1] %vm768_vm1, %v3582_v61  ;;  %4273 = vrot.lane.b32.xlu1 %v15288_v8, %s14205_s13 }
 0x207   : > { %v3756_v16 = vrot.slane %v12600_v44, %v14560_v20  ;;  %v3763_v18 = vrot.slane %v3749_v9, %v14560_v20  ;;  %v3617_v19 = vcombine.high %v3056_v2, %v3056_v2  ;;  %v3624_v22 = vrot.slane %v3056_v2, %v14560_v20  ;;  %3479 = vst.msk [vmem:[#allocation4 + $0x62] sm:$0x1] %vm768_vm1, %v3432_v12  ;;  %v4177_v44 = vld [vmem:[#allocation3 + $0x10] sm:$0xff]  ;;  %v12604_v2 = vpop.f32.mrf.mxu0 }
 0x208   : > { %v3446_v24 = vrot.slane %v3418_v11, %v14560_v20  ;;  %v3448_v25 = vcombine.high %v3432_v12, %v3432_v12  ;;  %v3449_v26 = vcombine.high %v3439_v15, %v3439_v15  ;;  %3476 = vst.msk [vmem:[#allocation4 + $0x4a] sm:$0x1] %vm768_vm1, %v3439_v15  ;;  %3477 = vst.msk [vmem:[#allocation4 + $0x52] sm:$0x1] %vm768_vm1, %v3447_v10  ;;  %12654 = vmatprep.subr.bf16.mxu0 %v18001_v14 }
 0x209   : > { %v3798_v27 = vcombine.high %v12601_v23, %v12601_v23  ;;  %v3764_v21 = vcombine.high %v3756_v16, %v3756_v16  ;;  %v3765_v30 = vcombine.high %v3763_v18, %v3763_v18  ;;  %v3772_v31 = vrot.slane %v3756_v16, %v14560_v20  ;;  %4335 = vrot.lane.b32.xlu0 %v15196_v0, %s14207_s9 }
 0x20a   : > { %v3779_v32 = vrot.slane %v3763_v18, %v14560_v20  ;;  %v3450_v29 = vcombine.high %v3446_v24, %v3446_v24  ;;  %3478 = vst.msk [vmem:[#allocation4 + $0x5a] sm:$0x1] %vm768_vm1, %v3449_v26  ;;  %3480 = vst.msk [vmem:[#allocation4 + $0x6a] sm:$0x1] %vm768_vm1, %v3446_v24  ;;  %v3631_v33 = vrot.slane %v3617_v19, %v14560_v20  ;;  %12615 = vmatmul.mubr.msk.bf16.vlgmr.msra.gmra.mxu1 %vm4575_vm3, %v14935_v28  ;;  %v3072_v24 = vpop.f32.mrf.mxu0 }
 0x20b   : > { %3481 = vst.msk [vmem:[#allocation4 + $0x72] sm:$0x1] %vm768_vm1, %v3448_v25  ;;  %v3632_v35 = vcombine.high %v3624_v22, %v3624_v22  ;;  %v3640_v36 = vrot.slane %v3624_v22, %v14560_v20  ;;  %v3786_v37 = vrot.slane %v3764_v21, %v14560_v20  ;;  %v3793_v40 = vrot.slane %v3765_v30, %v14560_v20 }
 0x20c   : > { %v3794_v41 = vcombine.high %v3772_v31, %v3772_v31  ;;  %v3795_v42 = vcombine.high %v3779_v32, %v3779_v32  ;;  %3863 = vst.msk [vmem:[#allocation4 + $0x5] sm:$0x1] %vm768_vm1, %v3772_v31  ;;  %3867 = vst.msk [vmem:[#allocation4 + $0x25] sm:$0x1] %vm768_vm1, %v3779_v32  ;;  %v3633_v34 = vcombine.high %v3631_v33, %v3631_v33  ;;  %4301 = vrot.lane.b32.xlu1 %v15219_v13, %s14204_s11 }
 0x20d   : > { %3482 = vst.msk [vmem:[#allocation4 + $0x7a] sm:$0x1] %vm768_vm1, %v3450_v29  ;;  %v3647_v46 = vrot.slane %v3631_v33, %v14560_v20  ;;  %v3654_v48 = vrot.slane %v3632_v35, %v14560_v20  ;;  %v3662_v49 = vcombine.high %v3640_v36, %v3640_v36  ;;  %3731 = vst.msk [vmem:[#allocation4 + $0x4] sm:$0x1] %vm768_vm1, %v3640_v36  ;;  %12645 = vmatmul.mubr.msk.bf16.vlgmr.msra.gmra.mxu0 %vm4575_vm3, %v15099_v38  ;;  %v4153_v33 = vld [vmem:[#allocation2 + $0x50] sm:$0xff] }
 0x20e   : > { %v3796_v50 = vcombine.high %v3786_v37, %v3786_v37  ;;  %v3797_v51 = vcombine.high %v3793_v40, %v3793_v40  ;;  %3864 = vst.msk [vmem:[#allocation4 + $0xd] sm:$0x1] %vm768_vm1, %v3786_v37  ;;  %3865 = vst.msk [vmem:[#allocation4 + $0x15] sm:$0x1] %vm768_vm1, %v3794_v41  ;;  %v3805_v28 = vrot.slane %v12601_v23, %v14560_v20  ;;  %12620 = vmatprep.mubr.msk.bf16.mxu1 %vm14206_vm2, %v18001_v14 }
 0x20f   : > { %3868 = vst.msk [vmem:[#allocation4 + $0x2d] sm:$0x1] %vm768_vm1, %v3793_v40  ;;  %3869 = vst.msk [vmem:[#allocation4 + $0x35] sm:$0x1] %vm768_vm1, %v3795_v42  ;;  %v3812_v52 = vrot.slane %v3798_v27, %v14560_v20  ;;  %v3661_v53 = vrot.slane %v3633_v34, %v14560_v20  ;;  %v3663_v54 = vcombine.high %v3647_v46, %v3647_v46  ;;  %12656 = vmatprep.mubr.msk.bf16.mxu0 %vm14206_vm2, %v18001_v14  ;;  %v12605_v34 = vpop.f32.mrf.mxu0 }
 0x210   : > { %v3664_v55 = vcombine.high %v3654_v48, %v3654_v48  ;;  %3732 = vst.msk [vmem:[#allocation4 + $0xc] sm:$0x1] %vm768_vm1, %v3654_v48  ;;  %3733 = vst.msk [vmem:[#allocation4 + $0x14] sm:$0x1] %vm768_vm1, %v3662_v49  ;;  %v15341_v57 = vpack.c.bf16 %v4177_v44, %v4177_v44  ;;  %v3813_v38 = vcombine.high %v3805_v28, %v3805_v28  ;;  %4305 = vrot.lane.b32.xlu1 %v15288_v8, %s14204_s11 }
 0x211   : > { %3735 = vst.msk [vmem:[#allocation4 + $0x24] sm:$0x1] %vm768_vm1, %v3647_v46  ;;  %3866 = vst.msk [vmem:[#allocation4 + $0x1d] sm:$0x1] %vm768_vm1, %v3796_v50  ;;  %v3814_v58 = vcombine.high %v3812_v52, %v3812_v52  ;;  %v3821_v59 = vrot.slane %v3805_v28, %v14560_v20  ;;  %v3828_v62 = vrot.slane %v3812_v52, %v14560_v20 }
 0x212   : > { %3870 = vst.msk [vmem:[#allocation4 + $0x3d] sm:$0x1] %vm768_vm1, %v3797_v51  ;;  %v3665_v56 = vcombine.high %v3661_v53, %v3661_v53  ;;  %3734 = vst.msk [vmem:[#allocation4 + $0x1c] sm:$0x1] %vm768_vm1, %v3664_v55  ;;  %v4672_v3 = vsel %vm4575_vm3, %v15341_v57, 0  ;;  %v3666_v4 = vcombine.high %v3059_v45, %v3059_v45  ;;  %v3673_v6 = vrot.slane %v3059_v45, %v14560_v20  ;;  %v4178_v51 = vld [vmem:[#allocation3 + $0x18] sm:$0xff] }
 0x213   : > { %3736 = vst.msk [vmem:[#allocation4 + $0x2c] sm:$0x1] %vm768_vm1, %v3661_v53  ;;  %3737 = vst.msk [vmem:[#allocation4 + $0x34] sm:$0x1] %vm768_vm1, %v3663_v54  ;;  %v3835_v61 = vrot.slane %v3813_v38, %v14560_v20  ;;  %v3842_v7 = vrot.slane %v3814_v58, %v14560_v20  ;;  %v3843_v9 = vcombine.high %v3821_v59, %v3821_v59  ;;  %12619 = vmatpush3.bf16.xpose.msra.mxu1 %v4672_v3 }
 0x214   : > { %v3844_v11 = vcombine.high %v3828_v62, %v3828_v62  ;;  %3871 = vst.msk [vmem:[#allocation4 + $0x45] sm:$0x1] %vm768_vm1, %v3821_v59  ;;  %3875 = vst.msk [vmem:[#allocation4 + $0x65] sm:$0x1] %vm768_vm1, %v3828_v62  ;;  %v3680_v12 = vrot.slane %v3666_v4, %v14560_v20  ;;  %v3681_v15 = vcombine.high %v3673_v6, %v3673_v6  ;;  %12624 = vmatprep.subr.bf16.mxu1 %v18001_v14 }
 0x215   : > { %3738 = vst.msk [vmem:[#allocation4 + $0x3c] sm:$0x1] %vm768_vm1, %v3665_v56  ;;  %v3689_v10 = vrot.slane %v3673_v6, %v14560_v20  ;;  %v15366_v16 = vpack.c.bf16 %v4183_v63, %v4183_v63  ;;  %v3845_v18 = vcombine.high %v3835_v61, %v3835_v61  ;;  %v3846_v19 = vcombine.high %v3842_v7, %v3842_v7  ;;  %v3075_v56 = vpop.f32.mrf.mxu0 }
 0x216   : > { %3872 = vst.msk [vmem:[#allocation4 + $0x4d] sm:$0x1] %vm768_vm1, %v3835_v61  ;;  %3873 = vst.msk [vmem:[#allocation4 + $0x55] sm:$0x1] %vm768_vm1, %v3843_v9  ;;  %v4013_v22 = vcombine.high %v12604_v2, %v12604_v2  ;;  %v4020_v23 = vrot.slane %v12604_v2, %v14560_v20  ;;  %v3682_v25 = vcombine.high %v3680_v12, %v3680_v12  ;;  %4333 = vrot.lane.b32.xlu1 %v15219_v13, %s14207_s9 }
 0x217   : > { %3876 = vst.msk [vmem:[#allocation4 + $0x6d] sm:$0x1] %vm768_vm1, %v3842_v7  ;;  %3877 = vst.msk [vmem:[#allocation4 + $0x75] sm:$0x1] %vm768_vm1, %v3844_v11  ;;  %v3696_v26 = vrot.slane %v3680_v12, %v14560_v20  ;;  %v3703_v27 = vrot.slane %v3681_v15, %v14560_v20  ;;  %v3711_v21 = vcombine.high %v3689_v10, %v3689_v10  ;;  %v4948_v30 = vsel %vm4575_vm3, %v15366_v16, 0  ;;  %v4185_v15 = vld [vmem:[#allocation3 + $0x50] sm:$0xff] }
 0x218   : > { %3739 = vst.msk [vmem:[#allocation4 + $0x44] sm:$0x1] %vm768_vm1, %v3689_v10  ;;  %3874 = vst.msk [vmem:[#allocation4 + $0x5d] sm:$0x1] %vm768_vm1, %v3845_v18  ;;  %v4027_v31 = vrot.slane %v4013_v22, %v14560_v20  ;;  %v4028_v32 = vcombine.high %v4020_v23, %v4020_v23  ;;  %v4036_v29 = vrot.slane %v4020_v23, %v14560_v20  ;;  %12655 = vmatpush3.bf16.xpose.msra.mxu0 %v4948_v30  ;;  %v4155_v10 = vld [vmem:[#allocation2 + $0x60] sm:$0xff] }
 0x219   : > { %3878 = vst.msk [vmem:[#allocation4 + $0x7d] sm:$0x1] %vm768_vm1, %v3846_v19  ;;  %v3710_v35 = vrot.slane %v3682_v25, %v14560_v20  ;;  %v3712_v36 = vcombine.high %v3696_v26, %v3696_v26  ;;  %v3713_v37 = vcombine.high %v3703_v27, %v3703_v27  ;;  %3740 = vst.msk [vmem:[#allocation4 + $0x4c] sm:$0x1] %vm768_vm1, %v3703_v27  ;;  %12666 = vmatprep.subr.bf16.mxu0 %v18001_v14  ;;  %v4180_v25 = vld [vmem:[#allocation3 + $0x28] sm:$0xff] }
 0x21a   : > { %3741 = vst.msk [vmem:[#allocation4 + $0x54] sm:$0x1] %vm768_vm1, %v3711_v21  ;;  %3743 = vst.msk [vmem:[#allocation4 + $0x64] sm:$0x1] %vm768_vm1, %v3696_v26  ;;  %v3881_v40 = vcombine.high %v3072_v24, %v3072_v24  ;;  %v4029_v41 = vcombine.high %v4027_v31, %v4027_v31  ;;  %v4043_v42 = vrot.slane %v4027_v31, %v14560_v20  ;;  %12621 = vmatmul.mubr.msk.bf16.vlgmr.msra.gmra.mxu1 %vm4575_vm3, %v14976_v60 }
 0x21b   : > { %v4050_v44 = vrot.slane %v4028_v32, %v14560_v20  ;;  %v4058_v45 = vcombine.high %v4036_v29, %v4036_v29  ;;  %4127 = vst.msk [vmem:[#allocation4 + $0x7] sm:$0x1] %vm768_vm1, %v4036_v29  ;;  %v3714_v46 = vcombine.high %v3710_v35, %v3710_v35  ;;  %3742 = vst.msk [vmem:[#allocation4 + $0x5c] sm:$0x1] %vm768_vm1, %v3713_v37  ;;  %4337 = vrot.lane.b32.xlu1 %v15288_v8, %s14207_s9 }
 0x21c   : > { %3744 = vst.msk [vmem:[#allocation4 + $0x6c] sm:$0x1] %vm768_vm1, %v3710_v35  ;;  %3745 = vst.msk [vmem:[#allocation4 + $0x74] sm:$0x1] %vm768_vm1, %v3712_v36  ;;  %v3888_v48 = vrot.slane %v3072_v24, %v14560_v20  ;;  %v3895_v49 = vrot.slane %v3881_v40, %v14560_v20  ;;  %v15400_v50 = vpack.c.bf16 %v4153_v33, %v4153_v33  ;;  %12626 = vmatprep.mubr.msk.bf16.mxu1 %vm14206_vm2, %v18001_v14  ;;  %v4154_v24 = vld [vmem:[#allocation2 + $0x58] sm:$0xff] }
 0x21d   : > { %v4057_v28 = vrot.slane %v4029_v41, %v14560_v20  ;;  %v4059_v52 = vcombine.high %v4043_v42, %v4043_v42  ;;  %v4060_v53 = vcombine.high %v4050_v44, %v4050_v44  ;;  %4128 = vst.msk [vmem:[#allocation4 + $0xf] sm:$0x1] %vm768_vm1, %v4050_v44  ;;  %4129 = vst.msk [vmem:[#allocation4 + $0x17] sm:$0x1] %vm768_vm1, %v4058_v45  ;;  %v4187_v45 = vld [vmem:[#allocation3 + $0x60] sm:$0xff] }
 0x21e   : > { %4131 = vst.msk [vmem:[#allocation4 + $0x27] sm:$0x1] %vm768_vm1, %v4043_v42  ;;  %v4062_v54 = vcombine.high %v12605_v34, %v12605_v34  ;;  %3746 = vst.msk [vmem:[#allocation4 + $0x7c] sm:$0x1] %vm768_vm1, %v3714_v46  ;;  %v3896_v60 = vcombine.high %v3888_v48, %v3888_v48  ;;  %v3897_v55 = vcombine.high %v3895_v49, %v3895_v49  ;;  %4275 = vrot.lane.b32.xlu0 %v15400_v50, %s14205_s13 }
 0x21f   : > { %v3904_v38 = vrot.slane %v3888_v48, %v14560_v20  ;;  %v3911_v58 = vrot.slane %v3895_v49, %v14560_v20  ;;  %v4061_v59 = vcombine.high %v4057_v28, %v4057_v28  ;;  %4130 = vst.msk [vmem:[#allocation4 + $0x1f] sm:$0x1] %vm768_vm1, %v4060_v53  ;;  %4132 = vst.msk [vmem:[#allocation4 + $0x2f] sm:$0x1] %vm768_vm1, %v4057_v28  ;;  %12657 = vmatmul.mubr.msk.bf16.vlgmr.msra.gmra.mxu0 %vm4575_vm3, %v15196_v0 }
 0x220   : > { %4133 = vst.msk [vmem:[#allocation4 + $0x37] sm:$0x1] %vm768_vm1, %v4059_v52  ;;  %v4069_v62 = vrot.slane %v12605_v34, %v14560_v20  ;;  %v4076_v63 = vrot.slane %v4062_v54, %v14560_v20  ;;  %v15418_v2 = vpack.c.bf16 %v4178_v51, %v4178_v51  ;;  %v3918_v3 = vrot.slane %v3896_v60, %v14560_v20  ;;  %v4156_v34 = vld [vmem:[#allocation2 + $0x68] sm:$0xff]  ;;  %v4182_v60 = vld [vmem:[#allocation3 + $0x38] sm:$0xff] }
 0x221   : > { %v3925_v4 = vrot.slane %v3897_v55, %v14560_v20  ;;  %v3926_v6 = vcombine.high %v3904_v38, %v3904_v38  ;;  %v3927_v61 = vcombine.high %v3911_v58, %v3911_v58  ;;  %3995 = vst.msk [vmem:[#allocation4 + $0x6] sm:$0x1] %vm768_vm1, %v3904_v38  ;;  %3999 = vst.msk [vmem:[#allocation4 + $0x26] sm:$0x1] %vm768_vm1, %v3911_v58  ;;  %12668 = vmatprep.mubr.msk.bf16.mxu0 %vm14206_vm2, %v18001_v14  ;;  %v4189_v58 = vld [vmem:[#allocation3 + $0x70] sm:$0xff] }
 0x222   : > { %4134 = vst.msk [vmem:[#allocation4 + $0x3f] sm:$0x1] %vm768_vm1, %v4061_v59  ;;  %v4077_v7 = vcombine.high %v4069_v62, %v4069_v62  ;;  %v4078_v9 = vcombine.high %v4076_v63, %v4076_v63  ;;  %v4085_v11 = vrot.slane %v4069_v62, %v14560_v20  ;;  %v4092_v12 = vrot.slane %v4076_v63, %v14560_v20  ;;  %v4184_v63 = vld [vmem:[#allocation3 + $0x48] sm:$0xff] }
 0x223   : > { %v3928_v18 = vcombine.high %v3918_v3, %v3918_v3  ;;  %v3929_v19 = vcombine.high %v3925_v4, %v3925_v4  ;;  %3996 = vst.msk [vmem:[#allocation4 + $0xe] sm:$0x1] %vm768_vm1, %v3918_v3  ;;  %3997 = vst.msk [vmem:[#allocation4 + $0x16] sm:$0x1] %vm768_vm1, %v3926_v6  ;;  %v4718_v22 = vsel %vm4575_vm3, %v15418_v2, 0  ;;  %v3930_v23 = vcombine.high %v3075_v56, %v3075_v56  ;;  %v4157_v3 = vld [vmem:[#allocation2 + $0x70] sm:$0xff] }
 0x224   : > { %4000 = vst.msk [vmem:[#allocation4 + $0x2e] sm:$0x1] %vm768_vm1, %v3925_v4  ;;  %4001 = vst.msk [vmem:[#allocation4 + $0x36] sm:$0x1] %vm768_vm1, %v3927_v61  ;;  %v4099_v0 = vrot.slane %v4077_v7, %v14560_v20  ;;  %v4106_v26 = vrot.slane %v4078_v9, %v14560_v20  ;;  %v4107_v27 = vcombine.high %v4085_v11, %v4085_v11  ;;  %12625 = vmatpush3.bf16.xpose.msra.mxu1 %v4718_v22  ;;  %v4158_v6 = vld [vmem:[#allocation2 + $0x78] sm:$0xff] }
 0x225   : > { %v4108_v21 = vcombine.high %v4092_v12, %v4092_v12  ;;  %4135 = vst.msk [vmem:[#allocation4 + $0x47] sm:$0x1] %vm768_vm1, %v4085_v11  ;;  %4139 = vst.msk [vmem:[#allocation4 + $0x67] sm:$0x1] %vm768_vm1, %v4092_v12  ;;  %v3937_v30 = vrot.slane %v3075_v56, %v14560_v20  ;;  %v3944_v31 = vrot.slane %v3930_v23, %v14560_v20  ;;  %12636 = vmatprep.subr.bf16.mxu1 %v18001_v14  ;;  %v4186_v61 = vld [vmem:[#allocation3 + $0x58] sm:$0xff]  ;;  %v15545_v7 = vpop.permute.xlu1 %4255  ;;  %v15550_v11 = vpop.permute.xlu0 %4287 }
 0x226   : > { %3998 = vst.msk [vmem:[#allocation4 + $0x1e] sm:$0x1] %vm768_vm1, %v3928_v18  ;;  %4002 = vst.msk [vmem:[#allocation4 + $0x3e] sm:$0x1] %vm768_vm1, %v3929_v19  ;;  %v15447_v32 = vpack.c.bf16 %v4185_v15, %v4185_v15  ;;  %v15449_v29 = vpack.c.bf16 %v4155_v10, %v4155_v10  ;;  %v4109_v33 = vcombine.high %v4099_v0, %v4099_v0  ;;  %v4188_v10 = vld [vmem:[#allocation3 + $0x68] sm:$0xff] }
 0x227   : > { %v4110_v35 = vcombine.high %v4106_v26, %v4106_v26  ;;  %4136 = vst.msk [vmem:[#allocation4 + $0x4f] sm:$0x1] %vm768_vm1, %v4099_v0  ;;  %4137 = vst.msk [vmem:[#allocation4 + $0x57] sm:$0x1] %vm768_vm1, %v4107_v27  ;;  %v15456_v36 = vpack.c.bf16 %v4154_v24, %v4154_v24  ;;  %v15458_v37 = vpack.c.bf16 %v4180_v25, %v4180_v25  ;;  %v4190_v0 = vld [vmem:[#allocation3 + $0x78] sm:$0xff] }
 0x228   : > { %4140 = vst.msk [vmem:[#allocation4 + $0x6f] sm:$0x1] %vm768_vm1, %v4106_v26  ;;  %4141 = vst.msk [vmem:[#allocation4 + $0x77] sm:$0x1] %vm768_vm1, %v4108_v21  ;;  %v3945_v40 = vcombine.high %v3937_v30, %v3937_v30  ;;  %v3946_v41 = vcombine.high %v3944_v31, %v3944_v31  ;;  %v3953_v42 = vrot.slane %v3937_v30, %v14560_v20  ;;  %4279 = vrot.lane.b32.xlu0 %v15449_v29, %s14205_s13  ;;  %v4207_v19 = vld [vmem:[#allocation4] sm:$0xff] }
 0x229   : > { %v3960_v44 = vrot.slane %v3944_v31, %v14560_v20  ;;  %4138 = vst.msk [vmem:[#allocation4 + $0x5f] sm:$0x1] %vm768_vm1, %v4109_v33  ;;  %4142 = vst.msk [vmem:[#allocation4 + $0x7f] sm:$0x1] %vm768_vm1, %v4110_v35  ;;  %v5040_v46 = vsel %vm4575_vm3, %v15447_v32, 0  ;;  %4277 = vrot.lane.b32.xlu1 %v15456_v36, %s14205_s13  ;;  %v4810_v48 = vsel %vm4575_vm3, %v15458_v37, 0  ;;  %v15477_v53 = vpack.c.bf16 %v4187_v45, %v4187_v45  ;;  %v15567_v18 = vpop.permute.xlu0 %4319 }
 0x22a   : > { %v3967_v49 = vrot.slane %v3945_v40, %v14560_v20  ;;  %v3974_v51 = vrot.slane %v3946_v41, %v14560_v20  ;;  %v3975_v28 = vcombine.high %v3953_v42, %v3953_v42  ;;  %4003 = vst.msk [vmem:[#allocation4 + $0x46] sm:$0x1] %vm768_vm1, %v3953_v42  ;;  %12667 = vmatpush3.bf16.xpose.msra.mxu0 %v5040_v46  ;;  %v4209_v31 = vld [vmem:[#allocation4 + $0x10] sm:$0xff]  ;;  %v4211_v33 = vld [vmem:[#allocation4 + $0x20] sm:$0xff] }
 0x22b   : > { %v3976_v52 = vcombine.high %v3960_v44, %v3960_v44  ;;  %4007 = vst.msk [vmem:[#allocation4 + $0x66] sm:$0x1] %vm768_vm1, %v3960_v44  ;;  %12678 = vmatprep.subr.bf16.mxu0 %v18001_v14  ;;  %v15479_v54 = vpack.c.bf16 %v4156_v34, %v4156_v34  ;;  %12627 = vmatmul.mubr.msk.bf16.vlgmr.msra.gmra.mxu1 %vm4575_vm3, %v15040_v47  ;;  %v5132_v47 = vsel %vm4575_vm3, %v15477_v53, 0  ;;  %v4208_v34 = vld [vmem:[#allocation4 + $0x8] sm:$0xff] }
 0x22c   : > { %v3977_v55 = vcombine.high %v3967_v49, %v3967_v49  ;;  %v3978_v38 = vcombine.high %v3974_v51, %v3974_v51  ;;  %4004 = vst.msk [vmem:[#allocation4 + $0x4e] sm:$0x1] %vm768_vm1, %v3967_v49  ;;  %4005 = vst.msk [vmem:[#allocation4 + $0x56] sm:$0x1] %vm768_vm1, %v3975_v28  ;;  %4307 = vrot.lane.b32.xlu0 %v15400_v50, %s14204_s11  ;;  %12637 = vmatpush3.bf16.xpose.msra.mxu1 %v4810_v48 }
 0x22d   : > { %4008 = vst.msk [vmem:[#allocation4 + $0x6e] sm:$0x1] %vm768_vm1, %v3974_v51  ;;  %4009 = vst.msk [vmem:[#allocation4 + $0x76] sm:$0x1] %vm768_vm1, %v3976_v52  ;;  %4281 = vrot.lane.b32.xlu1 %v15479_v54, %s14205_s13  ;;  %12638 = vmatprep.mubr.msk.bf16.mxu1 %vm14206_vm2, %v18001_v14  ;;  %v15496_v20 = vpack.c.bf16 %v4182_v60, %v4182_v60  ;;  %v15511_v62 = vpack.c.bf16 %v4189_v58, %v4189_v58  ;;  %v15561_v15 = vpop.permute.xlu1 %4257 }
 0x22e   : > { %4006 = vst.msk [vmem:[#allocation4 + $0x5e] sm:$0x1] %vm768_vm1, %v3977_v55  ;;  %4010 = vst.msk [vmem:[#allocation4 + $0x7e] sm:$0x1] %vm768_vm1, %v3978_v38  ;;  %12648 = vmatprep.subr.bf16.mxu1 %v18001_v14  ;;  %v4174_v9 = vpack.c.bf16 %v4158_v6, %v4158_v6  ;;  %v15576_v23 = vpack.c.bf16 %v4207_v19, %v4207_v19  ;;  %v15593_v26 = vpack.c.bf16 %v4190_v0, %v4190_v0  ;;  %v4210_v55 = vld [vmem:[#allocation4 + $0x18] sm:$0xff] }
 0x22f   : > { %v4902_v59 = vsel %vm4575_vm3, %v15496_v20, 0  ;;  %v5224_v56 = vsel %vm4575_vm3, %v15511_v62, 0  ;;  %v15661_v48 = vpack.c.bf16 %v4208_v34, %v4208_v34  ;;  %v15713_v58 = vpack.c.bf16 %v4210_v55, %v4210_v55 }
 0x230   : > { %4311 = vrot.lane.b32.xlu0 %v15449_v29, %s14204_s11  ;;  %18120 = vst [vmem:[#allocation29_spill] sm:$0xff] %v15576_v23  ;;  %v5270_v30 = vsel %vm4575_vm3, %v15593_v26, 0 }
 0x231   : > { %12669 = vmatmul.mubr.msk.bf16.vlgmr.msra.gmra.mxu0 %vm4575_vm3, %v15400_v50  ;;  %4309 = vrot.lane.b32.xlu1 %v15456_v36, %s14204_s11  ;;  %v15574_v22 = vpop.permute.xlu1 %4289  ;;  %18123 = vst [vmem:[#allocation32_spill] sm:$0xff] %v15661_v48  ;;  %18125 = vst [vmem:[#allocation34_spill] sm:$0xff] %v15713_v58 }
 0x232   : > { %12679 = vmatpush3.bf16.xpose.msra.mxu0 %v5132_v47  ;;  %12680 = vmatprep.mubr.msk.bf16.mxu0 %vm14206_vm2, %v18001_v14 }
 0x233   : > { %12690 = vmatprep.subr.bf16.mxu0 %v18001_v14  ;;  %12639 = vmatmul.mubr.msk.bf16.vlgmr.msra.gmra.mxu1 %vm4575_vm3, %v15076_v17  ;;  %v15526_v17 = vpack.c.bf16 %v4184_v63, %v4184_v63  ;;  %v4217_v55 = vld [vmem:[#allocation4 + $0x50] sm:$0xff] }
 0x234   : > { %4339 = vrot.lane.b32.xlu0 %v15400_v50, %s14207_s9  ;;  %12649 = vmatpush3.bf16.xpose.msra.mxu1 %v4902_v59  ;;  %v4173_v50 = vpack.c.bf16 %v4157_v3, %v4157_v3  ;;  %v4212_v59 = vld [vmem:[#allocation4 + $0x28] sm:$0xff] }
 0x235   : > { %4313 = vrot.lane.b32.xlu1 %v15479_v54, %s14204_s11  ;;  %12650 = vmatprep.mubr.msk.bf16.mxu1 %vm14206_vm2, %v18001_v14  ;;  %v4994_v4 = vsel %vm4575_vm3, %v15526_v17, 0  ;;  %v15595_v27 = vpop.permute.xlu1 %4321 }
 0x236   : > { %12660 = vmatprep.subr.bf16.mxu1 %v18001_v14  ;;  %v15584_v25 = vpop.permute.xlu0 %4259 }
 0x238   : > { %4343 = vrot.lane.b32.xlu0 %v15449_v29, %s14207_s9 }
 0x239   : > { %12681 = vmatmul.mubr.msk.bf16.vlgmr.msra.gmra.mxu0 %vm4575_vm3, %v15449_v29  ;;  %4341 = vrot.lane.b32.xlu1 %v15456_v36, %s14207_s9  ;;  %v15614_v29 = vpack.c.bf16 %v4209_v31, %v4209_v31 }
 0x23a   : > { %12691 = vmatpush3.bf16.xpose.msra.mxu0 %v5224_v56  ;;  %12692 = vmatprep.mubr.msk.bf16.mxu0 %vm14206_vm2, %v18001_v14 }
 0x23b   : > { %12702 = vmatprep.subr.bf16.mxu0 %v18001_v14  ;;  %12651 = vmatmul.mubr.msk.bf16.vlgmr.msra.gmra.mxu1 %vm4575_vm3, %v15219_v13  ;;  %v15548_v13 = vpack.c.bf16 %v4186_v61, %v4186_v61  ;;  %18121 = vst [vmem:[#allocation30_spill] sm:$0xff] %v15614_v29 }
 0x23c   : > { %4283 = vrot.lane.b32.xlu0 %v4173_v50, %s14205_s13  ;;  %12661 = vmatpush3.bf16.xpose.msra.mxu1 %v4994_v4 }
 0x23d   : > { %4345 = vrot.lane.b32.xlu1 %v15479_v54, %s14207_s9  ;;  %12662 = vmatprep.mubr.msk.bf16.mxu1 %vm14206_vm2, %v18001_v14  ;;  %v5086_v12 = vsel %vm4575_vm3, %v15548_v13, 0 }
 0x23e   : > { %12672 = vmatprep.subr.bf16.mxu1 %v18001_v14 }
 0x240   : > { %4315 = vrot.lane.b32.xlu0 %v4173_v50, %s14204_s11  ;;  %v15599_v21 = vpop.permute.xlu0 %4263 }
 0x241   : > { %12693 = vmatmul.mubr.msk.bf16.vlgmr.msra.gmra.mxu0 %vm4575_vm3, %v4173_v50  ;;  %4285 = vrot.lane.b32.xlu1 %v4174_v9, %s14205_s13 }
 0x242   : > { %12704 = vmatprep.mubr.msk.bf16.mxu0 %vm14206_vm2, %v18001_v14 }
 0x243   : > { %12663 = vmatmul.mubr.msk.bf16.vlgmr.msra.gmra.mxu1 %vm4575_vm3, %v15288_v8  ;;  %v15571_v8 = vpack.c.bf16 %v4188_v10, %v4188_v10  ;;  %v4215_v10 = vld [vmem:[#allocation4 + $0x40] sm:$0xff] }
 0x244   : > { %4347 = vrot.lane.b32.xlu0 %v4173_v50, %s14207_s9  ;;  %12673 = vmatpush3.bf16.xpose.msra.mxu1 %v5086_v12  ;;  %v15777_v0 = vpack.c.bf16 %v4215_v10, %v4215_v10 }
 0x245   : > { %4317 = vrot.lane.b32.xlu1 %v4174_v9, %s14204_s11  ;;  %12674 = vmatprep.mubr.msk.bf16.mxu1 %vm14206_vm2, %v18001_v14  ;;  %v5178_v24 = vsel %vm4575_vm3, %v15571_v8, 0 }
 0x246   : > { %12684 = vmatprep.subr.bf16.mxu1 %v18001_v14  ;;  %v15618_v35 = vpop.permute.xlu0 %4291  ;;  %18131 = vst [vmem:[#allocation40_spill] sm:$0xff] %v15777_v0 }
 0x248   : > { %4367 = vrot.lane.b32.xlu0 %v15134_v5, %s14205_s13 }
 0x249   : > { %4349 = vrot.lane.b32.xlu1 %v4174_v9, %s14207_s9 }
 0x24a   : > { %v15633_v40 = vpop.permute.xlu0 %4295 }
 0x24b   : > { %12675 = vmatmul.mubr.msk.bf16.vlgmr.msra.gmra.mxu1 %vm4575_vm3, %v15456_v36  ;;  %v15622_v36 = vpack.c.bf16 %v4211_v33, %v4211_v33 }
 0x24c   : > { %4399 = vrot.lane.b32.xlu0 %v15134_v5, %s14204_s11  ;;  %12685 = vmatpush3.bf16.xpose.msra.mxu1 %v5178_v24 }
 0x24d   : > { %4479 = vrot.lane.b32.xlu1 %v15576_v23, %s14205_s13  ;;  %12686 = vmatprep.mubr.msk.bf16.mxu1 %vm14206_vm2, %v18001_v14  ;;  %18122 = vst [vmem:[#allocation31_spill] sm:$0xff] %v15622_v36 }
 0x24e   : > { %12696 = vmatprep.subr.bf16.mxu1 %v18001_v14  ;;  %v15643_v42 = vpop.permute.xlu0 %4323 }
 0x250   : > { %4431 = vrot.lane.b32.xlu0 %v15134_v5, %s14207_s9  ;;  %v15611_v5 = vpop.permute.xlu1 %4261 }
 0x251   : > { %4401 = vrot.lane.b32.xlu1 %v15261_v39, %s14204_s11 }
 0x253   : > { %12687 = vmatmul.mubr.msk.bf16.vlgmr.msra.gmra.mxu1 %vm4575_vm3, %v15479_v54  ;;  %v15653_v45 = vpop.permute.xlu0 %4327 }
 0x254   : > { %4369 = vrot.lane.b32.xlu0 %v15261_v39, %s14205_s13  ;;  %12697 = vmatpush3.bf16.xpose.msra.mxu1 %v5270_v30  ;;  %v4214_v30 = vld [vmem:[#allocation4 + $0x38] sm:$0xff] }
 0x255   : > { %4433 = vrot.lane.b32.xlu1 %v15261_v39, %s14207_s9  ;;  %12698 = vmatprep.mubr.msk.bf16.mxu1 %vm14206_vm2, %v18001_v14  ;;  %v15627_v39 = vpop.permute.xlu1 %4265  ;;  %v15801_v33 = vpack.c.bf16 %v4214_v30, %v4214_v30  ;;  %v15814_v30 = vpack.c.bf16 %v4217_v55, %v4217_v55  ;;  %v4220_v55 = vld [vmem:[#allocation4 + $0x68] sm:$0xff] }
 0x256   : > { %12708 = vmatprep.subr.bf16.mxu1 %v18001_v14 }
 0x257   : > { %18134 = vst [vmem:[#allocation43_spill] sm:$0xff] %v15801_v33  ;;  %18137 = vst [vmem:[#allocation46_spill] sm:$0xff] %v15814_v30 }
 0x258   : > { %4371 = vrot.lane.b32.xlu0 %v15341_v57, %s14205_s13 }
 0x259   : > { %4483 = vrot.lane.b32.xlu1 %v15614_v29, %s14205_s13  ;;  %v15639_v41 = vpop.permute.xlu1 %4293  ;;  %v15837_v29 = vpack.c.bf16 %v4220_v55, %v4220_v55 }
 0x25b   : > { %12699 = vmatmul.mubr.msk.bf16.vlgmr.msra.gmra.mxu1 %vm4575_vm3, %v4174_v9  ;;  %18143 = vst [vmem:[#allocation51_spill] sm:$0xff] %v15837_v29 }
 0x25c   : > { %4375 = vrot.lane.b32.xlu0 %v15176_v43, %s14205_s13  ;;  %12710 = vmatprep.mubr.msk.bf16.mxu1 %vm14206_vm2, %v18001_v14 }
 0x25d   : > { %4487 = vrot.lane.b32.xlu1 %v15622_v36, %s14205_s13  ;;  %v15647_v44 = vpop.permute.xlu1 %4297 }
 0x260   : > { %4403 = vrot.lane.b32.xlu0 %v15341_v57, %s14204_s11 }
 0x261   : > { %4373 = vrot.lane.b32.xlu1 %v15418_v2, %s14205_s13  ;;  %v15659_v46 = vpop.permute.xlu1 %4325 }
 0x264   : > { %4407 = vrot.lane.b32.xlu0 %v15176_v43, %s14204_s11 }
 0x265   : > { %4377 = vrot.lane.b32.xlu1 %v15458_v37, %s14205_s13  ;;  %v15669_v49 = vpop.permute.xlu1 %4329 }
 0x268   : > { %4435 = vrot.lane.b32.xlu0 %v15341_v57, %s14207_s9  ;;  %v15665_v57 = vpop.permute.xlu0 %4267 }
 0x269   : > { %4405 = vrot.lane.b32.xlu1 %v15418_v2, %s14204_s11 }
 0x26c   : > { %4439 = vrot.lane.b32.xlu0 %v15176_v43, %s14207_s9  ;;  %v4213_v43 = vld [vmem:[#allocation4 + $0x30] sm:$0xff]  ;;  %v15675_v51 = vpop.permute.xlu0 %4271 }
 0x26d   : > { %4409 = vrot.lane.b32.xlu1 %v15458_v37, %s14204_s11  ;;  %v15677_v28 = vpack.c.bf16 %v4213_v43, %v4213_v43  ;;  %v4216_v43 = vld [vmem:[#allocation4 + $0x48] sm:$0xff] }
 0x26e   : > { %v15809_v10 = vpack.c.bf16 %v4216_v43, %v4216_v43 }
 0x26f   : > { %18124 = vst [vmem:[#allocation33_spill] sm:$0xff] %v15677_v28 }
 0x270   : > { %4481 = vrot.lane.b32.xlu0 %v15661_v48, %s14205_s13  ;;  %v15687_v52 = vpop.permute.xlu0 %4299  ;;  %18135 = vst [vmem:[#allocation44_spill] sm:$0xff] %v15809_v10 }
 0x271   : > { %4437 = vrot.lane.b32.xlu1 %v15418_v2, %s14207_s9  ;;  %v15683_v2 = vpop.permute.xlu1 %4269 }
 0x274   : > { %4379 = vrot.lane.b32.xlu0 %v15278_v1, %s14205_s13  ;;  %v15697_v54 = vpop.permute.xlu0 %4303 }
 0x275   : > { %4441 = vrot.lane.b32.xlu1 %v15458_v37, %s14207_s9 }
 0x278   : > { %4383 = vrot.lane.b32.xlu0 %v15366_v16, %s14205_s13  ;;  %v15691_v37 = vpop.permute.xlu1 %4273  ;;  %v15707_v38 = vpop.permute.xlu0 %4331 }
 0x279   : > { %4491 = vrot.lane.b32.xlu1 %v15677_v28, %s14205_s13  ;;  %v4219_v28 = vld [vmem:[#allocation4 + $0x60] sm:$0xff] }
 0x27a   : > { %v15829_v36 = vpack.c.bf16 %v4219_v28, %v4219_v28  ;;  %v4222_v28 = vld [vmem:[#allocation4 + $0x78] sm:$0xff] }
 0x27c   : > { %4411 = vrot.lane.b32.xlu0 %v15278_v1, %s14204_s11  ;;  %v15721_v63 = vpop.permute.xlu0 %4335  ;;  %18142 = vst [vmem:[#allocation50_spill] sm:$0xff] %v15829_v36 }
 0x27d   : > { %4381 = vrot.lane.b32.xlu1 %v15496_v20, %s14205_s13 }
 0x27e   : > { %v15701_v60 = vpop.permute.xlu1 %4301 }
 0x280   : > { %4415 = vrot.lane.b32.xlu0 %v15366_v16, %s14204_s11 }
 0x281   : > { %4385 = vrot.lane.b32.xlu1 %v15526_v17, %s14205_s13 }
 0x282   : > { %v15711_v47 = vpop.permute.xlu1 %4305 }
 0x284   : > { %4443 = vrot.lane.b32.xlu0 %v15278_v1, %s14207_s9  ;;  %v15719_v1 = vpack.c.bf16 %v4212_v59, %v4212_v59 }
 0x285   : > { %4413 = vrot.lane.b32.xlu1 %v15496_v20, %s14204_s11 }
 0x286   : > { %18126 = vst [vmem:[#allocation35_spill] sm:$0xff] %v15719_v1 }
 0x288   : > { %4447 = vrot.lane.b32.xlu0 %v15366_v16, %s14207_s9  ;;  %v15723_v16 = vpop.permute.xlu1 %4333 }
 0x289   : > { %4417 = vrot.lane.b32.xlu1 %v15526_v17, %s14204_s11 }
 0x28c   : > { %4485 = vrot.lane.b32.xlu0 %v15713_v58, %s14205_s13 }
 0x28d   : > { %4445 = vrot.lane.b32.xlu1 %v15496_v20, %s14207_s9  ;;  %v15735_v20 = vpop.permute.xlu1 %4337 }
 0x28e   : > { %18127 = vst [vmem:[#allocation36_spill] sm:$0xff] %v15735_v20 }
 0x290   : > { %4489 = vrot.lane.b32.xlu0 %v15719_v1, %s14205_s13  ;;  %v15731_v56 = vpop.permute.xlu0 %4275 }
 0x291   : > { %4449 = vrot.lane.b32.xlu1 %v15526_v17, %s14207_s9 }
 0x294   : > { %4387 = vrot.lane.b32.xlu0 %v15447_v32, %s14205_s13 }
 0x295   : > { %4389 = vrot.lane.b32.xlu1 %v15548_v13, %s14205_s13 }
 0x298   : > { %4391 = vrot.lane.b32.xlu0 %v15477_v53, %s14205_s13 }
 0x299   : > { %4393 = vrot.lane.b32.xlu1 %v15571_v8, %s14205_s13 }
 0x29a   : > { %v15741_v3 = vpop.permute.xlu0 %4279 }
 0x29b   : > { %v15743_v50 = vpop.permute.xlu1 %4277 }
 0x29c   : > { %4419 = vrot.lane.b32.xlu0 %v15447_v32, %s14204_s11 }
 0x29d   : > { %4421 = vrot.lane.b32.xlu1 %v15548_v13, %s14204_s11 }
 0x29e   : > { %v15749_v17 = vpop.permute.xlu0 %4307 }
 0x29f   : > { %v15751_v4 = vpop.permute.xlu1 %4281 }
 0x2a0   : > { %4423 = vrot.lane.b32.xlu0 %v15477_v53, %s14204_s11 }
 0x2a1   : > { %4425 = vrot.lane.b32.xlu1 %v15571_v8, %s14204_s11 }
 0x2a2   : > { %v15757_v6 = vpop.permute.xlu0 %4311 }
 0x2a3   : > { %v15759_v61 = vpop.permute.xlu1 %4309 }
 0x2a4   : > { %4451 = vrot.lane.b32.xlu0 %v15447_v32, %s14207_s9 }
 0x2a5   : > { %4453 = vrot.lane.b32.xlu1 %v15548_v13, %s14207_s9 }
 0x2a6   : > { %v15765_v9 = vpop.permute.xlu0 %4339 }
 0x2a7   : > { %18128 = vst [vmem:[#allocation37_spill] sm:$0xff] %v15765_v9  ;;  %v15767_v12 = vpop.permute.xlu1 %4313 }
 0x2a8   : > { %4455 = vrot.lane.b32.xlu0 %v15477_v53, %s14207_s9 }
 0x2a9   : > { %4457 = vrot.lane.b32.xlu1 %v15571_v8, %s14207_s9 }
 0x2aa   : > { %v15773_v19 = vpop.permute.xlu0 %4343 }
 0x2ab   : > { %18129 = vst [vmem:[#allocation38_spill] sm:$0xff] %v15773_v19  ;;  %v15775_v24 = vpop.permute.xlu1 %4341 }
 0x2ac   : > { %18130 = vst [vmem:[#allocation39_spill] sm:$0xff] %v15775_v24  ;;  %4395 = vrot.lane.b32.xlu0 %v15511_v62, %s14205_s13 }
 0x2ad   : > { %4495 = vrot.lane.b32.xlu1 %v15777_v0, %s14205_s13  ;;  %v4218_v0 = vld [vmem:[#allocation4 + $0x58] sm:$0xff] }
 0x2ae   : > { %v15783_v32 = vpop.permute.xlu0 %4283 }
 0x2af   : > { %v15785_v13 = vpop.permute.xlu1 %4345 }
 0x2b0   : > { %18132 = vst [vmem:[#allocation41_spill] sm:$0xff] %v15785_v13  ;;  %4427 = vrot.lane.b32.xlu0 %v15511_v62, %s14204_s11 }
 0x2b1   : > { %4397 = vrot.lane.b32.xlu1 %v15593_v26, %s14205_s13 }
 0x2b2   : > { %v15791_v53 = vpop.permute.xlu0 %4315 }
 0x2b3   : > { %v15793_v8 = vpop.permute.xlu1 %4285 }
 0x2b4   : > { %4459 = vrot.lane.b32.xlu0 %v15511_v62, %s14207_s9 }
 0x2b5   : > { %4429 = vrot.lane.b32.xlu1 %v15593_v26, %s14204_s11 }
 0x2b6   : > { %v15799_v31 = vpop.permute.xlu0 %4347 }
 0x2b7   : > { %18133 = vst [vmem:[#allocation42_spill] sm:$0xff] %v15799_v31  ;;  %v15803_v34 = vpop.permute.xlu1 %4317 }
 0x2b8   : > { %4493 = vrot.lane.b32.xlu0 %v15801_v33, %s14205_s13  ;;  %v18138_v33 = vmov 0.0  }
 0x2b9   : > { %4461 = vrot.lane.b32.xlu1 %v15593_v26, %s14207_s9  ;;  %v15821_v26 = vpop.f32.mrf.mxu1 }
 0x2ba   : > { %v4368_v59 = vpop.permute.xlu0 %4367  ;;  %18139 = vst [vmem:[#allocation47_spill] sm:$0xff] %v15821_v26  ;;  %v7520_v19 = vsel %vm4575_vm3, %v15821_v26, -inf }
 0x2bb   : > { %v5316_v62 = vsel %vm4575_vm3, %v4368_v59, 0  ;;  %v15812_v14 = vpop.permute.xlu1 %4349  ;;  %v15825_v59 = vpack.c.bf16 %v4218_v0, %v4218_v0  ;;  %v12610_v58 = vpop.f32.mrf.mxu1 }
 0x2bc   : > { %18136 = vst [vmem:[#allocation45_spill] sm:$0xff] %v15812_v14  ;;  %4497 = vrot.lane.b32.xlu0 %v15809_v10, %s14205_s13  ;;  %12703 = vmatpush3.bf16.xpose.msra.mxu0 %v5316_v62  ;;  %v4221_v62 = vld [vmem:[#allocation4 + $0x70] sm:$0xff] }
 0x2bd   : > { %4499 = vrot.lane.b32.xlu1 %v15814_v30, %s14205_s13  ;;  %12714 = vmatprep.subr.bf16.mxu0 %v18138_v33  ;;  %18140 = vst [vmem:[#allocation48_spill] sm:$0xff] %v15825_v59  ;;  %v4619_v30 = vpop.f32.mrf.mxu1 }
 0x2be   : > { %v15823_v43 = vpop.permute.xlu0 %4399  ;;  %v15849_v30 = vpop.f32.mrf.mxu0 }
 0x2bf   : > { %v15827_v1 = vpop.permute.xlu1 %4479  ;;  %v12611_v58 = vpop.f32.mrf.mxu1  ;;  %18145 = vst [vmem:[#allocation53_spill] sm:$0xff] %v15849_v30  ;;  %v7532_v24 = vsel %vm4575_vm3, %v15849_v30, -inf }
 0x2c0   : > { %18141 = vst [vmem:[#allocation49_spill] sm:$0xff] %v15827_v1  ;;  %4501 = vrot.lane.b32.xlu0 %v15825_v59, %s14205_s13  ;;  %v15843_v1 = vpack.c.bf16 %v4221_v62, %v4221_v62 }
 0x2c1   : > { %4503 = vrot.lane.b32.xlu1 %v15829_v36, %s14205_s13  ;;  %v15853_v36 = vpack.c.bf16 %v4222_v28, %v4222_v28 }
 0x2c2   : > { %v15835_v10 = vpop.permute.xlu0 %4431  ;;  %18144 = vst [vmem:[#allocation52_spill] sm:$0xff] %v15843_v1 }
 0x2c3   : > { %12705 = vmatmul.mubr.msk.bf16.vlgmr.msra.gmra.mxu0 %vm4575_vm3, %v15545_v7  ;;  %v15841_v0 = vpop.permute.xlu1 %4401  ;;  %18146 = vst [vmem:[#allocation54_spill] sm:$0xff] %v15853_v36  ;;  %v12634_v7 = vpop.f32.mrf.mxu0 }
 0x2c4   : > { %4505 = vrot.lane.b32.xlu0 %v15837_v29, %s14205_s13  ;;  %12716 = vmatprep.mubr.msk.bf16.mxu0 %vm14206_vm2, %v18138_v33 }
 0x2c5   : > { %4507 = vrot.lane.b32.xlu1 %v15843_v1, %s14205_s13  ;;  %v4803_v58 = vpop.f32.mrf.mxu0 }
 0x2c6   : > { %v4370_v55 = vpop.permute.xlu0 %4369 }
 0x2c7   : > { %v5362_v59 = vsel %vm4575_vm3, %v4370_v55, 0  ;;  %v15856_v62 = vpop.permute.xlu1 %4433  ;;  %v12635_v48 = vpop.f32.mrf.mxu0 }
 0x2c8   : > { %4509 = vrot.lane.b32.xlu0 %v15853_v36, %s14205_s13  ;;  %12709 = vmatpush3.bf16.xpose.msra.mxu1 %v5362_v59 }
 0x2c9   : > { %12720 = vmatprep.subr.bf16.mxu1 %v18138_v33 }
 0x2ca   : > { %v4372_v29 = vpop.permute.xlu0 %4371  ;;  %v15871_v59 = vpop.f32.mrf.mxu1 }
 0x2cb   : > { %v5408_v14 = vsel %vm4575_vm3, %v4372_v29, 0  ;;  %v15862_v1 = vpop.permute.xlu1 %4483  ;;  %18149 = vst [vmem:[#allocation57_spill] sm:$0xff] %v15871_v59 }
 0x2cc   : > { %18147 = vst [vmem:[#allocation55_spill] sm:$0xff] %v15862_v1  ;;  %12715 = vmatpush3.bf16.xpose.msra.mxu0 %v5408_v14  ;;  %v12616_v48 = vpop.f32.mrf.mxu1 }
 0x2cd   : > { %12726 = vmatprep.subr.bf16.mxu0 %v18138_v33 }
 0x2ce   : > { %v4376_v28 = vpop.permute.xlu0 %4375 }
 0x2cf   : > { %12711 = vmatmul.mubr.msk.bf16.vlgmr.msra.gmra.mxu1 %vm4575_vm3, %v15561_v15  ;;  %v15867_v55 = vpop.permute.xlu1 %4487  ;;  %v5500_v29 = vsel %vm4575_vm3, %v4376_v28, 0  ;;  %v15881_v15 = vpop.f32.mrf.mxu0 }
 0x2d0   : > { %18148 = vst [vmem:[#allocation56_spill] sm:$0xff] %v15867_v55  ;;  %12722 = vmatprep.mubr.msk.bf16.mxu1 %vm14206_vm2, %v18138_v33  ;;  %18150 = vst [vmem:[#allocation58_spill] sm:$0xff] %v15881_v15  ;;  %v4665_v55 = vpop.f32.mrf.mxu1  ;;  %v7538_v30 = vsel %vm4575_vm3, %v15881_v15, -inf }
 0x2d1   : > { %v12646_v28 = vpop.f32.mrf.mxu0 }
 0x2d2   : > { %v15873_v7 = vpop.permute.xlu0 %4403  ;;  %v12617_v36 = vpop.f32.mrf.mxu1 }
 0x2d3   : > { %12717 = vmatmul.mubr.msk.bf16.vlgmr.msra.gmra.mxu0 %vm4575_vm3, %v15584_v25  ;;  %v4374_v14 = vpop.permute.xlu1 %4373  ;;  %v4895_v48 = vpop.f32.mrf.mxu0 }
 0x2d4   : > { %12727 = vmatpush3.bf16.xpose.msra.mxu0 %v5500_v29  ;;  %v5454_v58 = vsel %vm4575_vm3, %v4374_v14, 0  ;;  %12728 = vmatprep.mubr.msk.bf16.mxu0 %vm14206_vm2, %v18138_v33 }
 0x2d5   : > { %12721 = vmatpush3.bf16.xpose.msra.mxu1 %v5454_v58  ;;  %12738 = vmatprep.subr.bf16.mxu0 %v18138_v33  ;;  %v12647_v14 = vpop.f32.mrf.mxu0 }
 0x2d6   : > { %v15884_v1 = vpop.permute.xlu0 %4407  ;;  %12732 = vmatprep.subr.bf16.mxu1 %v18138_v33 }
 0x2d7   : > { %v4378_v25 = vpop.permute.xlu1 %4377 }
 0x2d8   : > { %v5546_v55 = vsel %vm4575_vm3, %v4378_v25, 0 }
 0x2da   : > { %v15887_v29 = vpop.permute.xlu0 %4435  ;;  %v15902_v58 = vpop.f32.mrf.mxu1 }
 0x2db   : > { %12729 = vmatmul.mubr.msk.bf16.vlgmr.msra.gmra.mxu0 %vm4575_vm3, %v15599_v21  ;;  %v15891_v23 = vpop.permute.xlu1 %4405  ;;  %18151 = vst [vmem:[#allocation59_spill] sm:$0xff] %v15902_v58 }
 0x2dc   : > { %12723 = vmatmul.mubr.msk.bf16.vlgmr.msra.gmra.mxu1 %vm4575_vm3, %v15611_v5  ;;  %12740 = vmatprep.mubr.msk.bf16.mxu0 %vm14206_vm2, %v18138_v33  ;;  %v12622_v28 = vpop.f32.mrf.mxu1 }
 0x2dd   : > { %12733 = vmatpush3.bf16.xpose.msra.mxu1 %v5546_v55  ;;  %12734 = vmatprep.mubr.msk.bf16.mxu1 %vm14206_vm2, %v18138_v33 }
 0x2de   : > { %v15900_v36 = vpop.permute.xlu0 %4439  ;;  %12744 = vmatprep.subr.bf16.mxu1 %v18138_v33  ;;  %v4711_v48 = vpop.f32.mrf.mxu1 }
 0x2df   : > { %v15905_v21 = vpop.permute.xlu1 %4409  ;;  %v15909_v5 = vpop.f32.mrf.mxu0 }
 0x2e0   : > { %18153 = vst [vmem:[#allocation61_spill] sm:$0xff] %v15909_v5  ;;  %v12623_v55 = vpop.f32.mrf.mxu1 }
 0x2e1   : > { %v12658_v31 = vpop.f32.mrf.mxu0  ;;  %v7526_v55 = vsel %vm4575_vm3, %v15902_v58, -inf }
 0x2e2   : > { %v15907_v25 = vpop.permute.xlu0 %4481 }
 0x2e3   : > { %18152 = vst [vmem:[#allocation60_spill] sm:$0xff] %v15907_v25  ;;  %v15911_v14 = vpop.permute.xlu1 %4437  ;;  %v4987_v48 = vpop.f32.mrf.mxu0 }
 0x2e4   : > { %12735 = vmatmul.mubr.msk.bf16.vlgmr.msra.gmra.mxu1 %vm4575_vm3, %v15627_v39 }
 0x2e5   : > { %12746 = vmatprep.mubr.msk.bf16.mxu1 %vm14206_vm2, %v18138_v33  ;;  %v12659_v39 = vpop.f32.mrf.mxu0 }
 0x2e6   : > { %v4380_v13 = vpop.permute.xlu0 %4379 }
 0x2e7   : > { %v5592_v28 = vsel %vm4575_vm3, %v4380_v13, 0  ;;  %7521 = vmax.xlane.f32.xlu0 %v7520_v19  ;;  %v15920_v25 = vpop.permute.xlu1 %4441  ;;  %v7523_v19 = vsel %vm4575_vm3, %v15871_v59, -inf }
 0x2e8   : > { %12739 = vmatpush3.bf16.xpose.msra.mxu0 %v5592_v28 }
 0x2e9   : > { %7533 = vmax.xlane.f32.xlu1 %v7532_v24  ;;  %12750 = vmatprep.subr.bf16.mxu0 %v18138_v33 }
 0x2ea   : > { %v4384_v31 = vpop.permute.xlu0 %4383 }
 0x2eb   : > { %7527 = vmax.xlane.f32.xlu0 %v7526_v55  ;;  %v15927_v26 = vpop.permute.xlu1 %4491  ;;  %v15929_v13 = vpop.f32.mrf.mxu1  ;;  %v5684_v39 = vsel %vm4575_vm3, %v4384_v31, 0 }
 0x2ec   : > { %18154 = vst [vmem:[#allocation62_spill] sm:$0xff] %v15927_v26  ;;  %18155 = vst [vmem:[#allocation63_spill] sm:$0xff] %v15929_v13  ;;  %v7529_v28 = vsel %vm4575_vm3, %v15929_v13, -inf }
 0x2ed   : > { %7524 = vmax.xlane.f32.xlu1 %v7523_v19  ;;  %v12628_v48 = vpop.f32.mrf.mxu1 }
 0x2ee   : > { %v15935_v24 = vpop.permute.xlu0 %4411 }
 0x2ef   : > { %7530 = vmax.xlane.f32.xlu0 %v7529_v28  ;;  %12741 = vmatmul.mubr.msk.bf16.vlgmr.msra.gmra.mxu0 %vm4575_vm3, %v15665_v57  ;;  %v4382_v55 = vpop.permute.xlu1 %4381  ;;  %v4757_v26 = vpop.f32.mrf.mxu1 }
 0x2f0   : > { %12751 = vmatpush3.bf16.xpose.msra.mxu0 %v5684_v39  ;;  %v5638_v58 = vsel %vm4575_vm3, %v4382_v55, 0  ;;  %12752 = vmatprep.mubr.msk.bf16.mxu0 %vm14206_vm2, %v18138_v33  ;;  %v7544_v39 = vsel %vm4575_vm3, %v15909_v5, -inf }
 0x2f1   : > { %v15945_v19 = vpop.f32.mrf.mxu0  ;;  %7539 = vmax.xlane.f32.xlu1 %v7538_v30  ;;  %12745 = vmatpush3.bf16.xpose.msra.mxu1 %v5638_v58  ;;  %v12629_v31 = vpop.f32.mrf.mxu1 }
 0x2f2   : > { %18156 = vst [vmem:[#allocation64_spill] sm:$0xff] %v15945_v19  ;;  %v15947_v28 = vpop.permute.xlu0 %4415  ;;  %12756 = vmatprep.subr.bf16.mxu1 %v18138_v33  ;;  %12762 = vmatprep.subr.bf16.mxu0 %v18138_v33 }
 0x2f3   : > { %v12670_v57 = vpop.f32.mrf.mxu0  ;;  %v4386_v26 = vpop.permute.xlu1 %4385 }
 0x2f4   : > { %v15951_v48 = vpop.f32.mrf.mxu1  ;;  %v5730_v15 = vsel %vm4575_vm3, %v4386_v26, 0 }
 0x2f5   : > { %18157 = vst [vmem:[#allocation65_spill] sm:$0xff] %v15951_v48  ;;  %v5079_v55 = vpop.f32.mrf.mxu0  ;;  %v7535_v13 = vsel %vm4575_vm3, %v15951_v48, -inf  ;;  %7545 = vmax.xlane.f32.xlu1 %v7544_v39 }
 0x2f6   : > { %v12640_v30 = vpop.f32.mrf.mxu1  ;;  %7536 = vmax.xlane.f32.xlu0 %v7535_v13  ;;  %v15957_v58 = vpop.permute.xlu0 %4443  ;;  %v7550_v55 = vsel %vm4575_vm3, %v15945_v19, -inf }
 0x2f7   : > { %v12671_v31 = vpop.f32.mrf.mxu0  ;;  %12753 = vmatmul.mubr.msk.bf16.vlgmr.msra.gmra.mxu0 %vm4575_vm3, %v15675_v51  ;;  %v15961_v57 = vpop.permute.xlu1 %4413 }
 0x2f8   : > { %v4849_v59 = vpop.f32.mrf.mxu1  ;;  %12747 = vmatmul.mubr.msk.bf16.vlgmr.msra.gmra.mxu1 %vm4575_vm3, %v15683_v2  ;;  %12764 = vmatprep.mubr.msk.bf16.mxu0 %vm14206_vm2, %v18138_v33 }
 0x2f9   : > { %v15970_v13 = vpop.f32.mrf.mxu0  ;;  %7551 = vmax.xlane.f32.xlu1 %v7550_v55  ;;  %12757 = vmatpush3.bf16.xpose.msra.mxu1 %v5730_v15 }
 0x2fa   : > { %18158 = vst [vmem:[#allocation66_spill] sm:$0xff] %v15970_v13  ;;  %v12641_v39 = vpop.f32.mrf.mxu1  ;;  %v15972_v51 = vpop.permute.xlu0 %4447  ;;  %12758 = vmatprep.mubr.msk.bf16.mxu1 %vm14206_vm2, %v18138_v33  ;;  %12768 = vmatprep.subr.bf16.mxu1 %v18138_v33  ;;  %v7556_v30 = vsel %vm4575_vm3, %v15970_v13, -inf }
 0x2fb   : > { %v12682_v59 = vpop.f32.mrf.mxu0  ;;  %v15977_v2 = vpop.permute.xlu1 %4417 }
 0x2fc   : > { %v15979_v26 = vpop.f32.mrf.mxu1 }
 0x2fd   : > { %18159 = vst [vmem:[#allocation67_spill] sm:$0xff] %v15979_v26  ;;  %v5171_v31 = vpop.f32.mrf.mxu0  ;;  %v7541_v15 = vsel %vm4575_vm3, %v15979_v26, -inf  ;;  %7557 = vmax.xlane.f32.xlu1 %v7556_v30 }
 0x2fe   : > { %v12652_v55 = vpop.f32.mrf.mxu1  ;;  %7542 = vmax.xlane.f32.xlu0 %v7541_v15  ;;  %v15985_v39 = vpop.permute.xlu0 %4485 }
 0x2ff   : > { %18160 = vst [vmem:[#allocation68_spill] sm:$0xff] %v15985_v39  ;;  %v12683_v48 = vpop.f32.mrf.mxu0  ;;  %v15987_v19 = vpop.permute.xlu1 %4445 }
 0x300   : > { %v4941_v59 = vpop.f32.mrf.mxu1  ;;  %12759 = vmatmul.mubr.msk.bf16.vlgmr.msra.gmra.mxu1 %vm4575_vm3, %v15691_v37 }
 0x301   : > { %v15991_v5 = vpop.f32.mrf.mxu0  ;;  %12770 = vmatprep.mubr.msk.bf16.mxu1 %vm14206_vm2, %v18138_v33 }
 0x302   : > { %18161 = vst [vmem:[#allocation69_spill] sm:$0xff] %v15991_v5  ;;  %v12653_v31 = vpop.f32.mrf.mxu1  ;;  %v15995_v13 = vpop.permute.xlu0 %4489  ;;  %v7562_v30 = vsel %vm4575_vm3, %v15991_v5, -inf }
 0x303   : > { %18162 = vst [vmem:[#allocation70_spill] sm:$0xff] %v15995_v13  ;;  %v12694_v15 = vpop.f32.mrf.mxu0  ;;  %7563 = vmax.xlane.f32.xlu1 %v7562_v30  ;;  %v15999_v48 = vpop.permute.xlu1 %4449 }
 0x304   : > { %v16001_v55 = vpop.f32.mrf.mxu1 }
 0x305   : > { %18163 = vst [vmem:[#allocation71_spill] sm:$0xff] %v16001_v55  ;;  %v5263_v59 = vpop.f32.mrf.mxu0  ;;  %v7547_v37 = vsel %vm4575_vm3, %v16001_v55, -inf }
 0x306   : > { %v12664_v39 = vpop.f32.mrf.mxu1  ;;  %7548 = vmax.xlane.f32.xlu0 %v7547_v37  ;;  %v4388_v26 = vpop.permute.xlu0 %4387 }
 0x307   : > { %v12695_v9 = vpop.f32.mrf.mxu0  ;;  %v5776_v31 = vsel %vm4575_vm3, %v4388_v26, 0  ;;  %v4390_v13 = vpop.permute.xlu1 %4389 }
 0x308   : > { %v5033_v20 = vpop.f32.mrf.mxu1  ;;  %12763 = vmatpush3.bf16.xpose.msra.mxu0 %v5776_v31  ;;  %v5822_v15 = vsel %vm4575_vm3, %v4390_v13, 0 }
 0x309   : > { %12769 = vmatpush3.bf16.xpose.msra.mxu1 %v5822_v15  ;;  %12774 = vmatprep.subr.bf16.mxu0 %v18138_v33 }
 0x30a   : > { %v12665_v30 = vpop.f32.mrf.mxu1  ;;  %v4392_v5 = vpop.permute.xlu0 %4391  ;;  %12780 = vmatprep.subr.bf16.mxu1 %v18138_v33 }
 0x30b   : > { %v4394_v59 = vpop.permute.xlu1 %4393  ;;  %v5868_v20 = vsel %vm4575_vm3, %v4392_v5, 0 }
 0x30c   : > { %v16009_v55 = vpop.f32.mrf.mxu1  ;;  %v5914_v37 = vsel %vm4575_vm3, %v4394_v59, 0 }
 0x30d   : > { %18164 = vst [vmem:[#allocation72_spill] sm:$0xff] %v16009_v55  ;;  %v7553_v9 = vsel %vm4575_vm3, %v16009_v55, -inf }
 0x30e   : > { %v12676_v39 = vpop.f32.mrf.mxu1  ;;  %7554 = vmax.xlane.f32.xlu0 %v7553_v9  ;;  %v16013_v26 = vpop.permute.xlu0 %4419 }
 0x30f   : > { %12765 = vmatmul.mubr.msk.bf16.vlgmr.msra.gmra.mxu0 %vm4575_vm3, %v15731_v56  ;;  %v16018_v13 = vpop.permute.xlu1 %4421 }
 0x310   : > { %v5125_v31 = vpop.f32.mrf.mxu1  ;;  %12775 = vmatpush3.bf16.xpose.msra.mxu0 %v5868_v20  ;;  %12771 = vmatmul.mubr.msk.bf16.vlgmr.msra.gmra.mxu1 %vm4575_vm3, %v15743_v50 }
 0x311   : > { %12781 = vmatpush3.bf16.xpose.msra.mxu1 %v5914_v37  ;;  %12776 = vmatprep.mubr.msk.bf16.mxu0 %vm14206_vm2, %v18138_v33 }
 0x312   : > { %v12677_v15 = vpop.f32.mrf.mxu1  ;;  %v16025_v30 = vpop.permute.xlu0 %4423  ;;  %12782 = vmatprep.mubr.msk.bf16.mxu1 %vm14206_vm2, %v18138_v33  ;;  %12786 = vmatprep.subr.bf16.mxu0 %v18138_v33 }
 0x313   : > { %v16030_v56 = vpop.permute.xlu1 %4425  ;;  %12792 = vmatprep.subr.bf16.mxu1 %v18138_v33 }
 0x314   : > { %v16033_v5 = vpop.f32.mrf.mxu1 }
 0x315   : > { %18165 = vst [vmem:[#allocation73_spill] sm:$0xff] %v16033_v5  ;;  %v7559_v50 = vsel %vm4575_vm3, %v16033_v5, -inf }
 0x316   : > { %v16037_v59 = vpop.permute.xlu0 %4451  ;;  %7560 = vmax.xlane.f32.xlu0 %v7559_v50  ;;  %v12688_v9 = vpop.f32.mrf.mxu1 }
 0x317   : > { %12777 = vmatmul.mubr.msk.bf16.vlgmr.msra.gmra.mxu0 %vm4575_vm3, %v15741_v3  ;;  %v16041_v39 = vpop.permute.xlu1 %4453 }
 0x318   : > { %v5217_v20 = vpop.f32.mrf.mxu1  ;;  %12783 = vmatmul.mubr.msk.bf16.vlgmr.msra.gmra.mxu1 %vm4575_vm3, %v15751_v4  ;;  %12788 = vmatprep.mubr.msk.bf16.mxu0 %vm14206_vm2, %v18138_v33 }
 0x319   : > { %12794 = vmatprep.mubr.msk.bf16.mxu1 %vm14206_vm2, %v18138_v33 }
 0x31a   : > { %v16049_v37 = vpop.permute.xlu0 %4455  ;;  %v12689_v31 = vpop.f32.mrf.mxu1 }
 0x31b   : > { %18166 = vst [vmem:[#allocation74_spill] sm:$0xff] %v16049_v37  ;;  %v16051_v15 = vpop.permute.xlu1 %4457 }
 0x31c   : > { %18167 = vst [vmem:[#allocation75_spill] sm:$0xff] %v16051_v15  ;;  %v16053_v50 = vpop.f32.mrf.mxu1 }
 0x31d   : > { %18168 = vst [vmem:[#allocation76_spill] sm:$0xff] %v16053_v50  ;;  %v7565_v3 = vsel %vm4575_vm3, %v16053_v50, -inf  ;;  %v6052_v50 = vsel %vm4575_vm3, %v15823_v43, 0 }
 0x31e   : > { %v4396_v9 = vpop.permute.xlu0 %4395  ;;  %7566 = vmax.xlane.f32.xlu0 %v7565_v3  ;;  %v12700_v20 = vpop.f32.mrf.mxu1 }
 0x31f   : > { %v5960_v4 = vsel %vm4575_vm3, %v4396_v9, 0  ;;  %v16058_v5 = vpop.permute.xlu1 %4495 }
 0x320   : > { %v5309_v55 = vpop.f32.mrf.mxu1  ;;  %12787 = vmatpush3.bf16.xpose.msra.mxu0 %v5960_v4 }
 0x321   : > { %12798 = vmatprep.subr.bf16.mxu0 %v18138_v33  ;;  %v6098_v55 = vsel %vm4575_vm3, %v15841_v0, 0 }
 0x322   : > { %v12701_v37 = vpop.f32.mrf.mxu1 }
 0x323   : > { %v4398_v31 = vpop.permute.xlu1 %4397  ;;  %v18173_v37 = vld [vmem:[#allocation39_spill] sm:$0xff] }
 0x324   : > { %v6006_v15 = vsel %vm4575_vm3, %v4398_v31, 0 }
 0x325   : > { %12793 = vmatpush3.bf16.xpose.msra.mxu1 %v6006_v15 }
 0x326   : > { %12804 = vmatprep.subr.bf16.mxu1 %v18138_v33 }
 0x327   : > { %12789 = vmatmul.mubr.msk.bf16.vlgmr.msra.gmra.mxu0 %vm4575_vm3, %v15783_v32  ;;  %v6144_v32 = vsel %vm4575_vm3, %v15873_v7, 0  ;;  %v7202_v7 = vsel %vm4575_vm3, %v15999_v48, 0  ;;  %v18171_v48 = vld [vmem:[#allocation37_spill] sm:$0xff] }
 0x328   : > { %12799 = vmatpush3.bf16.xpose.msra.mxu0 %v6052_v50  ;;  %12800 = vmatprep.mubr.msk.bf16.mxu0 %vm14206_vm2, %v18138_v33 }
 0x329   : > { %12810 = vmatprep.subr.bf16.mxu0 %v18138_v33 }
 0x32c   : > { %12795 = vmatmul.mubr.msk.bf16.vlgmr.msra.gmra.mxu1 %vm4575_vm3, %v15793_v8  ;;  %v6190_v8 = vsel %vm4575_vm3, %v15891_v23, 0  ;;  %v6328_v23 = vsel %vm4575_vm3, %v15935_v24, 0  ;;  %v18169_v24 = vld [vmem:[#allocation36_spill] sm:$0xff] }
 0x32d   : > { %12805 = vmatpush3.bf16.xpose.msra.mxu1 %v6098_v55  ;;  %12806 = vmatprep.mubr.msk.bf16.mxu1 %vm14206_vm2, %v18138_v33  ;;  %v18174_v55 = vld [vmem:[#allocation38_spill] sm:$0xff] }
 0x32e   : > { %12816 = vmatprep.subr.bf16.mxu1 %v18138_v33 }
 0x32f   : > { %12801 = vmatmul.mubr.msk.bf16.vlgmr.msra.gmra.mxu0 %vm4575_vm3, %v15550_v11  ;;  %v6236_v11 = vsel %vm4575_vm3, %v15884_v1, 0 }
 0x330   : > { %12811 = vmatpush3.bf16.xpose.msra.mxu0 %v6144_v32  ;;  %12812 = vmatprep.mubr.msk.bf16.mxu0 %vm14206_vm2, %v18138_v33 }
 0x331   : > { %12822 = vmatprep.subr.bf16.mxu0 %v18138_v33 }
 0x334   : > { %12807 = vmatmul.mubr.msk.bf16.vlgmr.msra.gmra.mxu1 %vm4575_vm3, %v15574_v22  ;;  %v6282_v22 = vsel %vm4575_vm3, %v15905_v21, 0 }
 0x335   : > { %12817 = vmatpush3.bf16.xpose.msra.mxu1 %v6190_v8  ;;  %12818 = vmatprep.mubr.msk.bf16.mxu1 %vm14206_vm2, %v18138_v33 }
 0x336   : > { %12828 = vmatprep.subr.bf16.mxu1 %v18138_v33 }
 0x337   : > { %12813 = vmatmul.mubr.msk.bf16.vlgmr.msra.gmra.mxu0 %vm4575_vm3, %v15618_v35  ;;  %v6374_v35 = vsel %vm4575_vm3, %v15961_v57, 0 }
 0x338   : > { %12823 = vmatpush3.bf16.xpose.msra.mxu0 %v6236_v11  ;;  %12824 = vmatprep.mubr.msk.bf16.mxu0 %vm14206_vm2, %v18138_v33 }
 0x339   : > { %12834 = vmatprep.subr.bf16.mxu0 %v18138_v33 }
 0x33c   : > { %12819 = vmatmul.mubr.msk.bf16.vlgmr.msra.gmra.mxu1 %vm4575_vm3, %v15639_v41  ;;  %v6466_v41 = vsel %vm4575_vm3, %v15977_v2, 0 }
 0x33d   : > { %12829 = vmatpush3.bf16.xpose.msra.mxu1 %v6282_v22  ;;  %12830 = vmatprep.mubr.msk.bf16.mxu1 %vm14206_vm2, %v18138_v33 }
 0x33e   : > { %12840 = vmatprep.subr.bf16.mxu1 %v18138_v33 }
 0x33f   : > { %12825 = vmatmul.mubr.msk.bf16.vlgmr.msra.gmra.mxu0 %vm4575_vm3, %v15633_v40  ;;  %v6420_v40 = vsel %vm4575_vm3, %v15947_v28, 0 }
 0x340   : > { %12835 = vmatpush3.bf16.xpose.msra.mxu0 %v6328_v23  ;;  %12836 = vmatprep.mubr.msk.bf16.mxu0 %vm14206_vm2, %v18138_v33 }
 0x341   : > { %12846 = vmatprep.subr.bf16.mxu0 %v18138_v33 }
 0x344   : > { %12831 = vmatmul.mubr.msk.bf16.vlgmr.msra.gmra.mxu1 %vm4575_vm3, %v15647_v44  ;;  %v6512_v44 = vsel %vm4575_vm3, %v16013_v26, 0 }
 0x345   : > { %12841 = vmatpush3.bf16.xpose.msra.mxu1 %v6374_v35  ;;  %12842 = vmatprep.mubr.msk.bf16.mxu1 %vm14206_vm2, %v18138_v33 }
 0x346   : > { %12852 = vmatprep.subr.bf16.mxu1 %v18138_v33 }
 0x347   : > { %12837 = vmatmul.mubr.msk.bf16.vlgmr.msra.gmra.mxu0 %vm4575_vm3, %v15687_v52  ;;  %v6558_v52 = vsel %vm4575_vm3, %v16018_v13, 0 }
 0x348   : > { %12847 = vmatpush3.bf16.xpose.msra.mxu0 %v6420_v40  ;;  %12848 = vmatprep.mubr.msk.bf16.mxu0 %vm14206_vm2, %v18138_v33  ;;  %v18177_v40 = vld [vmem:[#allocation41_spill] sm:$0xff] }
 0x349   : > { %12858 = vmatprep.subr.bf16.mxu0 %v18138_v33 }
 0x34c   : > { %12843 = vmatmul.mubr.msk.bf16.vlgmr.msra.gmra.mxu1 %vm4575_vm3, %v15701_v60  ;;  %v6650_v60 = vsel %vm4575_vm3, %v16030_v56, 0 }
 0x34d   : > { %12853 = vmatpush3.bf16.xpose.msra.mxu1 %v6466_v41  ;;  %12854 = vmatprep.mubr.msk.bf16.mxu1 %vm14206_vm2, %v18138_v33 }
 0x34e   : > { %12864 = vmatprep.subr.bf16.mxu1 %v18138_v33 }
 0x34f   : > { %12849 = vmatmul.mubr.msk.bf16.vlgmr.msra.gmra.mxu0 %vm4575_vm3, %v15697_v54  ;;  %v6604_v54 = vsel %vm4575_vm3, %v16025_v30, 0  ;;  %v18172_v30 = vld [vmem:[#allocation75_spill] sm:$0xff] }
 0x350   : > { %12859 = vmatpush3.bf16.xpose.msra.mxu0 %v6512_v44  ;;  %12860 = vmatprep.mubr.msk.bf16.mxu0 %vm14206_vm2, %v18138_v33  ;;  %v7386_v56 = vsel %vm4575_vm3, %v18172_v30, 0 }
 0x351   : > { %12870 = vmatprep.subr.bf16.mxu0 %v18138_v33 }
 0x354   : > { %12855 = vmatmul.mubr.msk.bf16.vlgmr.msra.gmra.mxu1 %vm4575_vm3, %v15711_v47  ;;  %v4428_v47 = vpop.permute.xlu0 %4427 }
 0x355   : > { %12865 = vmatpush3.bf16.xpose.msra.mxu1 %v6558_v52  ;;  %12866 = vmatprep.mubr.msk.bf16.mxu1 %vm14206_vm2, %v18138_v33  ;;  %v6696_v1 = vsel %vm4575_vm3, %v4428_v47, 0 }
 0x356   : > { %12876 = vmatprep.subr.bf16.mxu1 %v18138_v33 }
 0x357   : > { %12861 = vmatmul.mubr.msk.bf16.vlgmr.msra.gmra.mxu0 %vm4575_vm3, %v15749_v17  ;;  %v4430_v17 = vpop.permute.xlu1 %4429 }
 0x358   : > { %12871 = vmatpush3.bf16.xpose.msra.mxu0 %v6604_v54  ;;  %12872 = vmatprep.mubr.msk.bf16.mxu0 %vm14206_vm2, %v18138_v33  ;;  %v18178_v54 = vld [vmem:[#allocation42_spill] sm:$0xff] }
 0x359   : > { %12882 = vmatprep.subr.bf16.mxu0 %v18138_v33 }
 0x35b   : > { %v4462_v9 = vpop.permute.xlu1 %4461 }
 0x35c   : > { %12867 = vmatmul.mubr.msk.bf16.vlgmr.msra.gmra.mxu1 %vm4575_vm3, %v15759_v61  ;;  %v6742_v61 = vsel %vm4575_vm3, %v4430_v17, 0  ;;  %v7478_v23 = vsel %vm4575_vm3, %v4462_v9, 0 }
 0x35d   : > { %12877 = vmatpush3.bf16.xpose.msra.mxu1 %v6650_v60  ;;  %12878 = vmatprep.mubr.msk.bf16.mxu1 %vm14206_vm2, %v18138_v33  ;;  %v18179_v60 = vld [vmem:[#allocation29_spill] sm:$0xff] }
 0x35e   : > { %12888 = vmatprep.subr.bf16.mxu1 %v18138_v33  ;;  %v8293_v47 = vsel %vm8291_vm4, %v18179_v60, 0 }
 0x35f   : > { %12873 = vmatmul.mubr.msk.bf16.vlgmr.msra.gmra.mxu0 %vm4575_vm3, %v15757_v6  ;;  %v6788_v6 = vsel %vm4575_vm3, %v15835_v10, 0  ;;  %v16302_v35 = vpop.permute.xlu1 %4499 }
 0x360   : > { %12883 = vmatpush3.bf16.xpose.msra.mxu0 %v6696_v1  ;;  %12884 = vmatprep.mubr.msk.bf16.mxu0 %vm14206_vm2, %v18138_v33 }
 0x361   : > { %12894 = vmatprep.subr.bf16.mxu0 %v18138_v33 }
 0x364   : > { %12879 = vmatmul.mubr.msk.bf16.vlgmr.msra.gmra.mxu1 %vm4575_vm3, %v15767_v12  ;;  %v6834_v12 = vsel %vm4575_vm3, %v15856_v62, 0 }
 0x365   : > { %12889 = vmatpush3.bf16.xpose.msra.mxu1 %v6742_v61  ;;  %12890 = vmatprep.mubr.msk.bf16.mxu1 %vm14206_vm2, %v18138_v33  ;;  %v16322_v61 = vpop.permute.xlu1 %4503 }
 0x366   : > { %12900 = vmatprep.subr.bf16.mxu1 %v18138_v33  ;;  %18181 = vst [vmem:[#allocation75_spill] sm:$0xff] %v16322_v61 }
 0x367   : > { %12885 = vmatmul.mubr.msk.bf16.vlgmr.msra.gmra.mxu0 %vm4575_vm3, %v15791_v53  ;;  %v6880_v53 = vsel %vm4575_vm3, %v15887_v29, 0 }
 0x368   : > { %12895 = vmatpush3.bf16.xpose.msra.mxu0 %v6788_v6  ;;  %12896 = vmatprep.mubr.msk.bf16.mxu0 %vm14206_vm2, %v18138_v33 }
 0x369   : > { %12906 = vmatprep.subr.bf16.mxu0 %v18138_v33 }
 0x36c   : > { %12891 = vmatmul.mubr.msk.bf16.vlgmr.msra.gmra.mxu1 %vm4575_vm3, %v15803_v34  ;;  %v6926_v34 = vsel %vm4575_vm3, %v15911_v14, 0  ;;  %v7294_v14 = vsel %vm4575_vm3, %v16041_v39, 0 }
 0x36d   : > { %12901 = vmatpush3.bf16.xpose.msra.mxu1 %v6834_v12  ;;  %12902 = vmatprep.mubr.msk.bf16.mxu1 %vm14206_vm2, %v18138_v33  ;;  %v18182_v12 = vld [vmem:[#allocation45_spill] sm:$0xff] }
 0x36e   : > { %12912 = vmatprep.subr.bf16.mxu1 %v18138_v33 }
 0x36f   : > { %12897 = vmatmul.mubr.msk.bf16.vlgmr.msra.gmra.mxu0 %vm4575_vm3, %v15567_v18  ;;  %v6972_v18 = vsel %vm4575_vm3, %v15900_v36, 0 }
 0x370   : > { %12907 = vmatpush3.bf16.xpose.msra.mxu0 %v6880_v53  ;;  %12908 = vmatprep.mubr.msk.bf16.mxu0 %vm14206_vm2, %v18138_v33  ;;  %v18183_v53 = vld [vmem:[#allocation32_spill] sm:$0xff] }
 0x371   : > { %12918 = vmatprep.subr.bf16.mxu0 %v18138_v33 }
 0x374   : > { %12903 = vmatmul.mubr.msk.bf16.vlgmr.msra.gmra.mxu1 %vm4575_vm3, %v15595_v27  ;;  %v7018_v27 = vsel %vm4575_vm3, %v15920_v25, 0 }
 0x375   : > { %12913 = vmatpush3.bf16.xpose.msra.mxu1 %v6926_v34  ;;  %12914 = vmatprep.mubr.msk.bf16.mxu1 %vm14206_vm2, %v18138_v33  ;;  %v8339_v34 = vsel %vm8291_vm4, %v18183_v53, 0 }
 0x376   : > { %12924 = vmatprep.subr.bf16.mxu1 %v18138_v33 }
 0x377   : > { %12909 = vmatmul.mubr.msk.bf16.vlgmr.msra.gmra.mxu0 %vm4575_vm3, %v15643_v42  ;;  %v7064_v42 = vsel %vm4575_vm3, %v15957_v58, 0  ;;  %v18170_v58 = vld [vmem:[#allocation74_spill] sm:$0xff] }
 0x378   : > { %12919 = vmatpush3.bf16.xpose.msra.mxu0 %v6972_v18  ;;  %12920 = vmatprep.mubr.msk.bf16.mxu0 %vm14206_vm2, %v18138_v33  ;;  %v7340_v57 = vsel %vm4575_vm3, %v18170_v58, 0  ;;  %18176 = vst [vmem:[#allocation74_spill] sm:$0xff] %v16302_v35 }
 0x379   : > { %12930 = vmatprep.subr.bf16.mxu0 %v18138_v33 }
 0x37c   : > { %12915 = vmatmul.mubr.msk.bf16.vlgmr.msra.gmra.mxu1 %vm4575_vm3, %v15659_v46  ;;  %v7110_v46 = vsel %vm4575_vm3, %v15987_v19, 0 }
 0x37d   : > { %12925 = vmatpush3.bf16.xpose.msra.mxu1 %v7018_v27  ;;  %12926 = vmatprep.mubr.msk.bf16.mxu1 %vm14206_vm2, %v18138_v33 }
 0x37e   : > { %12936 = vmatprep.subr.bf16.mxu1 %v18138_v33 }
 0x37f   : > { %12921 = vmatmul.mubr.msk.bf16.vlgmr.msra.gmra.mxu0 %vm4575_vm3, %v15653_v45  ;;  %v7156_v45 = vsel %vm4575_vm3, %v15972_v51, 0  ;;  %v4460_v51 = vpop.permute.xlu0 %4459 }
 0x380   : > { %12931 = vmatpush3.bf16.xpose.msra.mxu0 %v7064_v42  ;;  %12932 = vmatprep.mubr.msk.bf16.mxu0 %vm14206_vm2, %v18138_v33  ;;  %v7432_v4 = vsel %vm4575_vm3, %v4460_v51, 0  ;;  %v16335_v42 = vpop.permute.xlu1 %4507  ;;  %v18188_v51 = vld [vmem:[#allocation57_spill] sm:$0xff] }
 0x381   : > { %12942 = vmatprep.subr.bf16.mxu0 %v18138_v33  ;;  %18185 = vst [vmem:[#allocation38_spill] sm:$0xff] %v16335_v42 }
 0x383   : > { %v16222_v10 = vpop.f32.mrf.mxu0  ;;  %v16286_v15 = vpop.permute.xlu0 %4493 }
 0x384   : > { %v7568_v43 = vsel %vm4575_vm3, %v16222_v10, -inf  ;;  %12927 = vmatmul.mubr.msk.bf16.vlgmr.msra.gmra.mxu1 %vm4575_vm3, %v15669_v49 }
 0x385   : > { %v12706_v0 = vpop.f32.mrf.mxu0  ;;  %7569 = vmax.xlane.f32.xlu1 %v7568_v43  ;;  %12937 = vmatpush3.bf16.xpose.msra.mxu1 %v7110_v46 }
 0x386   : > { %12938 = vmatprep.mubr.msk.bf16.mxu1 %vm14206_vm2, %v18138_v33  ;;  %12948 = vmatprep.subr.bf16.mxu1 %v18138_v33 }
 0x387   : > { %v5355_v62 = vpop.f32.mrf.mxu0  ;;  %12933 = vmatmul.mubr.msk.bf16.vlgmr.msra.gmra.mxu0 %vm4575_vm3, %v15707_v38  ;;  %v7248_v38 = vsel %vm4575_vm3, %v16037_v59, 0  ;;  %v16299_v22 = vpop.permute.xlu0 %4497 }
 0x388   : > { %12943 = vmatpush3.bf16.xpose.msra.mxu0 %v7156_v45  ;;  %12944 = vmatprep.mubr.msk.bf16.mxu0 %vm14206_vm2, %v18138_v33  ;;  %18175 = vst [vmem:[#allocation36_spill] sm:$0xff] %v16299_v22  ;;  %v7534_v45 = vpop.xlane.xlu1 %7533 }
 0x389   : > { %v12707_v49 = vpop.f32.mrf.mxu0  ;;  %12954 = vmatprep.subr.bf16.mxu0 %v18138_v33 }
 0x38b   : > { %v16319_v17 = vpop.permute.xlu0 %4501 }
 0x38c   : > { %12939 = vmatmul.mubr.msk.bf16.vlgmr.msra.gmra.mxu1 %vm4575_vm3, %v15723_v16  ;;  %18180 = vst [vmem:[#allocation37_spill] sm:$0xff] %v16319_v17 }
 0x38d   : > { %12949 = vmatpush3.bf16.xpose.msra.mxu1 %v7202_v7  ;;  %12950 = vmatprep.mubr.msk.bf16.mxu1 %vm14206_vm2, %v18138_v33 }
 0x38e   : > { %12960 = vmatprep.subr.bf16.mxu1 %v18138_v33 }
 0x38f   : > { %v16249_v29 = vpop.f32.mrf.mxu1  ;;  %12945 = vmatmul.mubr.msk.bf16.vlgmr.msra.gmra.mxu0 %vm4575_vm3, %v15721_v63  ;;  %v16331_v18 = vpop.permute.xlu0 %4505 }
 0x390   : > { %12955 = vmatpush3.bf16.xpose.msra.mxu0 %v7248_v38  ;;  %v7571_v36 = vsel %vm4575_vm3, %v16249_v29, -inf  ;;  %12956 = vmatprep.mubr.msk.bf16.mxu0 %vm14206_vm2, %v18138_v33  ;;  %18184 = vst [vmem:[#allocation39_spill] sm:$0xff] %v16331_v18 }
 0x391   : > { %7572 = vmax.xlane.f32.xlu0 %v7571_v36  ;;  %v12712_v16 = vpop.f32.mrf.mxu1  ;;  %12966 = vmatprep.subr.bf16.mxu0 %v18138_v33 }
 0x393   : > { %v5401_v21 = vpop.f32.mrf.mxu1  ;;  %v16258_v25 = vpop.f32.mrf.mxu0 }
 0x394   : > { %v7574_v63 = vsel %vm4575_vm3, %v16258_v25, -inf  ;;  %12951 = vmatmul.mubr.msk.bf16.vlgmr.msra.gmra.mxu1 %vm4575_vm3, %v18169_v24  ;;  %v16339_v62 = vpop.permute.xlu0 %4509 }
 0x395   : > { %v12718_v19 = vpop.f32.mrf.mxu0  ;;  %7575 = vmax.xlane.f32.xlu1 %v7574_v63  ;;  %v12713_v28 = vpop.f32.mrf.mxu1  ;;  %12961 = vmatpush3.bf16.xpose.msra.mxu1 %v7294_v14  ;;  %18186 = vst [vmem:[#allocation41_spill] sm:$0xff] %v16339_v62 }
 0x396   : > { %12962 = vmatprep.mubr.msk.bf16.mxu1 %vm14206_vm2, %v18138_v33  ;;  %12972 = vmatprep.subr.bf16.mxu1 %v18138_v33  ;;  %v7525_v63 = vpop.xlane.xlu1 %7524  ;;  %v18187_v28 = vld [vmem:[#allocation47_spill] sm:$0xff] }
 0x397   : > { %v5447_v2 = vpop.f32.mrf.mxu0  ;;  %12957 = vmatmul.mubr.msk.bf16.vlgmr.msra.gmra.mxu0 %vm4575_vm3, %v18171_v48 }
 0x398   : > { %12967 = vmatpush3.bf16.xpose.msra.mxu0 %v7340_v57  ;;  %12968 = vmatprep.mubr.msk.bf16.mxu0 %vm14206_vm2, %v18138_v33  ;;  %v7522_v16 = vpop.xlane.xlu0 %7521  ;;  %v7713_v2 = vsub.f32 %v18188_v51, %v7525_v63 }
 0x399   : > { %v12719_v26 = vpop.f32.mrf.mxu0  ;;  %12978 = vmatprep.subr.bf16.mxu0 %v18138_v33  ;;  %v7712_v58 = vsub.f32 %v18187_v28, %v7522_v16  ;;  %v18192_v28 = vld [vmem:[#allocation61_spill] sm:$0xff] }
 0x39b   : > { %v16276_v13 = vpop.f32.mrf.mxu0  ;;  %v7776_v30 = vmul.f32 1.442695, %v7712_v58 }
 0x39c   : > { %v7580_v59 = vsel %vm4575_vm3, %v16276_v13, -inf  ;;  %v16282_v39 = vpop.f32.mrf.mxu1  ;;  %12963 = vmatmul.mubr.msk.bf16.vlgmr.msra.gmra.mxu1 %vm4575_vm3, %v18173_v37 }
 0x39d   : > { %v12730_v50 = vpop.f32.mrf.mxu0  ;;  %7581 = vmax.xlane.f32.xlu1 %v7580_v59  ;;  %12973 = vmatpush3.bf16.xpose.msra.mxu1 %v7386_v56  ;;  %v7577_v3 = vsel %vm4575_vm3, %v16282_v39, -inf  ;;  %v18189_v56 = vld [vmem:[#allocation53_spill] sm:$0xff]  ;;  %13653 = vpow2.f32 %v7776_v30 }
 0x39e   : > { %7578 = vmax.xlane.f32.xlu0 %v7577_v3  ;;  %v12724_v20 = vpop.f32.mrf.mxu1  ;;  %12974 = vmatprep.mubr.msk.bf16.mxu1 %vm14206_vm2, %v18138_v33  ;;  %v7716_v59 = vsub.f32 %v18189_v56, %v7534_v45  ;;  %v7778_v50 = vmul.f32 1.442695, %v7713_v2  ;;  %v18193_v2 = vld [vmem:[#allocation63_spill] sm:$0xff] }
 0x39f   : > { %v5539_v31 = vpop.f32.mrf.mxu0  ;;  %12969 = vmatmul.mubr.msk.bf16.vlgmr.msra.gmra.mxu0 %vm4575_vm3, %v18174_v55  ;;  %12984 = vmatprep.subr.bf16.mxu1 %v18138_v33 }
 0x3a0   : > { %12979 = vmatpush3.bf16.xpose.msra.mxu0 %v7432_v4  ;;  %v5493_v32 = vpop.f32.mrf.mxu1  ;;  %12980 = vmatprep.mubr.msk.bf16.mxu0 %vm14206_vm2, %v18138_v33  ;;  %v7784_v20 = vmul.f32 1.442695, %v7716_v59  ;;  %13655 = vpow2.f32 %v7778_v50  ;;  %v7540_v31 = vpop.xlane.xlu1 %7539 }
 0x3a1   : > { %v12731_v8 = vpop.f32.mrf.mxu0  ;;  %12990 = vmatprep.subr.bf16.mxu0 %v18138_v33  ;;  %v18190_v32 = vld [vmem:[#allocation58_spill] sm:$0xff] }
 0x3a2   : > { %v12725_v11 = vpop.f32.mrf.mxu1  ;;  %13657 = vpow2.f32 %v7784_v20  ;;  %v7718_v8 = vsub.f32 %v18190_v32, %v7540_v31 }
 0x3a4   : > { %12975 = vmatmul.mubr.msk.bf16.vlgmr.msra.gmra.mxu1 %vm4575_vm3, %v18177_v40  ;;  %v16306_v41 = vpop.f32.mrf.mxu1  ;;  %v7788_v11 = vmul.f32 1.442695, %v7718_v8  ;;  %v7528_v40 = vpop.xlane.xlu0 %7527 }
 0x3a5   : > { %12985 = vmatpush3.bf16.xpose.msra.mxu1 %v7478_v23  ;;  %v7583_v44 = vsel %vm4575_vm3, %v16306_v41, -inf  ;;  %12986 = vmatprep.mubr.msk.bf16.mxu1 %vm14206_vm2, %v18138_v33 }
 0x3a6   : > { %7584 = vmax.xlane.f32.xlu0 %v7583_v44  ;;  %v12736_v52 = vpop.f32.mrf.mxu1  ;;  %12996 = vmatprep.subr.bf16.mxu1 %v18138_v33  ;;  %13659 = vpow2.f32 %v7788_v11  ;;  %v18194_v11 = vld [vmem:[#allocation64_spill] sm:$0xff] }
 0x3a7   : > { %12981 = vmatmul.mubr.msk.bf16.vlgmr.msra.gmra.mxu0 %vm4575_vm3, %v18178_v54 }
 0x3a8   : > { %12991 = vmatpush3.bf16.msra.mxu0 %v8293_v47  ;;  %v5585_v1 = vpop.f32.mrf.mxu1  ;;  %12992 = vmatprep.mubr.msk.bf16.mxu0 %vm14206_vm2, %v18138_v33 }
 0x3a9   : > { %13002 = vmatprep.subr.bf16.mxu0 %v18138_v33 }
 0x3aa   : > { %v12737_v6 = vpop.f32.mrf.mxu1  ;;  %v16363_v54 = vpop.eup %13653 }
 0x3ac   : > { %12987 = vmatmul.mubr.msk.bf16.vlgmr.msra.gmra.mxu1 %vm4575_vm3, %v18182_v12 }
 0x3ad   : > { %12997 = vmatpush3.bf16.msra.mxu1 %v8339_v34  ;;  %12998 = vmatprep.mubr.msk.bf16.mxu1 %vm14206_vm2, %v18138_v33  ;;  %v16367_v6 = vpop.eup %13655 }
 0x3ae   : > { %13008 = vmatprep.subr.bf16.mxu1 %v18138_v33 }
 0x3af   : > { %v16333_v27 = vpop.f32.mrf.mxu0 }
 0x3b0   : > { %v7586_v46 = vsel %vm4575_vm3, %v16333_v27, -inf }
 0x3b1   : > { %v12742_v43 = vpop.f32.mrf.mxu0  ;;  %7587 = vmax.xlane.f32.xlu1 %v7586_v46  ;;  %v18191_v46 = vld [vmem:[#allocation59_spill] sm:$0xff] }
 0x3b2   : > { %v7714_v43 = vsub.f32 %v18191_v46, %v7528_v40 }
 0x3b3   : > { %v5631_v0 = vpop.f32.mrf.mxu0 }
 0x3b4   : > { %v7904_v0 = vsel %vm4575_vm3, %v16363_v54, 0.0 }
 0x3b5   : > { %v12743_v49 = vpop.f32.mrf.mxu0 }
 0x3b6   : > { %v16372_v49 = vpop.eup %13657 }
 0x3b7   : > { %v16341_v7 = vpop.f32.mrf.mxu0  ;;  %v16388_v20 = vpop.eup %13659 }
 0x3b8   : > { %v7592_v38 = vsel %vm4575_vm3, %v16341_v7, -inf  ;;  %v16345_v36 = vpop.f32.mrf.mxu1 }
 0x3b9   : > { %v12754_v21 = vpop.f32.mrf.mxu0  ;;  %7593 = vmax.xlane.f32.xlu1 %v7592_v38  ;;  %v7589_v14 = vsel %vm4575_vm3, %v16345_v36, -inf  ;;  %v7546_v38 = vpop.xlane.xlu1 %7545 }
 0x3ba   : > { %7590 = vmax.xlane.f32.xlu0 %v7589_v14  ;;  %v12748_v24 = vpop.f32.mrf.mxu1  ;;  %v7907_v21 = vsel %vm4575_vm3, %v16367_v6, 0.0  ;;  %v7531_v14 = vpop.xlane.xlu0 %7530  ;;  %v7720_v58 = vsub.f32 %v18192_v28, %v7546_v38 }
 0x3bb   : > { %v5723_v19 = vpop.f32.mrf.mxu0 }
 0x3bc   : > { %v5677_v57 = vpop.f32.mrf.mxu1  ;;  %v7780_v19 = vmul.f32 1.442695, %v7714_v43  ;;  %v7792_v50 = vmul.f32 1.442695, %v7720_v58 }
 0x3bd   : > { %v12755_v48 = vpop.f32.mrf.mxu0  ;;  %v7916_v57 = vsel %vm4575_vm3, %v16372_v49, 0.0  ;;  %v7552_v31 = vpop.xlane.xlu1 %7551 }
 0x3be   : > { %v12749_v26 = vpop.f32.mrf.mxu1  ;;  %v7715_v48 = vsub.f32 %v18193_v2, %v7531_v14  ;;  %13661 = vpow2.f32 %v7780_v19  ;;  %v7537_v32 = vpop.xlane.xlu0 %7536  ;;  %v7722_v40 = vsub.f32 %v18194_v11, %v7552_v31  ;;  %v18197_v14 = vld [vmem:[#allocation67_spill] sm:$0xff]  ;;  %v18198_v31 = vld [vmem:[#allocation69_spill] sm:$0xff] }
 0x3bf   : > { %13663 = vpow2.f32 %v7792_v50  ;;  %v18199_v11 = vld [vmem:[#allocation71_spill] sm:$0xff] }
 0x3c0   : > { %v16352_v37 = vpop.f32.mrf.mxu1 }
 0x3c1   : > { %v7595_v3 = vsel %vm4575_vm3, %v16352_v37, -inf  ;;  %v7558_v46 = vpop.xlane.xlu1 %7557 }
 0x3c2   : > { %7596 = vmax.xlane.f32.xlu0 %v7595_v3  ;;  %v12760_v9 = vpop.f32.mrf.mxu1  ;;  %v7543_v43 = vpop.xlane.xlu0 %7542 }
 0x3c4   : > { %v5769_v4 = vpop.f32.mrf.mxu1 }
 0x3c5   : > { %v7782_v4 = vmul.f32 1.442695, %v7715_v48 }
 0x3c6   : > { %v12761_v55 = vpop.f32.mrf.mxu1 }
 0x3c7   : > { %13665 = vpow2.f32 %v7782_v4 }
 0x3cf   : > { %v16357_v23 = vpop.f32.mrf.mxu0 }
 0x3d0   : > { %v7598_v44 = vsel %vm4575_vm3, %v16357_v23, -inf  ;;  %v16361_v52 = vpop.f32.mrf.mxu1 }
 0x3d1   : > { %v12766_v47 = vpop.f32.mrf.mxu0  ;;  %7599 = vmax.xlane.f32.xlu1 %v7598_v44  ;;  %v7601_v1 = vsel %vm4575_vm3, %v16361_v52, -inf  ;;  %v7922_v44 = vsel %vm4575_vm3, %v16388_v20, 0.0 }
 0x3d2   : > { %7602 = vmax.xlane.f32.xlu0 %v7601_v1  ;;  %v12772_v12 = vpop.f32.mrf.mxu1  ;;  %v18195_v47 = vld [vmem:[#allocation65_spill] sm:$0xff] }
 0x3d3   : > { %v5815_v34 = vpop.f32.mrf.mxu0  ;;  %v7717_v1 = vsub.f32 %v18195_v47, %v7537_v32  ;;  %v7796_v12 = vmul.f32 1.442695, %v7722_v40 }
 0x3d4   : > { %v5861_v45 = vpop.f32.mrf.mxu1 }
 0x3d5   : > { %v12767_v16 = vpop.f32.mrf.mxu0  ;;  %7905 = vadd.xlane.f32.xlu1 %v7904_v0  ;;  %v7786_v34 = vmul.f32 1.442695, %v7717_v1  ;;  %13667 = vpow2.f32 %v7796_v12  ;;  %v18196_v45 = vld [vmem:[#allocation66_spill] sm:$0xff] }
 0x3d6   : > { %7908 = vadd.xlane.f32.xlu0 %v7907_v21  ;;  %v12773_v63 = vpop.f32.mrf.mxu1  ;;  %v7724_v38 = vsub.f32 %v18196_v45, %v7558_v46  ;;  %v16399_v21 = vpop.eup %13661 }
 0x3d7   : > { %v16376_v24 = vpop.f32.mrf.mxu0  ;;  %13669 = vpow2.f32 %v7786_v34  ;;  %v7719_v63 = vsub.f32 %v18197_v14, %v7543_v43  ;;  %v16406_v48 = vpop.eup %13663 }
 0x3d8   : > { %v16381_v51 = vpop.f32.mrf.mxu1  ;;  %v7604_v3 = vsel %vm4575_vm3, %v16376_v24, -inf  ;;  %v7800_v58 = vmul.f32 1.442695, %v7724_v38  ;;  %v16410_v50 = vpop.eup %13665  ;;  %v7928_v32 = vsel %vm4575_vm3, %v16406_v48, 0.0 }
 0x3d9   : > { %v12778_v26 = vpop.f32.mrf.mxu0  ;;  %7917 = vadd.xlane.f32.xlu1 %v7916_v57  ;;  %v7607_v30 = vsel %vm4575_vm3, %v16381_v51, -inf  ;;  %v7910_v57 = vsel %vm4575_vm3, %v16399_v21, 0.0  ;;  %v7913_v47 = vsel %vm4575_vm3, %v16410_v50, 0.0 }
 0x3da   : > { %7608 = vmax.xlane.f32.xlu0 %v7607_v30  ;;  %v12784_v56 = vpop.f32.mrf.mxu1  ;;  %v7790_v26 = vmul.f32 1.442695, %v7719_v63  ;;  %v7564_v30 = vpop.xlane.xlu1 %7563  ;;  %13671 = vpow2.f32 %v7800_v58 }
 0x3db   : > { %v5907_v59 = vpop.f32.mrf.mxu0 }
 0x3dc   : > { %v5953_v9 = vpop.f32.mrf.mxu1  ;;  %13673 = vpow2.f32 %v7790_v26 }
 0x3dd   : > { %v12779_v55 = vpop.f32.mrf.mxu0  ;;  %7605 = vmax.xlane.f32.xlu1 %v7604_v3  ;;  %v7549_v3 = vpop.xlane.xlu0 %7548 }
 0x3de   : > { %v12785_v8 = vpop.f32.mrf.mxu1  ;;  %v7726_v55 = vsub.f32 %v18198_v31, %v7564_v30  ;;  %v7721_v40 = vsub.f32 %v18199_v11, %v7549_v3  ;;  %v18200_v30 = vld [vmem:[#allocation72_spill] sm:$0xff] }
 0x3e0   : > { %v7804_v34 = vmul.f32 1.442695, %v7726_v55  ;;  %v7794_v38 = vmul.f32 1.442695, %v7721_v40 }
 0x3e1   : > { %7923 = vadd.xlane.f32.xlu1 %v7922_v44 }
 0x3e2   : > { %v16424_v45 = vpop.eup %13667  ;;  %13675 = vpow2.f32 %v7804_v34 }
 0x3e3   : > { %13677 = vpow2.f32 %v7794_v38 }
 0x3e4   : > { %v16428_v63 = vpop.eup %13669 }
 0x3e5   : > { %v7919_v3 = vsel %vm4575_vm3, %v16428_v63, 0.0 }
 0x3e7   : > { %v16394_v0 = vpop.f32.mrf.mxu0 }
 0x3e8   : > { %v7610_v16 = vsel %vm4575_vm3, %v16394_v0, -inf }
 0x3e9   : > { %v12790_v19 = vpop.f32.mrf.mxu0  ;;  %7611 = vmax.xlane.f32.xlu1 %v7610_v16 }
 0x3ea   : > { %v7555_v19 = vpop.xlane.xlu0 %7554 }
 0x3eb   : > { %v5999_v28 = vpop.f32.mrf.mxu0 }
 0x3ec   : > { %v16404_v2 = vpop.f32.mrf.mxu1 }
 0x3ed   : > { %v12791_v56 = vpop.f32.mrf.mxu0  ;;  %7911 = vadd.xlane.f32.xlu1 %v7910_v57  ;;  %v7613_v59 = vsel %vm4575_vm3, %v16404_v2, -inf  ;;  %v7934_v57 = vsel %vm4575_vm3, %v16424_v45, 0.0 }
 0x3ee   : > { %7614 = vmax.xlane.f32.xlu0 %v7613_v59  ;;  %v12796_v9 = vpop.f32.mrf.mxu1  ;;  %v7723_v56 = vsub.f32 %v18200_v30, %v7555_v19 }
 0x3ef   : > { %v16412_v4 = vpop.f32.mrf.mxu0 }
 0x3f0   : > { %v6045_v8 = vpop.f32.mrf.mxu1  ;;  %v7616_v46 = vsel %vm4575_vm3, %v16412_v4, -inf  ;;  %v7798_v11 = vmul.f32 1.442695, %v7723_v56 }
 0x3f1   : > { %v12802_v44 = vpop.f32.mrf.mxu0  ;;  %7929 = vadd.xlane.f32.xlu1 %v7928_v32  ;;  %v16441_v8 = vpop.eup %13671 }
 0x3f2   : > { %7914 = vadd.xlane.f32.xlu0 %v7913_v47  ;;  %v12797_v1 = vpop.f32.mrf.mxu1  ;;  %v16445_v47 = vpop.eup %13673  ;;  %13679 = vpow2.f32 %v7798_v11 }
 0x3f3   : > { %v6091_v12 = vpop.f32.mrf.mxu0  ;;  %v7561_v1 = vpop.xlane.xlu0 %7560 }
 0x3f4   : > { %v16422_v43 = vpop.f32.mrf.mxu1 }
 0x3f5   : > { %v12803_v16 = vpop.f32.mrf.mxu0  ;;  %7617 = vmax.xlane.f32.xlu1 %v7616_v46  ;;  %v7619_v14 = vsel %vm4575_vm3, %v16422_v43, -inf  ;;  %v7940_v46 = vsel %vm4575_vm3, %v16441_v8, 0.0 }
 0x3f6   : > { %7620 = vmax.xlane.f32.xlu0 %v7619_v14  ;;  %v12808_v28 = vpop.f32.mrf.mxu1  ;;  %v18201_v16 = vld [vmem:[#allocation73_spill] sm:$0xff] }
 0x3f7   : > { %v16430_v58 = vpop.f32.mrf.mxu0  ;;  %v7725_v14 = vsub.f32 %v18201_v16, %v7561_v1  ;;  %v7925_v28 = vsel %vm4575_vm3, %v16445_v47, 0.0  ;;  %v7567_v11 = vpop.xlane.xlu0 %7566 }
 0x3f8   : > { %v6137_v26 = vpop.f32.mrf.mxu1  ;;  %v7622_v55 = vsel %vm4575_vm3, %v16430_v58, -inf }
 0x3f9   : > { %v12814_v59 = vpop.f32.mrf.mxu0  ;;  %7935 = vadd.xlane.f32.xlu1 %v7934_v57 }
 0x3fa   : > { %7920 = vadd.xlane.f32.xlu0 %v7919_v3  ;;  %v12809_v9 = vpop.f32.mrf.mxu1  ;;  %v16458_v59 = vpop.eup %13675  ;;  %v7802_v3 = vmul.f32 1.442695, %v7725_v14 }
 0x3fb   : > { %v6183_v31 = vpop.f32.mrf.mxu0  ;;  %v7946_v1 = vsel %vm4575_vm3, %v16458_v59, 0.0 }
 0x3fc   : > { %v16439_v32 = vpop.f32.mrf.mxu1  ;;  %13681 = vpow2.f32 %v7802_v3 }
 0x3fd   : > { %v12815_v40 = vpop.f32.mrf.mxu0  ;;  %7623 = vmax.xlane.f32.xlu1 %v7622_v55  ;;  %v7625_v44 = vsel %vm4575_vm3, %v16439_v32, -inf  ;;  %v16462_v55 = vpop.eup %13677 }
 0x3fe   : > { %7626 = vmax.xlane.f32.xlu0 %v7625_v44  ;;  %v12820_v12 = vpop.f32.mrf.mxu1  ;;  %v7931_v14 = vsel %vm4575_vm3, %v16462_v55, 0.0 }
 0x3ff   : > { %v16447_v34 = vpop.f32.mrf.mxu0 }
 0x400   : > { %v6229_v38 = vpop.f32.mrf.mxu1  ;;  %v7628_v30 = vsel %vm4575_vm3, %v16447_v34, -inf }
 0x401   : > { %v12826_v19 = vpop.f32.mrf.mxu0  ;;  %7941 = vadd.xlane.f32.xlu1 %v7940_v46  ;;  %v18202_v46 = vld [vmem:[#allocation76_spill] sm:$0xff] }
 0x402   : > { %7926 = vadd.xlane.f32.xlu0 %v7925_v28  ;;  %v12821_v57 = vpop.f32.mrf.mxu1  ;;  %v7727_v38 = vsub.f32 %v18202_v46, %v7567_v11 }
 0x403   : > { %v6275_v26 = vpop.f32.mrf.mxu0 }
 0x404   : > { %v16456_v56 = vpop.f32.mrf.mxu1 }
 0x405   : > { %v12827_v9 = vpop.f32.mrf.mxu0  ;;  %7629 = vmax.xlane.f32.xlu1 %v7628_v30  ;;  %v7631_v31 = vsel %vm4575_vm3, %v16456_v56, -inf  ;;  %v7806_v30 = vmul.f32 1.442695, %v7727_v38 }
 0x406   : > { %7632 = vmax.xlane.f32.xlu0 %v7631_v31  ;;  %v12832_v40 = vpop.f32.mrf.mxu1  ;;  %v16477_v31 = vpop.eup %13679 }
 0x407   : > { %v16464_v44 = vpop.f32.mrf.mxu0  ;;  %13683 = vpow2.f32 %v7806_v30  ;;  %v7937_v38 = vsel %vm4575_vm3, %v16477_v31, 0.0 }
 0x408   : > { %v6321_v12 = vpop.f32.mrf.mxu1  ;;  %v7634_v57 = vsel %vm4575_vm3, %v16464_v44, -inf }
 0x409   : > { %v12838_v16 = vpop.f32.mrf.mxu0  ;;  %7947 = vadd.xlane.f32.xlu1 %v7946_v1 }
 0x40a   : > { %7932 = vadd.xlane.f32.xlu0 %v7931_v14  ;;  %v12833_v19 = vpop.f32.mrf.mxu1 }
 0x40b   : > { %v6367_v28 = vpop.f32.mrf.mxu0 }
 0x40c   : > { %v16473_v26 = vpop.f32.mrf.mxu1 }
 0x40d   : > { %v12839_v9 = vpop.f32.mrf.mxu0  ;;  %7635 = vmax.xlane.f32.xlu1 %v7634_v57  ;;  %v7637_v3 = vsel %vm4575_vm3, %v16473_v26, -inf }
 0x40e   : > { %7638 = vmax.xlane.f32.xlu0 %v7637_v3  ;;  %v12844_v11 = vpop.f32.mrf.mxu1  ;;  %v16489_v9 = vpop.eup %13681 }
 0x40f   : > { %v16479_v40 = vpop.f32.mrf.mxu0 }
 0x410   : > { %v7640_v1 = vsel %vm4575_vm3, %v16479_v40, -inf  ;;  %v6413_v12 = vpop.f32.mrf.mxu1 }
 0x411   : > { %v12850_v46 = vpop.f32.mrf.mxu0  ;;  %7641 = vmax.xlane.f32.xlu1 %v7640_v1 }
 0x412   : > { %7938 = vadd.xlane.f32.xlu0 %v7937_v38  ;;  %v12845_v16 = vpop.f32.mrf.mxu1  ;;  %v7943_v46 = vsel %vm4575_vm3, %v16489_v9, 0.0 }
 0x413   : > { %v6459_v14 = vpop.f32.mrf.mxu0 }
 0x414   : > { %v16485_v19 = vpop.f32.mrf.mxu1 }
 0x415   : > { %v12851_v28 = vpop.f32.mrf.mxu0  ;;  %v7643_v57 = vsel %vm4575_vm3, %v16485_v19, -inf }
 0x416   : > { %7644 = vmax.xlane.f32.xlu0 %v7643_v57  ;;  %v12856_v3 = vpop.f32.mrf.mxu1 }
 0x417   : > { %v16491_v11 = vpop.f32.mrf.mxu0  ;;  %v16501_v3 = vpop.eup %13683 }
 0x418   : > { %v7646_v30 = vsel %vm4575_vm3, %v16491_v11, -inf  ;;  %v6505_v1 = vpop.f32.mrf.mxu1 }
 0x419   : > { %v12862_v12 = vpop.f32.mrf.mxu0  ;;  %7647 = vmax.xlane.f32.xlu1 %v7646_v30 }
 0x41a   : > { %7944 = vadd.xlane.f32.xlu0 %v7943_v46  ;;  %v12857_v38 = vpop.f32.mrf.mxu1  ;;  %v7949_v46 = vsel %vm4575_vm3, %v16501_v3, 0.0 }
 0x41b   : > { %v6551_v16 = vpop.f32.mrf.mxu0 }
 0x41c   : > { %v16497_v14 = vpop.f32.mrf.mxu1 }
 0x41d   : > { %v12863_v28 = vpop.f32.mrf.mxu0  ;;  %v7649_v57 = vsel %vm4575_vm3, %v16497_v14, -inf }
 0x41e   : > { %7650 = vmax.xlane.f32.xlu0 %v7649_v57  ;;  %v12868_v62 = vpop.f32.mrf.mxu1 }
 0x41f   : > { %v16503_v42 = vpop.f32.mrf.mxu0 }
 0x420   : > { %18203 = vst [vmem:[#allocation42_spill] sm:$0xff] %v16503_v42  ;;  %v7652_v30 = vsel %vm4575_vm3, %v16503_v42, -inf  ;;  %v6597_v1 = vpop.f32.mrf.mxu1 }
 0x421   : > { %v12874_v12 = vpop.f32.mrf.mxu0  ;;  %7653 = vmax.xlane.f32.xlu1 %v7652_v30 }
 0x422   : > { %7950 = vadd.xlane.f32.xlu0 %v7949_v46  ;;  %v12869_v38 = vpop.f32.mrf.mxu1 }
 0x423   : > { %v6643_v16 = vpop.f32.mrf.mxu0 }
 0x424   : > { %v16509_v28 = vpop.f32.mrf.mxu1 }
 0x425   : > { %18204 = vst [vmem:[#allocation45_spill] sm:$0xff] %v16509_v28  ;;  %v12875_v18 = vpop.f32.mrf.mxu0  ;;  %v7655_v62 = vsel %vm4575_vm3, %v16509_v28, -inf }
 0x426   : > { %7656 = vmax.xlane.f32.xlu0 %v7655_v62  ;;  %v12880_v57 = vpop.f32.mrf.mxu1 }
 0x427   : > { %v16513_v61 = vpop.f32.mrf.mxu0 }
 0x428   : > { %18205 = vst [vmem:[#allocation47_spill] sm:$0xff] %v16513_v61  ;;  %v7658_v1 = vsel %vm4575_vm3, %v16513_v61, -inf  ;;  %v6689_v30 = vpop.f32.mrf.mxu1  ;;  %v7570_v61 = vpop.xlane.xlu1 %7569 }
 0x429   : > { %v12886_v12 = vpop.f32.mrf.mxu0  ;;  %7659 = vmax.xlane.f32.xlu1 %v7658_v1 }
 0x42a   : > { %v12881_v42 = vpop.f32.mrf.mxu1  ;;  %v7728_v12 = vsub.f32 %v16222_v10, %v7570_v61 }
 0x42b   : > { %v6735_v46 = vpop.f32.mrf.mxu0 }
 0x42c   : > { %v16517_v38 = vpop.f32.mrf.mxu1 }
 0x42d   : > { %18206 = vst [vmem:[#allocation57_spill] sm:$0xff] %v16517_v38  ;;  %v12887_v16 = vpop.f32.mrf.mxu0  ;;  %v7661_v18 = vsel %vm4575_vm3, %v16517_v38, -inf }
 0x42e   : > { %7662 = vmax.xlane.f32.xlu0 %v7661_v18  ;;  %v12892_v28 = vpop.f32.mrf.mxu1 }
 0x42f   : > { %v16521_v62 = vpop.f32.mrf.mxu0  ;;  %v7573_v28 = vpop.xlane.xlu0 %7572 }
 0x430   : > { %18207 = vst [vmem:[#allocation53_spill] sm:$0xff] %v16521_v62  ;;  %v7664_v57 = vsel %vm4575_vm3, %v16521_v62, -inf  ;;  %v6781_v17 = vpop.f32.mrf.mxu1  ;;  %v7808_v62 = vmul.f32 1.442695, %v7728_v12 }
 0x431   : > { %v12898_v30 = vpop.f32.mrf.mxu0  ;;  %7665 = vmax.xlane.f32.xlu1 %v7664_v57 }
 0x432   : > { %v12893_v1 = vpop.f32.mrf.mxu1  ;;  %v7729_v30 = vsub.f32 %v16249_v29, %v7573_v28  ;;  %13685 = vpow2.f32 %v7808_v62 }
 0x433   : > { %v6827_v42 = vpop.f32.mrf.mxu0  ;;  %v7576_v1 = vpop.xlane.xlu1 %7575 }
 0x434   : > { %v16526_v46 = vpop.f32.mrf.mxu1  ;;  %v7579_v22 = vpop.xlane.xlu0 %7578 }
 0x435   : > { %18208 = vst [vmem:[#allocation58_spill] sm:$0xff] %v16526_v46  ;;  %v12899_v16 = vpop.f32.mrf.mxu0  ;;  %v7667_v18 = vsel %vm4575_vm3, %v16526_v46, -inf }
 0x436   : > { %7668 = vmax.xlane.f32.xlu0 %v7667_v18  ;;  %v12904_v38 = vpop.f32.mrf.mxu1  ;;  %v7730_v16 = vsub.f32 %v16258_v25, %v7576_v1  ;;  %v7731_v25 = vsub.f32 %v16282_v39, %v7579_v22 }
 0x437   : > { %v16530_v35 = vpop.f32.mrf.mxu0  ;;  %v7810_v38 = vmul.f32 1.442695, %v7729_v30  ;;  %v7582_v62 = vpop.xlane.xlu1 %7581 }
 0x438   : > { %18209 = vst [vmem:[#allocation59_spill] sm:$0xff] %v16530_v35  ;;  %v7670_v17 = vsel %vm4575_vm3, %v16530_v35, -inf  ;;  %v6873_v57 = vpop.f32.mrf.mxu1  ;;  %v7812_v29 = vmul.f32 1.442695, %v7730_v16 }
 0x439   : > { %v12910_v10 = vpop.f32.mrf.mxu0  ;;  %7671 = vmax.xlane.f32.xlu1 %v7670_v17  ;;  %13687 = vpow2.f32 %v7810_v38 }
 0x43a   : > { %v12905_v61 = vpop.f32.mrf.mxu1  ;;  %13689 = vpow2.f32 %v7812_v29 }
 0x43b   : > { %v6919_v42 = vpop.f32.mrf.mxu0  ;;  %v7732_v61 = vsub.f32 %v16276_v13, %v7582_v62 }
 0x43c   : > { %v16536_v46 = vpop.f32.mrf.mxu1 }
 0x43d   : > { %18210 = vst [vmem:[#allocation61_spill] sm:$0xff] %v16536_v46  ;;  %v12911_v18 = vpop.f32.mrf.mxu0  ;;  %v7673_v12 = vsel %vm4575_vm3, %v16536_v46, -inf  ;;  %v7816_v39 = vmul.f32 1.442695, %v7732_v61  ;;  %v18225_v46 = vld [vmem:[#allocation30_spill] sm:$0xff] }
 0x43e   : > { %7674 = vmax.xlane.f32.xlu0 %v7673_v12  ;;  %v12916_v57 = vpop.f32.mrf.mxu1  ;;  %v7814_v18 = vmul.f32 1.442695, %v7731_v25  ;;  %v7588_v12 = vpop.xlane.xlu1 %7587 }
 0x43f   : > { %v16540_v35 = vpop.f32.mrf.mxu0  ;;  %v7734_v22 = vsub.f32 %v16333_v27, %v7588_v12 }
 0x440   : > { %18211 = vst [vmem:[#allocation63_spill] sm:$0xff] %v16540_v35  ;;  %v7676_v28 = vsel %vm4575_vm3, %v16540_v35, -inf  ;;  %v6965_v17 = vpop.f32.mrf.mxu1  ;;  %13691 = vpow2.f32 %v7814_v18 }
 0x441   : > { %v12922_v1 = vpop.f32.mrf.mxu0  ;;  %7677 = vmax.xlane.f32.xlu1 %v7676_v28  ;;  %v7585_v17 = vpop.xlane.xlu0 %7584  ;;  %13693 = vpow2.f32 %v7816_v39 }
 0x442   : > { %v12917_v30 = vpop.f32.mrf.mxu1  ;;  %v16555_v28 = vpop.eup %13685  ;;  %v7733_v62 = vsub.f32 %v16306_v41, %v7585_v17 }
 0x443   : > { %v7011_v10 = vpop.f32.mrf.mxu0  ;;  %v7594_v25 = vpop.xlane.xlu1 %7593  ;;  %v7952_v27 = vsel %vm4575_vm3, %v16555_v28, 0.0 }
 0x444   : > { %v16546_v42 = vpop.f32.mrf.mxu1  ;;  %v7736_v61 = vsub.f32 %v16341_v7, %v7594_v25 }
 0x445   : > { %18212 = vst [vmem:[#allocation64_spill] sm:$0xff] %v16546_v42  ;;  %v12923_v16 = vpop.f32.mrf.mxu0  ;;  %v7679_v57 = vsel %vm4575_vm3, %v16546_v42, -inf  ;;  %v7591_v30 = vpop.xlane.xlu0 %7590 }
 0x446   : > { %7680 = vmax.xlane.f32.xlu0 %v7679_v57  ;;  %v12928_v38 = vpop.f32.mrf.mxu1  ;;  %v7820_v57 = vmul.f32 1.442695, %v7734_v22  ;;  %v7735_v18 = vsub.f32 %v16345_v36, %v7591_v30  ;;  %v16566_v17 = vpop.eup %13687  ;;  %v7824_v7 = vmul.f32 1.442695, %v7736_v61 }
 0x447   : > { %v16550_v35 = vpop.f32.mrf.mxu0  ;;  %v7818_v38 = vmul.f32 1.442695, %v7733_v62 }
 0x448   : > { %18213 = vst [vmem:[#allocation65_spill] sm:$0xff] %v16550_v35  ;;  %v7682_v29 = vsel %vm4575_vm3, %v16550_v35, -inf  ;;  %v7057_v13 = vpop.f32.mrf.mxu1  ;;  %13695 = vpow2.f32 %v7820_v57  ;;  %v7822_v36 = vmul.f32 1.442695, %v7735_v18 }
 0x449   : > { %v12934_v1 = vpop.f32.mrf.mxu0  ;;  %7683 = vmax.xlane.f32.xlu1 %v7682_v29  ;;  %13697 = vpow2.f32 %v7818_v38 }
 0x44a   : > { %v12929_v10 = vpop.f32.mrf.mxu1  ;;  %v16572_v1 = vpop.eup %13689  ;;  %13699 = vpow2.f32 %v7824_v7 }
 0x44b   : > { %v7103_v16 = vpop.f32.mrf.mxu0  ;;  %v7597_v29 = vpop.xlane.xlu0 %7596  ;;  %v7958_v57 = vsel %vm4575_vm3, %v16572_v1, 0.0  ;;  %13701 = vpow2.f32 %v7822_v36 }
 0x44c   : > { %v16561_v12 = vpop.f32.mrf.mxu1  ;;  %v7737_v30 = vsub.f32 %v16352_v37, %v7597_v29  ;;  %v7955_v16 = vsel %vm4575_vm3, %v16566_v17, 0.0 }
 0x44d   : > { %18214 = vst [vmem:[#allocation66_spill] sm:$0xff] %v16561_v12  ;;  %v12935_v13 = vpop.f32.mrf.mxu0  ;;  %7953 = vadd.xlane.f32.xlu1 %v7952_v27  ;;  %v7685_v41 = vsel %vm4575_vm3, %v16561_v12, -inf  ;;  %v16583_v18 = vpop.eup %13691 }
 0x44e   : > { %7686 = vmax.xlane.f32.xlu0 %v7685_v41  ;;  %v12940_v39 = vpop.f32.mrf.mxu1  ;;  %v7826_v41 = vmul.f32 1.442695, %v7737_v30  ;;  %v7961_v30 = vsel %vm4575_vm3, %v16583_v18, 0.0 }
 0x44f   : > { %v16568_v22 = vpop.f32.mrf.mxu0 }
 0x450   : > { %18215 = vst [vmem:[#allocation67_spill] sm:$0xff] %v16568_v22  ;;  %v7688_v25 = vsel %vm4575_vm3, %v16568_v22, -inf  ;;  %v7149_v62 = vpop.f32.mrf.mxu1  ;;  %13703 = vpow2.f32 %v7826_v41 }
 0x451   : > { %v12946_v10 = vpop.f32.mrf.mxu0  ;;  %7689 = vmax.xlane.f32.xlu1 %v7688_v25  ;;  %v16589_v62 = vpop.eup %13693 }
 0x452   : > { %7956 = vadd.xlane.f32.xlu0 %v7955_v16  ;;  %v12941_v27 = vpop.f32.mrf.mxu1 }
 0x453   : > { %v7195_v13 = vpop.f32.mrf.mxu0 }
 0x454   : > { %v16579_v61 = vpop.f32.mrf.mxu1 }
 0x455   : > { %18216 = vst [vmem:[#allocation69_spill] sm:$0xff] %v16579_v61  ;;  %v12947_v38 = vpop.f32.mrf.mxu0  ;;  %7959 = vadd.xlane.f32.xlu1 %v7958_v57  ;;  %v7691_v37 = vsel %vm4575_vm3, %v16579_v61, -inf  ;;  %v16599_v41 = vpop.eup %13695 }
 0x456   : > { %7692 = vmax.xlane.f32.xlu0 %v7691_v37  ;;  %v12952_v29 = vpop.f32.mrf.mxu1  ;;  %v7964_v38 = vsel %vm4575_vm3, %v16589_v62, 0.0 }
 0x457   : > { %v16585_v39 = vpop.f32.mrf.mxu0 }
 0x458   : > { %18217 = vst [vmem:[#allocation71_spill] sm:$0xff] %v16585_v39  ;;  %v7694_v7 = vsel %vm4575_vm3, %v16585_v39, -inf  ;;  %v7241_v25 = vpop.f32.mrf.mxu1 }
 0x459   : > { %v12958_v36 = vpop.f32.mrf.mxu0  ;;  %7695 = vmax.xlane.f32.xlu1 %v7694_v7 }
 0x45a   : > { %v7600_v10 = vpop.xlane.xlu1 %7599  ;;  %7962 = vadd.xlane.f32.xlu0 %v7961_v30  ;;  %v12953_v16 = vpop.f32.mrf.mxu1 }
 0x45b   : > { %v7738_v27 = vsub.f32 %v16357_v23, %v7600_v10  ;;  %v7287_v13 = vpop.f32.mrf.mxu0  ;;  %v7603_v57 = vpop.xlane.xlu0 %7602 }
 0x45c   : > { %v7739_v37 = vsub.f32 %v16361_v52, %v7603_v57  ;;  %v16597_v29 = vpop.f32.mrf.mxu1  ;;  %v16603_v30 = vpop.eup %13697  ;;  %v7970_v57 = vsel %vm4575_vm3, %v16599_v41, 0.0 }
 0x45d   : > { %18218 = vst [vmem:[#allocation72_spill] sm:$0xff] %v16597_v29  ;;  %v7828_v7 = vmul.f32 1.442695, %v7738_v27  ;;  %v12959_v25 = vpop.f32.mrf.mxu0  ;;  %7965 = vadd.xlane.f32.xlu1 %v7964_v38  ;;  %v7697_v36 = vsel %vm4575_vm3, %v16597_v29, -inf  ;;  %v7967_v29 = vsel %vm4575_vm3, %v16603_v30, 0.0 }
 0x45e   : > { %v7906_v23 = vpop.xlane.xlu1 %7905  ;;  %v7830_v10 = vmul.f32 1.442695, %v7739_v37  ;;  %7698 = vmax.xlane.f32.xlu0 %v7697_v36  ;;  %v12964_v16 = vpop.f32.mrf.mxu1 }
 0x45f   : > { %13705 = vpow2.f32 %v7828_v7  ;;  %v16605_v13 = vpop.f32.mrf.mxu0  ;;  %v7909_v52 = vpop.xlane.xlu0 %7908 }
 0x460   : > { %18219 = vst [vmem:[#allocation73_spill] sm:$0xff] %v16605_v13  ;;  %13707 = vrcp.f32 %v7906_v23  ;;  %v7333_v27 = vpop.f32.mrf.mxu1  ;;  %v16609_v25 = vpop.eup %13699 }
 0x461   : > { %13709 = vpow2.f32 %v7830_v10  ;;  %v12970_v38 = vpop.f32.mrf.mxu0  ;;  %7971 = vadd.xlane.f32.xlu1 %v7970_v57  ;;  %v16613_v37 = vpop.eup %13701  ;;  %v7976_v27 = vsel %vm4575_vm3, %v16609_v25, 0.0 }
 0x462   : > { %v16615_v36 = vpop.xlane.xlu1 %7917  ;;  %13711 = vrcp.f32 %v7909_v52  ;;  %7968 = vadd.xlane.f32.xlu0 %v7967_v29  ;;  %v12965_v7 = vpop.f32.mrf.mxu1  ;;  %v7973_v38 = vsel %vm4575_vm3, %v16613_v37, 0.0 }
 0x463   : > { %v7379_v23 = vpop.f32.mrf.mxu0  ;;  %v7609_v16 = vpop.xlane.xlu0 %7608 }
 0x464   : > { %v7741_v39 = vsub.f32 %v16381_v51, %v7609_v16  ;;  %v16620_v10 = vpop.f32.mrf.mxu1  ;;  %v16624_v61 = vpop.eup %13703 }
 0x465   : > { %18220 = vst [vmem:[#allocation76_spill] sm:$0xff] %v16620_v10  ;;  %v12971_v57 = vpop.f32.mrf.mxu0  ;;  %7977 = vadd.xlane.f32.xlu1 %v7976_v27  ;;  %18221 = vst [vmem:[#allocation77_spill] sm:$0xff] %v16624_v61  ;;  %v7979_v27 = vsel %vm4575_vm3, %v16624_v61, 0.0 }
 0x466   : > { %v7606_v22 = vpop.xlane.xlu1 %7605  ;;  %v7834_v52 = vmul.f32 1.442695, %v7741_v39  ;;  %7974 = vadd.xlane.f32.xlu0 %v7973_v38  ;;  %v12976_v29 = vpop.f32.mrf.mxu1 }
 0x467   : > { %v7740_v7 = vsub.f32 %v16376_v24, %v7606_v22  ;;  %v16627_v23 = vpop.f32.mrf.mxu0 }
 0x468   : > { %18222 = vst [vmem:[#allocation78_spill] sm:$0xff] %v16627_v23  ;;  %13713 = vpow2.f32 %v7834_v52  ;;  %v7425_v12 = vpop.f32.mrf.mxu1 }
 0x469   : > { %v7832_v51 = vmul.f32 1.442695, %v7740_v7  ;;  %v12982_v16 = vpop.f32.mrf.mxu0 }
 0x46a   : > { %7980 = vadd.xlane.f32.xlu0 %v7979_v27  ;;  %v12977_v57 = vpop.f32.mrf.mxu1  ;;  %v7924_v52 = vpop.xlane.xlu1 %7923 }
 0x46b   : > { %13715 = vpow2.f32 %v7832_v51  ;;  %v7471_v35 = vpop.f32.mrf.mxu0 }
 0x46c   : > { %v16631_v42 = vpop.eup %13705  ;;  %v16633_v39 = vpop.f32.mrf.mxu1 }
 0x46d   : > { %18223 = vst [vmem:[#allocation79_spill] sm:$0xff] %v16631_v42  ;;  %18224 = vst [vmem:[#allocation80_spill] sm:$0xff] %v16633_v39  ;;  %v13708_v38 = vpop.eup %13707  ;;  %v12983_v29 = vpop.f32.mrf.mxu0  ;;  %v7982_v24 = vsel %vm4575_vm3, %v16631_v42, 0.0  ;;  %v8385_v42 = vsel %vm8291_vm4, %v18225_v46, 0 }
 0x46e   : > { %v16637_v22 = vpop.eup %13709  ;;  %v8160_v12 = vmul.f32 %v13708_v38, %v16363_v54  ;;  %7983 = vadd.xlane.f32.xlu1 %v7982_v24  ;;  %v12988_v7 = vpop.f32.mrf.mxu1  ;;  %v18226_v24 = vld [vmem:[#allocation34_spill] sm:$0xff] }
 0x46f   : > { %v13712_v16 = vpop.eup %13711  ;;  %v7985_v35 = vsel %vm4575_vm3, %v16637_v22, 0.0 }
 0x470   : > { %v8224_v51 = vpack.c.bf16 %v8160_v12, %v8160_v12  ;;  %v8161_v27 = vmul.f32 %v13712_v16, %v16367_v6  ;;  %7986 = vadd.xlane.f32.xlu0 %v7985_v35  ;;  %v7517_v57 = vpop.f32.mrf.mxu1  ;;  %v8431_v6 = vsel %vm8291_vm4, %v18226_v24, 0 }
 0x472   : > { %v8225_v29 = vpack.c.bf16 %v8161_v27, %v8161_v27  ;;  %12993 = vmatmul.mubr.msk.bf16.vlgmr.msra.gmra.mxu0 %vm4575_vm3, %v8224_v51  ;;  %v7612_v61 = vpop.xlane.xlu1 %7611  ;;  %v12989_v54 = vpop.f32.mrf.mxu1 }
 0x473   : > { %13003 = vmatpush3.bf16.msra.mxu0 %v8385_v42  ;;  %v7742_v38 = vsub.f32 %v16394_v0, %v7612_v61  ;;  %13004 = vmatprep.mubr.msk.bf16.mxu0 %vm14206_vm2, %v18138_v33 }
 0x474   : > { %12999 = vmatmul.mubr.msk.bf16.vlgmr.msra.gmra.mxu1 %vm4575_vm3, %v8225_v29  ;;  %13014 = vmatprep.subr.bf16.mxu0 %v18138_v33  ;;  %v7703_v29 = vsel %vm4575_vm3, %v16620_v10, -inf }
 0x475   : > { %v16653_v12 = vpop.eup %13713  ;;  %v7836_v7 = vmul.f32 1.442695, %v7742_v38  ;;  %13009 = vmatpush3.bf16.msra.mxu1 %v8431_v6  ;;  %13010 = vmatprep.mubr.msk.bf16.mxu1 %vm14206_vm2, %v18138_v33  ;;  %v7700_v38 = vsel %vm4575_vm3, %v16605_v13, -inf }
 0x476   : > { %v7912_v42 = vpop.xlane.xlu1 %7911  ;;  %v7991_v0 = vsel %vm4575_vm3, %v16653_v12, 0.0  ;;  %13020 = vmatprep.subr.bf16.mxu1 %v18138_v33 }
 0x477   : > { %13717 = vpow2.f32 %v7836_v7  ;;  %v7615_v61 = vpop.xlane.xlu0 %7614  ;;  %7992 = vadd.xlane.f32.xlu0 %v7991_v0 }
 0x478   : > { %v16660_v16 = vpop.eup %13715  ;;  %13719 = vrcp.f32 %v7912_v42  ;;  %v7743_v35 = vsub.f32 %v16404_v2, %v7615_v61 }
 0x479   : > { %v7988_v51 = vsel %vm4575_vm3, %v16660_v16, 0.0  ;;  %13721 = vrcp.f32 %v16615_v36 }
 0x47a   : > { %7989 = vadd.xlane.f32.xlu1 %v7988_v51  ;;  %v7930_v27 = vpop.xlane.xlu1 %7929  ;;  %v7838_v57 = vmul.f32 1.442695, %v7743_v35 }
 0x47b   : > { %v7915_v54 = vpop.xlane.xlu0 %7914  ;;  %7704 = vmax.xlane.f32.xlu0 %v7703_v29 }
 0x47c   : > { %13723 = vpow2.f32 %v7838_v57 }
 0x47d   : > { %13725 = vrcp.f32 %v7915_v54 }
 0x47e   : > { %7701 = vmax.xlane.f32.xlu1 %v7700_v38  ;;  %v7618_v2 = vpop.xlane.xlu1 %7617 }
 0x47f   : > { %v7744_v6 = vsub.f32 %v16412_v4, %v7618_v2  ;;  %v7621_v7 = vpop.xlane.xlu0 %7620 }
 0x480   : > { %v7745_v42 = vsub.f32 %v16422_v43, %v7621_v7 }
 0x481   : > { %v7840_v0 = vmul.f32 1.442695, %v7744_v6 }
 0x482   : > { %v16672_v61 = vpop.xlane.xlu1 %7935  ;;  %v7842_v35 = vmul.f32 1.442695, %v7745_v42 }
 0x483   : > { %13727 = vpow2.f32 %v7840_v0  ;;  %v7921_v36 = vpop.xlane.xlu0 %7920 }
 0x484   : > { %v16674_v51 = vpop.eup %13717  ;;  %13729 = vrcp.f32 %v7924_v52 }
 0x485   : > { %v13720_v57 = vpop.eup %13719  ;;  %13731 = vpow2.f32 %v7842_v35  ;;  %v7994_v29 = vsel %vm4575_vm3, %v16674_v51, 0.0  ;;  %v18227_v35 = vld [vmem:[#allocation31_spill] sm:$0xff] }
 0x486   : > { %v8162_v54 = vmul.f32 %v13720_v57, %v16399_v21  ;;  %7995 = vadd.xlane.f32.xlu1 %v7994_v29  ;;  %v7624_v4 = vpop.xlane.xlu1 %7623  ;;  %13733 = vrcp.f32 %v7921_v36  ;;  %v13722_v2 = vpop.eup %13721  ;;  %v8477_v10 = vsel %vm8291_vm4, %v18227_v35, 0 }
 0x487   : > { %v7746_v43 = vsub.f32 %v16430_v58, %v7624_v4  ;;  %v7627_v38 = vpop.xlane.xlu0 %7626  ;;  %v8164_v29 = vmul.f32 %v13722_v2, %v16372_v49 }
 0x488   : > { %v8226_v6 = vpack.c.bf16 %v8162_v54, %v8162_v54  ;;  %v7747_v7 = vsub.f32 %v16439_v32, %v7627_v38 }
 0x489   : > { %v16681_v42 = vpop.eup %13723  ;;  %v7844_v52 = vmul.f32 1.442695, %v7746_v43  ;;  %v8228_v49 = vpack.c.bf16 %v8164_v29, %v8164_v29 }
 0x48a   : > { %v13726_v0 = vpop.eup %13725  ;;  %13005 = vmatmul.mubr.msk.bf16.vlgmr.msra.gmra.mxu0 %vm4575_vm3, %v8226_v6  ;;  %v16686_v21 = vpop.xlane.xlu1 %7941  ;;  %v7846_v57 = vmul.f32 1.442695, %v7747_v7  ;;  %v7997_v58 = vsel %vm4575_vm3, %v16681_v42, 0.0 }
 0x48b   : > { %v8163_v36 = vmul.f32 %v13726_v0, %v16410_v50  ;;  %13735 = vpow2.f32 %v7844_v52  ;;  %13015 = vmatpush3.bf16.msra.mxu0 %v8477_v10  ;;  %v7927_v32 = vpop.xlane.xlu0 %7926  ;;  %7998 = vadd.xlane.f32.xlu0 %v7997_v58  ;;  %v18228_v50 = vld [vmem:[#allocation35_spill] sm:$0xff]  ;;  %v18229_v0 = vld [vmem:[#allocation33_spill] sm:$0xff] }
 0x48c   : > { %13737 = vrcp.f32 %v7930_v27  ;;  %13016 = vmatprep.mubr.msk.bf16.mxu0 %vm14206_vm2, %v18138_v33  ;;  %13026 = vmatprep.subr.bf16.mxu0 %v18138_v33  ;;  %v8523_v10 = vsel %vm8291_vm4, %v18228_v50, 0 }
 0x48d   : > { %v8227_v54 = vpack.c.bf16 %v8163_v36, %v8163_v36  ;;  %13739 = vpow2.f32 %v7846_v57  ;;  %v8569_v57 = vsel %vm8291_vm4, %v18229_v0, 0 }
 0x48e   : > { %v7630_v4 = vpop.xlane.xlu1 %7629  ;;  %13741 = vrcp.f32 %v7927_v32 }
 0x48f   : > { %v7748_v43 = vsub.f32 %v16447_v34, %v7630_v4  ;;  %13011 = vmatmul.mubr.msk.bf16.vlgmr.msra.gmra.mxu1 %vm4575_vm3, %v8227_v54  ;;  %v7633_v38 = vpop.xlane.xlu0 %7632 }
 0x490   : > { %v16699_v6 = vpop.eup %13727  ;;  %13021 = vmatpush3.bf16.msra.mxu1 %v8523_v10  ;;  %v7749_v27 = vsub.f32 %v16456_v56, %v7633_v38  ;;  %13022 = vmatprep.mubr.msk.bf16.mxu1 %vm14206_vm2, %v18138_v33 }
 0x491   : > { %v13730_v2 = vpop.eup %13729  ;;  %v7848_v7 = vmul.f32 1.442695, %v7748_v43  ;;  %v8000_v34 = vsel %vm4575_vm3, %v16699_v6, 0.0  ;;  %13032 = vmatprep.subr.bf16.mxu1 %v18138_v33 }
 0x492   : > { %v16707_v52 = vpop.eup %13731  ;;  %13017 = vmatmul.mubr.msk.bf16.vlgmr.msra.gmra.mxu0 %vm4575_vm3, %v8228_v49  ;;  %8001 = vadd.xlane.f32.xlu1 %v8000_v34  ;;  %v7850_v58 = vmul.f32 1.442695, %v7749_v27  ;;  %v8166_v29 = vmul.f32 %v13730_v2, %v16388_v20  ;;  %v18230_v49 = vld [vmem:[#allocation43_spill] sm:$0xff] }
 0x493   : > { %v13734_v56 = vpop.eup %13733  ;;  %13743 = vpow2.f32 %v7848_v7  ;;  %13027 = vmatpush3.bf16.msra.mxu0 %v8569_v57  ;;  %v7933_v36 = vpop.xlane.xlu0 %7932  ;;  %v8003_v32 = vsel %vm4575_vm3, %v16707_v52, 0.0  ;;  %13028 = vmatprep.mubr.msk.bf16.mxu0 %vm14206_vm2, %v18138_v33  ;;  %v8615_v27 = vsel %vm8291_vm4, %v18230_v49, 0  ;;  %v18231_v7 = vld [vmem:[#allocation40_spill] sm:$0xff] }
 0x494   : > { %13745 = vrcp.f32 %v16672_v61  ;;  %v8165_v54 = vmul.f32 %v13734_v56, %v16428_v63  ;;  %8004 = vadd.xlane.f32.xlu0 %v8003_v32  ;;  %13038 = vmatprep.subr.bf16.mxu0 %v18138_v33  ;;  %v8230_v38 = vpack.c.bf16 %v8166_v29, %v8166_v29  ;;  %v8661_v34 = vsel %vm8291_vm4, %v18231_v7, 0 }
 0x495   : > { %13747 = vpow2.f32 %v7850_v58 }
 0x496   : > { %v8229_v4 = vpack.c.bf16 %v8165_v54, %v8165_v54  ;;  %13749 = vrcp.f32 %v7933_v36 }
 0x497   : > { %v7639_v43 = vpop.xlane.xlu0 %7638  ;;  %13751 = vrcp.f32 %v16686_v21 }
 0x498   : > { %v16720_v10 = vpop.eup %13735  ;;  %13023 = vmatmul.mubr.msk.bf16.vlgmr.msra.gmra.mxu1 %vm4575_vm3, %v8229_v4  ;;  %v7751_v20 = vsub.f32 %v16473_v26, %v7639_v43  ;;  %v18232_v43 = vld [vmem:[#allocation44_spill] sm:$0xff] }
 0x499   : > { %v13738_v61 = vpop.eup %13737  ;;  %13033 = vmatpush3.bf16.msra.mxu1 %v8615_v27  ;;  %v8006_v63 = vsel %vm4575_vm3, %v16720_v10, 0.0  ;;  %13034 = vmatprep.mubr.msk.bf16.mxu1 %vm14206_vm2, %v18138_v33 }
 0x49a   : > { %v16730_v2 = vpop.eup %13739  ;;  %13029 = vmatmul.mubr.msk.bf16.vlgmr.msra.gmra.mxu0 %vm4575_vm3, %v8230_v38  ;;  %8007 = vadd.xlane.f32.xlu1 %v8006_v63  ;;  %v7854_v57 = vmul.f32 1.442695, %v7751_v20  ;;  %v8168_v36 = vmul.f32 %v13738_v61, %v16406_v48  ;;  %v8707_v48 = vsel %vm8291_vm4, %v18232_v43, 0  ;;  %v18233_v61 = vld [vmem:[#allocation46_spill] sm:$0xff] }
 0x49b   : > { %v13742_v58 = vpop.eup %13741  ;;  %13039 = vmatpush3.bf16.msra.mxu0 %v8661_v34  ;;  %v7939_v26 = vpop.xlane.xlu0 %7938  ;;  %v8009_v56 = vsel %vm4575_vm3, %v16730_v2, 0.0  ;;  %13040 = vmatprep.mubr.msk.bf16.mxu0 %vm14206_vm2, %v18138_v33  ;;  %v8753_v63 = vsel %vm8291_vm4, %v18233_v61, 0 }
 0x49c   : > { %v8167_v32 = vmul.f32 %v13742_v58, %v16445_v47  ;;  %13753 = vpow2.f32 %v7854_v57  ;;  %8010 = vadd.xlane.f32.xlu0 %v8009_v56  ;;  %13044 = vmatprep.subr.bf16.mxu1 %v18138_v33  ;;  %v8232_v4 = vpack.c.bf16 %v8168_v36, %v8168_v36  ;;  %v7948_v47 = vpop.xlane.xlu1 %7947 }
 0x49d   : > { %13755 = vrcp.f32 %v7939_v26  ;;  %13050 = vmatprep.subr.bf16.mxu0 %v18138_v33 }
 0x49e   : > { %v8231_v21 = vpack.c.bf16 %v8167_v32, %v8167_v32  ;;  %13757 = vrcp.f32 %v7948_v47 }
 0x49f   : > { %v16744_v29 = vpop.xlane.xlu0 %7644 }
 0x4a0   : > { %v16746_v54 = vpop.eup %13743  ;;  %13035 = vmatmul.mubr.msk.bf16.vlgmr.msra.gmra.mxu1 %vm4575_vm3, %v8231_v21 }
 0x4a1   : > { %v13746_v38 = vpop.eup %13745  ;;  %13045 = vmatpush3.bf16.msra.mxu1 %v8707_v48  ;;  %v8012_v27 = vsel %vm4575_vm3, %v16746_v54, 0.0  ;;  %13046 = vmatprep.mubr.msk.bf16.mxu1 %vm14206_vm2, %v18138_v33  ;;  %v18234_v48 = vld [vmem:[#allocation48_spill] sm:$0xff] }
 0x4a2   : > { %v16755_v20 = vpop.eup %13747  ;;  %13041 = vmatmul.mubr.msk.bf16.vlgmr.msra.gmra.mxu0 %vm4575_vm3, %v8232_v4  ;;  %8013 = vadd.xlane.f32.xlu1 %v8012_v27  ;;  %v8170_v26 = vmul.f32 %v13746_v38, %v16424_v45  ;;  %v8799_v27 = vsel %vm8291_vm4, %v18234_v48, 0  ;;  %v18235_v38 = vld [vmem:[#allocation50_spill] sm:$0xff] }
 0x4a3   : > { %v13750_v34 = vpop.eup %13749  ;;  %13051 = vmatpush3.bf16.msra.mxu0 %v8753_v63  ;;  %v7945_v57 = vpop.xlane.xlu0 %7944  ;;  %v8015_v58 = vsel %vm4575_vm3, %v16755_v20, 0.0  ;;  %13052 = vmatprep.mubr.msk.bf16.mxu0 %vm14206_vm2, %v18138_v33  ;;  %v8845_v47 = vsel %vm8291_vm4, %v18235_v38, 0 }
 0x4a4   : > { %v8169_v56 = vmul.f32 %v13750_v34, %v16462_v55  ;;  %8016 = vadd.xlane.f32.xlu0 %v8015_v58  ;;  %13056 = vmatprep.subr.bf16.mxu1 %v18138_v33  ;;  %13759 = vrcp.f32 %v7945_v57  ;;  %v13752_v21 = vpop.eup %13751  ;;  %v8234_v4 = vpack.c.bf16 %v8170_v26, %v8170_v26 }
 0x4a5   : > { %13062 = vmatprep.subr.bf16.mxu0 %v18138_v33  ;;  %v8172_v58 = vmul.f32 %v13752_v21, %v16441_v8  ;;  %v18237_v21 = vld [vmem:[#allocation52_spill] sm:$0xff] }
 0x4a6   : > { %v8233_v36 = vpack.c.bf16 %v8169_v56, %v8169_v56 }
 0x4a7   : > { %v16768_v32 = vpop.xlane.xlu0 %7650  ;;  %v8236_v56 = vpack.c.bf16 %v8172_v58, %v8172_v58 }
 0x4a8   : > { %13047 = vmatmul.mubr.msk.bf16.vlgmr.msra.gmra.mxu1 %vm4575_vm3, %v8233_v36  ;;  %v7636_v36 = vpop.xlane.xlu1 %7635 }
 0x4a9   : > { %v16773_v45 = vpop.eup %13753  ;;  %13057 = vmatpush3.bf16.msra.mxu1 %v8799_v27  ;;  %13058 = vmatprep.mubr.msk.bf16.mxu1 %vm14206_vm2, %v18138_v33 }
 0x4aa   : > { %v13756_v55 = vpop.eup %13755  ;;  %13053 = vmatmul.mubr.msk.bf16.vlgmr.msra.gmra.mxu0 %vm4575_vm3, %v8234_v4  ;;  %v8021_v63 = vsel %vm4575_vm3, %v16773_v45, 0.0  ;;  %13068 = vmatprep.subr.bf16.mxu1 %v18138_v33  ;;  %v18236_v4 = vld [vmem:[#allocation51_spill] sm:$0xff] }
 0x4ab   : > { %v8171_v34 = vmul.f32 %v13756_v55, %v16477_v31  ;;  %13063 = vmatpush3.bf16.msra.mxu0 %v8845_v47  ;;  %v7951_v57 = vpop.xlane.xlu0 %7950  ;;  %8022 = vadd.xlane.f32.xlu0 %v8021_v63  ;;  %v8891_v27 = vsel %vm8291_vm4, %v18236_v4, 0  ;;  %v13758_v31 = vpop.eup %13757  ;;  %v8937_v55 = vsel %vm8291_vm4, %v18237_v21, 0 }
 0x4ac   : > { %13064 = vmatprep.mubr.msk.bf16.mxu0 %vm14206_vm2, %v18138_v33  ;;  %13074 = vmatprep.subr.bf16.mxu0 %v18138_v33  ;;  %13761 = vrcp.f32 %v7951_v57  ;;  %v8174_v63 = vmul.f32 %v13758_v31, %v16458_v59  ;;  %v7642_v57 = vpop.xlane.xlu1 %7641 }
 0x4ad   : > { %v8235_v26 = vpack.c.bf16 %v8171_v34, %v8171_v34 }
 0x4ae   : > { %v8238_v58 = vpack.c.bf16 %v8174_v63, %v8174_v63 }
 0x4b0   : > { %13059 = vmatmul.mubr.msk.bf16.vlgmr.msra.gmra.mxu1 %vm4575_vm3, %v8235_v26  ;;  %v18238_v26 = vld [vmem:[#allocation54_spill] sm:$0xff]  ;;  %v16811_v31 = vpop.xlane.xlu1 %7647 }
 0x4b1   : > { %13069 = vmatpush3.bf16.msra.mxu1 %v8891_v27  ;;  %13070 = vmatprep.mubr.msk.bf16.mxu1 %vm14206_vm2, %v18138_v33  ;;  %v13760_v8 = vpop.eup %13759  ;;  %v18239_v27 = vld [vmem:[#allocation49_spill] sm:$0xff] }
 0x4b2   : > { %13065 = vmatmul.mubr.msk.bf16.vlgmr.msra.gmra.mxu0 %vm4575_vm3, %v8236_v56  ;;  %13080 = vmatprep.subr.bf16.mxu1 %v18138_v33  ;;  %v8173_v47 = vmul.f32 %v13760_v8, %v16489_v9  ;;  %v8983_v56 = vsel %vm8291_vm4, %v18238_v26, 0  ;;  %v9029_v59 = vsel %vm8291_vm4, %v18239_v27, 0 }
 0x4b3   : > { %13075 = vmatpush3.bf16.msra.mxu0 %v8937_v55  ;;  %4511 = vrot.lane.b32.xlu1 %v18179_v60, %s14204_s11 }
 0x4b4   : > { %13076 = vmatprep.mubr.msk.bf16.mxu0 %vm14206_vm2, %v18138_v33  ;;  %13086 = vmatprep.subr.bf16.mxu0 %v18138_v33  ;;  %v8237_v34 = vpack.c.bf16 %v8173_v47, %v8173_v47  ;;  %v7750_v47 = vsub.f32 %v16464_v44, %v7636_v36  ;;  %v16820_v63 = vpop.xlane.xlu1 %7653  ;;  %v16832_v44 = vpop.xlane.xlu0 %7656  ;;  %v7752_v36 = vsub.f32 %v16479_v40, %v7642_v57 }
 0x4b8   : > { %13071 = vmatmul.mubr.msk.bf16.vlgmr.msra.gmra.mxu1 %vm4575_vm3, %v8237_v34  ;;  %v18240_v34 = vld [vmem:[#allocation60_spill] sm:$0xff]  ;;  %v16837_v27 = vpop.xlane.xlu0 %7662 }
 0x4b9   : > { %13081 = vmatpush3.bf16.msra.mxu1 %v8983_v56  ;;  %13082 = vmatprep.mubr.msk.bf16.mxu1 %vm14206_vm2, %v18138_v33  ;;  %v13762_v9 = vpop.eup %13761  ;;  %v9075_v56 = vsel %vm8291_vm4, %v18240_v34, 0 }
 0x4ba   : > { %13077 = vmatmul.mubr.msk.bf16.vlgmr.msra.gmra.mxu0 %vm4575_vm3, %v8238_v58  ;;  %13092 = vmatprep.subr.bf16.mxu1 %v18138_v33  ;;  %v8175_v8 = vmul.f32 %v13762_v9, %v16501_v3  ;;  %v7852_v3 = vmul.f32 1.442695, %v7750_v47  ;;  %v16827_v58 = vpop.xlane.xlu1 %7659 }
 0x4bb   : > { %13087 = vmatpush3.bf16.msra.mxu0 %v9029_v59  ;;  %13088 = vmatprep.mubr.msk.bf16.mxu0 %vm14206_vm2, %v18138_v33  ;;  %v7856_v59 = vmul.f32 1.442695, %v7752_v36 }
 0x4bc   : > { %13098 = vmatprep.subr.bf16.mxu0 %v18138_v33  ;;  %v8239_v55 = vpack.c.bf16 %v8175_v8, %v8175_v8  ;;  %13763 = vpow2.f32 %v7852_v3 }
 0x4bd   : > { %13765 = vpow2.f32 %v7856_v59  ;;  %v7706_v59 = vsel %vm4575_vm3, %v16627_v23, -inf }
 0x4be   : > { %v16835_v9 = vpop.xlane.xlu1 %7665 }
 0x4bf   : > { %v16843_v47 = vpop.xlane.xlu0 %7668 }
 0x4c0   : > { %13083 = vmatmul.mubr.msk.bf16.vlgmr.msra.gmra.mxu1 %vm4575_vm3, %v8239_v55  ;;  %v7753_v55 = vsub.f32 %v16485_v19, %v16744_v29 }
 0x4c1   : > { %13093 = vmatpush3.bf16.msra.mxu1 %v9075_v56  ;;  %4513 = vrot.lane.b32.xlu0 %v18183_v53, %s14204_s11 }
 0x4c2   : > { %13094 = vmatprep.mubr.msk.bf16.mxu1 %vm14206_vm2, %v18138_v33  ;;  %13104 = vmatprep.subr.bf16.mxu1 %v18138_v33  ;;  %v16839_v8 = vpop.xlane.xlu1 %7671  ;;  %v7858_v56 = vmul.f32 1.442695, %v7753_v55 }
 0x4c4   : > { %13767 = vpow2.f32 %v7858_v56 }
 0x4c7   : > { %v16847_v13 = vpop.xlane.xlu0 %7674 }
 0x4c9   : > { %v16851_v40 = vpop.eup %13763 }
 0x4ca   : > { %v16845_v34 = vpop.xlane.xlu1 %7677  ;;  %v8018_v53 = vsel %vm4575_vm3, %v16851_v40, 0.0  ;;  %v16863_v55 = vpop.eup %13765 }
 0x4cb   : > { %18244 = vst [vmem:[#allocation35_spill] sm:$0xff] %v16863_v55 }
 0x4cf   : > { %v16853_v57 = vpop.xlane.xlu0 %7680 }
 0x4d2   : > { %v16849_v3 = vpop.xlane.xlu1 %7683 }
 0x4d3   : > { %18241 = vst [vmem:[#allocation30_spill] sm:$0xff] %v16849_v3  ;;  %v8024_v3 = vsel %vm4575_vm3, %v16863_v55, 0.0  ;;  %v18247_v55 = vld [vmem:[#allocation55_spill] sm:$0xff] }
 0x4d6   : > { %v7954_v36 = vpop.xlane.xlu1 %7953 }
 0x4d7   : > { %8019 = vadd.xlane.f32.xlu1 %v8018_v53  ;;  %v16857_v19 = vpop.xlane.xlu0 %7686  ;;  %13769 = vrcp.f32 %v7954_v36  ;;  %v7709_v53 = vsel %vm4575_vm3, %v16633_v39, -inf  ;;  %v16871_v36 = vpop.eup %13767 }
 0x4d8   : > { %18242 = vst [vmem:[#allocation34_spill] sm:$0xff] %v16857_v19 }
 0x4da   : > { %v16859_v29 = vpop.xlane.xlu1 %7689 }
 0x4db   : > { %18243 = vst [vmem:[#allocation31_spill] sm:$0xff] %v16859_v29  ;;  %7707 = vmax.xlane.f32.xlu1 %v7706_v59  ;;  %v7957_v60 = vpop.xlane.xlu0 %7956 }
 0x4dc   : > { %13771 = vrcp.f32 %v7957_v60  ;;  %v8027_v60 = vsel %vm4575_vm3, %v16871_v36, 0.0 }
 0x4de   : > { %v7960_v56 = vpop.xlane.xlu1 %7959 }
 0x4df   : > { %8025 = vadd.xlane.f32.xlu1 %v8024_v3  ;;  %v16867_v26 = vpop.xlane.xlu0 %7692  ;;  %13773 = vrcp.f32 %v7960_v56  ;;  %v9121_v56 = vsel %vm8291_vm4, %v18247_v55, 0 }
 0x4e0   : > { %18245 = vst [vmem:[#allocation33_spill] sm:$0xff] %v16867_v26  ;;  %7710 = vmax.xlane.f32.xlu0 %v7709_v53 }
 0x4e2   : > { %v16873_v23 = vpop.xlane.xlu1 %7695 }
 0x4e3   : > { %18246 = vst [vmem:[#allocation43_spill] sm:$0xff] %v16873_v23  ;;  %v7963_v29 = vpop.xlane.xlu0 %7962 }
 0x4e4   : > { %8028 = vadd.xlane.f32.xlu0 %v8027_v60  ;;  %v13770_v59 = vpop.eup %13769  ;;  %13775 = vrcp.f32 %v7963_v29 }
 0x4e5   : > { %v8176_v3 = vmul.f32 %v13770_v59, %v16555_v28  ;;  %v18248_v59 = vld [vmem:[#allocation68_spill] sm:$0xff] }
 0x4e6   : > { %v7966_v19 = vpop.xlane.xlu1 %7965  ;;  %v9167_v55 = vsel %vm8291_vm4, %v18248_v59, 0 }
 0x4e7   : > { %v16878_v26 = vpop.xlane.xlu0 %7698  ;;  %v8240_v21 = vpack.c.bf16 %v8176_v3, %v8176_v3  ;;  %13777 = vrcp.f32 %v7966_v19 }
 0x4e9   : > { %v13772_v39 = vpop.eup %13771  ;;  %13089 = vmatmul.mubr.msk.bf16.vlgmr.msra.gmra.mxu0 %vm4575_vm3, %v8240_v21 }
 0x4ea   : > { %v7972_v53 = vpop.xlane.xlu1 %7971  ;;  %v8177_v23 = vmul.f32 %v13772_v39, %v16566_v17  ;;  %13099 = vmatpush3.bf16.msra.mxu0 %v9121_v56  ;;  %13100 = vmatprep.mubr.msk.bf16.mxu0 %vm14206_vm2, %v18138_v33 }
 0x4eb   : > { %v7969_v60 = vpop.xlane.xlu0 %7968  ;;  %13779 = vrcp.f32 %v7972_v53  ;;  %13110 = vmatprep.subr.bf16.mxu0 %v18138_v33 }
 0x4ec   : > { %v13774_v28 = vpop.eup %13773  ;;  %v8241_v29 = vpack.c.bf16 %v8177_v23, %v8177_v23  ;;  %13781 = vrcp.f32 %v7969_v60 }
 0x4ed   : > { %v8178_v19 = vmul.f32 %v13774_v28, %v16572_v1  ;;  %v18249_v1 = vld [vmem:[#allocation56_spill] sm:$0xff] }
 0x4ee   : > { %13095 = vmatmul.mubr.msk.bf16.vlgmr.msra.gmra.mxu1 %vm4575_vm3, %v8241_v29  ;;  %v7978_v39 = vpop.xlane.xlu1 %7977  ;;  %v9213_v3 = vsel %vm8291_vm4, %v18249_v1, 0 }
 0x4ef   : > { %v7975_v21 = vpop.xlane.xlu0 %7974  ;;  %v8242_v17 = vpack.c.bf16 %v8178_v19, %v8178_v19  ;;  %13105 = vmatpush3.bf16.msra.mxu1 %v9167_v55  ;;  %13106 = vmatprep.mubr.msk.bf16.mxu1 %vm14206_vm2, %v18138_v33  ;;  %v18250_v19 = vld [vmem:[#allocation70_spill] sm:$0xff] }
 0x4f0   : > { %4515 = vrot.lane.b32.xlu1 %v18225_v46, %s14204_s11  ;;  %13783 = vrcp.f32 %v7975_v21  ;;  %13116 = vmatprep.subr.bf16.mxu1 %v18138_v33  ;;  %v9259_v59 = vsel %vm8291_vm4, %v18250_v19, 0 }
 0x4f1   : > { %v13776_v23 = vpop.eup %13775  ;;  %13101 = vmatmul.mubr.msk.bf16.vlgmr.msra.gmra.mxu0 %vm4575_vm3, %v8242_v17  ;;  %13785 = vrcp.f32 %v7978_v39  ;;  %v18251_v39 = vld [vmem:[#allocation62_spill] sm:$0xff] }
 0x4f2   : > { %v8179_v56 = vmul.f32 %v13776_v23, %v16583_v18  ;;  %13111 = vmatpush3.bf16.msra.mxu0 %v9213_v3  ;;  %13112 = vmatprep.mubr.msk.bf16.mxu0 %vm14206_vm2, %v18138_v33  ;;  %v7754_v23 = vsub.f32 %v16491_v11, %v16811_v31  ;;  %v7755_v11 = vsub.f32 %v16497_v14, %v16768_v32 }
 0x4f3   : > { %13122 = vmatprep.subr.bf16.mxu0 %v18138_v33  ;;  %v7981_v29 = vpop.xlane.xlu0 %7980 }
 0x4f4   : > { %v13778_v53 = vpop.eup %13777  ;;  %v8243_v60 = vpack.c.bf16 %v8179_v56, %v8179_v56  ;;  %13787 = vrcp.f32 %v7981_v29  ;;  %v7860_v29 = vmul.f32 1.442695, %v7754_v23  ;;  %v7862_v14 = vmul.f32 1.442695, %v7755_v11 }
 0x4f5   : > { %v8180_v28 = vmul.f32 %v13778_v53, %v16589_v62  ;;  %v9305_v62 = vsel %vm8291_vm4, %v18251_v39, 0  ;;  %v18253_v39 = vld [vmem:[#allocation77_spill] sm:$0xff] }
 0x4f6   : > { %13107 = vmatmul.mubr.msk.bf16.vlgmr.msra.gmra.mxu1 %vm4575_vm3, %v8243_v60 }
 0x4f7   : > { %v8244_v55 = vpack.c.bf16 %v8180_v28, %v8180_v28  ;;  %13117 = vmatpush3.bf16.msra.mxu1 %v9259_v59  ;;  %13118 = vmatprep.mubr.msk.bf16.mxu1 %vm14206_vm2, %v18138_v33  ;;  %v7984_v21 = vpop.xlane.xlu1 %7983  ;;  %v9351_v28 = vsel %vm8291_vm4, %v16286_v15, 0  ;;  %v9397_v15 = vsel %vm8291_vm4, %v16058_v5, 0 }
 0x4f8   : > { %v13780_v18 = vpop.eup %13779  ;;  %13128 = vmatprep.subr.bf16.mxu1 %v18138_v33  ;;  %13789 = vrcp.f32 %v7984_v21 }
 0x4f9   : > { %v13782_v17 = vpop.eup %13781  ;;  %13113 = vmatmul.mubr.msk.bf16.vlgmr.msra.gmra.mxu0 %vm4575_vm3, %v8244_v55  ;;  %v8182_v3 = vmul.f32 %v13780_v18, %v16599_v41  ;;  %v7987_v60 = vpop.xlane.xlu0 %7986  ;;  %v18252_v18 = vld [vmem:[#allocation36_spill] sm:$0xff] }
 0x4fa   : > { %4517 = vrot.lane.b32.xlu0 %v18226_v24, %s14204_s11  ;;  %v8181_v1 = vmul.f32 %v13782_v17, %v16603_v30  ;;  %13123 = vmatpush3.bf16.msra.mxu0 %v9305_v62  ;;  %13791 = vrcp.f32 %v7987_v60  ;;  %v9443_v5 = vsel %vm8291_vm4, %v18252_v18, 0  ;;  %v18254_v62 = vld [vmem:[#allocation74_spill] sm:$0xff] }
 0x4fb   : > { %13124 = vmatprep.mubr.msk.bf16.mxu0 %vm14206_vm2, %v18138_v33  ;;  %13134 = vmatprep.subr.bf16.mxu0 %v18138_v33  ;;  %v8246_v30 = vpack.c.bf16 %v8182_v3, %v8182_v3  ;;  %13793 = vpow2.f32 %v7860_v29  ;;  %v9489_v23 = vsel %vm8291_vm4, %v18254_v62, 0  ;;  %v18255_v3 = vld [vmem:[#allocation79_spill] sm:$0xff]  ;;  %v18259_v62 = vld [vmem:[#allocation38_spill] sm:$0xff] }
 0x4fc   : > { %v8245_v56 = vpack.c.bf16 %v8181_v1, %v8181_v1 }
 0x4fd   : > { %v13784_v53 = vpop.eup %13783 }
 0x4fe   : > { %13119 = vmatmul.mubr.msk.bf16.vlgmr.msra.gmra.mxu1 %vm4575_vm3, %v8245_v56  ;;  %v13786_v41 = vpop.eup %13785  ;;  %v8183_v31 = vmul.f32 %v13784_v53, %v16613_v37 }
 0x4ff   : > { %13129 = vmatpush3.bf16.msra.mxu1 %v9351_v28  ;;  %13130 = vmatprep.mubr.msk.bf16.mxu1 %vm14206_vm2, %v18138_v33  ;;  %v8184_v32 = vmul.f32 %v13786_v41, %v16609_v25  ;;  %v18256_v28 = vld [vmem:[#allocation37_spill] sm:$0xff] }
 0x500   : > { %13140 = vmatprep.subr.bf16.mxu1 %v18138_v33  ;;  %v8247_v37 = vpack.c.bf16 %v8183_v31, %v8183_v31  ;;  %v7993_v55 = vpop.xlane.xlu0 %7992  ;;  %v9535_v29 = vsel %vm8291_vm4, %v18256_v28, 0 }
 0x501   : > { %13125 = vmatmul.mubr.msk.bf16.vlgmr.msra.gmra.mxu0 %vm4575_vm3, %v8246_v30  ;;  %v13788_v59 = vpop.eup %13787  ;;  %v8248_v21 = vpack.c.bf16 %v8184_v32, %v8184_v32 }
 0x502   : > { %13135 = vmatpush3.bf16.msra.mxu0 %v9397_v15  ;;  %13136 = vmatprep.mubr.msk.bf16.mxu0 %vm14206_vm2, %v18138_v33  ;;  %v8185_v25 = vmul.f32 %v13788_v59, %v18253_v39 }
 0x503   : > { %v7990_v19 = vpop.xlane.xlu1 %7989  ;;  %13146 = vmatprep.subr.bf16.mxu0 %v18138_v33 }
 0x504   : > { %13795 = vrcp.f32 %v7990_v19  ;;  %v8249_v53 = vpack.c.bf16 %v8185_v25, %v8185_v25  ;;  %v16959_v31 = vpop.xlane.xlu0 %7704 }
 0x505   : > { %13797 = vpow2.f32 %v7862_v14  ;;  %v13790_v17 = vpop.eup %13789  ;;  %v18257_v14 = vld [vmem:[#allocation75_spill] sm:$0xff] }
 0x506   : > { %13131 = vmatmul.mubr.msk.bf16.vlgmr.msra.gmra.mxu1 %vm4575_vm3, %v8247_v37  ;;  %13799 = vrcp.f32 %v7993_v55  ;;  %v8186_v56 = vmul.f32 %v13790_v17, %v18255_v3  ;;  %v9581_v32 = vsel %vm8291_vm4, %v18257_v14, 0 }
 0x507   : > { %13141 = vmatpush3.bf16.msra.mxu1 %v9443_v5  ;;  %13142 = vmatprep.mubr.msk.bf16.mxu1 %vm14206_vm2, %v18138_v33  ;;  %v16948_v1 = vpop.xlane.xlu1 %7701  ;;  %v13792_v60 = vpop.eup %13791 }
 0x508   : > { %13152 = vmatprep.subr.bf16.mxu1 %v18138_v33  ;;  %v16957_v30 = vpop.eup %13793  ;;  %v8250_v41 = vpack.c.bf16 %v8186_v56, %v8186_v56  ;;  %v8187_v19 = vmul.f32 %v13792_v60, %v16637_v22 }
 0x509   : > { %13137 = vmatmul.mubr.msk.bf16.vlgmr.msra.gmra.mxu0 %vm4575_vm3, %v8248_v21  ;;  %v8030_v37 = vsel %vm4575_vm3, %v16957_v30, 0.0  ;;  %v18258_v21 = vld [vmem:[#allocation39_spill] sm:$0xff] }
 0x50a   : > { %13147 = vmatpush3.bf16.msra.mxu0 %v9489_v23  ;;  %13148 = vmatprep.mubr.msk.bf16.mxu0 %vm14206_vm2, %v18138_v33  ;;  %v8251_v18 = vpack.c.bf16 %v8187_v19, %v8187_v19  ;;  %v9627_v17 = vsel %vm8291_vm4, %v18258_v21, 0  ;;  %v9673_v23 = vsel %vm8291_vm4, %v18259_v62, 0 }
 0x50b   : > { %13158 = vmatprep.subr.bf16.mxu0 %v18138_v33 }
 0x50e   : > { %13143 = vmatmul.mubr.msk.bf16.vlgmr.msra.gmra.mxu1 %vm4575_vm3, %v8249_v53 }
 0x50f   : > { %v7996_v11 = vpop.xlane.xlu1 %7995  ;;  %13153 = vmatpush3.bf16.msra.mxu1 %v9535_v29  ;;  %13154 = vmatprep.mubr.msk.bf16.mxu1 %vm14206_vm2, %v18138_v33 }
 0x510   : > { %13801 = vrcp.f32 %v7996_v11  ;;  %13164 = vmatprep.subr.bf16.mxu1 %v18138_v33 }
 0x511   : > { %v13796_v15 = vpop.eup %13795  ;;  %13149 = vmatmul.mubr.msk.bf16.vlgmr.msra.gmra.mxu0 %vm4575_vm3, %v8250_v41 }
 0x512   : > { %13159 = vmatpush3.bf16.msra.mxu0 %v9581_v32  ;;  %13160 = vmatprep.mubr.msk.bf16.mxu0 %vm14206_vm2, %v18138_v33  ;;  %v8188_v59 = vmul.f32 %v13796_v15, %v16660_v16  ;;  %v16974_v22 = vpop.eup %13797 }
 0x513   : > { %13170 = vmatprep.subr.bf16.mxu0 %v18138_v33  ;;  %v13800_v5 = vpop.eup %13799  ;;  %v8033_v25 = vsel %vm4575_vm3, %v16974_v22, 0.0 }
 0x514   : > { %8031 = vadd.xlane.f32.xlu1 %v8030_v37  ;;  %v7999_v55 = vpop.xlane.xlu0 %7998  ;;  %v8252_v39 = vpack.c.bf16 %v8188_v59, %v8188_v59  ;;  %v8189_v16 = vmul.f32 %v13800_v5, %v16653_v12  ;;  %v18260_v12 = vld [vmem:[#allocation41_spill] sm:$0xff] }
 0x515   : > { %13803 = vrcp.f32 %v7999_v55  ;;  %v9719_v28 = vsel %vm8291_vm4, %v18260_v12, 0  ;;  %v18261_v55 = vld [vmem:[#allocation42_spill] sm:$0xff] }
 0x516   : > { %13155 = vmatmul.mubr.msk.bf16.vlgmr.msra.gmra.mxu1 %vm4575_vm3, %v8251_v18  ;;  %v8253_v53 = vpack.c.bf16 %v8189_v16, %v8189_v16  ;;  %v7756_v18 = vsub.f32 %v18261_v55, %v16820_v63 }
 0x517   : > { %13165 = vmatpush3.bf16.msra.mxu1 %v9627_v17  ;;  %13166 = vmatprep.mubr.msk.bf16.mxu1 %vm14206_vm2, %v18138_v33 }
 0x518   : > { %13176 = vmatprep.subr.bf16.mxu1 %v18138_v33 }
 0x519   : > { %8034 = vadd.xlane.f32.xlu0 %v8033_v25  ;;  %13161 = vmatmul.mubr.msk.bf16.vlgmr.msra.gmra.mxu0 %vm4575_vm3, %v8252_v39  ;;  %v7864_v25 = vmul.f32 1.442695, %v7756_v18 }
 0x51a   : > { %13171 = vmatpush3.bf16.msra.mxu0 %v9673_v23  ;;  %13172 = vmatprep.mubr.msk.bf16.mxu0 %vm14206_vm2, %v18138_v33  ;;  %v18264_v23 = vld [vmem:[#allocation45_spill] sm:$0xff] }
 0x51b   : > { %v8002_v3 = vpop.xlane.xlu1 %8001  ;;  %13182 = vmatprep.subr.bf16.mxu0 %v18138_v33  ;;  %v7757_v63 = vsub.f32 %v18264_v23, %v16832_v44 }
 0x51c   : > { %13805 = vrcp.f32 %v8002_v3 }
 0x51d   : > { %v13802_v56 = vpop.eup %13801  ;;  %v8005_v15 = vpop.xlane.xlu0 %8004 }
 0x51e   : > { %v8190_v60 = vmul.f32 %v13802_v56, %v16674_v51  ;;  %13167 = vmatmul.mubr.msk.bf16.vlgmr.msra.gmra.mxu1 %vm4575_vm3, %v8253_v53  ;;  %13807 = vrcp.f32 %v8005_v15 }
 0x51f   : > { %13177 = vmatpush3.bf16.msra.mxu1 %v9719_v28  ;;  %13178 = vmatprep.mubr.msk.bf16.mxu1 %vm14206_vm2, %v18138_v33  ;;  %13809 = vpow2.f32 %v7864_v25 }
 0x520   : > { %v8254_v29 = vpack.c.bf16 %v8190_v60, %v8190_v60  ;;  %13188 = vmatprep.subr.bf16.mxu1 %v18138_v33 }
 0x522   : > { %v13804_v11 = vpop.eup %13803  ;;  %13173 = vmatmul.mubr.msk.bf16.vlgmr.msra.gmra.mxu0 %vm4575_vm3, %v8254_v29  ;;  %v7866_v29 = vmul.f32 1.442695, %v7757_v63 }
 0x523   : > { %v8191_v41 = vmul.f32 %v13804_v11, %v16681_v42  ;;  %13184 = vmatprep.mubr.msk.bf16.mxu0 %vm14206_vm2, %v18138_v33  ;;  %v8008_v19 = vpop.xlane.xlu1 %8007 }
 0x524   : > { %13811 = vpow2.f32 %v7866_v29 }
 0x525   : > { %v8255_v51 = vpack.c.bf16 %v8191_v41, %v8191_v41  ;;  %4519 = vrot.lane.b32.xlu1 %v18227_v35, %s14204_s11  ;;  %v8011_v37 = vpop.xlane.xlu0 %8010  ;;  %13813 = vrcp.f32 %v8008_v19  ;;  %v18272_v19 = vld [vmem:[#allocation47_spill] sm:$0xff] }
 0x526   : > { %13815 = vrcp.f32 %v8011_v37 }
 0x527   : > { %13179 = vmatmul.mubr.msk.bf16.vlgmr.msra.gmra.mxu1 %vm4575_vm3, %v8255_v51 }
 0x528   : > { %13190 = vmatprep.mubr.msk.bf16.mxu1 %vm14206_vm2, %v18138_v33 }
 0x529   : > { %v13806_v14 = vpop.eup %13805 }
 0x52a   : > { %v8192_v42 = vmul.f32 %v13806_v14, %v16699_v6 }
 0x52b   : > { %v17007_v32 = vpop.xlane.xlu1 %8013  ;;  %v13808_v62 = vpop.eup %13807 }
 0x52c   : > { %v8256_v17 = vpack.c.bf16 %v8192_v42, %v8192_v42  ;;  %v8193_v60 = vmul.f32 %v13808_v62, %v16707_v52  ;;  %v17035_v44 = vpop.eup %13809 }
 0x52d   : > { %v17015_v21 = vpop.xlane.xlu0 %8016  ;;  %v8036_v52 = vsel %vm4575_vm3, %v17035_v44, 0.0 }
 0x52e   : > { %v8257_v15 = vpack.c.bf16 %v8193_v60, %v8193_v60 }
 0x52f   : > { %v4512_v59 = vpop.permute.xlu1 %4511  ;;  %4521 = vrot.lane.b32.xlu0 %v18228_v50, %s14204_s11 }
 0x530   : > { %v9765_v5 = vsel %vm8291_vm4, %v4512_v59, 0 }
 0x531   : > { %13183 = vmatpush3.bf16.msra.mxu0 %v9765_v5  ;;  %v17039_v14 = vpop.eup %13811 }
 0x532   : > { %v17017_v39 = vpop.f32.mrf.mxu0  ;;  %13194 = vmatprep.subr.bf16.mxu0 %v18138_v33  ;;  %v8039_v55 = vsel %vm4575_vm3, %v17039_v14, 0.0 }
 0x533   : > { %18262 = vst [vmem:[#allocation40_spill] sm:$0xff] %v17017_v39 }
 0x534   : > { %v12994_v16 = vpop.f32.mrf.mxu0  ;;  %13185 = vmatmul.mubr.msk.bf16.vlgmr.msra.gmra.mxu0 %vm4575_vm3, %v8256_v17  ;;  %v17021_v6 = vpop.f32.mrf.mxu1 }
 0x535   : > { %18263 = vst [vmem:[#allocation44_spill] sm:$0xff] %v17021_v6  ;;  %v17025_v3 = vpop.xlane.xlu0 %8022  ;;  %13196 = vmatprep.mubr.msk.bf16.mxu0 %vm14206_vm2, %v18138_v33 }
 0x536   : > { %v8332_v56 = vpop.f32.mrf.mxu0  ;;  %v13000_v53 = vpop.f32.mrf.mxu1 }
 0x538   : > { %v12995_v12 = vpop.f32.mrf.mxu0  ;;  %v8378_v28 = vpop.f32.mrf.mxu1 }
 0x539   : > { %v4514_v11 = vpop.permute.xlu0 %4513 }
 0x53a   : > { %v9811_v41 = vsel %vm8291_vm4, %v4514_v11, 0  ;;  %v13001_v51 = vpop.f32.mrf.mxu1 }
 0x53b   : > { %13189 = vmatpush3.bf16.msra.mxu1 %v9811_v41 }
 0x53c   : > { %13200 = vmatprep.subr.bf16.mxu1 %v18138_v33 }
 0x53e   : > { %13191 = vmatmul.mubr.msk.bf16.vlgmr.msra.gmra.mxu1 %vm4575_vm3, %v8257_v15 }
 0x53f   : > { %13202 = vmatprep.mubr.msk.bf16.mxu1 %vm14206_vm2, %v18138_v33 }
 0x549   : > { %8037 = vadd.xlane.f32.xlu1 %v8036_v52 }
 0x54a   : > { %v17041_v42 = vpop.f32.mrf.mxu0 }
 0x54b   : > { %18265 = vst [vmem:[#allocation46_spill] sm:$0xff] %v17041_v42 }
 0x54c   : > { %v13006_v59 = vpop.f32.mrf.mxu0 }
 0x54e   : > { %v8424_v18 = vpop.f32.mrf.mxu0  ;;  %8040 = vadd.xlane.f32.xlu0 %v8039_v55 }
 0x54f   : > { %v17045_v5 = vpop.f32.mrf.mxu1 }
 0x550   : > { %18266 = vst [vmem:[#allocation48_spill] sm:$0xff] %v17045_v5  ;;  %v13007_v17 = vpop.f32.mrf.mxu0 }
 0x551   : > { %v13012_v25 = vpop.f32.mrf.mxu1 }
 0x552   : > { %v17047_v16 = vpop.f32.mrf.mxu0 }
 0x553   : > { %18267 = vst [vmem:[#allocation50_spill] sm:$0xff] %v17047_v16  ;;  %v8470_v62 = vpop.f32.mrf.mxu1 }
 0x554   : > { %v13018_v23 = vpop.f32.mrf.mxu0  ;;  %v7758_v62 = vsub.f32 %v18272_v19, %v16827_v58 }
 0x555   : > { %v13013_v63 = vpop.f32.mrf.mxu1 }
 0x556   : > { %v8516_v56 = vpop.f32.mrf.mxu0 }
 0x557   : > { %v13814_v56 = vpop.eup %13813 }
 0x558   : > { %v13019_v53 = vpop.f32.mrf.mxu0  ;;  %v17049_v60 = vpop.f32.mrf.mxu1 }
 0x559   : > { %18268 = vst [vmem:[#allocation51_spill] sm:$0xff] %v17049_v60 }
 0x55a   : > { %v17051_v12 = vpop.f32.mrf.mxu0  ;;  %4523 = vrot.lane.b32.xlu1 %v18229_v0, %s14204_s11  ;;  %v13024_v28 = vpop.f32.mrf.mxu1 }
 0x55b   : > { %18269 = vst [vmem:[#allocation49_spill] sm:$0xff] %v17051_v12 }
 0x55c   : > { %v13030_v29 = vpop.f32.mrf.mxu0  ;;  %v8562_v11 = vpop.f32.mrf.mxu1 }
 0x55d   : > { %v7868_v29 = vmul.f32 1.442695, %v7758_v62 }
 0x55e   : > { %v8608_v41 = vpop.f32.mrf.mxu0  ;;  %v13025_v51 = vpop.f32.mrf.mxu1 }
 0x55f   : > { %v18274_v51 = vld [vmem:[#allocation57_spill] sm:$0xff]  ;;  %13817 = vpow2.f32 %v7868_v29 }
 0x560   : > { %v13031_v15 = vpop.f32.mrf.mxu0  ;;  %v17055_v52 = vpop.xlane.xlu1 %8019 }
 0x561   : > { %v17057_v59 = vpop.f32.mrf.mxu1  ;;  %v7759_v15 = vsub.f32 %v18274_v51, %v16837_v27 }
 0x562   : > { %18270 = vst [vmem:[#allocation60_spill] sm:$0xff] %v17057_v59  ;;  %v17059_v55 = vpop.f32.mrf.mxu0 }
 0x563   : > { %18271 = vst [vmem:[#allocation55_spill] sm:$0xff] %v17059_v55  ;;  %v13036_v18 = vpop.f32.mrf.mxu1  ;;  %v7870_v55 = vmul.f32 1.442695, %v7759_v15 }
 0x564   : > { %v13042_v17 = vpop.f32.mrf.mxu0  ;;  %v17061_v25 = vpop.xlane.xlu1 %7707  ;;  %4525 = vrot.lane.b32.xlu0 %v18230_v49, %s14204_s11 }
 0x565   : > { %v8654_v23 = vpop.f32.mrf.mxu1  ;;  %v8194_v17 = vmul.f32 %v13814_v56, %v16720_v10  ;;  %13819 = vpow2.f32 %v7870_v55 }
 0x566   : > { %v8700_v63 = vpop.f32.mrf.mxu0  ;;  %13821 = vrcp.f32 %v17007_v32 }
 0x567   : > { %v13037_v37 = vpop.f32.mrf.mxu1  ;;  %v13816_v63 = vpop.eup %13815  ;;  %v8258_v12 = vpack.c.bf16 %v8194_v17, %v8194_v17  ;;  %13823 = vrcp.f32 %v17015_v21 }
 0x568   : > { %v13043_v53 = vpop.f32.mrf.mxu0  ;;  %v17067_v28 = vpop.xlane.xlu1 %8025  ;;  %v8195_v27 = vmul.f32 %v13816_v63, %v16730_v2 }
 0x569   : > { %v17069_v11 = vpop.f32.mrf.mxu1  ;;  %v17071_v41 = vpop.xlane.xlu0 %7710 }
 0x56a   : > { %18273 = vst [vmem:[#allocation68_spill] sm:$0xff] %v17069_v11  ;;  %v17075_v18 = vpop.f32.mrf.mxu0 }
 0x56b   : > { %18275 = vst [vmem:[#allocation56_spill] sm:$0xff] %v17075_v18  ;;  %v13048_v58 = vpop.f32.mrf.mxu1 }
 0x56c   : > { %v13054_v19 = vpop.f32.mrf.mxu0  ;;  %v4516_v23 = vpop.permute.xlu1 %4515 }
 0x56d   : > { %v9857_v37 = vsel %vm8291_vm4, %v4516_v23, 0  ;;  %v8746_v53 = vpop.f32.mrf.mxu1  ;;  %v17079_v62 = vpop.xlane.xlu0 %8028 }
 0x56e   : > { %v8792_v11 = vpop.f32.mrf.mxu0  ;;  %13195 = vmatpush3.bf16.msra.mxu0 %v9857_v37  ;;  %v17097_v23 = vpop.eup %13817 }
 0x56f   : > { %v13049_v59 = vpop.f32.mrf.mxu1  ;;  %13206 = vmatprep.subr.bf16.mxu0 %v18138_v33 }
 0x570   : > { %v13055_v10 = vpop.f32.mrf.mxu0  ;;  %v8259_v59 = vpack.c.bf16 %v8195_v27, %v8195_v27 }
 0x571   : > { %v17083_v56 = vpop.f32.mrf.mxu1  ;;  %13197 = vmatmul.mubr.msk.bf16.vlgmr.msra.gmra.mxu0 %vm4575_vm3, %v8258_v12  ;;  %v4518_v29 = vpop.permute.xlu0 %4517  ;;  %v8042_v10 = vsel %vm4575_vm3, %v17097_v23, 0.0 }
 0x572   : > { %18276 = vst [vmem:[#allocation70_spill] sm:$0xff] %v17083_v56  ;;  %v17086_v51 = vpop.f32.mrf.mxu0  ;;  %v9903_v58 = vsel %vm8291_vm4, %v4518_v29, 0  ;;  %13208 = vmatprep.mubr.msk.bf16.mxu0 %vm14206_vm2, %v18138_v33 }
 0x573   : > { %18277 = vst [vmem:[#allocation62_spill] sm:$0xff] %v17086_v51  ;;  %v13060_v11 = vpop.f32.mrf.mxu1  ;;  %13201 = vmatpush3.bf16.msra.mxu1 %v9903_v58  ;;  %v17103_v58 = vpop.eup %13819 }
 0x574   : > { %v13066_v15 = vpop.f32.mrf.mxu0  ;;  %13212 = vmatprep.subr.bf16.mxu1 %v18138_v33 }
 0x575   : > { %v8838_v2 = vpop.f32.mrf.mxu1 }
 0x576   : > { %v8884_v17 = vpop.f32.mrf.mxu0  ;;  %13203 = vmatmul.mubr.msk.bf16.vlgmr.msra.gmra.mxu1 %vm4575_vm3, %v8259_v59  ;;  %v8045_v2 = vsel %vm4575_vm3, %v17103_v58, 0.0 }
 0x577   : > { %v13061_v12 = vpop.f32.mrf.mxu1  ;;  %13214 = vmatprep.mubr.msk.bf16.mxu1 %vm14206_vm2, %v18138_v33 }
 0x578   : > { %v13067_v55 = vpop.f32.mrf.mxu0 }
 0x579   : > { %v17095_v19 = vpop.f32.mrf.mxu1 }
 0x57a   : > { %18278 = vst [vmem:[#allocation36_spill] sm:$0xff] %v17095_v19  ;;  %v17099_v63 = vpop.f32.mrf.mxu0 }
 0x57b   : > { %18279 = vst [vmem:[#allocation77_spill] sm:$0xff] %v17099_v63  ;;  %v13072_v37 = vpop.f32.mrf.mxu1 }
 0x57c   : > { %v13078_v53 = vpop.f32.mrf.mxu0  ;;  %v18281_v37 = vld [vmem:[#allocation53_spill] sm:$0xff] }
 0x57d   : > { %v8930_v27 = vpop.f32.mrf.mxu1  ;;  %v7760_v53 = vsub.f32 %v18281_v37, %v16835_v9 }
 0x57e   : > { %v8976_v29 = vpop.f32.mrf.mxu0  ;;  %8043 = vadd.xlane.f32.xlu1 %v8042_v10  ;;  %v13822_v27 = vpop.eup %13821 }
 0x57f   : > { %v13073_v11 = vpop.f32.mrf.mxu1  ;;  %v7872_v29 = vmul.f32 1.442695, %v7760_v53 }
 0x580   : > { %v13079_v59 = vpop.f32.mrf.mxu0  ;;  %v18282_v11 = vld [vmem:[#allocation58_spill] sm:$0xff] }
 0x581   : > { %v17105_v15 = vpop.f32.mrf.mxu1  ;;  %v7761_v59 = vsub.f32 %v18282_v11, %v16843_v47  ;;  %13825 = vpow2.f32 %v7872_v29 }
 0x582   : > { %18280 = vst [vmem:[#allocation74_spill] sm:$0xff] %v17105_v15 }
 0x583   : > { %v13084_v17 = vpop.f32.mrf.mxu1  ;;  %8046 = vadd.xlane.f32.xlu0 %v8045_v2  ;;  %v8196_v2 = vmul.f32 %v13822_v27, %v16746_v54 }
 0x585   : > { %v9022_v12 = vpop.f32.mrf.mxu1  ;;  %v8260_v63 = vpack.c.bf16 %v8196_v2, %v8196_v2 }
 0x586   : > { %v13824_v12 = vpop.eup %13823 }
 0x587   : > { %v13085_v55 = vpop.f32.mrf.mxu1  ;;  %v8197_v9 = vmul.f32 %v13824_v12, %v16755_v20 }
 0x588   : > { %v7874_v55 = vmul.f32 1.442695, %v7761_v59 }
 0x589   : > { %v8261_v47 = vpack.c.bf16 %v8197_v9, %v8197_v9 }
 0x58a   : > { %13827 = vpow2.f32 %v7874_v55 }
 0x58b   : > { %13829 = vrcp.f32 %v17055_v52  ;;  %v18286_v52 = vld [vmem:[#allocation59_spill] sm:$0xff] }
 0x58c   : > { %13831 = vrcp.f32 %v17025_v3 }
 0x58f   : > { %4527 = vrot.lane.b32.xlu1 %v18231_v7, %s14204_s11 }
 0x599   : > { %4529 = vrot.lane.b32.xlu0 %v18232_v43, %s14204_s11 }
 0x59d   : > { %v17117_v10 = vpop.xlane.xlu1 %8031 }
 0x5a1   : > { %v4520_v17 = vpop.permute.xlu1 %4519 }
 0x5a2   : > { %v9949_v32 = vsel %vm8291_vm4, %v4520_v17, 0  ;;  %v17123_v21 = vpop.xlane.xlu0 %8034 }
 0x5a3   : > { %13207 = vmatpush3.bf16.msra.mxu0 %v9949_v32 }
 0x5a4   : > { %13218 = vmatprep.subr.bf16.mxu0 %v18138_v33 }
 0x5a6   : > { %13209 = vmatmul.mubr.msk.bf16.vlgmr.msra.gmra.mxu0 %vm4575_vm3, %v8260_v63  ;;  %v4522_v37 = vpop.permute.xlu0 %4521  ;;  %v17137_v63 = vpop.eup %13825 }
 0x5a7   : > { %v9995_v54 = vsel %vm8291_vm4, %v4522_v37, 0  ;;  %13220 = vmatprep.mubr.msk.bf16.mxu0 %vm14206_vm2, %v18138_v33  ;;  %v8048_v12 = vsel %vm4575_vm3, %v17137_v63, 0.0  ;;  %v17147_v55 = vpop.eup %13827 }
 0x5a8   : > { %13213 = vmatpush3.bf16.msra.mxu1 %v9995_v54  ;;  %v13830_v3 = vpop.eup %13829 }
 0x5a9   : > { %13224 = vmatprep.subr.bf16.mxu1 %v18138_v33  ;;  %v17132_v53 = vpop.f32.mrf.mxu0  ;;  %v13832_v5 = vpop.eup %13831 }
 0x5ab   : > { %13215 = vmatmul.mubr.msk.bf16.vlgmr.msra.gmra.mxu1 %vm4575_vm3, %v8261_v47  ;;  %v13090_v27 = vpop.f32.mrf.mxu0 }
 0x5ac   : > { %13226 = vmatprep.mubr.msk.bf16.mxu1 %vm14206_vm2, %v18138_v33  ;;  %v8051_v27 = vsel %vm4575_vm3, %v17147_v55, 0.0 }
 0x5ad   : > { %v9068_v20 = vpop.f32.mrf.mxu0 }
 0x5ae   : > { %v17139_v29 = vpop.f32.mrf.mxu1 }
 0x5af   : > { %v13091_v11 = vpop.f32.mrf.mxu0 }
 0x5b0   : > { %v13096_v2 = vpop.f32.mrf.mxu1 }
 0x5b1   : > { %v17143_v17 = vpop.f32.mrf.mxu0 }
 0x5b2   : > { %v9114_v32 = vpop.f32.mrf.mxu1 }
 0x5b3   : > { %8049 = vadd.xlane.f32.xlu1 %v8048_v12  ;;  %v13102_v9 = vpop.f32.mrf.mxu0 }
 0x5b4   : > { %v13097_v37 = vpop.f32.mrf.mxu1 }
 0x5b5   : > { %v9160_v54 = vpop.f32.mrf.mxu0 }
 0x5b6   : > { %v17149_v47 = vpop.f32.mrf.mxu1 }
 0x5b7   : > { %v13103_v20 = vpop.f32.mrf.mxu0 }
 0x5b8   : > { %8052 = vadd.xlane.f32.xlu0 %v8051_v27  ;;  %v13108_v2 = vpop.f32.mrf.mxu1 }
 0x5b9   : > { %v17155_v59 = vpop.f32.mrf.mxu0 }
 0x5ba   : > { %v9206_v12 = vpop.f32.mrf.mxu1 }
 0x5bb   : > { %v13114_v32 = vpop.f32.mrf.mxu0 }
 0x5bc   : > { %v13109_v15 = vpop.f32.mrf.mxu1 }
 0x5bd   : > { %v9252_v51 = vpop.f32.mrf.mxu0 }
 0x5be   : > { %v17157_v9 = vpop.f32.mrf.mxu1 }
 0x5bf   : > { %v13115_v37 = vpop.f32.mrf.mxu0 }
 0x5c0   : > { %v13120_v19 = vpop.f32.mrf.mxu1 }
 0x5c1   : > { %v17161_v18 = vpop.f32.mrf.mxu0 }
 0x5c2   : > { %18283 = vst [vmem:[#allocation79_spill] sm:$0xff] %v17161_v18  ;;  %v9298_v20 = vpop.f32.mrf.mxu1 }
 0x5c3   : > { %v13126_v56 = vpop.f32.mrf.mxu0 }
 0x5c4   : > { %4531 = vrot.lane.b32.xlu1 %v18233_v61, %s14204_s11  ;;  %v13121_v27 = vpop.f32.mrf.mxu1 }
 0x5c5   : > { %v9344_v2 = vpop.f32.mrf.mxu0  ;;  %v7762_v27 = vsub.f32 %v18286_v52, %v16839_v8  ;;  %v8198_v8 = vmul.f32 %v13830_v3, %v16851_v40  ;;  %v8199_v40 = vmul.f32 %v13832_v5, %v16773_v45 }
 0x5c6   : > { %v17166_v15 = vpop.f32.mrf.mxu1 }
 0x5c7   : > { %18284 = vst [vmem:[#allocation37_spill] sm:$0xff] %v17166_v15  ;;  %v13127_v51 = vpop.f32.mrf.mxu0 }
 0x5c8   : > { %v13132_v32 = vpop.f32.mrf.mxu1 }
 0x5c9   : > { %v17171_v19 = vpop.f32.mrf.mxu0 }
 0x5ca   : > { %18285 = vst [vmem:[#allocation75_spill] sm:$0xff] %v17171_v19  ;;  %v9390_v37 = vpop.f32.mrf.mxu1 }
 0x5cb   : > { %v13138_v56 = vpop.f32.mrf.mxu0 }
 0x5cc   : > { %v13133_v20 = vpop.f32.mrf.mxu1  ;;  %v7876_v56 = vmul.f32 1.442695, %v7762_v27 }
 0x5cd   : > { %v9436_v54 = vpop.f32.mrf.mxu0  ;;  %v18289_v20 = vld [vmem:[#allocation61_spill] sm:$0xff] }
 0x5ce   : > { %4533 = vrot.lane.b32.xlu0 %v18234_v48, %s14204_s11  ;;  %v17177_v2 = vpop.f32.mrf.mxu1  ;;  %v7763_v16 = vsub.f32 %v18289_v20, %v16847_v13  ;;  %13833 = vpow2.f32 %v7876_v56 }
 0x5cf   : > { %18287 = vst [vmem:[#allocation39_spill] sm:$0xff] %v17177_v2  ;;  %v13139_v51 = vpop.f32.mrf.mxu0 }
 0x5d0   : > { %v13144_v12 = vpop.f32.mrf.mxu1  ;;  %v7878_v6 = vmul.f32 1.442695, %v7763_v16 }
 0x5d1   : > { %v17181_v11 = vpop.f32.mrf.mxu0 }
 0x5d2   : > { %18288 = vst [vmem:[#allocation38_spill] sm:$0xff] %v17181_v11  ;;  %v17183_v37 = vpop.xlane.xlu1 %8037  ;;  %v9482_v54 = vpop.f32.mrf.mxu1  ;;  %13835 = vpow2.f32 %v7878_v6  ;;  %v18303_v11 = vld [vmem:[#allocation66_spill] sm:$0xff] }
 0x5d3   : > { %v13150_v60 = vpop.f32.mrf.mxu0  ;;  %13837 = vrcp.f32 %v17067_v28 }
 0x5d4   : > { %v13145_v52 = vpop.f32.mrf.mxu1  ;;  %v8262_v60 = vpack.c.bf16 %v8198_v8, %v8198_v8  ;;  %v8263_v8 = vpack.c.bf16 %v8199_v40, %v8199_v40  ;;  %13839 = vrcp.f32 %v17079_v62  ;;  %v18297_v62 = vld [vmem:[#allocation35_spill] sm:$0xff] }
 0x5d5   : > { %v9528_v42 = vpop.f32.mrf.mxu0 }
 0x5d6   : > { %v4524_v51 = vpop.permute.xlu1 %4523  ;;  %v17189_v32 = vpop.f32.mrf.mxu1 }
 0x5d7   : > { %v10041_v12 = vsel %vm8291_vm4, %v4524_v51, 0  ;;  %18290 = vst [vmem:[#allocation41_spill] sm:$0xff] %v17189_v32  ;;  %v17191_v39 = vpop.xlane.xlu0 %8040  ;;  %v13151_v27 = vpop.f32.mrf.mxu0 }
 0x5d8   : > { %13219 = vmatpush3.bf16.msra.mxu0 %v10041_v12  ;;  %v13156_v54 = vpop.f32.mrf.mxu1 }
 0x5d9   : > { %13230 = vmatprep.subr.bf16.mxu0 %v18138_v33  ;;  %v17197_v42 = vpop.f32.mrf.mxu0 }
 0x5da   : > { %18291 = vst [vmem:[#allocation42_spill] sm:$0xff] %v17197_v42  ;;  %v9574_v3 = vpop.f32.mrf.mxu1 }
 0x5db   : > { %13221 = vmatmul.mubr.msk.bf16.vlgmr.msra.gmra.mxu0 %vm4575_vm3, %v8262_v60  ;;  %v4526_v56 = vpop.permute.xlu0 %4525  ;;  %v13162_v20 = vpop.f32.mrf.mxu0 }
 0x5dc   : > { %v10087_v16 = vsel %vm8291_vm4, %v4526_v56, 0  ;;  %13232 = vmatprep.mubr.msk.bf16.mxu0 %vm14206_vm2, %v18138_v33  ;;  %v13157_v52 = vpop.f32.mrf.mxu1  ;;  %v17213_v54 = vpop.eup %13833 }
 0x5dd   : > { %13225 = vmatpush3.bf16.msra.mxu1 %v10087_v16  ;;  %v9620_v51 = vpop.f32.mrf.mxu0  ;;  %v8054_v20 = vsel %vm4575_vm3, %v17213_v54, 0.0 }
 0x5de   : > { %13236 = vmatprep.subr.bf16.mxu1 %v18138_v33  ;;  %v17204_v45 = vpop.f32.mrf.mxu1 }
 0x5df   : > { %18292 = vst [vmem:[#allocation45_spill] sm:$0xff] %v17204_v45  ;;  %v13163_v5 = vpop.f32.mrf.mxu0  ;;  %v17221_v51 = vpop.eup %13835 }
 0x5e0   : > { %13227 = vmatmul.mubr.msk.bf16.vlgmr.msra.gmra.mxu1 %vm4575_vm3, %v8263_v8  ;;  %v13168_v6 = vpop.f32.mrf.mxu1  ;;  %v13838_v8 = vpop.eup %13837 }
 0x5e1   : > { %13238 = vmatprep.mubr.msk.bf16.mxu1 %vm14206_vm2, %v18138_v33 }
 0x5e2   : > { %v17211_v27 = vpop.f32.mrf.mxu0  ;;  %v9666_v60 = vpop.f32.mrf.mxu1 }
 0x5e3   : > { %18293 = vst [vmem:[#allocation47_spill] sm:$0xff] %v17211_v27  ;;  %v8057_v60 = vsel %vm4575_vm3, %v17221_v51, 0.0 }
 0x5e4   : > { %v13174_v40 = vpop.f32.mrf.mxu0  ;;  %v13169_v3 = vpop.f32.mrf.mxu1 }
 0x5e6   : > { %v9712_v56 = vpop.f32.mrf.mxu0 }
 0x5e7   : > { %v17217_v16 = vpop.f32.mrf.mxu1 }
 0x5e8   : > { %18294 = vst [vmem:[#allocation57_spill] sm:$0xff] %v17217_v16  ;;  %8055 = vadd.xlane.f32.xlu1 %v8054_v20  ;;  %v13175_v52 = vpop.f32.mrf.mxu0  ;;  %v8200_v16 = vmul.f32 %v13838_v8, %v18297_v62  ;;  %v18298_v8 = vld [vmem:[#allocation52_spill] sm:$0xff] }
 0x5e9   : > { %v13180_v5 = vpop.f32.mrf.mxu1 }
 0x5ea   : > { %v13840_v5 = vpop.eup %13839 }
 0x5eb   : > { %v9758_v6 = vpop.f32.mrf.mxu1 }
 0x5ed   : > { %8058 = vadd.xlane.f32.xlu0 %v8057_v60  ;;  %v13181_v40 = vpop.f32.mrf.mxu1 }
 0x5f4   : > { %v17225_v3 = vpop.f32.mrf.mxu0 }
 0x5f6   : > { %v13186_v56 = vpop.f32.mrf.mxu0 }
 0x5f8   : > { %v9804_v12 = vpop.f32.mrf.mxu0 }
 0x5f9   : > { %4535 = vrot.lane.b32.xlu1 %v18235_v38, %s14204_s11  ;;  %v18295_v12 = vld [vmem:[#allocation63_spill] sm:$0xff] }
 0x5fa   : > { %v13187_v20 = vpop.f32.mrf.mxu0  ;;  %v7764_v40 = vsub.f32 %v18295_v12, %v16845_v34  ;;  %v8264_v34 = vpack.c.bf16 %v8200_v16, %v8200_v16  ;;  %v8201_v12 = vmul.f32 %v13840_v5, %v16871_v36 }
 0x5fb   : > { %v18296_v20 = vld [vmem:[#allocation64_spill] sm:$0xff] }
 0x5fc   : > { %v7880_v28 = vmul.f32 1.442695, %v7764_v40  ;;  %v7765_v27 = vsub.f32 %v18296_v20, %v16853_v57 }
 0x5fe   : > { %v17230_v52 = vpop.f32.mrf.mxu1  ;;  %13841 = vpow2.f32 %v7880_v28  ;;  %v7882_v45 = vmul.f32 1.442695, %v7765_v27 }
 0x600   : > { %v13192_v6 = vpop.f32.mrf.mxu1  ;;  %13843 = vpow2.f32 %v7882_v45 }
 0x601   : > { %13845 = vrcp.f32 %v17117_v10 }
 0x602   : > { %v9850_v60 = vpop.f32.mrf.mxu1  ;;  %13847 = vrcp.f32 %v17123_v21 }
 0x603   : > { %4537 = vrot.lane.b32.xlu0 %v18236_v4, %s14204_s11 }
 0x604   : > { %v13193_v56 = vpop.f32.mrf.mxu1 }
 0x607   : > { %v17239_v13 = vpop.xlane.xlu1 %8043 }
 0x60b   : > { %v4528_v42 = vpop.permute.xlu1 %4527  ;;  %v17257_v27 = vpop.eup %13841 }
 0x60c   : > { %v10133_v6 = vsel %vm8291_vm4, %v4528_v42, 0  ;;  %v17245_v60 = vpop.xlane.xlu0 %8046  ;;  %v8265_v42 = vpack.c.bf16 %v8201_v12, %v8201_v12  ;;  %v8060_v36 = vsel %vm4575_vm3, %v17257_v27, 0.0 }
 0x60d   : > { %13231 = vmatpush3.bf16.msra.mxu0 %v10133_v6  ;;  %v17261_v45 = vpop.eup %13843 }
 0x60e   : > { %13242 = vmatprep.subr.bf16.mxu0 %v18138_v33  ;;  %v8063_v16 = vsel %vm4575_vm3, %v17261_v45, 0.0 }
 0x610   : > { %13233 = vmatmul.mubr.msk.bf16.vlgmr.msra.gmra.mxu0 %vm4575_vm3, %v8264_v34  ;;  %v4530_v40 = vpop.permute.xlu0 %4529  ;;  %v18299_v34 = vld [vmem:[#allocation54_spill] sm:$0xff] }
 0x611   : > { %v10179_v57 = vsel %vm8291_vm4, %v4530_v40, 0  ;;  %13244 = vmatprep.mubr.msk.bf16.mxu0 %vm14206_vm2, %v18138_v33  ;;  %v18300_v40 = vld [vmem:[#allocation30_spill] sm:$0xff] }
 0x612   : > { %13237 = vmatpush3.bf16.msra.mxu1 %v10179_v57  ;;  %v18301_v57 = vld [vmem:[#allocation65_spill] sm:$0xff] }
 0x613   : > { %13248 = vmatprep.subr.bf16.mxu1 %v18138_v33 }
 0x615   : > { %13239 = vmatmul.mubr.msk.bf16.vlgmr.msra.gmra.mxu1 %vm4575_vm3, %v8265_v42  ;;  %v7766_v42 = vsub.f32 %v18301_v57, %v18300_v40 }
 0x616   : > { %13250 = vmatprep.mubr.msk.bf16.mxu1 %vm14206_vm2, %v18138_v33 }
 0x617   : > { %v7884_v21 = vmul.f32 1.442695, %v7766_v42 }
 0x619   : > { %13849 = vpow2.f32 %v7884_v21 }
 0x61d   : > { %8061 = vadd.xlane.f32.xlu1 %v8060_v36  ;;  %v13846_v36 = vpop.eup %13845 }
 0x61e   : > { %v13848_v6 = vpop.eup %13847 }
 0x61f   : > { %v8203_v57 = vmul.f32 %v13848_v6, %v16974_v22 }
 0x622   : > { %8064 = vadd.xlane.f32.xlu0 %v8063_v16 }
 0x62e   : > { %4539 = vrot.lane.b32.xlu1 %v18298_v8, %s14204_s11 }
 0x631   : > { %v17268_v5 = vpop.f32.mrf.mxu0 }
 0x633   : > { %v13198_v56 = vpop.f32.mrf.mxu0 }
 0x635   : > { %v9896_v28 = vpop.f32.mrf.mxu0 }
 0x636   : > { %v17271_v20 = vpop.f32.mrf.mxu1  ;;  %v18302_v28 = vld [vmem:[#allocation34_spill] sm:$0xff] }
 0x637   : > { %v13199_v62 = vpop.f32.mrf.mxu0  ;;  %v7767_v32 = vsub.f32 %v18303_v11, %v18302_v28  ;;  %v8267_v11 = vpack.c.bf16 %v8203_v57, %v8203_v57  ;;  %v18307_v57 = vld [vmem:[#allocation31_spill] sm:$0xff] }
 0x638   : > { %4541 = vrot.lane.b32.xlu0 %v18299_v34, %s14204_s11  ;;  %v13204_v12 = vpop.f32.mrf.mxu1  ;;  %v8202_v62 = vmul.f32 %v13846_v36, %v16957_v30 }
 0x639   : > { %v7886_v18 = vmul.f32 1.442695, %v7767_v32  ;;  %v18304_v32 = vld [vmem:[#allocation29_spill] sm:$0xff] }
 0x63a   : > { %v9942_v10 = vpop.f32.mrf.mxu1  ;;  %v8266_v40 = vpack.c.bf16 %v8202_v62, %v8202_v62  ;;  %v18306_v62 = vld [vmem:[#allocation32_spill] sm:$0xff] }
 0x63b   : > { %13851 = vpow2.f32 %v7886_v18 }
 0x63c   : > { %v17279_v16 = vpop.xlane.xlu1 %8049  ;;  %v13205_v56 = vpop.f32.mrf.mxu1  ;;  %13853 = vrcp.f32 %v17183_v37 }
 0x63d   : > { %13855 = vrcp.f32 %v17191_v39 }
 0x640   : > { %v4532_v19 = vpop.permute.xlu1 %4531 }
 0x641   : > { %v10225_v2 = vsel %vm8291_vm4, %v4532_v19, 0  ;;  %v17285_v12 = vpop.xlane.xlu0 %8052  ;;  %v17297_v19 = vpop.eup %13849 }
 0x642   : > { %13243 = vmatpush3.bf16.msra.mxu0 %v10225_v2  ;;  %v8066_v22 = vsel %vm4575_vm3, %v17297_v19, 0.0 }
 0x643   : > { %13254 = vmatprep.subr.bf16.mxu0 %v18138_v33 }
 0x645   : > { %13245 = vmatmul.mubr.msk.bf16.vlgmr.msra.gmra.mxu0 %vm4575_vm3, %v8266_v40  ;;  %v4534_v42 = vpop.permute.xlu0 %4533 }
 0x646   : > { %v10271_v30 = vsel %vm8291_vm4, %v4534_v42, 0  ;;  %13256 = vmatprep.mubr.msk.bf16.mxu0 %vm14206_vm2, %v18138_v33  ;;  %v18308_v42 = vld [vmem:[#allocation67_spill] sm:$0xff] }
 0x647   : > { %13249 = vmatpush3.bf16.msra.mxu1 %v10271_v30  ;;  %v7768_v30 = vsub.f32 %v18308_v42, %v18307_v57 }
 0x648   : > { %13260 = vmatprep.subr.bf16.mxu1 %v18138_v33  ;;  %v17301_v18 = vpop.eup %13851 }
 0x649   : > { %v8069_v2 = vsel %vm4575_vm3, %v17301_v18, 0.0  ;;  %v7888_v39 = vmul.f32 1.442695, %v7768_v30 }
 0x64a   : > { %13251 = vmatmul.mubr.msk.bf16.vlgmr.msra.gmra.mxu1 %vm4575_vm3, %v8267_v11  ;;  %v13854_v11 = vpop.eup %13853 }
 0x64b   : > { %13262 = vmatprep.mubr.msk.bf16.mxu1 %vm14206_vm2, %v18138_v33  ;;  %v13856_v28 = vpop.eup %13855  ;;  %13857 = vpow2.f32 %v7888_v39 }
 0x64c   : > { %v8205_v42 = vmul.f32 %v13856_v28, %v17039_v14 }
 0x652   : > { %8067 = vadd.xlane.f32.xlu1 %v8066_v22 }
 0x657   : > { %8070 = vadd.xlane.f32.xlu0 %v8069_v2 }
 0x663   : > { %4543 = vrot.lane.b32.xlu1 %v18304_v32, %s14207_s9  ;;  %v18309_v32 = vld [vmem:[#allocation33_spill] sm:$0xff] }
 0x666   : > { %v17308_v6 = vpop.f32.mrf.mxu0 }
 0x667   : > { %18305 = vst [vmem:[#allocation53_spill] sm:$0xff] %v17308_v6 }
 0x668   : > { %v13210_v10 = vpop.f32.mrf.mxu0 }
 0x669   : > { %v18310_v10 = vld [vmem:[#allocation69_spill] sm:$0xff] }
 0x66a   : > { %v9988_v36 = vpop.f32.mrf.mxu0 }
 0x66b   : > { %v17311_v56 = vpop.f32.mrf.mxu1  ;;  %v7769_v36 = vsub.f32 %v18310_v10, %v18309_v32 }
 0x66c   : > { %v13211_v21 = vpop.f32.mrf.mxu0 }
 0x66d   : > { %4545 = vrot.lane.b32.xlu0 %v18306_v62, %s14207_s9  ;;  %v13216_v40 = vpop.f32.mrf.mxu1  ;;  %v8204_v21 = vmul.f32 %v13854_v11, %v17035_v44  ;;  %v7890_v6 = vmul.f32 1.442695, %v7769_v36 }
 0x66f   : > { %v10034_v37 = vpop.f32.mrf.mxu1  ;;  %v8268_v57 = vpack.c.bf16 %v8204_v21, %v8204_v21  ;;  %13859 = vpow2.f32 %v7890_v6 }
 0x670   : > { %v17337_v37 = vpop.eup %13857  ;;  %13861 = vrcp.f32 %v17239_v13 }
 0x671   : > { %v17319_v22 = vpop.xlane.xlu1 %8055  ;;  %v13217_v2 = vpop.f32.mrf.mxu1  ;;  %v8072_v14 = vsel %vm4575_vm3, %v17337_v37, 0.0  ;;  %13863 = vrcp.f32 %v17245_v60 }
 0x675   : > { %v4536_v15 = vpop.permute.xlu1 %4535 }
 0x676   : > { %v10317_v62 = vsel %vm8291_vm4, %v4536_v15, 0  ;;  %v17325_v40 = vpop.xlane.xlu0 %8058  ;;  %v8269_v15 = vpack.c.bf16 %v8205_v42, %v8205_v42 }
 0x677   : > { %13255 = vmatpush3.bf16.msra.mxu0 %v10317_v62  ;;  %v18311_v62 = vld [vmem:[#allocation43_spill] sm:$0xff] }
 0x678   : > { %13266 = vmatprep.subr.bf16.mxu0 %v18138_v33 }
 0x67a   : > { %13257 = vmatmul.mubr.msk.bf16.vlgmr.msra.gmra.mxu0 %vm4575_vm3, %v8268_v57  ;;  %v4538_v30 = vpop.permute.xlu0 %4537 }
 0x67b   : > { %v10363_v44 = vsel %vm8291_vm4, %v4538_v30, 0  ;;  %13268 = vmatprep.mubr.msk.bf16.mxu0 %vm14206_vm2, %v18138_v33 }
 0x67c   : > { %13261 = vmatpush3.bf16.msra.mxu1 %v10363_v44  ;;  %v17341_v6 = vpop.eup %13859 }
 0x67d   : > { %13272 = vmatprep.subr.bf16.mxu1 %v18138_v33  ;;  %v8075_v28 = vsel %vm4575_vm3, %v17341_v6, 0.0  ;;  %v13862_v42 = vpop.eup %13861 }
 0x67f   : > { %13263 = vmatmul.mubr.msk.bf16.vlgmr.msra.gmra.mxu1 %vm4575_vm3, %v8269_v15  ;;  %v18313_v15 = vld [vmem:[#allocation72_spill] sm:$0xff] }
 0x680   : > { %13274 = vmatprep.mubr.msk.bf16.mxu1 %vm14206_vm2, %v18138_v33 }
 0x687   : > { %8073 = vadd.xlane.f32.xlu1 %v8072_v14  ;;  %v7771_v14 = vsub.f32 %v18313_v15, %v16878_v26 }
 0x68c   : > { %8076 = vadd.xlane.f32.xlu0 %v8075_v28  ;;  %v8206_v28 = vmul.f32 %v13862_v42, %v17097_v23 }
 0x698   : > { %4547 = vrot.lane.b32.xlu1 %v18225_v46, %s14207_s9  ;;  %v18312_v46 = vld [vmem:[#allocation71_spill] sm:$0xff] }
 0x699   : > { %v7770_v57 = vsub.f32 %v18312_v46, %v18311_v62  ;;  %v8270_v62 = vpack.c.bf16 %v8206_v28, %v8206_v28 }
 0x69b   : > { %v17348_v11 = vpop.f32.mrf.mxu0  ;;  %v7892_v60 = vmul.f32 1.442695, %v7770_v57 }
 0x69d   : > { %v13222_v2 = vpop.f32.mrf.mxu0  ;;  %13865 = vpow2.f32 %v7892_v60 }
 0x69f   : > { %v10080_v39 = vpop.f32.mrf.mxu0 }
 0x6a0   : > { %v17351_v32 = vpop.f32.mrf.mxu1  ;;  %v13864_v39 = vpop.eup %13863 }
 0x6a1   : > { %v13223_v10 = vpop.f32.mrf.mxu0  ;;  %v13570_v36 = vpack.i.bf16 %v17351_v32, %v17348_v11  ;;  %v8207_v46 = vmul.f32 %v13864_v39, %v17103_v58 }
 0x6a2   : > { %4549 = vrot.lane.b32.xlu0 %v18226_v24, %s14207_s9  ;;  %v13228_v21 = vpop.f32.mrf.mxu1 }
 0x6a3   : > { %v7894_v21 = vmul.f32 1.442695, %v7771_v14  ;;  %v8271_v23 = vpack.c.bf16 %v8207_v46, %v8207_v46 }
 0x6a4   : > { %v10126_v13 = vpop.f32.mrf.mxu1 }
 0x6a5   : > { %13867 = vpow2.f32 %v7894_v21 }
 0x6a6   : > { %v17359_v30 = vpop.xlane.xlu1 %8061  ;;  %v13229_v44 = vpop.f32.mrf.mxu1  ;;  %13869 = vrcp.f32 %v17279_v16 }
 0x6a7   : > { %13871 = vrcp.f32 %v17285_v12 }
 0x6aa   : > { %v4540_v2 = vpop.permute.xlu1 %4539  ;;  %v17377_v13 = vpop.eup %13865 }
 0x6ab   : > { %v10409_v24 = vsel %vm8291_vm4, %v4540_v2, 0  ;;  %v17365_v10 = vpop.xlane.xlu0 %8064  ;;  %v8078_v58 = vsel %vm4575_vm3, %v17377_v13, 0.0 }
 0x6ac   : > { %13267 = vmatpush3.bf16.msra.mxu0 %v10409_v24 }
 0x6ad   : > { %13278 = vmatprep.subr.bf16.mxu0 %v18138_v33 }
 0x6af   : > { %13269 = vmatmul.mubr.msk.bf16.vlgmr.msra.gmra.mxu0 %vm4575_vm3, %v8270_v62  ;;  %v4542_v57 = vpop.permute.xlu0 %4541 }
 0x6b0   : > { %v10455_v26 = vsel %vm8291_vm4, %v4542_v57, 0  ;;  %13280 = vmatprep.mubr.msk.bf16.mxu0 %vm14206_vm2, %v18138_v33 }
 0x6b1   : > { %13273 = vmatpush3.bf16.msra.mxu1 %v10455_v26  ;;  %v18315_v26 = vld [vmem:[#allocation76_spill] sm:$0xff] }
 0x6b2   : > { %13284 = vmatprep.subr.bf16.mxu1 %v18138_v33  ;;  %v17381_v42 = vpop.eup %13867 }
 0x6b3   : > { %v8081_v44 = vsel %vm4575_vm3, %v17381_v42, 0.0  ;;  %v13870_v62 = vpop.eup %13869 }
 0x6b4   : > { %13275 = vmatmul.mubr.msk.bf16.vlgmr.msra.gmra.mxu1 %vm4575_vm3, %v8271_v23  ;;  %v7773_v23 = vsub.f32 %v18315_v26, %v16959_v31 }
 0x6b5   : > { %13286 = vmatprep.mubr.msk.bf16.mxu1 %vm14206_vm2, %v18138_v33 }
 0x6bc   : > { %8079 = vadd.xlane.f32.xlu1 %v8078_v58  ;;  %v8208_v58 = vmul.f32 %v13870_v62, %v17137_v63 }
 0x6c1   : > { %8082 = vadd.xlane.f32.xlu0 %v8081_v44 }
 0x6cd   : > { %4551 = vrot.lane.b32.xlu1 %v18227_v35, %s14207_s9  ;;  %v18314_v35 = vld [vmem:[#allocation73_spill] sm:$0xff] }
 0x6ce   : > { %v7772_v21 = vsub.f32 %v18314_v35, %v16948_v1  ;;  %v8272_v1 = vpack.c.bf16 %v8208_v58, %v8208_v58 }
 0x6d0   : > { %v17388_v60 = vpop.f32.mrf.mxu0  ;;  %v7896_v12 = vmul.f32 1.442695, %v7772_v21 }
 0x6d2   : > { %v13234_v15 = vpop.f32.mrf.mxu0  ;;  %13873 = vpow2.f32 %v7896_v12 }
 0x6d3   : > { %v13872_v15 = vpop.eup %13871 }
 0x6d4   : > { %v10172_v14 = vpop.f32.mrf.mxu0 }
 0x6d5   : > { %v17391_v28 = vpop.f32.mrf.mxu1 }
 0x6d6   : > { %v13235_v2 = vpop.f32.mrf.mxu0  ;;  %v13595_v39 = vpack.i.bf16 %v17391_v28, %v17388_v60 }
 0x6d7   : > { %4553 = vrot.lane.b32.xlu0 %v18228_v50, %s14207_s9  ;;  %v13240_v24 = vpop.f32.mrf.mxu1  ;;  %v7898_v2 = vmul.f32 1.442695, %v7773_v23 }
 0x6d8   : > { %v8209_v24 = vmul.f32 %v13872_v15, %v17147_v55 }
 0x6d9   : > { %v10218_v16 = vpop.f32.mrf.mxu1  ;;  %13875 = vpow2.f32 %v7898_v2 }
 0x6da   : > { %v8273_v63 = vpack.c.bf16 %v8209_v24, %v8209_v24  ;;  %13877 = vrcp.f32 %v17319_v22 }
 0x6db   : > { %v17399_v46 = vpop.xlane.xlu1 %8067  ;;  %v13241_v57 = vpop.f32.mrf.mxu1  ;;  %13879 = vrcp.f32 %v17325_v40 }
 0x6df   : > { %v4544_v44 = vpop.permute.xlu1 %4543  ;;  %v17417_v21 = vpop.eup %13873 }
 0x6e0   : > { %v10501_v50 = vsel %vm8291_vm4, %v4544_v44, 0  ;;  %v17405_v14 = vpop.xlane.xlu0 %8070  ;;  %v8084_v55 = vsel %vm4575_vm3, %v17417_v21, 0.0 }
 0x6e1   : > { %13279 = vmatpush3.bf16.msra.mxu0 %v10501_v50 }
 0x6e2   : > { %13290 = vmatprep.subr.bf16.mxu0 %v18138_v33 }
 0x6e4   : > { %13281 = vmatmul.mubr.msk.bf16.vlgmr.msra.gmra.mxu0 %vm4575_vm3, %v8272_v1  ;;  %v4546_v35 = vpop.permute.xlu0 %4545 }
 0x6e5   : > { %v10547_v31 = vsel %vm8291_vm4, %v4546_v35, 0  ;;  %13292 = vmatprep.mubr.msk.bf16.mxu0 %vm14206_vm2, %v18138_v33  ;;  %v18317_v35 = vld [vmem:[#allocation80_spill] sm:$0xff] }
 0x6e6   : > { %13285 = vmatpush3.bf16.msra.mxu1 %v10547_v31  ;;  %v17421_v16 = vpop.eup %13875  ;;  %v7775_v31 = vsub.f32 %v18317_v35, %v17071_v41 }
 0x6e7   : > { %13296 = vmatprep.subr.bf16.mxu1 %v18138_v33  ;;  %v8087_v62 = vsel %vm4575_vm3, %v17421_v16, 0.0  ;;  %v13878_v2 = vpop.eup %13877 }
 0x6e9   : > { %13287 = vmatmul.mubr.msk.bf16.vlgmr.msra.gmra.mxu1 %vm4575_vm3, %v8273_v63  ;;  %v8210_v63 = vmul.f32 %v13878_v2, %v17213_v54 }
 0x6ea   : > { %13298 = vmatprep.mubr.msk.bf16.mxu1 %vm14206_vm2, %v18138_v33 }
 0x6f1   : > { %8085 = vadd.xlane.f32.xlu1 %v8084_v55 }
 0x6f6   : > { %8088 = vadd.xlane.f32.xlu0 %v8087_v62  ;;  %v13880_v62 = vpop.eup %13879 }
 0x702   : > { %4555 = vrot.lane.b32.xlu1 %v18229_v0, %s14207_s9  ;;  %v18316_v0 = vld [vmem:[#allocation78_spill] sm:$0xff] }
 0x703   : > { %v7774_v50 = vsub.f32 %v18316_v0, %v17061_v25  ;;  %v8274_v25 = vpack.c.bf16 %v8210_v63, %v8210_v63 }
 0x705   : > { %v17428_v57 = vpop.f32.mrf.mxu0  ;;  %v7900_v40 = vmul.f32 1.442695, %v7774_v50 }
 0x707   : > { %v13246_v12 = vpop.f32.mrf.mxu0  ;;  %13881 = vpow2.f32 %v7900_v40 }
 0x709   : > { %v10264_v26 = vpop.f32.mrf.mxu0 }
 0x70a   : > { %v17431_v23 = vpop.f32.mrf.mxu1  ;;  %v7902_v26 = vmul.f32 1.442695, %v7775_v31 }
 0x70b   : > { %v13247_v58 = vpop.f32.mrf.mxu0  ;;  %v13600_v44 = vpack.i.bf16 %v17431_v23, %v17428_v57 }
 0x70c   : > { %4557 = vrot.lane.b32.xlu0 %v18230_v49, %s14207_s9  ;;  %v13252_v15 = vpop.f32.mrf.mxu1  ;;  %v8211_v58 = vmul.f32 %v13880_v62, %v17221_v51  ;;  %13883 = vpow2.f32 %v7902_v26 }
 0x70d   : > { %13885 = vrcp.f32 %v17359_v30 }
 0x70e   : > { %v10310_v22 = vpop.f32.mrf.mxu1  ;;  %v8275_v54 = vpack.c.bf16 %v8211_v58, %v8211_v58  ;;  %13887 = vrcp.f32 %v17365_v10 }
 0x70f   : > { %13889 = vrcp.f32 %v17399_v46 }
 0x710   : > { %v17439_v1 = vpop.xlane.xlu1 %8073  ;;  %v13253_v24 = vpop.f32.mrf.mxu1  ;;  %13891 = vrcp.f32 %v17405_v14 }
 0x711   : > { %13893 = vrcp.f32 %v17439_v1 }
 0x714   : > { %v4548_v55 = vpop.permute.xlu1 %4547  ;;  %v17457_v0 = vpop.eup %13881 }
 0x715   : > { %v10593_v49 = vsel %vm8291_vm4, %v4548_v55, 0  ;;  %v17445_v12 = vpop.xlane.xlu0 %8076  ;;  %v8090_v51 = vsel %vm4575_vm3, %v17457_v0, 0.0 }
 0x716   : > { %13291 = vmatpush3.bf16.msra.mxu0 %v10593_v49  ;;  %13895 = vrcp.f32 %v17445_v12  ;;  %v18322_v12 = vpack.i.bf16 %v17157_v9, %v17155_v59 }
 0x717   : > { %13302 = vmatprep.subr.bf16.mxu0 %v18138_v33 }
 0x719   : > { %13293 = vmatmul.mubr.msk.bf16.vlgmr.msra.gmra.mxu0 %vm4575_vm3, %v8274_v25  ;;  %v4550_v15 = vpop.permute.xlu0 %4549  ;;  %v17461_v50 = vpop.eup %13883  ;;  %v18320_v25 = vpack.i.bf16 %v17271_v20, %v17268_v5 }
 0x71a   : > { %v10639_v41 = vsel %vm8291_vm4, %v4550_v15, 0  ;;  %13304 = vmatprep.mubr.msk.bf16.mxu0 %vm14206_vm2, %v18138_v33  ;;  %v8093_v22 = vsel %vm4575_vm3, %v17461_v50, 0.0  ;;  %v13886_v63 = vpop.eup %13885 }
 0x71b   : > { %13297 = vmatpush3.bf16.msra.mxu1 %v10639_v41  ;;  %v8212_v55 = vmul.f32 %v13886_v63, %v17257_v27 }
 0x71c   : > { %13308 = vmatprep.subr.bf16.mxu1 %v18138_v33 }
 0x71d   : > { %v8276_v26 = vpack.c.bf16 %v8212_v55, %v8212_v55 }
 0x71e   : > { %13299 = vmatmul.mubr.msk.bf16.vlgmr.msra.gmra.mxu1 %vm4575_vm3, %v8275_v54 }
 0x71f   : > { %13310 = vmatprep.mubr.msk.bf16.mxu1 %vm14206_vm2, %v18138_v33 }
 0x726   : > { %8091 = vadd.xlane.f32.xlu1 %v8090_v51 }
 0x72b   : > { %8094 = vadd.xlane.f32.xlu0 %v8093_v22 }
 0x737   : > { %4559 = vrot.lane.b32.xlu1 %v18231_v7, %s14207_s9 }
 0x73a   : > { %v17468_v2 = vpop.f32.mrf.mxu0 }
 0x73b   : > { %4563 = vrot.lane.b32.xlu1 %v18233_v61, %s14207_s9 }
 0x73c   : > { %v13258_v24 = vpop.f32.mrf.mxu0 }
 0x73e   : > { %v10356_v40 = vpop.f32.mrf.mxu0 }
 0x73f   : > { %4565 = vrot.lane.b32.xlu1 %v18234_v48, %s14207_s9  ;;  %v17475_v35 = vpop.f32.mrf.mxu1 }
 0x740   : > { %v13259_v31 = vpop.f32.mrf.mxu0  ;;  %v13625_v7 = vpack.i.bf16 %v17475_v35, %v17468_v2 }
 0x741   : > { %4561 = vrot.lane.b32.xlu0 %v18232_v43, %s14207_s9  ;;  %v13264_v30 = vpop.f32.mrf.mxu1  ;;  %v13888_v43 = vpop.eup %13887 }
 0x742   : > { %v8213_v27 = vmul.f32 %v13888_v43, %v17261_v45  ;;  %v13890_v41 = vpop.eup %13889 }
 0x743   : > { %4569 = vrot.lane.b32.xlu1 %v18236_v4, %s14207_s9  ;;  %v10402_v61 = vpop.f32.mrf.mxu1  ;;  %v8214_v22 = vmul.f32 %v13890_v41, %v17297_v19  ;;  %v13892_v24 = vpop.eup %13891 }
 0x744   : > { %v8215_v30 = vmul.f32 %v13892_v24, %v17301_v18 }
 0x745   : > { %v17483_v10 = vpop.xlane.xlu1 %8079  ;;  %4567 = vrot.lane.b32.xlu0 %v18235_v38, %s14207_s9  ;;  %v13265_v48 = vpop.f32.mrf.mxu1  ;;  %v18318_v38 = vpack.i.bf16 %v17149_v47, %v17143_v17  ;;  %v8277_v47 = vpack.c.bf16 %v8213_v27, %v8213_v27  ;;  %v8278_v14 = vpack.c.bf16 %v8214_v22, %v8214_v22 }
 0x746   : > { %v8279_v19 = vpack.c.bf16 %v8215_v30, %v8215_v30  ;;  %13897 = vrcp.f32 %v17483_v10  ;;  %v13894_v27 = vpop.eup %13893 }
 0x747   : > { %4573 = vrot.lane.b32.xlu1 %v18299_v34, %s14207_s9 }
 0x749   : > { %v4552_v62 = vpop.permute.xlu1 %4551  ;;  %4571 = vrot.lane.b32.xlu0 %v18298_v8, %s14207_s9  ;;  %v18319_v8 = vpack.i.bf16 %v17139_v29, %v17132_v53  ;;  %v18321_v53 = vpack.i.bf16 %v17230_v52, %v17225_v3 }
 0x74a   : > { %v10685_v4 = vsel %vm8291_vm4, %v4552_v62, 0  ;;  %v17493_v49 = vpop.xlane.xlu0 %8082 }
 0x74b   : > { %13303 = vmatpush3.bf16.msra.mxu0 %v10685_v4  ;;  %13531 = vrot.lane.b32.xlu1 %v18318_v38, %s14208_s10  ;;  %13899 = vrcp.f32 %v17493_v49 }
 0x74c   : > { %13314 = vmatprep.subr.bf16.mxu0 %v18138_v33 }
 0x74d   : > { %13526 = vrot.lane.b32.xlu0 %v18319_v8, %s14208_s10 }
 0x74e   : > { %13305 = vmatmul.mubr.msk.bf16.vlgmr.msra.gmra.mxu0 %vm4575_vm3, %v8276_v26  ;;  %v4554_v34 = vpop.permute.xlu0 %4553 }
 0x74f   : > { %13541 = vrot.lane.b32.xlu1 %v18320_v25, %s14209_s5  ;;  %v10731_v17 = vsel %vm8291_vm4, %v4554_v34, 0  ;;  %13316 = vmatprep.mubr.msk.bf16.mxu0 %vm14206_vm2, %v18138_v33  ;;  %v8216_v34 = vmul.f32 %v13894_v27, %v17337_v37  ;;  %v13896_v25 = vpop.eup %13895  ;;  %v13652_v27 = vld [vmem:[#allocation16] sm:$0xff]  }
 0x750   : > { %13309 = vmatpush3.bf16.msra.mxu1 %v10731_v17  ;;  %v8217_v59 = vmul.f32 %v13896_v25, %v17341_v6 }
 0x751   : > { %13536 = vrot.lane.b32.xlu0 %v18321_v53, %s14209_s5  ;;  %13320 = vmatprep.subr.bf16.mxu1 %v18138_v33  ;;  %v18323_v53 = vld [vmem:[#allocation53_spill] sm:$0xff]  ;;  %v8280_v49 = vpack.c.bf16 %v8216_v34, %v8216_v34 }
 0x752   : > { %v8281_v6 = vpack.c.bf16 %v8217_v59, %v8217_v59 }
 0x753   : > { %13311 = vmatmul.mubr.msk.bf16.vlgmr.msra.gmra.mxu1 %vm4575_vm3, %v8277_v47 }
 0x754   : > { %13322 = vmatprep.mubr.msk.bf16.mxu1 %vm14206_vm2, %v18138_v33 }
 0x76f   : > { %v17522_v29 = vpop.f32.mrf.mxu0 }
 0x771   : > { %v13270_v45 = vpop.f32.mrf.mxu0 }
 0x772   : > { %v18324_v45 = vpack.i.bf16 %v17311_v56, %v18323_v53  ;;  %v18326_v53 = vld [vmem:[#allocation79_spill] sm:$0xff] }
 0x773   : > { %v10448_v5 = vpop.f32.mrf.mxu0 }
 0x774   : > { %v17525_v20 = vpop.f32.mrf.mxu1  ;;  %v13898_v5 = vpop.eup %13897 }
 0x775   : > { %v13271_v58 = vpop.f32.mrf.mxu0  ;;  %v13630_v3 = vpack.i.bf16 %v17525_v20, %v17522_v29  ;;  %v8218_v56 = vmul.f32 %v13898_v5, %v17377_v13  ;;  %v13900_v41 = vpop.eup %13899 }
 0x776   : > { %v13276_v52 = vpop.f32.mrf.mxu1  ;;  %v8219_v24 = vmul.f32 %v13900_v41, %v17381_v42 }
 0x777   : > { %v8282_v22 = vpack.c.bf16 %v8218_v56, %v8218_v56 }
 0x778   : > { %v10494_v15 = vpop.f32.mrf.mxu1 }
 0x77a   : > { %v8086_v54 = vpop.xlane.xlu1 %8085  ;;  %v13277_v51 = vpop.f32.mrf.mxu1 }
 0x77b   : > { %13901 = vrcp.f32 %v8086_v54 }
 0x77e   : > { %v4556_v46 = vpop.permute.xlu1 %4555 }
 0x77f   : > { %v10777_v40 = vsel %vm8291_vm4, %v4556_v46, 0  ;;  %v8089_v31 = vpop.xlane.xlu0 %8088 }
 0x780   : > { %13315 = vmatpush3.bf16.msra.mxu0 %v10777_v40  ;;  %13903 = vrcp.f32 %v8089_v31 }
 0x781   : > { %13326 = vmatprep.subr.bf16.mxu0 %v18138_v33 }
 0x783   : > { %13317 = vmatmul.mubr.msk.bf16.vlgmr.msra.gmra.mxu0 %vm4575_vm3, %v8278_v14  ;;  %v4558_v61 = vpop.permute.xlu0 %4557  ;;  %v8283_v14 = vpack.c.bf16 %v8219_v24, %v8219_v24  ;;  %v18331_v24 = vld [vmem:[#allocation44_spill] sm:$0xff] }
 0x784   : > { %v10823_v63 = vsel %vm8291_vm4, %v4558_v61, 0  ;;  %13328 = vmatprep.mubr.msk.bf16.mxu0 %vm14206_vm2, %v18138_v33 }
 0x785   : > { %13321 = vmatpush3.bf16.msra.mxu1 %v10823_v63 }
 0x786   : > { %13332 = vmatprep.subr.bf16.mxu1 %v18138_v33 }
 0x788   : > { %13323 = vmatmul.mubr.msk.bf16.vlgmr.msra.gmra.mxu1 %vm4575_vm3, %v8279_v19  ;;  %v13902_v13 = vpop.eup %13901 }
 0x789   : > { %13334 = vmatprep.mubr.msk.bf16.mxu1 %vm14206_vm2, %v18138_v33  ;;  %v8220_v40 = vmul.f32 %v13902_v13, %v17417_v21 }
 0x78b   : > { %v8284_v42 = vpack.c.bf16 %v8220_v40, %v8220_v40 }
 0x78d   : > { %v13904_v30 = vpop.eup %13903 }
 0x7a4   : > { %v10537_v18 = vpop.f32.mrf.mxu0 }
 0x7a6   : > { %v13282_v48 = vpop.f32.mrf.mxu0 }
 0x7a8   : > { %v10540_v55 = vpop.f32.mrf.mxu0 }
 0x7a9   : > { %v10583_v62 = vpop.f32.mrf.mxu1 }
 0x7aa   : > { %v13283_v43 = vpop.f32.mrf.mxu0  ;;  %v13545_v4 = vpack.i.bf16 %v10583_v62, %v10537_v18  ;;  %v8221_v18 = vmul.f32 %v13904_v30, %v17421_v16 }
 0x7ab   : > { %v13288_v38 = vpop.f32.mrf.mxu1 }
 0x7ac   : > { %13546 = vrot.lane.b32.xlu0 %v13545_v4, %s14210_s16  ;;  %v8285_v62 = vpack.c.bf16 %v8221_v18, %v8221_v18 }
 0x7ad   : > { %v10586_v26 = vpop.f32.mrf.mxu1 }
 0x7ae   : > { %v13651_v26 = vld [vmem:[#allocation16 + $0x8] sm:$0xff]  }
 0x7af   : > { %v8092_v8 = vpop.xlane.xlu1 %8091  ;;  %v13289_v1 = vpop.f32.mrf.mxu1 }
 0x7b0   : > { %13556 = vrot.lane.b32.xlu0 %v18322_v12, %s14208_s10  ;;  %13905 = vrcp.f32 %v8092_v8 }
 0x7b3   : > { %v4560_v10 = vpop.permute.xlu1 %4559 }
 0x7b4   : > { %v10869_v17 = vsel %vm8291_vm4, %v4560_v10, 0  ;;  %v8095_v47 = vpop.xlane.xlu0 %8094  ;;  %13566 = vrot.lane.b32.xlu0 %v18324_v45, %s14209_s5 }
 0x7b5   : > { %13327 = vmatpush3.bf16.msra.mxu0 %v10869_v17  ;;  %13907 = vrcp.f32 %v8095_v47  ;;  %v18325_v47 = vld [vmem:[#allocation37_spill] sm:$0xff] }
 0x7b6   : > { %13338 = vmatprep.subr.bf16.mxu0 %v18138_v33  ;;  %v18327_v45 = vpack.i.bf16 %v18325_v47, %v18326_v53 }
 0x7b7   : > { %v4564_v9 = vpop.permute.xlu1 %4563 }
 0x7b8   : > { %v10961_v37 = vsel %vm8291_vm4, %v4564_v9, 0  ;;  %13329 = vmatmul.mubr.msk.bf16.vlgmr.msra.gmra.mxu0 %vm4575_vm3, %v8280_v49  ;;  %v4562_v58 = vpop.permute.xlu0 %4561 }
 0x7b9   : > { %13339 = vmatpush3.bf16.msra.mxu0 %v10961_v37  ;;  %v10915_v52 = vsel %vm8291_vm4, %v4562_v58, 0  ;;  %13340 = vmatprep.mubr.msk.bf16.mxu0 %vm14206_vm2, %v18138_v33 }
 0x7ba   : > { %13333 = vmatpush3.bf16.msra.mxu1 %v10915_v52  ;;  %13350 = vmatprep.subr.bf16.mxu0 %v18138_v33 }
 0x7bb   : > { %v4566_v15 = vpop.permute.xlu1 %4565  ;;  %13344 = vmatprep.subr.bf16.mxu1 %v18138_v33 }
 0x7bc   : > { %v4568_v54 = vpop.permute.xlu0 %4567  ;;  %v11007_v51 = vsel %vm8291_vm4, %v4566_v15, 0 }
 0x7bd   : > { %13335 = vmatmul.mubr.msk.bf16.vlgmr.msra.gmra.mxu1 %vm4575_vm3, %v8281_v6  ;;  %v11053_v46 = vsel %vm8291_vm4, %v4568_v54, 0  ;;  %v13906_v19 = vpop.eup %13905  ;;  %v18328_v54 = vld [vmem:[#allocation39_spill] sm:$0xff] }
 0x7be   : > { %13345 = vmatpush3.bf16.msra.mxu1 %v11007_v51  ;;  %13346 = vmatprep.mubr.msk.bf16.mxu1 %vm14206_vm2, %v18138_v33  ;;  %v8222_v48 = vmul.f32 %v13906_v19, %v17457_v0  ;;  %v18329_v51 = vld [vmem:[#allocation75_spill] sm:$0xff] }
 0x7bf   : > { %13356 = vmatprep.subr.bf16.mxu1 %v18138_v33  ;;  %v4570_v31 = vpop.permute.xlu1 %4569 }
 0x7c0   : > { %13341 = vmatmul.mubr.msk.bf16.vlgmr.msra.gmra.mxu0 %vm4575_vm3, %v8282_v22  ;;  %v11099_v61 = vsel %vm8291_vm4, %v4570_v31, 0  ;;  %v4572_v63 = vpop.permute.xlu0 %4571  ;;  %v8286_v16 = vpack.c.bf16 %v8222_v48, %v8222_v48  ;;  %v18330_v22 = vpack.i.bf16 %v18328_v54, %v18329_v51  ;;  %v18332_v31 = vld [vmem:[#allocation40_spill] sm:$0xff] }
 0x7c1   : > { %13351 = vmatpush3.bf16.msra.mxu0 %v11053_v46  ;;  %13352 = vmatprep.mubr.msk.bf16.mxu0 %vm14206_vm2, %v18138_v33  ;;  %v11145_v21 = vsel %vm8291_vm4, %v4572_v63, 0 }
 0x7c2   : > { %13362 = vmatprep.subr.bf16.mxu0 %v18138_v33  ;;  %v13908_v43 = vpop.eup %13907 }
 0x7c3   : > { %v4574_v55 = vpop.permute.xlu1 %4573  ;;  %v8223_v38 = vmul.f32 %v13908_v43, %v17461_v50 }
 0x7c4   : > { %v11191_v4 = vsel %vm8291_vm4, %v4574_v55, 0  ;;  %v13527_v9 = vpop.permute.xlu0 %13526  ;;  %vm11742_vm4 = vcmask 261123  }
 0x7c5   : > { %13347 = vmatmul.mubr.msk.bf16.vlgmr.msra.gmra.mxu1 %vm4575_vm3, %v8283_v14  ;;  %v8287_v0 = vpack.c.bf16 %v8223_v38, %v8223_v38  ;;  %v13529_v11 = vunpack.i.h.bf16 %v13527_v9  ;;  %v13528_v32 = vunpack.i.l.bf16 %v13527_v9 }
 0x7c6   : > { %13357 = vmatpush3.bf16.msra.mxu1 %v11099_v61  ;;  %13358 = vmatprep.mubr.msk.bf16.mxu1 %vm14206_vm2, %v18138_v33 }
 0x7c7   : > { %13368 = vmatprep.subr.bf16.mxu1 %v18138_v33  ;;  %v11426_v40 = vsel %vm4575_vm3, %v18331_v24, %v13529_v11  ;;  %v11425_v14 = vsel %vm4575_vm3, %v18332_v31, %v13528_v32  ;;  %v13532_v48 = vpop.permute.xlu1 %13531 }
 0x7c8   : > { %13353 = vmatmul.mubr.msk.bf16.vlgmr.msra.gmra.mxu0 %vm4575_vm3, %v8284_v42  ;;  %v13537_v15 = vpop.permute.xlu0 %13536 }
 0x7c9   : > { %13363 = vmatpush3.bf16.msra.mxu0 %v11145_v21  ;;  %13364 = vmatprep.mubr.msk.bf16.mxu0 %vm14206_vm2, %v18138_v33  ;;  %v13538_v46 = vunpack.i.l.bf16 %v13537_v15 }
 0x7ca   : > { %13374 = vmatprep.subr.bf16.mxu0 %v13651_v26 }
 0x7cb   : > { %v11442_v42 = vsel %vm11441_vm5, %v11425_v14, %v13538_v46  ;;  %v13542_v38 = vpop.permute.xlu1 %13541  ;;  %v18339_v46 = vld [vmem:[#allocation42_spill] sm:$0xff] }
 0x7cd   : > { %13359 = vmatmul.mubr.msk.bf16.vlgmr.msra.gmra.mxu1 %vm4575_vm3, %v8285_v62 }
 0x7ce   : > { %13369 = vmatpush3.bf16.msra.mxu1 %v11191_v4  ;;  %13370 = vmatprep.mubr.msk.bf16.mxu1 %vm14206_vm2, %v18138_v33  ;;  %vm11786_vm2 = vcmask 261125  }
 0x7d0   : > { %13365 = vmatmul.mubr.msk.bf16.vlgmr.msra.gmra.mxu0 %vm4575_vm3, %v8286_v16 }
 0x7d1   : > { %13375 = vmatpush3.bf16.msra.mxu0 %v13651_v26 }
 0x7d2   : > { %13376 = vmatprep.subr.bf16.mxu0 %v13652_v27 }
 0x7d5   : > { %13371 = vmatmul.mubr.msk.bf16.vlgmr.msra.gmra.mxu1 %vm4575_vm3, %v8287_v0  ;;  %13377 = vmatpush3.bf16.msra.mxu0 %v13652_v27  ;;  %v18333_v0 = vld [vmem:[#allocation41_spill] sm:$0xff]  ;;  %v18334_v27 = vld [vmem:[#allocation38_spill] sm:$0xff] }
 0x7d9   : > { %v10629_v8 = vpop.f32.mrf.mxu0 }
 0x7db   : > { %v13294_v1 = vpop.f32.mrf.mxu0 }
 0x7dc   : > { %v13534_v1 = vunpack.i.h.bf16 %v13532_v48 }
 0x7dd   : > { %v10632_v12 = vpop.f32.mrf.mxu0 }
 0x7de   : > { %v10675_v34 = vpop.f32.mrf.mxu1  ;;  %v13533_v12 = vunpack.i.l.bf16 %v13532_v48 }
 0x7df   : > { %v13295_v10 = vpop.f32.mrf.mxu0  ;;  %v13550_v25 = vpack.i.bf16 %v10675_v34, %v10629_v8  ;;  %v18335_v8 = vpack.i.bf16 %v18333_v0, %v18334_v27  ;;  %v13544_v34 = vunpack.i.h.bf16 %v13542_v38  ;;  %v18343_v0 = vld [vmem:[#allocation57_spill] sm:$0xff]  ;;  %v18344_v27 = vld [vmem:[#allocation47_spill] sm:$0xff] }
 0x7e0   : > { %v13300_v33 = vpop.f32.mrf.mxu1  ;;  %v13543_v10 = vunpack.i.l.bf16 %v13542_v38 }
 0x7e1   : > { %13551 = vrot.lane.b32.xlu1 %v13550_v25, %s14210_s16  ;;  %v18336_v33 = vld [vmem:[#allocation48_spill] sm:$0xff] }
 0x7e2   : > { %v10678_v50 = vpop.f32.mrf.mxu1 }
 0x7e3   : > { %v11428_v50 = vsel %vm4575_vm3, %v18336_v33, %v13534_v1 }
 0x7e4   : > { %v13301_v17 = vpop.f32.mrf.mxu1 }
 0x7e5   : > { %13561 = vrot.lane.b32.xlu1 %v18327_v45, %s14208_s10  ;;  %v18337_v17 = vld [vmem:[#allocation46_spill] sm:$0xff] }
 0x7e6   : > { %v11427_v47 = vsel %vm4575_vm3, %v18337_v17, %v13533_v12 }
 0x7e9   : > { %13571 = vrot.lane.b32.xlu1 %v13570_v36, %s14209_s5  ;;  %v13539_v36 = vunpack.i.h.bf16 %v13537_v15 }
 0x7eb   : > { %v11443_v63 = vsel %vm11441_vm5, %v11426_v40, %v13539_v36  ;;  %v18338_v36 = vld [vmem:[#allocation45_spill] sm:$0xff] }
 0x80e   : > { %v10721_v49 = vpop.f32.mrf.mxu0 }
 0x810   : > { %v13306_v5 = vpop.f32.mrf.mxu0 }
 0x811   : > { %v11444_v5 = vsel %vm11441_vm5, %v11427_v47, %v13543_v10 }
 0x812   : > { %v10724_v59 = vpop.f32.mrf.mxu0 }
 0x813   : > { %v10767_v37 = vpop.f32.mrf.mxu1 }
 0x814   : > { %v13307_v58 = vpop.f32.mrf.mxu0  ;;  %v13575_v52 = vpack.i.bf16 %v10767_v37, %v10721_v49  ;;  %v11445_v49 = vsel %vm11441_vm5, %v11428_v50, %v13544_v34 }
 0x815   : > { %v13312_v56 = vpop.f32.mrf.mxu1 }
 0x816   : > { %13576 = vrot.lane.b32.xlu0 %v13575_v52, %s14210_s16 }
 0x817   : > { %v10770_v6 = vpop.f32.mrf.mxu1 }
 0x819   : > { %v13313_v41 = vpop.f32.mrf.mxu1 }
 0x81a   : > { %13586 = vrot.lane.b32.xlu0 %v18330_v22, %s14208_s10 }
 0x81e   : > { %v13547_v13 = vpop.permute.xlu0 %13546  ;;  %13596 = vrot.lane.b32.xlu0 %v13595_v39, %s14209_s5 }
 0x81f   : > { %v13549_v30 = vunpack.i.h.bf16 %v13547_v13  ;;  %v13548_v61 = vunpack.i.l.bf16 %v13547_v13  ;;  %v18340_v13 = vpack.i.bf16 %v18338_v36, %v18339_v46 }
 0x821   : > { %v11460_v19 = vsel %vm11458_vm6, %v11443_v63, %v13549_v30  ;;  %v11459_v18 = vsel %vm11458_vm6, %v11442_v42, %v13548_v61 }
 0x822   : > { %v11476_v21 = vpack.c.bf16 %v11460_v19, %v11459_v18  ;;  %v13557_v58 = vpop.permute.xlu0 %13556 }
 0x823   : > { %v13559_v24 = vunpack.i.h.bf16 %v13557_v58  ;;  %v13558_v40 = vunpack.i.l.bf16 %v13557_v58  ;;  %v18346_v58 = vld [vmem:[#allocation60_spill] sm:$0xff] }
 0x824   : > { %13378 = vmatprep.mubr.msk.bf16.mxu0 %vm530_vm0, %v11476_v21  ;;  %v18341_v21 = vld [vmem:[#allocation51_spill] sm:$0xff] }
 0x826   : > { %v13567_v22 = vpop.permute.xlu0 %13566 }
 0x827   : > { %v13569_v14 = vunpack.i.h.bf16 %v13567_v22  ;;  %v13568_v30 = vunpack.i.l.bf16 %v13567_v22 }
 0x843   : > { %v10813_v60 = vpop.f32.mrf.mxu0 }
 0x845   : > { %v13318_v28 = vpop.f32.mrf.mxu0 }
 0x846   : > { %v18342_v28 = vld [vmem:[#allocation50_spill] sm:$0xff] }
 0x847   : > { %v10816_v39 = vpop.f32.mrf.mxu0 }
 0x848   : > { %v10859_v55 = vpop.f32.mrf.mxu1  ;;  %v11429_v39 = vsel %vm4575_vm3, %v18342_v28, %v13558_v40 }
 0x849   : > { %v13319_v62 = vpop.f32.mrf.mxu0  ;;  %v13580_v43 = vpack.i.bf16 %v10859_v55, %v10813_v60  ;;  %v11430_v60 = vsel %vm4575_vm3, %v18341_v21, %v13559_v24 }
 0x84a   : > { %v13324_v4 = vpop.f32.mrf.mxu1 }
 0x84b   : > { %13581 = vrot.lane.b32.xlu1 %v13580_v43, %s14210_s16  ;;  %v11446_v43 = vsel %vm11441_vm5, %v11429_v39, %v13568_v30  ;;  %v11447_v4 = vsel %vm11441_vm5, %v11430_v60, %v13569_v14 }
 0x84c   : > { %v10862_v16 = vpop.f32.mrf.mxu1 }
 0x84e   : > { %v13325_v26 = vpop.f32.mrf.mxu1 }
 0x84f   : > { %13591 = vrot.lane.b32.xlu1 %v18335_v8, %s14208_s10  ;;  %v18345_v8 = vpack.i.bf16 %v18343_v0, %v18344_v27  ;;  %v18351_v0 = vld [vmem:[#allocation56_spill] sm:$0xff] }
 0x853   : > { %v13552_v25 = vpop.permute.xlu1 %13551  ;;  %13601 = vrot.lane.b32.xlu1 %v13600_v44, %s14209_s5 }
 0x854   : > { %v13554_v53 = vunpack.i.h.bf16 %v13552_v25  ;;  %v13553_v45 = vunpack.i.l.bf16 %v13552_v25 }
 0x856   : > { %v11462_v59 = vsel %vm11458_vm6, %v11445_v49, %v13554_v53  ;;  %v11461_v9 = vsel %vm11458_vm6, %v11444_v5, %v13553_v45 }
 0x857   : > { %v11477_v37 = vpack.c.bf16 %v11462_v59, %v11461_v9 }
 0x859   : > { %13379 = vmatmul.mubr.msk.bf16.vlgmr.msra.gmra.mxu0 %vm530_vm0, %v11477_v37  ;;  %v13562_v37 = vpop.permute.xlu1 %13561 }
 0x878   : > { %v10905_v57 = vpop.f32.mrf.mxu0 }
 0x87a   : > { %v13330_v23 = vpop.f32.mrf.mxu0 }
 0x87b   : > { %v13564_v23 = vunpack.i.h.bf16 %v13562_v37 }
 0x87c   : > { %v10908_v44 = vpop.f32.mrf.mxu0 }
 0x87d   : > { %v10951_v52 = vpop.f32.mrf.mxu1  ;;  %v13563_v44 = vunpack.i.l.bf16 %v13562_v37  ;;  %v18353_v37 = vld [vmem:[#allocation62_spill] sm:$0xff] }
 0x87e   : > { %v13331_v56 = vpop.f32.mrf.mxu0  ;;  %v13605_v6 = vpack.i.bf16 %v10951_v52, %v10905_v57  ;;  %v13572_v57 = vpop.permute.xlu1 %13571  ;;  %v11432_v52 = vsel %vm4575_vm3, %v18346_v58, %v13564_v23 }
 0x87f   : > { %v13336_v15 = vpop.f32.mrf.mxu1  ;;  %v13574_v29 = vunpack.i.h.bf16 %v13572_v57  ;;  %v13573_v20 = vunpack.i.l.bf16 %v13572_v57  ;;  %v18347_v56 = vld [vmem:[#allocation49_spill] sm:$0xff] }
 0x880   : > { %v10997_v41 = vpop.f32.mrf.mxu0  ;;  %13606 = vrot.lane.b32.xlu0 %v13605_v6, %s14210_s16  ;;  %v11431_v6 = vsel %vm4575_vm3, %v18347_v56, %v13563_v44 }
 0x881   : > { %v10954_v54 = vpop.f32.mrf.mxu1 }
 0x882   : > { %v13342_v51 = vpop.f32.mrf.mxu0  ;;  %v11448_v54 = vsel %vm11441_vm5, %v11431_v6, %v13573_v20 }
 0x883   : > { %v13337_v11 = vpop.f32.mrf.mxu1  ;;  %v11449_v51 = vsel %vm11441_vm5, %v11432_v52, %v13574_v29 }
 0x884   : > { %v11000_v32 = vpop.f32.mrf.mxu0  ;;  %13616 = vrot.lane.b32.xlu0 %v18340_v13, %s14208_s10 }
 0x885   : > { %v11043_v31 = vpop.f32.mrf.mxu1 }
 0x886   : > { %v13343_v61 = vpop.f32.mrf.mxu0  ;;  %v13610_v63 = vpack.i.bf16 %v11043_v31, %v10997_v41 }
 0x887   : > { %v13348_v42 = vpop.f32.mrf.mxu1  ;;  %v18348_v61 = vld [vmem:[#allocation68_spill] sm:$0xff] }
 0x888   : > { %v11089_v19 = vpop.f32.mrf.mxu0  ;;  %v13577_v18 = vpop.permute.xlu0 %13576  ;;  %13626 = vrot.lane.b32.xlu0 %v13625_v7, %s14209_s5  ;;  %13611 = vrot.lane.b32.xlu1 %v13610_v63, %s14210_s16  ;;  %v18349_v42 = vld [vmem:[#allocation55_spill] sm:$0xff] }
 0x889   : > { %v13579_v48 = vunpack.i.h.bf16 %v13577_v18  ;;  %v13578_v55 = vunpack.i.l.bf16 %v13577_v18  ;;  %v11046_v62 = vpop.f32.mrf.mxu1 }
 0x88a   : > { %v13354_v16 = vpop.f32.mrf.mxu0 }
 0x88b   : > { %v11464_v38 = vsel %vm11458_vm6, %v11447_v4, %v13579_v48  ;;  %v11463_v2 = vsel %vm11458_vm6, %v11446_v43, %v13578_v55  ;;  %v13349_v35 = vpop.f32.mrf.mxu1 }
 0x88c   : > { %v11478_v7 = vpack.c.bf16 %v11464_v38, %v11463_v2  ;;  %v11092_v26 = vpop.f32.mrf.mxu0  ;;  %13621 = vrot.lane.b32.xlu1 %v18345_v8, %s14208_s10  ;;  %v13587_v36 = vpop.permute.xlu0 %13586 }
 0x88d   : > { %v11135_v1 = vpop.f32.mrf.mxu1  ;;  %v13589_v13 = vunpack.i.h.bf16 %v13587_v36  ;;  %v13588_v24 = vunpack.i.l.bf16 %v13587_v36 }
 0x88e   : > { %v13355_v12 = vpop.f32.mrf.mxu0  ;;  %v13635_v34 = vpack.i.bf16 %v11135_v1, %v11089_v19  ;;  %13382 = vmatprep.mubr.msk.bf16.mxu0 %vm530_vm0, %v11478_v7  ;;  %v18350_v7 = vld [vmem:[#allocation70_spill] sm:$0xff] }
 0x88f   : > { %v13360_v10 = vpop.f32.mrf.mxu1  ;;  %v11434_v63 = vsel %vm4575_vm3, %v18348_v61, %v13589_v13  ;;  %v11433_v19 = vsel %vm4575_vm3, %v18349_v42, %v13588_v24 }
 0x890   : > { %v11181_v25 = vpop.f32.mrf.mxu0  ;;  %13631 = vrot.lane.b32.xlu1 %v13630_v3, %s14209_s5  ;;  %13636 = vrot.lane.b32.xlu0 %v13635_v34, %s14210_s16  ;;  %v13597_v46 = vpop.permute.xlu0 %13596 }
 0x891   : > { %v11138_v33 = vpop.f32.mrf.mxu1  ;;  %v13599_v31 = vunpack.i.h.bf16 %v13597_v46  ;;  %v13598_v14 = vunpack.i.l.bf16 %v13597_v46 }
 0x892   : > { %v13366_v50 = vpop.f32.mrf.mxu0 }
 0x893   : > { %v13361_v17 = vpop.f32.mrf.mxu1  ;;  %v11450_v60 = vsel %vm11441_vm5, %v11433_v19, %v13598_v14  ;;  %v11451_v28 = vsel %vm11441_vm5, %v11434_v63, %v13599_v31  ;;  %v17718_v63 = vld [vmem:[%s17981_s7] ss:$0 sm:$0xff] }
 0x894   : > { %v11184_v47 = vpop.f32.mrf.mxu0 }
 0x895   : > { %v11227_v53 = vpop.f32.mrf.mxu1 }
 0x896   : > { %v13367_v45 = vpop.f32.mrf.mxu0  ;;  %v13640_v49 = vpack.i.bf16 %v11227_v53, %v11181_v25 }
 0x897   : > { %v13372_v5 = vpop.f32.mrf.mxu1 }
 0x898   : > { %13641 = vrot.lane.b32.xlu1 %v13640_v49, %s14210_s16 }
 0x899   : > { %v11230_v59 = vpop.f32.mrf.mxu1 }
 0x89a   : > { %v18352_v59 = vld [vmem:[#allocation36_spill] sm:$0xff] }
 0x89b   : > { %v13373_v9 = vpop.f32.mrf.mxu1 }
 0x8bd   : > { %v13582_v3 = vpop.permute.xlu1 %13581 }
 0x8be   : > { %v13584_v15 = vunpack.i.h.bf16 %v13582_v3  ;;  %v13583_v41 = vunpack.i.l.bf16 %v13582_v3 }
 0x8c0   : > { %v11466_v22 = vsel %vm11458_vm6, %v11449_v51, %v13584_v15  ;;  %v11465_v11 = vsel %vm11458_vm6, %v11448_v54, %v13583_v41 }
 0x8c1   : > { %v11479_v32 = vpack.c.bf16 %v11466_v22, %v11465_v11  ;;  %v13592_v40 = vpop.permute.xlu1 %13591  ;;  %v18354_v22 = vld [vmem:[#allocation74_spill] sm:$0xff] }
 0x8c2   : > { %v13594_v43 = vunpack.i.h.bf16 %v13592_v40  ;;  %v13593_v4 = vunpack.i.l.bf16 %v13592_v40 }
 0x8c3   : > { %13383 = vmatmul.mubr.msk.bf16.gmra.mxu0 %vm530_vm0, %v11479_v32  ;;  %v18355_v32 = vld [vmem:[#allocation77_spill] sm:$0xff] }
 0x8c4   : > { %v11436_v26 = vsel %vm4575_vm3, %v18350_v7, %v13594_v43  ;;  %v11435_v27 = vsel %vm4575_vm3, %v18351_v0, %v13593_v4 }
 0x8c5   : > { %v13602_v39 = vpop.permute.xlu1 %13601 }
 0x8c6   : > { %v13604_v38 = vunpack.i.h.bf16 %v13602_v39  ;;  %v13603_v2 = vunpack.i.l.bf16 %v13602_v39 }
 0x8c8   : > { %v11452_v12 = vsel %vm11441_vm5, %v11435_v27, %v13603_v2  ;;  %v11453_v34 = vsel %vm11441_vm5, %v11436_v26, %v13604_v38 }
 0x8f2   : > { %v13607_v30 = vpop.permute.xlu0 %13606 }
 0x8f3   : > { %v13609_v18 = vunpack.i.h.bf16 %v13607_v30  ;;  %v13608_v21 = vunpack.i.l.bf16 %v13607_v30 }
 0x8f5   : > { %v11468_v48 = vsel %vm11458_vm6, %v11451_v28, %v13609_v18  ;;  %v11467_v55 = vsel %vm11458_vm6, %v11450_v60, %v13608_v21 }
 0x8f6   : > { %v11480_v62 = vpack.c.bf16 %v11468_v48, %v11467_v55  ;;  %v13617_v16 = vpop.permute.xlu0 %13616 }
 0x8f7   : > { %v13619_v17 = vunpack.i.h.bf16 %v13617_v16  ;;  %v13618_v47 = vunpack.i.l.bf16 %v13617_v16 }
 0x8f8   : > { %13386 = vmatprep.mubr.msk.bf16.mxu0 %vm530_vm0, %v11480_v62 }
 0x8f9   : > { %v11438_v9 = vsel %vm4575_vm3, %v18352_v59, %v13619_v17  ;;  %v11437_v57 = vsel %vm4575_vm3, %v18353_v37, %v13618_v47 }
 0x8fa   : > { %v13612_v35 = vpop.permute.xlu1 %13611  ;;  %v13627_v10 = vpop.permute.xlu0 %13626 }
 0x8fb   : > { %v13614_v8 = vunpack.i.h.bf16 %v13612_v35  ;;  %v13613_v1 = vunpack.i.l.bf16 %v13612_v35  ;;  %v13629_v45 = vunpack.i.h.bf16 %v13627_v10  ;;  %v13628_v49 = vunpack.i.l.bf16 %v13627_v10 }
 0x8fd   : > { %v11470_v25 = vsel %vm11458_vm6, %v11453_v34, %v13614_v8  ;;  %v11469_v33 = vsel %vm11458_vm6, %v11452_v12, %v13613_v1  ;;  %v11454_v29 = vsel %vm11441_vm5, %v11437_v57, %v13628_v49  ;;  %v11455_v20 = vsel %vm11441_vm5, %v11438_v9, %v13629_v45 }
 0x8fe   : > { %v11481_v50 = vpack.c.bf16 %v11470_v25, %v11469_v33  ;;  %v13622_v53 = vpop.permute.xlu1 %13621 }
 0x8ff   : > { %v13624_v6 = vunpack.i.h.bf16 %v13622_v53  ;;  %v13623_v15 = vunpack.i.l.bf16 %v13622_v53 }
 0x900   : > { %13387 = vmatmul.mubr.msk.bf16.gmra.mxu0 %vm530_vm0, %v11481_v50 }
 0x901   : > { %v11440_v11 = vsel %vm4575_vm3, %v18354_v22, %v13624_v6  ;;  %v11439_v36 = vsel %vm4575_vm3, %v18355_v32, %v13623_v15  ;;  %vm11808_vm3 = vcmask 261126  }
 0x902   : > { %v13637_v5 = vpop.permute.xlu0 %13636  ;;  %v13632_v3 = vpop.permute.xlu1 %13631 }
 0x903   : > { %v13639_v23 = vunpack.i.h.bf16 %v13637_v5  ;;  %v13638_v44 = vunpack.i.l.bf16 %v13637_v5  ;;  %v13634_v41 = vunpack.i.h.bf16 %v13632_v3  ;;  %v13633_v54 = vunpack.i.l.bf16 %v13632_v3 }
 0x905   : > { %v11472_v58 = vsel %vm11458_vm6, %v11455_v20, %v13639_v23  ;;  %v11471_v52 = vsel %vm11458_vm6, %v11454_v29, %v13638_v44  ;;  %v11456_v24 = vsel %vm11441_vm5, %v11439_v36, %v13633_v54  ;;  %v11457_v40 = vsel %vm11441_vm5, %v11440_v11, %v13634_v41 }
 0x906   : > { %v11482_v56 = vpack.c.bf16 %v11472_v58, %v11471_v52  ;;  %vm11720_vm5 = vcmask 261122  }
 0x908   : > { %13390 = vmatprep.mubr.msk.bf16.mxu0 %vm530_vm0, %v11482_v56 }
 0x90a   : > { %v13642_v51 = vpop.permute.xlu1 %13641 }
 0x90b   : > { %v13644_v46 = vunpack.i.h.bf16 %v13642_v51  ;;  %v13643_v13 = vunpack.i.l.bf16 %v13642_v51 }
 0x90d   : > { %v11474_v31 = vsel %vm11458_vm6, %v11457_v40, %v13644_v46  ;;  %v11473_v14 = vsel %vm11458_vm6, %v11456_v24, %v13643_v13  ;;  %vm11699_vm6 = vcmask 261121  }
 0x90e   : > { %v11483_v30 = vpack.c.bf16 %v11474_v31, %v11473_v14 }
 0x910   : > { %13391 = vmatmul.mubr.msk.bf16.gmra.mxu0 %vm530_vm0, %v11483_v30 }
 0x919   : > { %v13380_v61 = vpop.f32.mrf.mxu0 }
 0x91a   : > { %v11573_v21 = vadd.f32 %v13380_v61, %v17718_v63 }
 0x91b   : > { %v11564_v42 = vpop.f32.mrf.mxu0 }
 0x91c   : > { %v11565_v19 = vadd.f32 %v17718_v63, %v11564_v42  ;;  %v17728_v55 = vrot.slane %v11573_v21, 6 }
 0x91d   : > { %v13381_v18 = vpop.f32.mrf.mxu0 }
 0x91e   : > { %12238 = vst.msk [vmem:[%s17722_s25 + $0x69] sm:$0x80] %vm11830_vm7, %v11565_v19  ;;  %v11576_v60 = vadd.f32 %v13381_v18, %v17718_v63  ;;  %vm11723_vm7 = vcmask 254976  }
 0x91f   : > { %v11567_v28 = vpop.f32.mrf.mxu0 }
 0x920   : > { %v11568_v39 = vadd.f32 %v17718_v63, %v11567_v28  ;;  %v17730_v62 = vrot.slane %v11576_v60, 5 }
 0x922   : > { %v11643_v48 = vrot.slane %v11568_v39, 7  ;;  %v11792_v14 = vsel %vm11644_vm8, %v17730_v62, %v17728_v55 }
 0x924   : > { %v11645_v43 = vsel %vm11644_vm8, %v11643_v48, %v11565_v19  ;;  %v11682_v4 = vsel %vm11647_vm9, %v11643_v48, %v11565_v19  ;;  %v11703_v16 = vsel %vm11650_vm10, %v11643_v48, %v11565_v19  ;;  %v11725_v38 = vsel %vm11653_vm11, %v11643_v48, %v11565_v19 }
 0x925   : > { %v11648_v2 = vsel %vm11647_vm9, %v17728_v55, %v11645_v43  ;;  %v11683_v35 = vsel %vm11650_vm10, %v17728_v55, %v11682_v4  ;;  %v11704_v7 = vsel %vm11653_vm11, %v17728_v55, %v11703_v16  ;;  %v11726_v26 = vsel %vm11656_vm12, %v17728_v55, %v11725_v38 }
 0x926   : > { %v11747_v0 = vsel %vm11656_vm12, %v11643_v48, %v11565_v19  ;;  %v11769_v27 = vsel %vm11659_vm13, %v11643_v48, %v11565_v19  ;;  %v11791_v8 = vsel %vm11662_vm14, %v11643_v48, %v11565_v19  ;;  %v11813_v1 = vsel %vm11644_vm8, %v17728_v55, %v11643_v48 }
 0x927   : > { %v11748_v12 = vsel %vm11659_vm13, %v17728_v55, %v11747_v0  ;;  %v11770_v34 = vsel %vm11662_vm14, %v17728_v55, %v11769_v27  ;;  %12235 = vst.msk [vmem:[%s17722_s25 + $0x5a] sm:$0xc0] %vm11808_vm3, %v11791_v8  ;;  %v11727_v49 = vsel %vm11659_vm13, %v17730_v62, %v11726_v26  ;;  %v11651_v44 = vsel %vm11650_vm10, %v17730_v62, %v11648_v2 }
 0x928   : > { %v11749_v10 = vsel %vm11662_vm14, %v17730_v62, %v11748_v12  ;;  %12232 = vst.msk [vmem:[%s17722_s25 + $0x4b] sm:$0xe0] %vm11786_vm2, %v11770_v34  ;;  %v11684_v29 = vsel %vm11653_vm11, %v17730_v62, %v11683_v35  ;;  %v11705_v20 = vsel %vm11656_vm12, %v17730_v62, %v11704_v7  ;;  %v11814_v36 = vsel %vm11647_vm9, %v17730_v62, %v11813_v1 }
 0x929   : > { %12229 = vst.msk [vmem:[%s17722_s25 + $0x3c] sm:$0xf0] %vm11764_vm15, %v11749_v10  ;;  %vm11745_vm15 = vcmask 256000   ;;  %vm11767_vm2 = vcmask 257024   ;;  %vm11789_vm3 = vcmask 258048  }
 0x983   : > { %v13384_v25 = vpop.f32.mrf.mxu0 }
 0x984   : > { %v11589_v17 = vadd.f32 %v13384_v25, %v17718_v63 }
 0x985   : > { %v11580_v33 = vpop.f32.mrf.mxu0 }
 0x986   : > { %v11581_v50 = vadd.f32 %v17718_v63, %v11580_v33  ;;  %v11658_v9 = vrot.slane %v11589_v17, 2 }
 0x987   : > { %v13385_v47 = vpop.f32.mrf.mxu0 }
 0x988   : > { %v11652_v53 = vrot.slane %v11581_v50, 4  ;;  %v11592_v45 = vadd.f32 %v13385_v47, %v17718_v63 }
 0x989   : > { %v11583_v5 = vpop.f32.mrf.mxu0 }
 0x98a   : > { %v11728_v59 = vsel %vm11662_vm14, %v11652_v53, %v11727_v49  ;;  %v17767_v37 = vrot.slane %v11592_v45, 1  ;;  %v11584_v57 = vadd.f32 %v17718_v63, %v11583_v5  ;;  %v11654_v58 = vsel %vm11653_vm11, %v11652_v53, %v11651_v44 }
 0x98b   : > { %12226 = vst.msk [vmem:[%s17722_s25 + $0x2d] sm:$0xf8] %vm11742_vm4, %v11728_v59  ;;  %v11685_v52 = vsel %vm11656_vm12, %v11652_v53, %v11684_v29  ;;  %v11706_v56 = vsel %vm11659_vm13, %v11652_v53, %v11705_v20  ;;  %v11815_v46 = vsel %vm11650_vm10, %v11652_v53, %v11814_v36  ;;  %v11771_v61 = vsel %vm11644_vm8, %v11652_v53, %v17730_v62 }
 0x98c   : > { %v17772_v23 = vsel %vm11644_vm8, %v17767_v37, %v11658_v9  ;;  %v11655_v3 = vrot.slane %v11584_v57, 3  ;;  %v11793_v42 = vsel %vm11647_vm9, %v11652_v53, %v11792_v14  ;;  %vm11811_vm4 = vcmask 259072  }
 0x98e   : > { %v11657_v6 = vsel %vm11656_vm12, %v11655_v3, %v11654_v58  ;;  %v11686_v15 = vsel %vm11659_vm13, %v11655_v3, %v11685_v52  ;;  %v11707_v41 = vsel %vm11662_vm14, %v11655_v3, %v11706_v56  ;;  %v11729_v54 = vsel %vm11644_vm8, %v11658_v9, %v11655_v3 }
 0x98f   : > { %v11660_v51 = vsel %vm11659_vm13, %v11658_v9, %v11657_v6  ;;  %v11687_v22 = vsel %vm11662_vm14, %v11658_v9, %v11686_v15  ;;  %12223 = vst.msk [vmem:[%s17722_s25 + $0x1e] sm:$0xfc] %vm11720_vm5, %v11707_v41  ;;  %v11730_v32 = vsel %vm11647_vm9, %v17767_v37, %v11729_v54  ;;  %v11816_v13 = vsel %vm11653_vm11, %v11655_v3, %v11815_v46 }
 0x990   : > { %v11663_v11 = vsel %vm11662_vm14, %v17767_v37, %v11660_v51  ;;  %12220 = vst.msk [vmem:[%s17722_s25 + $0xf] sm:$0xfe] %vm11699_vm6, %v11687_v22  ;;  %v11817_v40 = vsel %vm11656_vm12, %v11658_v9, %v11816_v13  ;;  %v11750_v18 = vsel %vm11644_vm8, %v11655_v3, %v11652_v53  ;;  %v11772_v21 = vsel %vm11647_vm9, %v11655_v3, %v11771_v61 }
 0x991   : > { %11680 = vst.msk [vmem:[%s17722_s25] sm:$0xff] %vm530_vm0, %v11663_v11  ;;  %v11794_v60 = vsel %vm11650_vm10, %v11655_v3, %v11793_v42  ;;  %v11818_v28 = vsel %vm11659_vm13, %v17767_v37, %v11817_v40  ;;  %v11751_v62 = vsel %vm11647_vm9, %v11658_v9, %v11750_v18  ;;  %v11773_v43 = vsel %vm11650_vm10, %v11658_v9, %v11772_v21 }
 0x992   : > { %v11795_v4 = vsel %vm11653_vm11, %v11658_v9, %v11794_v60  ;;  %v11752_v35 = vsel %vm11650_vm10, %v17767_v37, %v11751_v62  ;;  %v11774_v7 = vsel %vm11653_vm11, %v17767_v37, %v11773_v43  ;;  %vm11833_vm5 = vcmask 260096  }
 0x993   : > { %v11796_v26 = vsel %vm11656_vm12, %v17767_v37, %v11795_v4 }
 0x9c0   : > { %v13388_v24 = vpop.f32.mrf.mxu0 }
 0x9c1   : > { %v11605_v16 = vadd.f32 %v13388_v24, %v17718_v63 }
 0x9c2   : > { %v11596_v31 = vpop.f32.mrf.mxu0 }
 0x9c3   : > { %v11597_v30 = vadd.f32 %v17718_v63, %v11596_v31  ;;  %v11666_v0 = vrot.slane %v11605_v16, 6 }
 0x9c4   : > { %v13389_v19 = vpop.f32.mrf.mxu0 }
 0x9c5   : > { %v11819_v39 = vsel %vm11662_vm14, %v11597_v30, %v11818_v28  ;;  %v11608_v38 = vadd.f32 %v13389_v19, %v17718_v63  ;;  %v11753_v27 = vsel %vm11653_vm11, %v11597_v30, %v11752_v35  ;;  %v11775_v8 = vsel %vm11656_vm12, %v11597_v30, %v11774_v7 }
 0x9c6   : > { %v11599_v48 = vpop.f32.mrf.mxu0  ;;  %12239 = vst.msk [vmem:[%s17722_s25 + $0x71] sm:$0xff] %vm530_vm0, %v11819_v39  ;;  %v11797_v1 = vsel %vm11659_vm13, %v11597_v30, %v11796_v26  ;;  %v11731_v17 = vsel %vm11650_vm10, %v11597_v30, %v11730_v32  ;;  %v11688_v5 = vsel %vm11644_vm8, %v11597_v30, %v17767_v37  ;;  %v11709_v59 = vsel %vm11647_vm9, %v11597_v30, %v17772_v23 }
 0x9c7   : > { %v11600_v55 = vadd.f32 %v17718_v63, %v11599_v48  ;;  %v11668_v12 = vrot.slane %v11608_v38, 5 }
 0x9c9   : > { %v11664_v2 = vrot.slane %v11600_v55, 7  ;;  %v11799_v32 = vsel %vm11644_vm8, %v11668_v12, %v11666_v0 }
 0x9cb   : > { %v11754_v34 = vsel %vm11656_vm12, %v11664_v2, %v11753_v27  ;;  %v11776_v10 = vsel %vm11659_vm13, %v11664_v2, %v11775_v8  ;;  %v11798_v25 = vsel %vm11662_vm14, %v11664_v2, %v11797_v1  ;;  %v11732_v53 = vsel %vm11653_vm11, %v11664_v2, %v11731_v17 }
 0x9cc   : > { %v11755_v33 = vsel %vm11659_vm13, %v11666_v0, %v11754_v34  ;;  %v11777_v50 = vsel %vm11662_vm14, %v11666_v0, %v11776_v10  ;;  %12236 = vst.msk [vmem:[%s17722_s25 + $0x62] sm:$0xff] %vm530_vm0, %v11798_v25  ;;  %v11733_v9 = vsel %vm11656_vm12, %v11666_v0, %v11732_v53  ;;  %v11665_v44 = vsel %vm11644_vm8, %v11664_v2, %v11597_v30 }
 0x9cd   : > { %v11756_v47 = vsel %vm11662_vm14, %v11668_v12, %v11755_v33  ;;  %12233 = vst.msk [vmem:[%s17722_s25 + $0x53] sm:$0xff] %vm530_vm0, %v11777_v50  ;;  %v11689_v29 = vsel %vm11647_vm9, %v11664_v2, %v11688_v5  ;;  %v11710_v20 = vsel %vm11650_vm10, %v11664_v2, %v11709_v59  ;;  %v11734_v56 = vsel %vm11659_vm13, %v11668_v12, %v11733_v9 }
 0x9ce   : > { %12230 = vst.msk [vmem:[%s17722_s25 + $0x44] sm:$0xff] %vm530_vm0, %v11756_v47  ;;  %v11667_v6 = vsel %vm11647_vm9, %v11666_v0, %v11665_v44  ;;  %v11690_v15 = vsel %vm11650_vm10, %v11666_v0, %v11689_v29  ;;  %v11711_v41 = vsel %vm11653_vm11, %v11666_v0, %v11710_v20  ;;  %v11820_v51 = vsel %vm11644_vm8, %v11666_v0, %v11664_v2 }
 0x9cf   : > { %v11669_v46 = vsel %vm11650_vm10, %v11668_v12, %v11667_v6  ;;  %v11691_v13 = vsel %vm11653_vm11, %v11668_v12, %v11690_v15  ;;  %v11712_v24 = vsel %vm11656_vm12, %v11668_v12, %v11711_v41 }
 0x9d0   : > { %v13392_v45 = vpop.f32.mrf.mxu0 }
 0x9d1   : > { %v11621_v3 = vadd.f32 %v13392_v45, %v17718_v63 }
 0x9d2   : > { %v11612_v49 = vpop.f32.mrf.mxu0 }
 0x9d3   : > { %v11613_v57 = vadd.f32 %v17718_v63, %v11612_v49  ;;  %v11674_v22 = vrot.slane %v11621_v3, 2 }
 0x9d4   : > { %v13393_v58 = vpop.f32.mrf.mxu0 }
 0x9d5   : > { %v11670_v52 = vrot.slane %v11613_v57, 4  ;;  %v11624_v37 = vadd.f32 %v13393_v58, %v17718_v63 }
 0x9d6   : > { %v11615_v23 = vpop.f32.mrf.mxu0 }
 0x9d7   : > { %v11735_v54 = vsel %vm11662_vm14, %v11670_v52, %v11734_v56  ;;  %v11676_v11 = vrot.slane %v11624_v37, 1  ;;  %v11616_v36 = vadd.f32 %v17718_v63, %v11615_v23  ;;  %v11671_v31 = vsel %vm11653_vm11, %v11670_v52, %v11669_v46 }
 0x9d8   : > { %12227 = vst.msk [vmem:[%s17722_s25 + $0x35] sm:$0xff] %vm530_vm0, %v11735_v54  ;;  %v11692_v14 = vsel %vm11656_vm12, %v11670_v52, %v11691_v13  ;;  %v11821_v63 = vsel %vm11647_vm9, %v11668_v12, %v11820_v51  ;;  %v11713_v61 = vsel %vm11659_vm13, %v11670_v52, %v11712_v24  ;;  %v11778_v42 = vsel %vm11644_vm8, %v11670_v52, %v11668_v12 }
 0x9d9   : > { %12222 = vst.msk [vmem:[%s17722_s25 + $0x1f] sm:$0x1] %vm768_vm1, %v11676_v11  ;;  %v11715_v40 = vsel %vm11644_vm8, %v11676_v11, %v11674_v22  ;;  %v11672_v30 = vrot.slane %v11616_v36, 3  ;;  %v11800_v19 = vsel %vm11647_vm9, %v11670_v52, %v11799_v32  ;;  %v11822_v18 = vsel %vm11650_vm10, %v11670_v52, %v11821_v63 }
 0x9da   : > { %12225 = vst.msk [vmem:[%s17722_s25 + $0x2e] sm:$0x3] %vm11723_vm7, %v11715_v40 }
 0x9db   : > { %v11673_v21 = vsel %vm11656_vm12, %v11672_v30, %v11671_v31  ;;  %v11693_v60 = vsel %vm11659_vm13, %v11672_v30, %v11692_v14  ;;  %v11714_v28 = vsel %vm11662_vm14, %v11672_v30, %v11713_v61  ;;  %v11736_v39 = vsel %vm11644_vm8, %v11674_v22, %v11672_v30 }
 0x9dc   : > { %v11675_v48 = vsel %vm11659_vm13, %v11674_v22, %v11673_v21  ;;  %v11694_v55 = vsel %vm11662_vm14, %v11674_v22, %v11693_v60  ;;  %12224 = vst.msk [vmem:[%s17722_s25 + $0x26] sm:$0xff] %vm530_vm0, %v11714_v28  ;;  %v11737_v62 = vsel %vm11647_vm9, %v11676_v11, %v11736_v39  ;;  %v11757_v43 = vsel %vm11644_vm8, %v11672_v30, %v11670_v52 }
 0x9dd   : > { %v11677_v4 = vsel %vm11662_vm14, %v11676_v11, %v11675_v48  ;;  %12221 = vst.msk [vmem:[%s17722_s25 + $0x17] sm:$0xff] %vm530_vm0, %v11694_v55  ;;  %v11758_v16 = vsel %vm11647_vm9, %v11674_v22, %v11757_v43  ;;  %v11779_v38 = vsel %vm11647_vm9, %v11672_v30, %v11778_v42  ;;  %v11801_v2 = vsel %vm11650_vm10, %v11672_v30, %v11800_v19 }
 0x9de   : > { %12228 = vst.msk [vmem:[%s17722_s25 + $0x3d] sm:$0x7] %vm11745_vm15, %v11737_v62  ;;  %v11759_v35 = vsel %vm11650_vm10, %v11676_v11, %v11758_v16  ;;  %v11780_v7 = vsel %vm11650_vm10, %v11674_v22, %v11779_v38  ;;  %v11802_v26 = vsel %vm11653_vm11, %v11674_v22, %v11801_v2  ;;  %v11823_v0 = vsel %vm11653_vm11, %v11672_v30, %v11822_v18 }
 0x9df   : > { %11681 = vst.msk [vmem:[%s17722_s25 + $0x8] sm:$0xff] %vm530_vm0, %v11677_v4  ;;  %v11781_v27 = vsel %vm11653_vm11, %v11676_v11, %v11780_v7  ;;  %v11803_v8 = vsel %vm11656_vm12, %v11676_v11, %v11802_v26  ;;  %v11824_v1 = vsel %vm11656_vm12, %v11674_v22, %v11823_v0 }
 0x9e0   : > { %12231 = vst.msk [vmem:[%s17722_s25 + $0x4c] sm:$0xf] %vm11767_vm2, %v11759_v35  ;;  %v11825_v12 = vsel %vm11659_vm13, %v11676_v11, %v11824_v1 }
 0x9e1   : > { %12234 = vst.msk [vmem:[%s17722_s25 + $0x5b] sm:$0x1f] %vm11789_vm3, %v11781_v27 }
 0x9e2   : > { %12237 = vst.msk [vmem:[%s17722_s25 + $0x6a] sm:$0x3f] %vm11811_vm4, %v11803_v8 }
 0x9e3   : > { %12240 = vst.msk [vmem:[%s17722_s25 + $0x79] sm:$0x7f] %vm11833_vm5, %v11825_v12 }
 0x9e4   : > { %14110 = shalt.err (!%p14107_p0)
}
 0x9e5   : > { %s14111_s15 = scalar_lea.hbm %s17911_s27, 2048  ;;  %s14115_s11 = scalar_lea.hbm %s17982_s8, 4096 }
 0x9e6   : > { %p14112_p11 = scmp.ne.s32.totalorder %s17911_s27, %s14111_s15  ;;  %p14116_p8 = scmp.lt.s32.totalorder %s17911_s27, %s17982_s8 }
 0x9e7   : > { %p14117_p10 = scmp.lt.s32.totalorder %s14115_s11, %s14111_s15 }
 0x9e8   : > { %p14113_p12 = pnand %p14112_p11, %p14355_p7 }
 0x9e9   : > { %p14118_p5 = por %p14117_p10, %p14116_p8 }
 0x9ea   : > { %p14114_p1 = pneg %p14113_p12 }
 0x9ec   : > { %p14119_p4 = pnand %p14118_p5, %p14114_p1 }
 0x9ee   : > { %14122 = shalt.err (!%p14119_p4)
}
 0x9ef   : > { %s14212_s5 = smov 128  }
 0x9f0   : > { %13420 = dma.vmem_to_hbm [thread:$0]  (%p14355_p7), %s17918_s18, 2048, %s17911_s27, %s11836_s20, %s14212_s5, %s14212_s5, %s14208_s10  }
 0x9f1 PF: > { %s18356_s16 = sld [smem:[#allocation23_spill]] }
 0x9f2   : > { %s18357_s14 = sld [smem:[#allocation26_spill]] }
 0x9f3   : > { %s18358_s23 = sld [smem:[#allocation25_spill]] }
 0x9f7   : > { %s11866_s25 = sand.u32 1, %s18356_s16  }
 0x9f8   : > { %p18359_p2 = scmp.ne.s32.totalorder %s18357_s14, 0  ;;  %s11867_s22 = scalar_lea.sflag [#allocation7], %s11866_s25 }
 0x9f9   : > { %p18360_p3 = scmp.ge.s32.totalorder %s18358_s23, 2 }
 0x9fb   : > { %p13446_p6 = pnand %p18360_p3, %p18359_p2 }
 0x9fd   : > { %p13447_p9 = pneg %p13446_p6 }
 0x9ff   : > { %14164 = dma.done.wait (%p13447_p9), %s11867_s22, 2048  }
 0xa00   : > { %14166 = vsyncadd (%p13447_p9), %s11867_s22, 4294965248  ;;  %s29_s10 = sadd.s32 1, %s18358_s23   ;;  %s18361_s21 = sld [smem:[#allocation28_spill]] }
 0xa01   : > { %p26_p13 = scmp.ge.s32.totalorder %s29_s10, 4   ;;  %s18362_s30 = sld [smem:[#allocation24_spill]] }
 0xa02   : > { %s18363_s9 = sld [smem:[#allocation27_spill]]  ;;  %s18364_s27 = smov %s14173_s28 }
 0xa03   : > { %s18365_s28 = smov %s14177_s29  ;;  %28 = sbr.rel (!%p26_p13) target bundleno = 15 (0xf), region = 144 }
 0xa06   : > { %s18366_s29 = smov %s18361_s21 }
 0xa08   :  { %11872 = vsyncpa [#allocation6], 1 }
 0xa09   :  { %11874 = vsyncpa [#allocation6 + $0x1], 1 }
 0xa0a   :  { %11875 = vsyncpa [#allocation9], 1 }
 0xa0b   :  { %11877 = vsyncpa [#allocation9 + $0x1], 1 }
 0xa0c   :  { %11878 = vsyncpa [#allocation12], 1 }
 0xa0d   :  { %11879 = vsyncpa [#allocation15], 1 }
 0xa0e   :  { %11880 = vsyncpa [#allocation7], 1 }
 0xa0f   :  { %11882 = vsyncpa [#allocation7 + $0x1], 1 }

</bundles_post_ra>
